<compile_context>
chip_gen: v7x
topology: tpu7x:2x2x1
jax: 0.10.0
libtpu: 0.0.40
codegen_flags: <defaults>
</compile_context>

<pallas_src>
import math
import jax
import jax.numpy as jnp
from jax.experimental import pallas as pl
from jax.experimental.pallas import tpu as pltpu

# ------------------------- small, self-consistent config -------------------------
B = 2
D_VIS = 32            # vis_cfg['dim']
D_TAB = 32            # tab_cfg['d_token']  (== D_VIS, required by mid_interaction cos-sim)
D_TEXT = 48           # stand-in BERT hidden size
HEADS = 4
FFN_HID = 64          # mid_cfg.{vis,tab}['hidden_dim']
VIS_T, VIS_H, VIS_W = 2, 2, 2
VIS_N_MASKED = 2      # kept patches per frame in the masked vision stream
TAB_L = 5             # tabular tokens incl. CLS at index 0
TAB_L_MASKED = 3

LOSS_CFG = {
    'vis_sim_loss': 1.0, 'tab_sim_loss': 1.0,
    'vis_total_dist_loss': 0.5, 'tab_total_dist_loss': 0.5,
    'vis_recon_loss': 1.0, 'tab_recon_loss': 1.0,
    'vis_commit_loss': 0.1, 'surv_loss': 1.0,
}

# =================== single fused mid-fusion Pallas kernel (all 4 passes) ===================

_BIAS_ROW_W = 128      # each packed 1-D param occupies one lane-padded row of the bias slab
_N_BIAS_ROWS = 15      # rows per weight set in the bias slab


def _pack_bias_set(init_b, blk):
    """Pack all 1-D params of one weight set into a (15, 128) f32 slab (static row layout)."""
    vecs = [init_b,
            blk['self_attn']['bqkv'], blk['self_attn']['bo'],
            blk['cross_attn']['bqkv'], blk['cross_attn']['bo'],
            blk['ffn_b1'], blk['ffn_b2'],
            blk['norm1_g'], blk['norm1_b'], blk['norm2_g'], blk['norm2_b'],
            blk['norm3_g'], blk['norm3_b'], blk['norm_f_g'], blk['norm_f_b']]
    rows = []
    for v in vecs:
        v = jnp.asarray(v, jnp.float32).reshape(-1)
        assert v.shape[0] <= _BIAS_ROW_W, "bias-slab row overflow"
        rows.append(jnp.pad(v, (0, _BIAS_ROW_W - v.shape[0])))
    return jnp.stack(rows, axis=0)                              # (15, 128) f32


def mid_fusion_fused(params, iv_bf, it, mv_bf, mt):
    """Run ALL FOUR mid-fusion decoder passes in one pallas_call.

    Pass 0: mid_vis weights, tgt = intact vis (B, Tv, D), mem = intact tab
    Pass 1: mid_tab weights, tgt = intact tab (B, Lt, D), mem = intact vis
    Pass 2: mid_vis weights, tgt = masked vis (B, Tm, D), mem = intact tab
    Pass 3: mid_tab weights, tgt = masked tab (B, Lm, D), mem = intact vis
    Each pass = memory init-projection + pre-norm DETR TransformerDecoderLayer
    (self-attn, cross-attn, FFN, 3 LayerNorms) + final decoder LayerNorm.
    Returns (slab (total_rows, D) f32, per-pass row offsets).
    """
    f32, bf16 = jnp.float32, jnp.bfloat16
    Bn, Lq_iv, D = iv_bf.shape
    Lq_it, Lq_mv, Lq_mt = it.shape[1], mv_bf.shape[1], mt.shape[1]
    assert it.shape[2] == D and mt.shape[2] == D and mv_bf.shape[2] == D
    H = HEADS
    assert D % H == 0
    Dh = D // H
    scale = 1.0 / math.sqrt(Dh)

    # Output slab: each pass starts at a sublane-aligned (multiple-of-8) row offset.
    sizes = [Bn * Lq_iv, Bn * Lq_it, Bn * Lq_mv, Bn * Lq_mt]
    offs, cur = [], 0
    for sz in sizes:
        offs.append(cur)
        cur = ((cur + sz + 7) // 8) * 8
    total_rows = cur

    vis_blk, tab_blk = params['mid_vis'], params['mid_tab']

    def stack2(a, b):          # weight matrices as bf16 (MXU-native, half the DMA bytes)
        return jnp.stack([jnp.asarray(a), jnp.asarray(b)], axis=0).astype(bf16)

    initw_all = stack2(params['vis_init_w'], params['tab_init_w'])            # (2, D, D)
    wqkvs_all = stack2(vis_blk['self_attn']['wqkv'], tab_blk['self_attn']['wqkv'])   # (2, D, 3D)
    wos_all = stack2(vis_blk['self_attn']['wo'], tab_blk['self_attn']['wo'])          # (2, D, D)
    wqkvc_all = stack2(vis_blk['cross_attn']['wqkv'], tab_blk['cross_attn']['wqkv'])  # (2, D, 3D)
    woc_all = stack2(vis_blk['cross_attn']['wo'], tab_blk['cross_attn']['wo'])        # (2, D, D)
    w1_all = stack2(vis_blk['ffn_w1'], tab_blk['ffn_w1'])                             # (2, D, F)
    w2_all = stack2(vis_blk['ffn_w2'], tab_blk['ffn_w2'])                             # (2, F, D)
    FFN = w1_all.shape[2]

    bias_slab = jnp.concatenate(
        [_pack_bias_set(params['vis_init_b'], vis_blk),
         _pack_bias_set(params['tab_init_b'], tab_blk)], axis=0)              # (30, 128) f32

    def kernel(iv_ref, it_ref, mv_ref, mt_ref,
               initw_ref, wqkvs_ref, wos_ref, wqkvc_ref, woc_ref, w1_ref, w2_ref,
               bias_ref, o_ref):

        def brow(s, r, width):                     # (1, width) f32 row of the bias slab
            base = s * _N_BIAS_ROWS + r
            return bias_ref[base:base + 1, 0:width]

        def split_cols(x):                         # (L, D) -> (H, L, Dh)
            return jnp.stack([x[:, h * Dh:(h + 1) * Dh] for h in range(H)], axis=0)

        def split_rows(w):                         # (D, D) -> (H, Dh, D)
            return jnp.stack([w[h * Dh:(h + 1) * Dh, :] for h in range(H)], axis=0)

        def ln(x, g, b):                           # f32 LayerNorm
            mu = jnp.mean(x, axis=-1, keepdims=True)
            var = jnp.mean((x - mu) ** 2, axis=-1, keepdims=True)
            return (x - mu) * jax.lax.rsqrt(var + 1e-5) * g + b

        # Hoist both weight sets out of the pass loop (each loaded from VMEM exactly once).
        sets = []
        for s in range(2):
            wqkv_c = wqkvc_ref[s]
            bqkv_c = brow(s, 3, 3 * D)
            sets.append(dict(
                iw=initw_ref[s], ib=brow(s, 0, D),
                wqkv_s=wqkvs_ref[s], bqkv_s=brow(s, 1, 3 * D),
                wo_s_h=split_rows(wos_ref[s]), bo_s=brow(s, 2, D),
                wq_c=wqkv_c[:, 0:D], bq_c=bqkv_c[:, 0:D],
                wkv_c=wqkv_c[:, D:3 * D], bkv_c=bqkv_c[:, D:3 * D],
                wo_c_h=split_rows(woc_ref[s]), bo_c=brow(s, 4, D),
                w1=w1_ref[s], b1=brow(s, 5, FFN),
                w2=w2_ref[s], b2=brow(s, 6, D),
                n1g=brow(s, 7, D), n1b=brow(s, 8, D),
                n2g=brow(s, 9, D), n2b=brow(s, 10, D),
                n3g=brow(s, 11, D), n3b=brow(s, 12, D),
                nfg=brow(s, 13, D), nfb=brow(s, 14, D),
            ))

        def mh_attention(q, k, v, wo_h):
            # q pre-scaled (f32); heads handled as a leading batch dim of dot_general so all
            # MXU pushes issue back-to-back.  Out-projection folded in per head + head-sum.
            qh = split_cols(q).astype(bf16)                     # (H, Lq, Dh)
            kh = split_cols(k).astype(bf16)                     # (H, Lk, Dh)
            vh = split_cols(v).astype(bf16)                     # (H, Lk, Dh)
            s = jax.lax.dot_general(qh, kh, (((2,), (2,)), ((0,), (0,))),
                                    preferred_element_type=f32)          # (H, Lq, Lk)
            s = s - jnp.max(s, axis=-1, keepdims=True)
            p = jnp.exp(s)
            p = p * pl.reciprocal(jnp.sum(p, axis=-1, keepdims=True), approx=True)
            pv = jax.lax.dot_general(p.astype(bf16), vh, (((2,), (1,)), ((0,), (0,))),
                                     preferred_element_type=f32)         # (H, Lq, Dh)
            ctb = jax.lax.dot_general(pv.astype(bf16), wo_h, (((2,), (1,)), ((0,), (0,))),
                                      preferred_element_type=f32)        # (H, Lq, D)
            return jnp.sum(ctb, axis=0)                                  # (Lq, D)

        o_ref[...] = jnp.zeros_like(o_ref)   # deterministic padding rows

        # Memory-side init-projection + cross-attn KV projection are identical for the two
        # passes sharing a (memory, weight-set) pair -> compute each once, reuse twice.
        mem_side = {}
        for s_idx, mref in ((0, it_ref), (1, iv_ref)):
            W = sets[s_idx]
            Lm = mref.shape[1]
            m = jnp.concatenate([mref[b] for b in range(Bn)], axis=0)          # (B*Lm, D)
            memp = jnp.dot(m.astype(bf16), W['iw'], preferred_element_type=f32) + W['ib']
            kv = jnp.dot(memp.astype(bf16), W['wkv_c'], preferred_element_type=f32) + W['bkv_c']
            mem_side[s_idx] = (Lm, kv[:, 0:D], kv[:, D:2 * D])

        pass_cfg = ((0, iv_ref, offs[0]),
                    (1, it_ref, offs[1]),
                    (0, mv_ref, offs[2]),
                    (1, mt_ref, offs[3]))

        for s_idx, tgt_ref, off in pass_cfg:                   # static, fully unrolled
            W = sets[s_idx]
            Lm, k_mem, v_mem = mem_side[s_idx]
            Lq = tgt_ref.shape[1]
            # fold batch into rows for LN / projections / FFN
            tgt = jnp.concatenate([tgt_ref[b] for b in range(Bn)], axis=0)     # (B*Lq, D) f32

            # --- self-attention (pre-norm, fused QKV projection), dropout == identity (eval) ---
            t2 = ln(tgt, W['n1g'], W['n1b'])
            qkv = jnp.dot(t2.astype(bf16), W['wqkv_s'], preferred_element_type=f32) + W['bqkv_s']
            q = qkv[:, 0:D] * scale
            k = qkv[:, D:2 * D]
            v = qkv[:, 2 * D:3 * D]
            attn = jnp.concatenate(
                [mh_attention(q[b * Lq:(b + 1) * Lq], k[b * Lq:(b + 1) * Lq],
                              v[b * Lq:(b + 1) * Lq], W['wo_s_h'])
                 for b in range(Bn)], axis=0)
            tgt = tgt + attn + W['bo_s']

            # --- cross-attention (pre-norm; memory KV hoisted & shared above) ---
            t2 = ln(tgt, W['n2g'], W['n2b'])
            q = (jnp.dot(t2.astype(bf16), W['wq_c'], preferred_element_type=f32)
                 + W['bq_c']) * scale
            attn = jnp.concatenate(
                [mh_attention(q[b * Lq:(b + 1) * Lq], k_mem[b * Lm:(b + 1) * Lm],
                              v_mem[b * Lm:(b + 1) * Lm], W['wo_c_h'])
                 for b in range(Bn)], axis=0)
            tgt = tgt + attn + W['bo_c']

            # --- feed-forward (pre-norm, relu) ---
            t2 = ln(tgt, W['n3g'], W['n3b'])
            hid = jnp.maximum(
                jnp.dot(t2.astype(bf16), W['w1'], preferred_element_type=f32) + W['b1'], 0.0)
            tgt = tgt + jnp.dot(hid.astype(bf16), W['w2'], preferred_element_type=f32) + W['b2']

            # --- final TransformerDecoder LayerNorm, written into the single output slab ---
            o_ref[off:off + Bn * Lq, :] = ln(tgt, W['nfg'], W['nfb'])

    inputs = [iv_bf.astype(f32), it.astype(f32), mv_bf.astype(f32), mt.astype(f32),
              initw_all, wqkvs_all, wos_all, wqkvc_all, woc_all, w1_all, w2_all, bias_slab]

    def full_spec(shape):
        if len(shape) == 2:
            return pl.BlockSpec(shape, lambda i: (0, 0))
        return pl.BlockSpec(shape, lambda i: (0, 0, 0))

    slab = pl.pallas_call(
        kernel,
        out_shape=jax.ShapeDtypeStruct((total_rows, D), f32),
        grid=(1,),
        in_specs=[full_spec(a.shape) for a in inputs],
        out_specs=pl.BlockSpec((total_rows, D), lambda i: (0, 0)),
        compiler_params=pltpu.CompilerParams(dimension_semantics=("arbitrary",)),
    )(*inputs)
    return slab, offs

# ================================= forward passes =================================

def forward_encoder(sample, key):
    # TODO(synk): CTViT_MAE / T2GFormer_MAE / BERT encoders are external pretrained models;
    # emit deterministic synthetic tokens with the correct shapes and layouts instead.
    k1, k2, k3, k4, k5 = jax.random.split(key, 5)
    storage = {
        'intact_vis_tokens': jax.random.normal(k1, (B, VIS_T, VIS_H, VIS_W, D_VIS), jnp.float32),
        'masked_vis_tokens': jax.random.normal(k2, (B * VIS_T, VIS_N_MASKED, D_VIS), jnp.float32),
        'vis_mae_kwargs': {'mask': jax.random.bernoulli(k3, 0.5, (B, VIS_T * VIS_H * VIS_W))},
        'intact_tab_tokens': jax.random.normal(k4, (B, TAB_L, D_TAB), jnp.float32),
        'masked_tab_tokens': jax.random.normal(k5, (B, TAB_L_MASKED, D_TAB), jnp.float32),
        'tab_mae_kwargs': {'tab_masks': None, 'tab_ids_keep': None},
        'sample': sample,
        'loss_dict': {},
    }
    return storage


def _cos_sim(f1, f2):
    # F.normalize(p=2, dim=1, eps=1e-12) then clamp(0, 1) -- matches the torch spec.
    a = f1 / jnp.maximum(jnp.sqrt(jnp.sum(f1 * f1, axis=1, keepdims=True)), 1e-12)
    b = f2 / jnp.maximum(jnp.sqrt(jnp.sum(f2 * f2, axis=1, keepdims=True)), 1e-12)
    return jnp.clip(jnp.sum(a * b, axis=1, keepdims=True), 0.0, 1.0)


def mid_interaction(params, storage):
    sample = storage['sample']
    # TODO(synk): BertTokenizer + BertModel are external; use deterministic synthetic [CLS] feats.
    pos_prompt = sample['pos_prompt_cls'] @ params['text_to_latent_w']   # bias=False
    neg_prompt = sample['neg_prompt_cls'] @ params['text_to_latent_w']

    def dist_loss(pos, neg):
        return jnp.mean(-pos / (pos + neg + 1e-7))

    def sim_loss(ii_pos, ii_neg, im_pos, im_neg):
        ii = jax.lax.stop_gradient(jnp.concatenate([ii_pos, ii_neg], -1))[:, None, :]
        im = jnp.concatenate([im_pos, im_neg], -1)[None, :, :]
        temp = jnp.mean((im - ii) ** 2, axis=-1)
        diag = jnp.diagonal(temp)[:, None]
        return jnp.mean(diag / (jnp.sum(temp, -1, keepdims=True) + 1e-7))

    assert storage['intact_tab2intact_vis'].ndim == 5
    ii_pooled = jnp.mean(storage['intact_tab2intact_vis'], axis=(1, 2, 3))
    ii_pos = _cos_sim(ii_pooled, pos_prompt)
    ii_neg = _cos_sim(ii_pooled, neg_prompt)

    t = storage['intact_tab2intact_vis'].shape[1]
    assert storage['intact_tab2masked_vis'].ndim == 3
    i2m = storage['intact_tab2masked_vis']                       # (b*t, n, d)
    bt, n, d = i2m.shape
    i2m = i2m.reshape(bt // t, t * n, d)                         # '(b t) n d -> b (t n) d'
    im_pooled = jnp.mean(i2m, axis=1)
    im_pos = _cos_sim(im_pooled, pos_prompt)
    im_neg = _cos_sim(im_pooled, neg_prompt)

    vis_sim_loss = sim_loss(ii_pos, ii_neg, im_pos, im_neg)
    vis_intact_dist = dist_loss(ii_pos, ii_neg)
    vis_masked_dist = dist_loss(im_pos, im_neg)
    vis_total_dist = 0.5 * (vis_intact_dist + vis_masked_dist)

    iv2it_cls = storage['intact_vis2intact_tab'][:, 0, :]
    iv2mt_cls = storage['intact_vis2masked_tab'][:, 0, :]
    tii_pos = _cos_sim(iv2it_cls, pos_prompt)
    tii_neg = _cos_sim(iv2it_cls, neg_prompt)
    tim_pos = _cos_sim(iv2mt_cls, pos_prompt)
    tim_neg = _cos_sim(iv2mt_cls, neg_prompt)
    tab_sim_loss = sim_loss(tii_pos, tii_neg, tim_pos, tim_neg)
    tab_intact_dist = dist_loss(tii_pos, tii_neg)
    tab_masked_dist = dist_loss(tim_pos, tim_neg)
    tab_total_dist = 0.5 * (tab_intact_dist + tab_masked_dist)

    storage['loss_dict'].update({
        'vis_sim_loss': vis_sim_loss, 'vis_intact_dist_loss': vis_intact_dist,
        'vis_masked_dist_loss': vis_masked_dist, 'vis_total_dist_loss': vis_total_dist,
        'tab_sim_loss': tab_sim_loss, 'tab_intact_dist_loss': tab_intact_dist,
        'tab_masked_dist_loss': tab_masked_dist, 'tab_total_dist_loss': tab_total_dist,
    })
    return storage


def forward_mid(params, storage):
    iv = storage['intact_vis_tokens']                # (B, T, H, W, D)
    b, t, hh, ww, d = iv.shape
    iv_bf = iv.reshape(b, t * hh * ww, d)            # batch-first (B, THW, D)
    mv = storage['masked_vis_tokens']                # (B*T, N, D)
    n = mv.shape[1]
    mv_bf = mv.reshape(b, t, n, d).reshape(b, t * n, d)   # '(b t) n d -> b (t n) d'
    it = storage['intact_tab_tokens']
    mt = storage['masked_tab_tokens']

    slab, offs = mid_fusion_fused(params, iv_bf, it, mv_bf, mt)

    p0 = slab[offs[0]:offs[0] + b * t * hh * ww].reshape(b, t, hh, ww, d)
    p1 = slab[offs[1]:offs[1] + b * it.shape[1]].reshape(b, it.shape[1], d)
    p2 = slab[offs[2]:offs[2] + b * t * n].reshape(b, t, n, d).reshape(b * t, n, d)
    p3 = slab[offs[3]:offs[3] + b * mt.shape[1]].reshape(b, mt.shape[1], d)

    storage.update({
        'intact_tab2intact_vis': p0,
        'intact_vis2intact_tab': p1,
        'intact_tab2masked_vis': p2,
        'intact_vis2masked_tab': p3,
    })
    return mid_interaction(params, storage)


def forward_decoder(storage):
    # TODO(synk): CTViT_MAE / T2GFormer_MAE decoders are external pretrained models;
    # stand-in reconstructions + commit loss preserve the dataflow only.
    recon_image = jnp.zeros_like(storage['sample']['image'])
    vis_commit_loss = jnp.mean(jnp.square(storage['intact_tab2masked_vis']))
    tab_recon = storage['intact_vis2masked_tab']
    storage.update({'recon_image': recon_image, 'tab_recon': tab_recon})
    storage['loss_dict'].update({'vis_commit_loss': vis_commit_loss})
    return storage


def surv_loss_func(pred, surv_time, surv_event):
    # surv_loss_func is injected at construction time; deterministic stand-in.
    loss = jnp.mean(surv_event * jnp.square(pred[:, 0] - surv_time))
    return (loss,)


def forward_loss(params, storage):
    # TODO(synk): real recon losses live inside the external MAE submodules.
    vis_recon_loss = jnp.mean(jnp.square(storage['recon_image'] - storage['sample']['image']))
    tab_recon_loss = jnp.mean(jnp.square(storage['tab_recon']))

    vis_feat_pool = jnp.mean(storage['intact_tab2intact_vis'], axis=(1, 2, 3))
    tab_feat_cls = storage['intact_vis2intact_tab'][:, 0, :]
    surv_in = jnp.concatenate([vis_feat_pool, tab_feat_cls], axis=-1)
    # surv head: Linear -> SiLU -> Linear (tiny; plain JAX per perf review)
    h = surv_in @ params['surv_w1'] + params['surv_b1']
    h = h * jax.nn.sigmoid(h)
    surv_pred = h @ params['surv_w2'] + params['surv_b2']

    surv_loss = surv_loss_func(surv_pred, storage['sample']['surv_time'],
                               storage['sample']['surv_event'])[0]

    storage['loss_dict'].update({'vis_recon_loss': vis_recon_loss,
                                 'tab_recon_loss': tab_recon_loss,
                                 'surv_loss': surv_loss})
    storage['surv_pred'] = surv_pred

    loss = 0.0
    for k, w in LOSS_CFG.items():
        loss = loss + storage['loss_dict'][k] * w
        storage['loss_dict'][k] = storage['loss_dict'][k] * w
    storage['loss_dict']['loss'] = loss
    storage['loss_dict'] = {k.replace('tab_', 'tab/').replace('vis_', 'vis/'): v
                            for k, v in storage['loss_dict'].items()}
    return storage


def before_output(storage):
    out = {'loss_dict': storage['loss_dict']}
    if 'surv_pred' in storage:
        out['surv_pred'] = storage['surv_pred']
    return out


def forward(params, sample, enc_key):
    storage = forward_encoder(sample, enc_key)
    storage = forward_mid(params, storage)
    storage = forward_decoder(storage)
    storage = forward_loss(params, storage)
    return before_output(storage)

# ================================ parameter init ================================

def _key_iter(key):
    while True:
        key, sub = jax.random.split(key)
        yield sub


def init_linear(kit, fan_in, fan_out, bias=True):
    bound = 1.0 / math.sqrt(fan_in)
    w = jax.random.uniform(next(kit), (fan_in, fan_out), jnp.float32, -bound, bound)
    b = jax.random.uniform(next(kit), (fan_out,), jnp.float32, -bound, bound) if bias else None
    return w, b


def init_mha_fused(kit, d):
    wq, bq = init_linear(kit, d, d)
    wk, bk = init_linear(kit, d, d)
    wv, bv = init_linear(kit, d, d)
    wo, bo = init_linear(kit, d, d)
    return {
        'wqkv': jnp.concatenate([wq, wk, wv], axis=1),   # (d, 3d) fused in-projection (q|k|v)
        'bqkv': jnp.concatenate([bq, bk, bv], axis=0),   # (3d,)
        'wo': wo, 'bo': bo,
    }


def init_decoder_block(kit, d, hid):
    w1, b1 = init_linear(kit, d, hid)
    w2, b2 = init_linear(kit, hid, d)
    return {
        'self_attn': init_mha_fused(kit, d),
        'cross_attn': init_mha_fused(kit, d),
        'ffn_w1': w1, 'ffn_b1': b1, 'ffn_w2': w2, 'ffn_b2': b2,
        'norm1_g': jnp.ones((d,), jnp.float32), 'norm1_b': jnp.zeros((d,), jnp.float32),
        'norm2_g': jnp.ones((d,), jnp.float32), 'norm2_b': jnp.zeros((d,), jnp.float32),
        'norm3_g': jnp.ones((d,), jnp.float32), 'norm3_b': jnp.zeros((d,), jnp.float32),
        'norm_f_g': jnp.ones((d,), jnp.float32), 'norm_f_b': jnp.zeros((d,), jnp.float32),
    }


def init_params(key):
    kit = _key_iter(key)
    p = {}
    p['text_to_latent_w'], _ = init_linear(kit, D_TEXT, D_VIS, bias=False)
    p['vis_init_w'], p['vis_init_b'] = init_linear(kit, D_TAB, D_VIS)
    p['tab_init_w'], p['tab_init_b'] = init_linear(kit, D_VIS, D_TAB)
    p['mid_vis'] = init_decoder_block(kit, D_VIS, FFN_HID)   # mid_cfg.vis: 1 decoder layer
    p['mid_tab'] = init_decoder_block(kit, D_TAB, FFN_HID)   # mid_cfg.tab: 1 decoder layer
    d_cat = D_TAB + D_VIS
    p['surv_w1'], p['surv_b1'] = init_linear(kit, d_cat, d_cat)
    p['surv_w2'], p['surv_b2'] = init_linear(kit, d_cat, 1)
    return p

# ==================================== main ====================================

if __name__ == "__main__":
    key = jax.random.PRNGKey(0)
    k_img, k_num, k_cat, k_time, k_evt, k_pos, k_neg, k_enc = jax.random.split(key, 8)
    sample = {
        'image': jax.random.normal(k_img, (B, 1, 4, 16, 16), jnp.float32),
        'num_feat': jax.random.normal(k_num, (B, 6), jnp.float32),
        'cat_feat': jax.random.randint(k_cat, (B, 3), 0, 5),
        'surv_time': jax.random.uniform(k_time, (B,), jnp.float32, 0.0, 5.0),
        'surv_event': (jax.random.uniform(k_evt, (B,)) > 0.5).astype(jnp.float32),
        # stand-in BERT [CLS] features for the pos/neg prompt strings:
        'pos_prompt_cls': jax.random.normal(k_pos, (B, D_TEXT), jnp.float32),
        'neg_prompt_cls': jax.random.normal(k_neg, (B, D_TEXT), jnp.float32),
    }
    params = init_params(jax.random.PRNGKey(1))

    forward_jit = jax.jit(forward)
    out = forward_jit(params, sample, k_enc)
    jax.block_until_ready(out['loss_dict']['loss'])
    assert out['surv_pred'].shape == (B, 1)
    assert bool(jnp.isfinite(out['loss_dict']['loss']))
    print("KERNEL_OK")
</pallas_src>

<mosaic_0001>
module attributes {stable_mosaic.version = 11 : i64} {
  func.func @kernel(%arg0: i32, %arg1: memref<2x8x32xf32, #tpu.memory_space<vmem>>, %arg2: memref<2x5x32xf32, #tpu.memory_space<vmem>>, %arg3: memref<2x4x32xf32, #tpu.memory_space<vmem>>, %arg4: memref<2x3x32xf32, #tpu.memory_space<vmem>>, %arg5: memref<2x32x32xbf16, #tpu.memory_space<vmem>>, %arg6: memref<2x32x96xbf16, #tpu.memory_space<vmem>>, %arg7: memref<2x32x32xbf16, #tpu.memory_space<vmem>>, %arg8: memref<2x32x96xbf16, #tpu.memory_space<vmem>>, %arg9: memref<2x32x32xbf16, #tpu.memory_space<vmem>>, %arg10: memref<2x32x64xbf16, #tpu.memory_space<vmem>>, %arg11: memref<2x64x32xbf16, #tpu.memory_space<vmem>>, %arg12: memref<30x128xf32, #tpu.memory_space<vmem>>, %arg13: memref<48x32xf32, #tpu.memory_space<vmem>>) attributes {dimension_semantics = [#tpu.dimension_semantics<arbitrary>], iteration_bounds = array<i64: 1>, scalar_prefetch = 0 : i64, scratch_operands = 0 : i64, tpu.core_type = #tpu.core_type<tc>, window_params = [{pipeline_mode = #tpu.pipeline_mode<synchronous>, transform_indices = @transform_0, window_bounds = array<i64: 2, 8, 32>}, {pipeline_mode = #tpu.pipeline_mode<synchronous>, transform_indices = @transform_1, window_bounds = array<i64: 2, 5, 32>}, {pipeline_mode = #tpu.pipeline_mode<synchronous>, transform_indices = @transform_2, window_bounds = array<i64: 2, 4, 32>}, {pipeline_mode = #tpu.pipeline_mode<synchronous>, transform_indices = @transform_3, window_bounds = array<i64: 2, 3, 32>}, {pipeline_mode = #tpu.pipeline_mode<synchronous>, transform_indices = @transform_4, window_bounds = array<i64: 2, 32, 32>}, {pipeline_mode = #tpu.pipeline_mode<synchronous>, transform_indices = @transform_5, window_bounds = array<i64: 2, 32, 96>}, {pipeline_mode = #tpu.pipeline_mode<synchronous>, transform_indices = @transform_6, window_bounds = array<i64: 2, 32, 32>}, {pipeline_mode = #tpu.pipeline_mode<synchronous>, transform_indices = @transform_7, window_bounds = array<i64: 2, 32, 96>}, {pipeline_mode = #tpu.pipeline_mode<synchronous>, transform_indices = @transform_8, window_bounds = array<i64: 2, 32, 32>}, {pipeline_mode = #tpu.pipeline_mode<synchronous>, transform_indices = @transform_9, window_bounds = array<i64: 2, 32, 64>}, {pipeline_mode = #tpu.pipeline_mode<synchronous>, transform_indices = @transform_10, window_bounds = array<i64: 2, 64, 32>}, {pipeline_mode = #tpu.pipeline_mode<synchronous>, transform_indices = @transform_11, window_bounds = array<i64: 30, 128>}, {pipeline_mode = #tpu.pipeline_mode<synchronous>, transform_indices = @transform_12, window_bounds = array<i64: 48, 32>}]} {
    %c0 = arith.constant 0 : index
    %c0_0 = arith.constant 0 : index
    %c0_1 = arith.constant 0 : index
    %0 = vector.load %arg8[%c0, %c0_0, %c0_1] : memref<2x32x96xbf16, #tpu.memory_space<vmem>>, vector<1x32x96xbf16>
    %1 = vector.shape_cast %0 : vector<1x32x96xbf16> to vector<32x96xbf16>
    %c3 = arith.constant 3 : index
    %c0_2 = arith.constant 0 : index
    %2 = vector.load %arg12[%c3, %c0_2] : memref<30x128xf32, #tpu.memory_space<vmem>>, vector<1x96xf32>
    %c0_3 = arith.constant 0 : index
    %c0_4 = arith.constant 0 : index
    %c0_5 = arith.constant 0 : index
    %3 = vector.load %arg5[%c0_3, %c0_4, %c0_5] : memref<2x32x32xbf16, #tpu.memory_space<vmem>>, vector<1x32x32xbf16>
    %4 = vector.shape_cast %3 : vector<1x32x32xbf16> to vector<32x32xbf16>
    %c0_6 = arith.constant 0 : index
    %c0_7 = arith.constant 0 : index
    %5 = vector.load %arg12[%c0_6, %c0_7] : memref<30x128xf32, #tpu.memory_space<vmem>>, vector<1x32xf32>
    %c0_8 = arith.constant 0 : index
    %c0_9 = arith.constant 0 : index
    %c0_10 = arith.constant 0 : index
    %6 = vector.load %arg6[%c0_8, %c0_9, %c0_10] : memref<2x32x96xbf16, #tpu.memory_space<vmem>>, vector<1x32x96xbf16>
    %7 = vector.shape_cast %6 : vector<1x32x96xbf16> to vector<32x96xbf16>
    %c1 = arith.constant 1 : index
    %c0_11 = arith.constant 0 : index
    %8 = vector.load %arg12[%c1, %c0_11] : memref<30x128xf32, #tpu.memory_space<vmem>>, vector<1x96xf32>
    %c0_12 = arith.constant 0 : index
    %c0_13 = arith.constant 0 : index
    %c0_14 = arith.constant 0 : index
    %9 = vector.load %arg7[%c0_12, %c0_13, %c0_14] : memref<2x32x32xbf16, #tpu.memory_space<vmem>>, vector<1x32x32xbf16>
    %10 = vector.shape_cast %9 : vector<1x32x32xbf16> to vector<32x32xbf16>
    %11 = vector.extract_strided_slice %10 {offsets = [0, 0], sizes = [8, 32], strides = [1, 1]} : vector<32x32xbf16> to vector<8x32xbf16>
    %12 = vector.extract_strided_slice %10 {offsets = [8, 0], sizes = [8, 32], strides = [1, 1]} : vector<32x32xbf16> to vector<8x32xbf16>
    %13 = vector.extract_strided_slice %10 {offsets = [16, 0], sizes = [8, 32], strides = [1, 1]} : vector<32x32xbf16> to vector<8x32xbf16>
    %14 = vector.extract_strided_slice %10 {offsets = [24, 0], sizes = [8, 32], strides = [1, 1]} : vector<32x32xbf16> to vector<8x32xbf16>
    %15 = vector.shape_cast %11 : vector<8x32xbf16> to vector<1x8x32xbf16>
    %16 = vector.shape_cast %12 : vector<8x32xbf16> to vector<1x8x32xbf16>
    %17 = vector.shape_cast %13 : vector<8x32xbf16> to vector<1x8x32xbf16>
    %18 = vector.shape_cast %14 : vector<8x32xbf16> to vector<1x8x32xbf16>
    %19 = tpu.concatenate %15, %16, %17, %18 in 0 : vector<1x8x32xbf16>, vector<1x8x32xbf16>, vector<1x8x32xbf16>, vector<1x8x32xbf16> -> vector<4x8x32xbf16>
    %c2 = arith.constant 2 : index
    %c0_15 = arith.constant 0 : index
    %20 = vector.load %arg12[%c2, %c0_15] : memref<30x128xf32, #tpu.memory_space<vmem>>, vector<1x32xf32>
    %21 = vector.extract_strided_slice %1 {offsets = [0, 0], sizes = [32, 32], strides = [1, 1]} : vector<32x96xbf16> to vector<32x32xbf16>
    %22 = vector.extract_strided_slice %2 {offsets = [0, 0], sizes = [1, 32], strides = [1, 1]} : vector<1x96xf32> to vector<1x32xf32>
    %23 = vector.extract_strided_slice %1 {offsets = [0, 32], sizes = [32, 64], strides = [1, 1]} : vector<32x96xbf16> to vector<32x64xbf16>
    %24 = vector.extract_strided_slice %2 {offsets = [0, 32], sizes = [1, 64], strides = [1, 1]} : vector<1x96xf32> to vector<1x64xf32>
    %c0_16 = arith.constant 0 : index
    %c0_17 = arith.constant 0 : index
    %c0_18 = arith.constant 0 : index
    %25 = vector.load %arg9[%c0_16, %c0_17, %c0_18] : memref<2x32x32xbf16, #tpu.memory_space<vmem>>, vector<1x32x32xbf16>
    %26 = vector.shape_cast %25 : vector<1x32x32xbf16> to vector<32x32xbf16>
    %27 = vector.extract_strided_slice %26 {offsets = [0, 0], sizes = [8, 32], strides = [1, 1]} : vector<32x32xbf16> to vector<8x32xbf16>
    %28 = vector.extract_strided_slice %26 {offsets = [8, 0], sizes = [8, 32], strides = [1, 1]} : vector<32x32xbf16> to vector<8x32xbf16>
    %29 = vector.extract_strided_slice %26 {offsets = [16, 0], sizes = [8, 32], strides = [1, 1]} : vector<32x32xbf16> to vector<8x32xbf16>
    %30 = vector.extract_strided_slice %26 {offsets = [24, 0], sizes = [8, 32], strides = [1, 1]} : vector<32x32xbf16> to vector<8x32xbf16>
    %31 = vector.shape_cast %27 : vector<8x32xbf16> to vector<1x8x32xbf16>
    %32 = vector.shape_cast %28 : vector<8x32xbf16> to vector<1x8x32xbf16>
    %33 = vector.shape_cast %29 : vector<8x32xbf16> to vector<1x8x32xbf16>
    %34 = vector.shape_cast %30 : vector<8x32xbf16> to vector<1x8x32xbf16>
    %35 = tpu.concatenate %31, %32, %33, %34 in 0 : vector<1x8x32xbf16>, vector<1x8x32xbf16>, vector<1x8x32xbf16>, vector<1x8x32xbf16> -> vector<4x8x32xbf16>
    %c4 = arith.constant 4 : index
    %c0_19 = arith.constant 0 : index
    %36 = vector.load %arg12[%c4, %c0_19] : memref<30x128xf32, #tpu.memory_space<vmem>>, vector<1x32xf32>
    %c0_20 = arith.constant 0 : index
    %c0_21 = arith.constant 0 : index
    %c0_22 = arith.constant 0 : index
    %37 = vector.load %arg10[%c0_20, %c0_21, %c0_22] : memref<2x32x64xbf16, #tpu.memory_space<vmem>>, vector<1x32x64xbf16>
    %38 = vector.shape_cast %37 : vector<1x32x64xbf16> to vector<32x64xbf16>
    %c5 = arith.constant 5 : index
    %c0_23 = arith.constant 0 : index
    %39 = vector.load %arg12[%c5, %c0_23] : memref<30x128xf32, #tpu.memory_space<vmem>>, vector<1x64xf32>
    %c0_24 = arith.constant 0 : index
    %c0_25 = arith.constant 0 : index
    %c0_26 = arith.constant 0 : index
    %40 = vector.load %arg11[%c0_24, %c0_25, %c0_26] : memref<2x64x32xbf16, #tpu.memory_space<vmem>>, vector<1x64x32xbf16>
    %41 = vector.shape_cast %40 : vector<1x64x32xbf16> to vector<64x32xbf16>
    %c6 = arith.constant 6 : index
    %c0_27 = arith.constant 0 : index
    %42 = vector.load %arg12[%c6, %c0_27] : memref<30x128xf32, #tpu.memory_space<vmem>>, vector<1x32xf32>
    %c7 = arith.constant 7 : index
    %c0_28 = arith.constant 0 : index
    %43 = vector.load %arg12[%c7, %c0_28] : memref<30x128xf32, #tpu.memory_space<vmem>>, vector<1x32xf32>
    %c8 = arith.constant 8 : index
    %c0_29 = arith.constant 0 : index
    %44 = vector.load %arg12[%c8, %c0_29] : memref<30x128xf32, #tpu.memory_space<vmem>>, vector<1x32xf32>
    %c9 = arith.constant 9 : index
    %c0_30 = arith.constant 0 : index
    %45 = vector.load %arg12[%c9, %c0_30] : memref<30x128xf32, #tpu.memory_space<vmem>>, vector<1x32xf32>
    %c10 = arith.constant 10 : index
    %c0_31 = arith.constant 0 : index
    %46 = vector.load %arg12[%c10, %c0_31] : memref<30x128xf32, #tpu.memory_space<vmem>>, vector<1x32xf32>
    %c11 = arith.constant 11 : index
    %c0_32 = arith.constant 0 : index
    %47 = vector.load %arg12[%c11, %c0_32] : memref<30x128xf32, #tpu.memory_space<vmem>>, vector<1x32xf32>
    %c12 = arith.constant 12 : index
    %c0_33 = arith.constant 0 : index
    %48 = vector.load %arg12[%c12, %c0_33] : memref<30x128xf32, #tpu.memory_space<vmem>>, vector<1x32xf32>
    %c13 = arith.constant 13 : index
    %c0_34 = arith.constant 0 : index
    %49 = vector.load %arg12[%c13, %c0_34] : memref<30x128xf32, #tpu.memory_space<vmem>>, vector<1x32xf32>
    %c14 = arith.constant 14 : index
    %c0_35 = arith.constant 0 : index
    %50 = vector.load %arg12[%c14, %c0_35] : memref<30x128xf32, #tpu.memory_space<vmem>>, vector<1x32xf32>
    %c1_36 = arith.constant 1 : index
    %c0_37 = arith.constant 0 : index
    %c0_38 = arith.constant 0 : index
    %51 = vector.load %arg8[%c1_36, %c0_37, %c0_38] : memref<2x32x96xbf16, #tpu.memory_space<vmem>>, vector<1x32x96xbf16>
    %52 = vector.shape_cast %51 : vector<1x32x96xbf16> to vector<32x96xbf16>
    %c18 = arith.constant 18 : index
    %c0_39 = arith.constant 0 : index
    %53 = vector.load %arg12[%c18, %c0_39] : memref<30x128xf32, #tpu.memory_space<vmem>>, vector<1x96xf32>
    %c1_40 = arith.constant 1 : index
    %c0_41 = arith.constant 0 : index
    %c0_42 = arith.constant 0 : index
    %54 = vector.load %arg5[%c1_40, %c0_41, %c0_42] : memref<2x32x32xbf16, #tpu.memory_space<vmem>>, vector<1x32x32xbf16>
    %55 = vector.shape_cast %54 : vector<1x32x32xbf16> to vector<32x32xbf16>
    %c15 = arith.constant 15 : index
    %c0_43 = arith.constant 0 : index
    %56 = vector.load %arg12[%c15, %c0_43] : memref<30x128xf32, #tpu.memory_space<vmem>>, vector<1x32xf32>
    %c1_44 = arith.constant 1 : index
    %c0_45 = arith.constant 0 : index
    %c0_46 = arith.constant 0 : index
    %57 = vector.load %arg6[%c1_44, %c0_45, %c0_46] : memref<2x32x96xbf16, #tpu.memory_space<vmem>>, vector<1x32x96xbf16>
    %58 = vector.shape_cast %57 : vector<1x32x96xbf16> to vector<32x96xbf16>
    %c16 = arith.constant 16 : index
    %c0_47 = arith.constant 0 : index
    %59 = vector.load %arg12[%c16, %c0_47] : memref<30x128xf32, #tpu.memory_space<vmem>>, vector<1x96xf32>
    %c1_48 = arith.constant 1 : index
    %c0_49 = arith.constant 0 : index
    %c0_50 = arith.constant 0 : index
    %60 = vector.load %arg7[%c1_48, %c0_49, %c0_50] : memref<2x32x32xbf16, #tpu.memory_space<vmem>>, vector<1x32x32xbf16>
    %61 = vector.shape_cast %60 : vector<1x32x32xbf16> to vector<32x32xbf16>
    %62 = vector.extract_strided_slice %61 {offsets = [0, 0], sizes = [8, 32], strides = [1, 1]} : vector<32x32xbf16> to vector<8x32xbf16>
    %63 = vector.extract_strided_slice %61 {offsets = [8, 0], sizes = [8, 32], strides = [1, 1]} : vector<32x32xbf16> to vector<8x32xbf16>
    %64 = vector.extract_strided_slice %61 {offsets = [16, 0], sizes = [8, 32], strides = [1, 1]} : vector<32x32xbf16> to vector<8x32xbf16>
    %65 = vector.extract_strided_slice %61 {offsets = [24, 0], sizes = [8, 32], strides = [1, 1]} : vector<32x32xbf16> to vector<8x32xbf16>
    %66 = vector.shape_cast %62 : vector<8x32xbf16> to vector<1x8x32xbf16>
    %67 = vector.shape_cast %63 : vector<8x32xbf16> to vector<1x8x32xbf16>
    %68 = vector.shape_cast %64 : vector<8x32xbf16> to vector<1x8x32xbf16>
    %69 = vector.shape_cast %65 : vector<8x32xbf16> to vector<1x8x32xbf16>
    %70 = tpu.concatenate %66, %67, %68, %69 in 0 : vector<1x8x32xbf16>, vector<1x8x32xbf16>, vector<1x8x32xbf16>, vector<1x8x32xbf16> -> vector<4x8x32xbf16>
    %c17 = arith.constant 17 : index
    %c0_51 = arith.constant 0 : index
    %71 = vector.load %arg12[%c17, %c0_51] : memref<30x128xf32, #tpu.memory_space<vmem>>, vector<1x32xf32>
    %72 = vector.extract_strided_slice %52 {offsets = [0, 0], sizes = [32, 32], strides = [1, 1]} : vector<32x96xbf16> to vector<32x32xbf16>
    %73 = vector.extract_strided_slice %53 {offsets = [0, 0], sizes = [1, 32], strides = [1, 1]} : vector<1x96xf32> to vector<1x32xf32>
    %74 = vector.extract_strided_slice %52 {offsets = [0, 32], sizes = [32, 64], strides = [1, 1]} : vector<32x96xbf16> to vector<32x64xbf16>
    %75 = vector.extract_strided_slice %53 {offsets = [0, 32], sizes = [1, 64], strides = [1, 1]} : vector<1x96xf32> to vector<1x64xf32>
    %c1_52 = arith.constant 1 : index
    %c0_53 = arith.constant 0 : index
    %c0_54 = arith.constant 0 : index
    %76 = vector.load %arg9[%c1_52, %c0_53, %c0_54] : memref<2x32x32xbf16, #tpu.memory_space<vmem>>, vector<1x32x32xbf16>
    %77 = vector.shape_cast %76 : vector<1x32x32xbf16> to vector<32x32xbf16>
    %78 = vector.extract_strided_slice %77 {offsets = [0, 0], sizes = [8, 32], strides = [1, 1]} : vector<32x32xbf16> to vector<8x32xbf16>
    %79 = vector.extract_strided_slice %77 {offsets = [8, 0], sizes = [8, 32], strides = [1, 1]} : vector<32x32xbf16> to vector<8x32xbf16>
    %80 = vector.extract_strided_slice %77 {offsets = [16, 0], sizes = [8, 32], strides = [1, 1]} : vector<32x32xbf16> to vector<8x32xbf16>
    %81 = vector.extract_strided_slice %77 {offsets = [24, 0], sizes = [8, 32], strides = [1, 1]} : vector<32x32xbf16> to vector<8x32xbf16>
    %82 = vector.shape_cast %78 : vector<8x32xbf16> to vector<1x8x32xbf16>
    %83 = vector.shape_cast %79 : vector<8x32xbf16> to vector<1x8x32xbf16>
    %84 = vector.shape_cast %80 : vector<8x32xbf16> to vector<1x8x32xbf16>
    %85 = vector.shape_cast %81 : vector<8x32xbf16> to vector<1x8x32xbf16>
    %86 = tpu.concatenate %82, %83, %84, %85 in 0 : vector<1x8x32xbf16>, vector<1x8x32xbf16>, vector<1x8x32xbf16>, vector<1x8x32xbf16> -> vector<4x8x32xbf16>
    %c19 = arith.constant 19 : index
    %c0_55 = arith.constant 0 : index
    %87 = vector.load %arg12[%c19, %c0_55] : memref<30x128xf32, #tpu.memory_space<vmem>>, vector<1x32xf32>
    %c1_56 = arith.constant 1 : index
    %c0_57 = arith.constant 0 : index
    %c0_58 = arith.constant 0 : index
    %88 = vector.load %arg10[%c1_56, %c0_57, %c0_58] : memref<2x32x64xbf16, #tpu.memory_space<vmem>>, vector<1x32x64xbf16>
    %89 = vector.shape_cast %88 : vector<1x32x64xbf16> to vector<32x64xbf16>
    %c20 = arith.constant 20 : index
    %c0_59 = arith.constant 0 : index
    %90 = vector.load %arg12[%c20, %c0_59] : memref<30x128xf32, #tpu.memory_space<vmem>>, vector<1x64xf32>
    %c1_60 = arith.constant 1 : index
    %c0_61 = arith.constant 0 : index
    %c0_62 = arith.constant 0 : index
    %91 = vector.load %arg11[%c1_60, %c0_61, %c0_62] : memref<2x64x32xbf16, #tpu.memory_space<vmem>>, vector<1x64x32xbf16>
    %92 = vector.shape_cast %91 : vector<1x64x32xbf16> to vector<64x32xbf16>
    %c21 = arith.constant 21 : index
    %c0_63 = arith.constant 0 : index
    %93 = vector.load %arg12[%c21, %c0_63] : memref<30x128xf32, #tpu.memory_space<vmem>>, vector<1x32xf32>
    %c22 = arith.constant 22 : index
    %c0_64 = arith.constant 0 : index
    %94 = vector.load %arg12[%c22, %c0_64] : memref<30x128xf32, #tpu.memory_space<vmem>>, vector<1x32xf32>
    %c23 = arith.constant 23 : index
    %c0_65 = arith.constant 0 : index
    %95 = vector.load %arg12[%c23, %c0_65] : memref<30x128xf32, #tpu.memory_space<vmem>>, vector<1x32xf32>
    %c24 = arith.constant 24 : index
    %c0_66 = arith.constant 0 : index
    %96 = vector.load %arg12[%c24, %c0_66] : memref<30x128xf32, #tpu.memory_space<vmem>>, vector<1x32xf32>
    %c25 = arith.constant 25 : index
    %c0_67 = arith.constant 0 : index
    %97 = vector.load %arg12[%c25, %c0_67] : memref<30x128xf32, #tpu.memory_space<vmem>>, vector<1x32xf32>
    %c26 = arith.constant 26 : index
    %c0_68 = arith.constant 0 : index
    %98 = vector.load %arg12[%c26, %c0_68] : memref<30x128xf32, #tpu.memory_space<vmem>>, vector<1x32xf32>
    %c27 = arith.constant 27 : index
    %c0_69 = arith.constant 0 : index
    %99 = vector.load %arg12[%c27, %c0_69] : memref<30x128xf32, #tpu.memory_space<vmem>>, vector<1x32xf32>
    %c28 = arith.constant 28 : index
    %c0_70 = arith.constant 0 : index
    %100 = vector.load %arg12[%c28, %c0_70] : memref<30x128xf32, #tpu.memory_space<vmem>>, vector<1x32xf32>
    %c29 = arith.constant 29 : index
    %c0_71 = arith.constant 0 : index
    %101 = vector.load %arg12[%c29, %c0_71] : memref<30x128xf32, #tpu.memory_space<vmem>>, vector<1x32xf32>
    %cst = arith.constant 0.000000e+00 : f32
    %102 = vector.broadcast %cst : f32 to vector<48x32xf32>
    %c0_72 = arith.constant 0 : index
    %c0_73 = arith.constant 0 : index
    %103 = vector.load %arg13[%c0_72, %c0_73] : memref<48x32xf32, #tpu.memory_space<vmem>>, vector<48x32xf32>
    tpu.vector_store %arg13[%c0_72, %c0_73], %102 {strides = array<i32>} : memref<48x32xf32, #tpu.memory_space<vmem>>, vector<48x32xf32>,
    %c0_74 = arith.constant 0 : index
    %c0_75 = arith.constant 0 : index
    %c0_76 = arith.constant 0 : index
    %104 = vector.load %arg2[%c0_74, %c0_75, %c0_76] : memref<2x5x32xf32, #tpu.memory_space<vmem>>, vector<1x5x32xf32>
    %105 = vector.shape_cast %104 : vector<1x5x32xf32> to vector<5x32xf32>
    %c1_77 = arith.constant 1 : index
    %c0_78 = arith.constant 0 : index
    %c0_79 = arith.constant 0 : index
    %106 = vector.load %arg2[%c1_77, %c0_78, %c0_79] : memref<2x5x32xf32, #tpu.memory_space<vmem>>, vector<1x5x32xf32>
    %107 = vector.shape_cast %106 : vector<1x5x32xf32> to vector<5x32xf32>
    %108 = tpu.concatenate %105, %107 in 0 : vector<5x32xf32>, vector<5x32xf32> -> vector<10x32xf32>
    %109 = arith.truncf %108 : vector<10x32xf32> to vector<10x32xbf16>
    %cst_80 = arith.constant dense<0.000000e+00> : vector<10x32xf32>
    %110 = tpu.matmul %109, %4, %cst_80 {dimension_numbers = #tpu.dot_dimension_numbers<[1], [0], [0], [1], [0, 0, 1, 1], [], []>} : vector<10x32xbf16>, vector<32x32xbf16>, vector<10x32xf32> -> vector<10x32xf32>
    %111 = vector.broadcast %5 : vector<1x32xf32> to vector<10x32xf32>
    %112 = arith.addf %110, %111 : vector<10x32xf32>
    %113 = arith.truncf %112 : vector<10x32xf32> to vector<10x32xbf16>
    %cst_81 = arith.constant dense<0.000000e+00> : vector<10x64xf32>
    %114 = tpu.matmul %113, %23, %cst_81 {dimension_numbers = #tpu.dot_dimension_numbers<[1], [0], [0], [1], [0, 0, 1, 1], [], []>} : vector<10x32xbf16>, vector<32x64xbf16>, vector<10x64xf32> -> vector<10x64xf32>
    %115 = vector.broadcast %24 : vector<1x64xf32> to vector<10x64xf32>
    %116 = arith.addf %114, %115 : vector<10x64xf32>
    %117 = vector.extract_strided_slice %116 {offsets = [0, 0], sizes = [10, 32], strides = [1, 1]} : vector<10x64xf32> to vector<10x32xf32>
    %118 = vector.extract_strided_slice %116 {offsets = [0, 32], sizes = [10, 32], strides = [1, 1]} : vector<10x64xf32> to vector<10x32xf32>
    %c0_82 = arith.constant 0 : index
    %c0_83 = arith.constant 0 : index
    %c0_84 = arith.constant 0 : index
    %119 = vector.load %arg1[%c0_82, %c0_83, %c0_84] : memref<2x8x32xf32, #tpu.memory_space<vmem>>, vector<1x8x32xf32>
    %120 = vector.shape_cast %119 : vector<1x8x32xf32> to vector<8x32xf32>
    %c1_85 = arith.constant 1 : index
    %c0_86 = arith.constant 0 : index
    %c0_87 = arith.constant 0 : index
    %121 = vector.load %arg1[%c1_85, %c0_86, %c0_87] : memref<2x8x32xf32, #tpu.memory_space<vmem>>, vector<1x8x32xf32>
    %122 = vector.shape_cast %121 : vector<1x8x32xf32> to vector<8x32xf32>
    %123 = tpu.concatenate %120, %122 in 0 : vector<8x32xf32>, vector<8x32xf32> -> vector<16x32xf32>
    %124 = arith.truncf %123 : vector<16x32xf32> to vector<16x32xbf16>
    %cst_88 = arith.constant dense<0.000000e+00> : vector<16x32xf32>
    %125 = tpu.matmul %124, %55, %cst_88 {dimension_numbers = #tpu.dot_dimension_numbers<[1], [0], [0], [1], [0, 0, 1, 1], [], []>} : vector<16x32xbf16>, vector<32x32xbf16>, vector<16x32xf32> -> vector<16x32xf32>
    %126 = vector.broadcast %56 : vector<1x32xf32> to vector<16x32xf32>
    %127 = arith.addf %125, %126 : vector<16x32xf32>
    %128 = arith.truncf %127 : vector<16x32xf32> to vector<16x32xbf16>
    %cst_89 = arith.constant dense<0.000000e+00> : vector<16x64xf32>
    %129 = tpu.matmul %128, %74, %cst_89 {dimension_numbers = #tpu.dot_dimension_numbers<[1], [0], [0], [1], [0, 0, 1, 1], [], []>} : vector<16x32xbf16>, vector<32x64xbf16>, vector<16x64xf32> -> vector<16x64xf32>
    %130 = vector.broadcast %75 : vector<1x64xf32> to vector<16x64xf32>
    %131 = arith.addf %129, %130 : vector<16x64xf32>
    %132 = vector.extract_strided_slice %131 {offsets = [0, 0], sizes = [16, 32], strides = [1, 1]} : vector<16x64xf32> to vector<16x32xf32>
    %133 = vector.extract_strided_slice %131 {offsets = [0, 32], sizes = [16, 32], strides = [1, 1]} : vector<16x64xf32> to vector<16x32xf32>
    %c0_90 = arith.constant 0 : index
    %c0_91 = arith.constant 0 : index
    %c0_92 = arith.constant 0 : index
    %134 = vector.load %arg1[%c0_90, %c0_91, %c0_92] : memref<2x8x32xf32, #tpu.memory_space<vmem>>, vector<1x8x32xf32>
    %135 = vector.shape_cast %134 : vector<1x8x32xf32> to vector<8x32xf32>
    %c1_93 = arith.constant 1 : index
    %c0_94 = arith.constant 0 : index
    %c0_95 = arith.constant 0 : index
    %136 = vector.load %arg1[%c1_93, %c0_94, %c0_95] : memref<2x8x32xf32, #tpu.memory_space<vmem>>, vector<1x8x32xf32>
    %137 = vector.shape_cast %136 : vector<1x8x32xf32> to vector<8x32xf32>
    %138 = tpu.concatenate %135, %137 in 0 : vector<8x32xf32>, vector<8x32xf32> -> vector<16x32xf32>
    %cst_96 = arith.constant dense<0.000000e+00> : vector<16xf32>
    %139 = vector.multi_reduction <add>, %138, %cst_96 [1] : vector<16x32xf32> to vector<16xf32>
    %140 = vector.shape_cast %139 : vector<16xf32> to vector<16x1xf32>
    %cst_97 = arith.constant 3.200000e+01 : f32
    %141 = vector.broadcast %cst_97 : f32 to vector<16x1xf32>
    %142 = arith.divf %140, %141 : vector<16x1xf32>
    %143 = vector.broadcast %142 : vector<16x1xf32> to vector<16x32xf32>
    %144 = arith.subf %138, %143 : vector<16x32xf32>
    %145 = arith.mulf %144, %144 : vector<16x32xf32>
    %cst_98 = arith.constant dense<0.000000e+00> : vector<16xf32>
    %146 = vector.multi_reduction <add>, %145, %cst_98 [1] : vector<16x32xf32> to vector<16xf32>
    %147 = vector.shape_cast %146 : vector<16xf32> to vector<16x1xf32>
    %cst_99 = arith.constant 3.200000e+01 : f32
    %148 = vector.broadcast %cst_99 : f32 to vector<16x1xf32>
    %149 = arith.divf %147, %148 : vector<16x1xf32>
    %150 = vector.broadcast %142 : vector<16x1xf32> to vector<16x32xf32>
    %151 = arith.subf %138, %150 : vector<16x32xf32>
    %cst_100 = arith.constant 9.99999974E-6 : f32
    %152 = vector.broadcast %cst_100 : f32 to vector<16x1xf32>
    %153 = arith.addf %149, %152 : vector<16x1xf32>
    %154 = math.rsqrt %153 : vector<16x1xf32>
    %155 = vector.broadcast %154 : vector<16x1xf32> to vector<16x32xf32>
    %156 = arith.mulf %151, %155 : vector<16x32xf32>
    %157 = vector.broadcast %43 : vector<1x32xf32> to vector<16x32xf32>
    %158 = arith.mulf %156, %157 : vector<16x32xf32>
    %159 = vector.broadcast %44 : vector<1x32xf32> to vector<16x32xf32>
    %160 = arith.addf %158, %159 : vector<16x32xf32>
    %161 = arith.truncf %160 : vector<16x32xf32> to vector<16x32xbf16>
    %cst_101 = arith.constant dense<0.000000e+00> : vector<16x96xf32>
    %162 = tpu.matmul %161, %7, %cst_101 {dimension_numbers = #tpu.dot_dimension_numbers<[1], [0], [0], [1], [0, 0, 1, 1], [], []>} : vector<16x32xbf16>, vector<32x96xbf16>, vector<16x96xf32> -> vector<16x96xf32>
    %163 = vector.broadcast %8 : vector<1x96xf32> to vector<16x96xf32>
    %164 = arith.addf %162, %163 : vector<16x96xf32>
    %165 = vector.extract_strided_slice %164 {offsets = [0, 0], sizes = [16, 32], strides = [1, 1]} : vector<16x96xf32> to vector<16x32xf32>
    %cst_102 = arith.constant 0.353553385 : f32
    %166 = vector.broadcast %cst_102 : f32 to vector<16x32xf32>
    %167 = arith.mulf %165, %166 : vector<16x32xf32>
    %168 = vector.extract_strided_slice %164 {offsets = [0, 32], sizes = [16, 32], strides = [1, 1]} : vector<16x96xf32> to vector<16x32xf32>
    %169 = vector.extract_strided_slice %164 {offsets = [0, 64], sizes = [16, 32], strides = [1, 1]} : vector<16x96xf32> to vector<16x32xf32>
    %170 = vector.extract_strided_slice %167 {offsets = [0, 0], sizes = [8, 32], strides = [1, 1]} : vector<16x32xf32> to vector<8x32xf32>
    %171 = vector.extract_strided_slice %168 {offsets = [0, 0], sizes = [8, 32], strides = [1, 1]} : vector<16x32xf32> to vector<8x32xf32>
    %172 = vector.extract_strided_slice %169 {offsets = [0, 0], sizes = [8, 32], strides = [1, 1]} : vector<16x32xf32> to vector<8x32xf32>
    %173 = vector.extract_strided_slice %170 {offsets = [0, 0], sizes = [8, 8], strides = [1, 1]} : vector<8x32xf32> to vector<8x8xf32>
    %174 = vector.extract_strided_slice %170 {offsets = [0, 8], sizes = [8, 8], strides = [1, 1]} : vector<8x32xf32> to vector<8x8xf32>
    %175 = vector.extract_strided_slice %170 {offsets = [0, 16], sizes = [8, 8], strides = [1, 1]} : vector<8x32xf32> to vector<8x8xf32>
    %176 = vector.extract_strided_slice %170 {offsets = [0, 24], sizes = [8, 8], strides = [1, 1]} : vector<8x32xf32> to vector<8x8xf32>
    %177 = vector.shape_cast %173 : vector<8x8xf32> to vector<1x8x8xf32>
    %178 = vector.shape_cast %174 : vector<8x8xf32> to vector<1x8x8xf32>
    %179 = vector.shape_cast %175 : vector<8x8xf32> to vector<1x8x8xf32>
    %180 = vector.shape_cast %176 : vector<8x8xf32> to vector<1x8x8xf32>
    %181 = tpu.concatenate %177, %178, %179, %180 in 0 : vector<1x8x8xf32>, vector<1x8x8xf32>, vector<1x8x8xf32>, vector<1x8x8xf32> -> vector<4x8x8xf32>
    %182 = arith.truncf %181 : vector<4x8x8xf32> to vector<4x8x8xbf16>
    %183 = vector.extract_strided_slice %171 {offsets = [0, 0], sizes = [8, 8], strides = [1, 1]} : vector<8x32xf32> to vector<8x8xf32>
    %184 = vector.extract_strided_slice %171 {offsets = [0, 8], sizes = [8, 8], strides = [1, 1]} : vector<8x32xf32> to vector<8x8xf32>
    %185 = vector.extract_strided_slice %171 {offsets = [0, 16], sizes = [8, 8], strides = [1, 1]} : vector<8x32xf32> to vector<8x8xf32>
    %186 = vector.extract_strided_slice %171 {offsets = [0, 24], sizes = [8, 8], strides = [1, 1]} : vector<8x32xf32> to vector<8x8xf32>
    %187 = vector.shape_cast %183 : vector<8x8xf32> to vector<1x8x8xf32>
    %188 = vector.shape_cast %184 : vector<8x8xf32> to vector<1x8x8xf32>
    %189 = vector.shape_cast %185 : vector<8x8xf32> to vector<1x8x8xf32>
    %190 = vector.shape_cast %186 : vector<8x8xf32> to vector<1x8x8xf32>
    %191 = tpu.concatenate %187, %188, %189, %190 in 0 : vector<1x8x8xf32>, vector<1x8x8xf32>, vector<1x8x8xf32>, vector<1x8x8xf32> -> vector<4x8x8xf32>
    %192 = arith.truncf %191 : vector<4x8x8xf32> to vector<4x8x8xbf16>
    %193 = vector.extract_strided_slice %172 {offsets = [0, 0], sizes = [8, 8], strides = [1, 1]} : vector<8x32xf32> to vector<8x8xf32>
    %194 = vector.extract_strided_slice %172 {offsets = [0, 8], sizes = [8, 8], strides = [1, 1]} : vector<8x32xf32> to vector<8x8xf32>
    %195 = vector.extract_strided_slice %172 {offsets = [0, 16], sizes = [8, 8], strides = [1, 1]} : vector<8x32xf32> to vector<8x8xf32>
    %196 = vector.extract_strided_slice %172 {offsets = [0, 24], sizes = [8, 8], strides = [1, 1]} : vector<8x32xf32> to vector<8x8xf32>
    %197 = vector.shape_cast %193 : vector<8x8xf32> to vector<1x8x8xf32>
    %198 = vector.shape_cast %194 : vector<8x8xf32> to vector<1x8x8xf32>
    %199 = vector.shape_cast %195 : vector<8x8xf32> to vector<1x8x8xf32>
    %200 = vector.shape_cast %196 : vector<8x8xf32> to vector<1x8x8xf32>
    %201 = tpu.concatenate %197, %198, %199, %200 in 0 : vector<1x8x8xf32>, vector<1x8x8xf32>, vector<1x8x8xf32>, vector<1x8x8xf32> -> vector<4x8x8xf32>
    %202 = arith.truncf %201 : vector<4x8x8xf32> to vector<4x8x8xbf16>
    %cst_103 = arith.constant dense<0.000000e+00> : vector<4x8x8xf32>
    %203 = tpu.matmul %182, %192, %cst_103 {dimension_numbers = #tpu.dot_dimension_numbers<[2], [2], [1], [1], [0, 0, 0, 1, 1, 1], [0], [0]>} : vector<4x8x8xbf16>, vector<4x8x8xbf16>, vector<4x8x8xf32> -> vector<4x8x8xf32>
    %cst_104 = arith.constant dense<0xFF800000> : vector<4x8xf32>
    %204 = vector.multi_reduction <maximumf>, %203, %cst_104 [2] : vector<4x8x8xf32> to vector<4x8xf32>
    %205 = vector.shape_cast %204 : vector<4x8xf32> to vector<4x8x1xf32>
    %206 = vector.broadcast %205 : vector<4x8x1xf32> to vector<4x8x8xf32>
    %207 = arith.subf %203, %206 : vector<4x8x8xf32>
    %208 = math.exp %207 : vector<4x8x8xf32>
    %cst_105 = arith.constant dense<0.000000e+00> : vector<4x8xf32>
    %209 = vector.multi_reduction <add>, %208, %cst_105 [2] : vector<4x8x8xf32> to vector<4x8xf32>
    %210 = vector.shape_cast %209 : vector<4x8xf32> to vector<4x8x1xf32>
    %211 = tpu.reciprocal %210 {approx = true} : vector<4x8x1xf32> -> vector<4x8x1xf32>
    %212 = vector.broadcast %211 : vector<4x8x1xf32> to vector<4x8x8xf32>
    %213 = arith.mulf %208, %212 : vector<4x8x8xf32>
    %214 = arith.truncf %213 : vector<4x8x8xf32> to vector<4x8x8xbf16>
    %cst_106 = arith.constant dense<0.000000e+00> : vector<4x8x8xf32>
    %215 = tpu.matmul %214, %202, %cst_106 {dimension_numbers = #tpu.dot_dimension_numbers<[2], [1], [1], [2], [0, 0, 0, 1, 1, 2], [0], [0]>} : vector<4x8x8xbf16>, vector<4x8x8xbf16>, vector<4x8x8xf32> -> vector<4x8x8xf32>
    %216 = arith.truncf %215 : vector<4x8x8xf32> to vector<4x8x8xbf16>
    %cst_107 = arith.constant dense<0.000000e+00> : vector<4x8x32xf32>
    %217 = tpu.matmul %216, %19, %cst_107 {dimension_numbers = #tpu.dot_dimension_numbers<[2], [1], [1], [2], [0, 0, 0, 1, 1, 2], [0], [0]>} : vector<4x8x8xbf16>, vector<4x8x32xbf16>, vector<4x8x32xf32> -> vector<4x8x32xf32>
    %cst_108 = arith.constant dense<0.000000e+00> : vector<8x32xf32>
    %218 = vector.multi_reduction <add>, %217, %cst_108 [0] : vector<4x8x32xf32> to vector<8x32xf32>
    %219 = vector.extract_strided_slice %167 {offsets = [8, 0], sizes = [8, 32], strides = [1, 1]} : vector<16x32xf32> to vector<8x32xf32>
    %220 = vector.extract_strided_slice %168 {offsets = [8, 0], sizes = [8, 32], strides = [1, 1]} : vector<16x32xf32> to vector<8x32xf32>
    %221 = vector.extract_strided_slice %169 {offsets = [8, 0], sizes = [8, 32], strides = [1, 1]} : vector<16x32xf32> to vector<8x32xf32>
    %222 = vector.extract_strided_slice %219 {offsets = [0, 0], sizes = [8, 8], strides = [1, 1]} : vector<8x32xf32> to vector<8x8xf32>
    %223 = vector.extract_strided_slice %219 {offsets = [0, 8], sizes = [8, 8], strides = [1, 1]} : vector<8x32xf32> to vector<8x8xf32>
    %224 = vector.extract_strided_slice %219 {offsets = [0, 16], sizes = [8, 8], strides = [1, 1]} : vector<8x32xf32> to vector<8x8xf32>
    %225 = vector.extract_strided_slice %219 {offsets = [0, 24], sizes = [8, 8], strides = [1, 1]} : vector<8x32xf32> to vector<8x8xf32>
    %226 = vector.shape_cast %222 : vector<8x8xf32> to vector<1x8x8xf32>
    %227 = vector.shape_cast %223 : vector<8x8xf32> to vector<1x8x8xf32>
    %228 = vector.shape_cast %224 : vector<8x8xf32> to vector<1x8x8xf32>
    %229 = vector.shape_cast %225 : vector<8x8xf32> to vector<1x8x8xf32>
    %230 = tpu.concatenate %226, %227, %228, %229 in 0 : vector<1x8x8xf32>, vector<1x8x8xf32>, vector<1x8x8xf32>, vector<1x8x8xf32> -> vector<4x8x8xf32>
    %231 = arith.truncf %230 : vector<4x8x8xf32> to vector<4x8x8xbf16>
    %232 = vector.extract_strided_slice %220 {offsets = [0, 0], sizes = [8, 8], strides = [1, 1]} : vector<8x32xf32> to vector<8x8xf32>
    %233 = vector.extract_strided_slice %220 {offsets = [0, 8], sizes = [8, 8], strides = [1, 1]} : vector<8x32xf32> to vector<8x8xf32>
    %234 = vector.extract_strided_slice %220 {offsets = [0, 16], sizes = [8, 8], strides = [1, 1]} : vector<8x32xf32> to vector<8x8xf32>
    %235 = vector.extract_strided_slice %220 {offsets = [0, 24], sizes = [8, 8], strides = [1, 1]} : vector<8x32xf32> to vector<8x8xf32>
    %236 = vector.shape_cast %232 : vector<8x8xf32> to vector<1x8x8xf32>
    %237 = vector.shape_cast %233 : vector<8x8xf32> to vector<1x8x8xf32>
    %238 = vector.shape_cast %234 : vector<8x8xf32> to vector<1x8x8xf32>
    %239 = vector.shape_cast %235 : vector<8x8xf32> to vector<1x8x8xf32>
    %240 = tpu.concatenate %236, %237, %238, %239 in 0 : vector<1x8x8xf32>, vector<1x8x8xf32>, vector<1x8x8xf32>, vector<1x8x8xf32> -> vector<4x8x8xf32>
    %241 = arith.truncf %240 : vector<4x8x8xf32> to vector<4x8x8xbf16>
    %242 = vector.extract_strided_slice %221 {offsets = [0, 0], sizes = [8, 8], strides = [1, 1]} : vector<8x32xf32> to vector<8x8xf32>
    %243 = vector.extract_strided_slice %221 {offsets = [0, 8], sizes = [8, 8], strides = [1, 1]} : vector<8x32xf32> to vector<8x8xf32>
    %244 = vector.extract_strided_slice %221 {offsets = [0, 16], sizes = [8, 8], strides = [1, 1]} : vector<8x32xf32> to vector<8x8xf32>
    %245 = vector.extract_strided_slice %221 {offsets = [0, 24], sizes = [8, 8], strides = [1, 1]} : vector<8x32xf32> to vector<8x8xf32>
    %246 = vector.shape_cast %242 : vector<8x8xf32> to vector<1x8x8xf32>
    %247 = vector.shape_cast %243 : vector<8x8xf32> to vector<1x8x8xf32>
    %248 = vector.shape_cast %244 : vector<8x8xf32> to vector<1x8x8xf32>
    %249 = vector.shape_cast %245 : vector<8x8xf32> to vector<1x8x8xf32>
    %250 = tpu.concatenate %246, %247, %248, %249 in 0 : vector<1x8x8xf32>, vector<1x8x8xf32>, vector<1x8x8xf32>, vector<1x8x8xf32> -> vector<4x8x8xf32>
    %251 = arith.truncf %250 : vector<4x8x8xf32> to vector<4x8x8xbf16>
    %cst_109 = arith.constant dense<0.000000e+00> : vector<4x8x8xf32>
    %252 = tpu.matmul %231, %241, %cst_109 {dimension_numbers = #tpu.dot_dimension_numbers<[2], [2], [1], [1], [0, 0, 0, 1, 1, 1], [0], [0]>} : vector<4x8x8xbf16>, vector<4x8x8xbf16>, vector<4x8x8xf32> -> vector<4x8x8xf32>
    %cst_110 = arith.constant dense<0xFF800000> : vector<4x8xf32>
    %253 = vector.multi_reduction <maximumf>, %252, %cst_110 [2] : vector<4x8x8xf32> to vector<4x8xf32>
    %254 = vector.shape_cast %253 : vector<4x8xf32> to vector<4x8x1xf32>
    %255 = vector.broadcast %254 : vector<4x8x1xf32> to vector<4x8x8xf32>
    %256 = arith.subf %252, %255 : vector<4x8x8xf32>
    %257 = math.exp %256 : vector<4x8x8xf32>
    %cst_111 = arith.constant dense<0.000000e+00> : vector<4x8xf32>
    %258 = vector.multi_reduction <add>, %257, %cst_111 [2] : vector<4x8x8xf32> to vector<4x8xf32>
    %259 = vector.shape_cast %258 : vector<4x8xf32> to vector<4x8x1xf32>
    %260 = tpu.reciprocal %259 {approx = true} : vector<4x8x1xf32> -> vector<4x8x1xf32>
    %261 = vector.broadcast %260 : vector<4x8x1xf32> to vector<4x8x8xf32>
    %262 = arith.mulf %257, %261 : vector<4x8x8xf32>
    %263 = arith.truncf %262 : vector<4x8x8xf32> to vector<4x8x8xbf16>
    %cst_112 = arith.constant dense<0.000000e+00> : vector<4x8x8xf32>
    %264 = tpu.matmul %263, %251, %cst_112 {dimension_numbers = #tpu.dot_dimension_numbers<[2], [1], [1], [2], [0, 0, 0, 1, 1, 2], [0], [0]>} : vector<4x8x8xbf16>, vector<4x8x8xbf16>, vector<4x8x8xf32> -> vector<4x8x8xf32>
    %265 = arith.truncf %264 : vector<4x8x8xf32> to vector<4x8x8xbf16>
    %cst_113 = arith.constant dense<0.000000e+00> : vector<4x8x32xf32>
    %266 = tpu.matmul %265, %19, %cst_113 {dimension_numbers = #tpu.dot_dimension_numbers<[2], [1], [1], [2], [0, 0, 0, 1, 1, 2], [0], [0]>} : vector<4x8x8xbf16>, vector<4x8x32xbf16>, vector<4x8x32xf32> -> vector<4x8x32xf32>
    %cst_114 = arith.constant dense<0.000000e+00> : vector<8x32xf32>
    %267 = vector.multi_reduction <add>, %266, %cst_114 [0] : vector<4x8x32xf32> to vector<8x32xf32>
    %268 = tpu.concatenate %218, %267 in 0 : vector<8x32xf32>, vector<8x32xf32> -> vector<16x32xf32>
    %269 = arith.addf %138, %268 : vector<16x32xf32>
    %270 = vector.broadcast %20 : vector<1x32xf32> to vector<16x32xf32>
    %271 = arith.addf %269, %270 : vector<16x32xf32>
    %cst_115 = arith.constant dense<0.000000e+00> : vector<16xf32>
    %272 = vector.multi_reduction <add>, %271, %cst_115 [1] : vector<16x32xf32> to vector<16xf32>
    %273 = vector.shape_cast %272 : vector<16xf32> to vector<16x1xf32>
    %cst_116 = arith.constant 3.200000e+01 : f32
    %274 = vector.broadcast %cst_116 : f32 to vector<16x1xf32>
    %275 = arith.divf %273, %274 : vector<16x1xf32>
    %276 = vector.broadcast %275 : vector<16x1xf32> to vector<16x32xf32>
    %277 = arith.subf %271, %276 : vector<16x32xf32>
    %278 = arith.mulf %277, %277 : vector<16x32xf32>
    %cst_117 = arith.constant dense<0.000000e+00> : vector<16xf32>
    %279 = vector.multi_reduction <add>, %278, %cst_117 [1] : vector<16x32xf32> to vector<16xf32>
    %280 = vector.shape_cast %279 : vector<16xf32> to vector<16x1xf32>
    %cst_118 = arith.constant 3.200000e+01 : f32
    %281 = vector.broadcast %cst_118 : f32 to vector<16x1xf32>
    %282 = arith.divf %280, %281 : vector<16x1xf32>
    %283 = vector.broadcast %275 : vector<16x1xf32> to vector<16x32xf32>
    %284 = arith.subf %271, %283 : vector<16x32xf32>
    %cst_119 = arith.constant 9.99999974E-6 : f32
    %285 = vector.broadcast %cst_119 : f32 to vector<16x1xf32>
    %286 = arith.addf %282, %285 : vector<16x1xf32>
    %287 = math.rsqrt %286 : vector<16x1xf32>
    %288 = vector.broadcast %287 : vector<16x1xf32> to vector<16x32xf32>
    %289 = arith.mulf %284, %288 : vector<16x32xf32>
    %290 = vector.broadcast %45 : vector<1x32xf32> to vector<16x32xf32>
    %291 = arith.mulf %289, %290 : vector<16x32xf32>
    %292 = vector.broadcast %46 : vector<1x32xf32> to vector<16x32xf32>
    %293 = arith.addf %291, %292 : vector<16x32xf32>
    %294 = arith.truncf %293 : vector<16x32xf32> to vector<16x32xbf16>
    %cst_120 = arith.constant dense<0.000000e+00> : vector<16x32xf32>
    %295 = tpu.matmul %294, %21, %cst_120 {dimension_numbers = #tpu.dot_dimension_numbers<[1], [0], [0], [1], [0, 0, 1, 1], [], []>} : vector<16x32xbf16>, vector<32x32xbf16>, vector<16x32xf32> -> vector<16x32xf32>
    %296 = vector.broadcast %22 : vector<1x32xf32> to vector<16x32xf32>
    %297 = arith.addf %295, %296 : vector<16x32xf32>
    %cst_121 = arith.constant 0.353553385 : f32
    %298 = vector.broadcast %cst_121 : f32 to vector<16x32xf32>
    %299 = arith.mulf %297, %298 : vector<16x32xf32>
    %300 = vector.extract_strided_slice %299 {offsets = [0, 0], sizes = [8, 32], strides = [1, 1]} : vector<16x32xf32> to vector<8x32xf32>
    %301 = vector.extract_strided_slice %117 {offsets = [0, 0], sizes = [5, 32], strides = [1, 1]} : vector<10x32xf32> to vector<5x32xf32>
    %302 = vector.extract_strided_slice %118 {offsets = [0, 0], sizes = [5, 32], strides = [1, 1]} : vector<10x32xf32> to vector<5x32xf32>
    %303 = vector.extract_strided_slice %300 {offsets = [0, 0], sizes = [8, 8], strides = [1, 1]} : vector<8x32xf32> to vector<8x8xf32>
    %304 = vector.extract_strided_slice %300 {offsets = [0, 8], sizes = [8, 8], strides = [1, 1]} : vector<8x32xf32> to vector<8x8xf32>
    %305 = vector.extract_strided_slice %300 {offsets = [0, 16], sizes = [8, 8], strides = [1, 1]} : vector<8x32xf32> to vector<8x8xf32>
    %306 = vector.extract_strided_slice %300 {offsets = [0, 24], sizes = [8, 8], strides = [1, 1]} : vector<8x32xf32> to vector<8x8xf32>
    %307 = vector.shape_cast %303 : vector<8x8xf32> to vector<1x8x8xf32>
    %308 = vector.shape_cast %304 : vector<8x8xf32> to vector<1x8x8xf32>
    %309 = vector.shape_cast %305 : vector<8x8xf32> to vector<1x8x8xf32>
    %310 = vector.shape_cast %306 : vector<8x8xf32> to vector<1x8x8xf32>
    %311 = tpu.concatenate %307, %308, %309, %310 in 0 : vector<1x8x8xf32>, vector<1x8x8xf32>, vector<1x8x8xf32>, vector<1x8x8xf32> -> vector<4x8x8xf32>
    %312 = arith.truncf %311 : vector<4x8x8xf32> to vector<4x8x8xbf16>
    %313 = vector.extract_strided_slice %301 {offsets = [0, 0], sizes = [5, 8], strides = [1, 1]} : vector<5x32xf32> to vector<5x8xf32>
    %314 = vector.extract_strided_slice %301 {offsets = [0, 8], sizes = [5, 8], strides = [1, 1]} : vector<5x32xf32> to vector<5x8xf32>
    %315 = vector.extract_strided_slice %301 {offsets = [0, 16], sizes = [5, 8], strides = [1, 1]} : vector<5x32xf32> to vector<5x8xf32>
    %316 = vector.extract_strided_slice %301 {offsets = [0, 24], sizes = [5, 8], strides = [1, 1]} : vector<5x32xf32> to vector<5x8xf32>
    %317 = vector.shape_cast %313 : vector<5x8xf32> to vector<1x5x8xf32>
    %318 = vector.shape_cast %314 : vector<5x8xf32> to vector<1x5x8xf32>
    %319 = vector.shape_cast %315 : vector<5x8xf32> to vector<1x5x8xf32>
    %320 = vector.shape_cast %316 : vector<5x8xf32> to vector<1x5x8xf32>
    %321 = tpu.concatenate %317, %318, %319, %320 in 0 : vector<1x5x8xf32>, vector<1x5x8xf32>, vector<1x5x8xf32>, vector<1x5x8xf32> -> vector<4x5x8xf32>
    %322 = arith.truncf %321 : vector<4x5x8xf32> to vector<4x5x8xbf16>
    %323 = vector.extract_strided_slice %302 {offsets = [0, 0], sizes = [5, 8], strides = [1, 1]} : vector<5x32xf32> to vector<5x8xf32>
    %324 = vector.extract_strided_slice %302 {offsets = [0, 8], sizes = [5, 8], strides = [1, 1]} : vector<5x32xf32> to vector<5x8xf32>
    %325 = vector.extract_strided_slice %302 {offsets = [0, 16], sizes = [5, 8], strides = [1, 1]} : vector<5x32xf32> to vector<5x8xf32>
    %326 = vector.extract_strided_slice %302 {offsets = [0, 24], sizes = [5, 8], strides = [1, 1]} : vector<5x32xf32> to vector<5x8xf32>
    %327 = vector.shape_cast %323 : vector<5x8xf32> to vector<1x5x8xf32>
    %328 = vector.shape_cast %324 : vector<5x8xf32> to vector<1x5x8xf32>
    %329 = vector.shape_cast %325 : vector<5x8xf32> to vector<1x5x8xf32>
    %330 = vector.shape_cast %326 : vector<5x8xf32> to vector<1x5x8xf32>
    %331 = tpu.concatenate %327, %328, %329, %330 in 0 : vector<1x5x8xf32>, vector<1x5x8xf32>, vector<1x5x8xf32>, vector<1x5x8xf32> -> vector<4x5x8xf32>
    %332 = arith.truncf %331 : vector<4x5x8xf32> to vector<4x5x8xbf16>
    %cst_122 = arith.constant dense<0.000000e+00> : vector<4x8x5xf32>
    %333 = tpu.matmul %312, %322, %cst_122 {dimension_numbers = #tpu.dot_dimension_numbers<[2], [2], [1], [1], [0, 0, 0, 1, 1, 1], [0], [0]>} : vector<4x8x8xbf16>, vector<4x5x8xbf16>, vector<4x8x5xf32> -> vector<4x8x5xf32>
    %cst_123 = arith.constant dense<0xFF800000> : vector<4x8xf32>
    %334 = vector.multi_reduction <maximumf>, %333, %cst_123 [2] : vector<4x8x5xf32> to vector<4x8xf32>
    %335 = vector.shape_cast %334 : vector<4x8xf32> to vector<4x8x1xf32>
    %336 = vector.broadcast %335 : vector<4x8x1xf32> to vector<4x8x5xf32>
    %337 = arith.subf %333, %336 : vector<4x8x5xf32>
    %338 = math.exp %337 : vector<4x8x5xf32>
    %cst_124 = arith.constant dense<0.000000e+00> : vector<4x8xf32>
    %339 = vector.multi_reduction <add>, %338, %cst_124 [2] : vector<4x8x5xf32> to vector<4x8xf32>
    %340 = vector.shape_cast %339 : vector<4x8xf32> to vector<4x8x1xf32>
    %341 = tpu.reciprocal %340 {approx = true} : vector<4x8x1xf32> -> vector<4x8x1xf32>
    %342 = vector.broadcast %341 : vector<4x8x1xf32> to vector<4x8x5xf32>
    %343 = arith.mulf %338, %342 : vector<4x8x5xf32>
    %344 = arith.truncf %343 : vector<4x8x5xf32> to vector<4x8x5xbf16>
    %cst_125 = arith.constant dense<0.000000e+00> : vector<4x8x8xf32>
    %345 = tpu.matmul %344, %332, %cst_125 {dimension_numbers = #tpu.dot_dimension_numbers<[2], [1], [1], [2], [0, 0, 0, 1, 1, 2], [0], [0]>} : vector<4x8x5xbf16>, vector<4x5x8xbf16>, vector<4x8x8xf32> -> vector<4x8x8xf32>
    %346 = arith.truncf %345 : vector<4x8x8xf32> to vector<4x8x8xbf16>
    %cst_126 = arith.constant dense<0.000000e+00> : vector<4x8x32xf32>
    %347 = tpu.matmul %346, %35, %cst_126 {dimension_numbers = #tpu.dot_dimension_numbers<[2], [1], [1], [2], [0, 0, 0, 1, 1, 2], [0], [0]>} : vector<4x8x8xbf16>, vector<4x8x32xbf16>, vector<4x8x32xf32> -> vector<4x8x32xf32>
    %cst_127 = arith.constant dense<0.000000e+00> : vector<8x32xf32>
    %348 = vector.multi_reduction <add>, %347, %cst_127 [0] : vector<4x8x32xf32> to vector<8x32xf32>
    %349 = vector.extract_strided_slice %299 {offsets = [8, 0], sizes = [8, 32], strides = [1, 1]} : vector<16x32xf32> to vector<8x32xf32>
    %350 = vector.extract_strided_slice %117 {offsets = [5, 0], sizes = [5, 32], strides = [1, 1]} : vector<10x32xf32> to vector<5x32xf32>
    %351 = vector.extract_strided_slice %118 {offsets = [5, 0], sizes = [5, 32], strides = [1, 1]} : vector<10x32xf32> to vector<5x32xf32>
    %352 = vector.extract_strided_slice %349 {offsets = [0, 0], sizes = [8, 8], strides = [1, 1]} : vector<8x32xf32> to vector<8x8xf32>
    %353 = vector.extract_strided_slice %349 {offsets = [0, 8], sizes = [8, 8], strides = [1, 1]} : vector<8x32xf32> to vector<8x8xf32>
    %354 = vector.extract_strided_slice %349 {offsets = [0, 16], sizes = [8, 8], strides = [1, 1]} : vector<8x32xf32> to vector<8x8xf32>
    %355 = vector.extract_strided_slice %349 {offsets = [0, 24], sizes = [8, 8], strides = [1, 1]} : vector<8x32xf32> to vector<8x8xf32>
    %356 = vector.shape_cast %352 : vector<8x8xf32> to vector<1x8x8xf32>
    %357 = vector.shape_cast %353 : vector<8x8xf32> to vector<1x8x8xf32>
    %358 = vector.shape_cast %354 : vector<8x8xf32> to vector<1x8x8xf32>
    %359 = vector.shape_cast %355 : vector<8x8xf32> to vector<1x8x8xf32>
    %360 = tpu.concatenate %356, %357, %358, %359 in 0 : vector<1x8x8xf32>, vector<1x8x8xf32>, vector<1x8x8xf32>, vector<1x8x8xf32> -> vector<4x8x8xf32>
    %361 = arith.truncf %360 : vector<4x8x8xf32> to vector<4x8x8xbf16>
    %362 = vector.extract_strided_slice %350 {offsets = [0, 0], sizes = [5, 8], strides = [1, 1]} : vector<5x32xf32> to vector<5x8xf32>
    %363 = vector.extract_strided_slice %350 {offsets = [0, 8], sizes = [5, 8], strides = [1, 1]} : vector<5x32xf32> to vector<5x8xf32>
    %364 = vector.extract_strided_slice %350 {offsets = [0, 16], sizes = [5, 8], strides = [1, 1]} : vector<5x32xf32> to vector<5x8xf32>
    %365 = vector.extract_strided_slice %350 {offsets = [0, 24], sizes = [5, 8], strides = [1, 1]} : vector<5x32xf32> to vector<5x8xf32>
    %366 = vector.shape_cast %362 : vector<5x8xf32> to vector<1x5x8xf32>
    %367 = vector.shape_cast %363 : vector<5x8xf32> to vector<1x5x8xf32>
    %368 = vector.shape_cast %364 : vector<5x8xf32> to vector<1x5x8xf32>
    %369 = vector.shape_cast %365 : vector<5x8xf32> to vector<1x5x8xf32>
    %370 = tpu.concatenate %366, %367, %368, %369 in 0 : vector<1x5x8xf32>, vector<1x5x8xf32>, vector<1x5x8xf32>, vector<1x5x8xf32> -> vector<4x5x8xf32>
    %371 = arith.truncf %370 : vector<4x5x8xf32> to vector<4x5x8xbf16>
    %372 = vector.extract_strided_slice %351 {offsets = [0, 0], sizes = [5, 8], strides = [1, 1]} : vector<5x32xf32> to vector<5x8xf32>
    %373 = vector.extract_strided_slice %351 {offsets = [0, 8], sizes = [5, 8], strides = [1, 1]} : vector<5x32xf32> to vector<5x8xf32>
    %374 = vector.extract_strided_slice %351 {offsets = [0, 16], sizes = [5, 8], strides = [1, 1]} : vector<5x32xf32> to vector<5x8xf32>
    %375 = vector.extract_strided_slice %351 {offsets = [0, 24], sizes = [5, 8], strides = [1, 1]} : vector<5x32xf32> to vector<5x8xf32>
    %376 = vector.shape_cast %372 : vector<5x8xf32> to vector<1x5x8xf32>
    %377 = vector.shape_cast %373 : vector<5x8xf32> to vector<1x5x8xf32>
    %378 = vector.shape_cast %374 : vector<5x8xf32> to vector<1x5x8xf32>
    %379 = vector.shape_cast %375 : vector<5x8xf32> to vector<1x5x8xf32>
    %380 = tpu.concatenate %376, %377, %378, %379 in 0 : vector<1x5x8xf32>, vector<1x5x8xf32>, vector<1x5x8xf32>, vector<1x5x8xf32> -> vector<4x5x8xf32>
    %381 = arith.truncf %380 : vector<4x5x8xf32> to vector<4x5x8xbf16>
    %cst_128 = arith.constant dense<0.000000e+00> : vector<4x8x5xf32>
    %382 = tpu.matmul %361, %371, %cst_128 {dimension_numbers = #tpu.dot_dimension_numbers<[2], [2], [1], [1], [0, 0, 0, 1, 1, 1], [0], [0]>} : vector<4x8x8xbf16>, vector<4x5x8xbf16>, vector<4x8x5xf32> -> vector<4x8x5xf32>
    %cst_129 = arith.constant dense<0xFF800000> : vector<4x8xf32>
    %383 = vector.multi_reduction <maximumf>, %382, %cst_129 [2] : vector<4x8x5xf32> to vector<4x8xf32>
    %384 = vector.shape_cast %383 : vector<4x8xf32> to vector<4x8x1xf32>
    %385 = vector.broadcast %384 : vector<4x8x1xf32> to vector<4x8x5xf32>
    %386 = arith.subf %382, %385 : vector<4x8x5xf32>
    %387 = math.exp %386 : vector<4x8x5xf32>
    %cst_130 = arith.constant dense<0.000000e+00> : vector<4x8xf32>
    %388 = vector.multi_reduction <add>, %387, %cst_130 [2] : vector<4x8x5xf32> to vector<4x8xf32>
    %389 = vector.shape_cast %388 : vector<4x8xf32> to vector<4x8x1xf32>
    %390 = tpu.reciprocal %389 {approx = true} : vector<4x8x1xf32> -> vector<4x8x1xf32>
    %391 = vector.broadcast %390 : vector<4x8x1xf32> to vector<4x8x5xf32>
    %392 = arith.mulf %387, %391 : vector<4x8x5xf32>
    %393 = arith.truncf %392 : vector<4x8x5xf32> to vector<4x8x5xbf16>
    %cst_131 = arith.constant dense<0.000000e+00> : vector<4x8x8xf32>
    %394 = tpu.matmul %393, %381, %cst_131 {dimension_numbers = #tpu.dot_dimension_numbers<[2], [1], [1], [2], [0, 0, 0, 1, 1, 2], [0], [0]>} : vector<4x8x5xbf16>, vector<4x5x8xbf16>, vector<4x8x8xf32> -> vector<4x8x8xf32>
    %395 = arith.truncf %394 : vector<4x8x8xf32> to vector<4x8x8xbf16>
    %cst_132 = arith.constant dense<0.000000e+00> : vector<4x8x32xf32>
    %396 = tpu.matmul %395, %35, %cst_132 {dimension_numbers = #tpu.dot_dimension_numbers<[2], [1], [1], [2], [0, 0, 0, 1, 1, 2], [0], [0]>} : vector<4x8x8xbf16>, vector<4x8x32xbf16>, vector<4x8x32xf32> -> vector<4x8x32xf32>
    %cst_133 = arith.constant dense<0.000000e+00> : vector<8x32xf32>
    %397 = vector.multi_reduction <add>, %396, %cst_133 [0] : vector<4x8x32xf32> to vector<8x32xf32>
    %398 = tpu.concatenate %348, %397 in 0 : vector<8x32xf32>, vector<8x32xf32> -> vector<16x32xf32>
    %399 = arith.addf %271, %398 : vector<16x32xf32>
    %400 = vector.broadcast %36 : vector<1x32xf32> to vector<16x32xf32>
    %401 = arith.addf %399, %400 : vector<16x32xf32>
    %cst_134 = arith.constant dense<0.000000e+00> : vector<16xf32>
    %402 = vector.multi_reduction <add>, %401, %cst_134 [1] : vector<16x32xf32> to vector<16xf32>
    %403 = vector.shape_cast %402 : vector<16xf32> to vector<16x1xf32>
    %cst_135 = arith.constant 3.200000e+01 : f32
    %404 = vector.broadcast %cst_135 : f32 to vector<16x1xf32>
    %405 = arith.divf %403, %404 : vector<16x1xf32>
    %406 = vector.broadcast %405 : vector<16x1xf32> to vector<16x32xf32>
    %407 = arith.subf %401, %406 : vector<16x32xf32>
    %408 = arith.mulf %407, %407 : vector<16x32xf32>
    %cst_136 = arith.constant dense<0.000000e+00> : vector<16xf32>
    %409 = vector.multi_reduction <add>, %408, %cst_136 [1] : vector<16x32xf32> to vector<16xf32>
    %410 = vector.shape_cast %409 : vector<16xf32> to vector<16x1xf32>
    %cst_137 = arith.constant 3.200000e+01 : f32
    %411 = vector.broadcast %cst_137 : f32 to vector<16x1xf32>
    %412 = arith.divf %410, %411 : vector<16x1xf32>
    %413 = vector.broadcast %405 : vector<16x1xf32> to vector<16x32xf32>
    %414 = arith.subf %401, %413 : vector<16x32xf32>
    %cst_138 = arith.constant 9.99999974E-6 : f32
    %415 = vector.broadcast %cst_138 : f32 to vector<16x1xf32>
    %416 = arith.addf %412, %415 : vector<16x1xf32>
    %417 = math.rsqrt %416 : vector<16x1xf32>
    %418 = vector.broadcast %417 : vector<16x1xf32> to vector<16x32xf32>
    %419 = arith.mulf %414, %418 : vector<16x32xf32>
    %420 = vector.broadcast %47 : vector<1x32xf32> to vector<16x32xf32>
    %421 = arith.mulf %419, %420 : vector<16x32xf32>
    %422 = vector.broadcast %48 : vector<1x32xf32> to vector<16x32xf32>
    %423 = arith.addf %421, %422 : vector<16x32xf32>
    %424 = arith.truncf %423 : vector<16x32xf32> to vector<16x32xbf16>
    %cst_139 = arith.constant dense<0.000000e+00> : vector<16x64xf32>
    %425 = tpu.matmul %424, %38, %cst_139 {dimension_numbers = #tpu.dot_dimension_numbers<[1], [0], [0], [1], [0, 0, 1, 1], [], []>} : vector<16x32xbf16>, vector<32x64xbf16>, vector<16x64xf32> -> vector<16x64xf32>
    %426 = vector.broadcast %39 : vector<1x64xf32> to vector<16x64xf32>
    %427 = arith.addf %425, %426 : vector<16x64xf32>
    %cst_140 = arith.constant 0.000000e+00 : f32
    %428 = vector.broadcast %cst_140 : f32 to vector<16x64xf32>
    %429 = arith.maximumf %427, %428 : vector<16x64xf32>
    %430 = arith.truncf %429 : vector<16x64xf32> to vector<16x64xbf16>
    %cst_141 = arith.constant dense<0.000000e+00> : vector<16x32xf32>
    %431 = tpu.matmul %430, %41, %cst_141 {dimension_numbers = #tpu.dot_dimension_numbers<[1], [0], [0], [1], [0, 0, 1, 1], [], []>} : vector<16x64xbf16>, vector<64x32xbf16>, vector<16x32xf32> -> vector<16x32xf32>
    %432 = arith.addf %401, %431 : vector<16x32xf32>
    %433 = vector.broadcast %42 : vector<1x32xf32> to vector<16x32xf32>
    %434 = arith.addf %432, %433 : vector<16x32xf32>
    %cst_142 = arith.constant dense<0.000000e+00> : vector<16xf32>
    %435 = vector.multi_reduction <add>, %434, %cst_142 [1] : vector<16x32xf32> to vector<16xf32>
    %436 = vector.shape_cast %435 : vector<16xf32> to vector<16x1xf32>
    %cst_143 = arith.constant 3.200000e+01 : f32
    %437 = vector.broadcast %cst_143 : f32 to vector<16x1xf32>
    %438 = arith.divf %436, %437 : vector<16x1xf32>
    %439 = vector.broadcast %438 : vector<16x1xf32> to vector<16x32xf32>
    %440 = arith.subf %434, %439 : vector<16x32xf32>
    %441 = arith.mulf %440, %440 : vector<16x32xf32>
    %cst_144 = arith.constant dense<0.000000e+00> : vector<16xf32>
    %442 = vector.multi_reduction <add>, %441, %cst_144 [1] : vector<16x32xf32> to vector<16xf32>
    %443 = vector.shape_cast %442 : vector<16xf32> to vector<16x1xf32>
    %cst_145 = arith.constant 3.200000e+01 : f32
    %444 = vector.broadcast %cst_145 : f32 to vector<16x1xf32>
    %445 = arith.divf %443, %444 : vector<16x1xf32>
    %446 = vector.broadcast %438 : vector<16x1xf32> to vector<16x32xf32>
    %447 = arith.subf %434, %446 : vector<16x32xf32>
    %cst_146 = arith.constant 9.99999974E-6 : f32
    %448 = vector.broadcast %cst_146 : f32 to vector<16x1xf32>
    %449 = arith.addf %445, %448 : vector<16x1xf32>
    %450 = math.rsqrt %449 : vector<16x1xf32>
    %451 = vector.broadcast %450 : vector<16x1xf32> to vector<16x32xf32>
    %452 = arith.mulf %447, %451 : vector<16x32xf32>
    %453 = vector.broadcast %49 : vector<1x32xf32> to vector<16x32xf32>
    %454 = arith.mulf %452, %453 : vector<16x32xf32>
    %455 = vector.broadcast %50 : vector<1x32xf32> to vector<16x32xf32>
    %456 = arith.addf %454, %455 : vector<16x32xf32>
    %c0_147 = arith.constant 0 : index
    %c0_148 = arith.constant 0 : index
    %457 = vector.load %arg13[%c0_147, %c0_148] : memref<48x32xf32, #tpu.memory_space<vmem>>, vector<16x32xf32>
    tpu.vector_store %arg13[%c0_147, %c0_148], %456 {strides = array<i32>} : memref<48x32xf32, #tpu.memory_space<vmem>>, vector<16x32xf32>,
    %c0_149 = arith.constant 0 : index
    %c0_150 = arith.constant 0 : index
    %c0_151 = arith.constant 0 : index
    %458 = vector.load %arg2[%c0_149, %c0_150, %c0_151] : memref<2x5x32xf32, #tpu.memory_space<vmem>>, vector<1x5x32xf32>
    %459 = vector.shape_cast %458 : vector<1x5x32xf32> to vector<5x32xf32>
    %c1_152 = arith.constant 1 : index
    %c0_153 = arith.constant 0 : index
    %c0_154 = arith.constant 0 : index
    %460 = vector.load %arg2[%c1_152, %c0_153, %c0_154] : memref<2x5x32xf32, #tpu.memory_space<vmem>>, vector<1x5x32xf32>
    %461 = vector.shape_cast %460 : vector<1x5x32xf32> to vector<5x32xf32>
    %462 = tpu.concatenate %459, %461 in 0 : vector<5x32xf32>, vector<5x32xf32> -> vector<10x32xf32>
    %cst_155 = arith.constant dense<0.000000e+00> : vector<10xf32>
    %463 = vector.multi_reduction <add>, %462, %cst_155 [1] : vector<10x32xf32> to vector<10xf32>
    %464 = vector.shape_cast %463 : vector<10xf32> to vector<10x1xf32>
    %cst_156 = arith.constant 3.200000e+01 : f32
    %465 = vector.broadcast %cst_156 : f32 to vector<10x1xf32>
    %466 = arith.divf %464, %465 : vector<10x1xf32>
    %467 = vector.broadcast %466 : vector<10x1xf32> to vector<10x32xf32>
    %468 = arith.subf %462, %467 : vector<10x32xf32>
    %469 = arith.mulf %468, %468 : vector<10x32xf32>
    %cst_157 = arith.constant dense<0.000000e+00> : vector<10xf32>
    %470 = vector.multi_reduction <add>, %469, %cst_157 [1] : vector<10x32xf32> to vector<10xf32>
    %471 = vector.shape_cast %470 : vector<10xf32> to vector<10x1xf32>
    %cst_158 = arith.constant 3.200000e+01 : f32
    %472 = vector.broadcast %cst_158 : f32 to vector<10x1xf32>
    %473 = arith.divf %471, %472 : vector<10x1xf32>
    %474 = vector.broadcast %466 : vector<10x1xf32> to vector<10x32xf32>
    %475 = arith.subf %462, %474 : vector<10x32xf32>
    %cst_159 = arith.constant 9.99999974E-6 : f32
    %476 = vector.broadcast %cst_159 : f32 to vector<10x1xf32>
    %477 = arith.addf %473, %476 : vector<10x1xf32>
    %478 = math.rsqrt %477 : vector<10x1xf32>
    %479 = vector.broadcast %478 : vector<10x1xf32> to vector<10x32xf32>
    %480 = arith.mulf %475, %479 : vector<10x32xf32>
    %481 = vector.broadcast %94 : vector<1x32xf32> to vector<10x32xf32>
    %482 = arith.mulf %480, %481 : vector<10x32xf32>
    %483 = vector.broadcast %95 : vector<1x32xf32> to vector<10x32xf32>
    %484 = arith.addf %482, %483 : vector<10x32xf32>
    %485 = arith.truncf %484 : vector<10x32xf32> to vector<10x32xbf16>
    %cst_160 = arith.constant dense<0.000000e+00> : vector<10x96xf32>
    %486 = tpu.matmul %485, %58, %cst_160 {dimension_numbers = #tpu.dot_dimension_numbers<[1], [0], [0], [1], [0, 0, 1, 1], [], []>} : vector<10x32xbf16>, vector<32x96xbf16>, vector<10x96xf32> -> vector<10x96xf32>
    %487 = vector.broadcast %59 : vector<1x96xf32> to vector<10x96xf32>
    %488 = arith.addf %486, %487 : vector<10x96xf32>
    %489 = vector.extract_strided_slice %488 {offsets = [0, 0], sizes = [10, 32], strides = [1, 1]} : vector<10x96xf32> to vector<10x32xf32>
    %cst_161 = arith.constant 0.353553385 : f32
    %490 = vector.broadcast %cst_161 : f32 to vector<10x32xf32>
    %491 = arith.mulf %489, %490 : vector<10x32xf32>
    %492 = vector.extract_strided_slice %488 {offsets = [0, 32], sizes = [10, 32], strides = [1, 1]} : vector<10x96xf32> to vector<10x32xf32>
    %493 = vector.extract_strided_slice %488 {offsets = [0, 64], sizes = [10, 32], strides = [1, 1]} : vector<10x96xf32> to vector<10x32xf32>
    %494 = vector.extract_strided_slice %491 {offsets = [0, 0], sizes = [5, 32], strides = [1, 1]} : vector<10x32xf32> to vector<5x32xf32>
    %495 = vector.extract_strided_slice %492 {offsets = [0, 0], sizes = [5, 32], strides = [1, 1]} : vector<10x32xf32> to vector<5x32xf32>
    %496 = vector.extract_strided_slice %493 {offsets = [0, 0], sizes = [5, 32], strides = [1, 1]} : vector<10x32xf32> to vector<5x32xf32>
    %497 = vector.extract_strided_slice %494 {offsets = [0, 0], sizes = [5, 8], strides = [1, 1]} : vector<5x32xf32> to vector<5x8xf32>
    %498 = vector.extract_strided_slice %494 {offsets = [0, 8], sizes = [5, 8], strides = [1, 1]} : vector<5x32xf32> to vector<5x8xf32>
    %499 = vector.extract_strided_slice %494 {offsets = [0, 16], sizes = [5, 8], strides = [1, 1]} : vector<5x32xf32> to vector<5x8xf32>
    %500 = vector.extract_strided_slice %494 {offsets = [0, 24], sizes = [5, 8], strides = [1, 1]} : vector<5x32xf32> to vector<5x8xf32>
    %501 = vector.shape_cast %497 : vector<5x8xf32> to vector<1x5x8xf32>
    %502 = vector.shape_cast %498 : vector<5x8xf32> to vector<1x5x8xf32>
    %503 = vector.shape_cast %499 : vector<5x8xf32> to vector<1x5x8xf32>
    %504 = vector.shape_cast %500 : vector<5x8xf32> to vector<1x5x8xf32>
    %505 = tpu.concatenate %501, %502, %503, %504 in 0 : vector<1x5x8xf32>, vector<1x5x8xf32>, vector<1x5x8xf32>, vector<1x5x8xf32> -> vector<4x5x8xf32>
    %506 = arith.truncf %505 : vector<4x5x8xf32> to vector<4x5x8xbf16>
    %507 = vector.extract_strided_slice %495 {offsets = [0, 0], sizes = [5, 8], strides = [1, 1]} : vector<5x32xf32> to vector<5x8xf32>
    %508 = vector.extract_strided_slice %495 {offsets = [0, 8], sizes = [5, 8], strides = [1, 1]} : vector<5x32xf32> to vector<5x8xf32>
    %509 = vector.extract_strided_slice %495 {offsets = [0, 16], sizes = [5, 8], strides = [1, 1]} : vector<5x32xf32> to vector<5x8xf32>
    %510 = vector.extract_strided_slice %495 {offsets = [0, 24], sizes = [5, 8], strides = [1, 1]} : vector<5x32xf32> to vector<5x8xf32>
    %511 = vector.shape_cast %507 : vector<5x8xf32> to vector<1x5x8xf32>
    %512 = vector.shape_cast %508 : vector<5x8xf32> to vector<1x5x8xf32>
    %513 = vector.shape_cast %509 : vector<5x8xf32> to vector<1x5x8xf32>
    %514 = vector.shape_cast %510 : vector<5x8xf32> to vector<1x5x8xf32>
    %515 = tpu.concatenate %511, %512, %513, %514 in 0 : vector<1x5x8xf32>, vector<1x5x8xf32>, vector<1x5x8xf32>, vector<1x5x8xf32> -> vector<4x5x8xf32>
    %516 = arith.truncf %515 : vector<4x5x8xf32> to vector<4x5x8xbf16>
    %517 = vector.extract_strided_slice %496 {offsets = [0, 0], sizes = [5, 8], strides = [1, 1]} : vector<5x32xf32> to vector<5x8xf32>
    %518 = vector.extract_strided_slice %496 {offsets = [0, 8], sizes = [5, 8], strides = [1, 1]} : vector<5x32xf32> to vector<5x8xf32>
    %519 = vector.extract_strided_slice %496 {offsets = [0, 16], sizes = [5, 8], strides = [1, 1]} : vector<5x32xf32> to vector<5x8xf32>
    %520 = vector.extract_strided_slice %496 {offsets = [0, 24], sizes = [5, 8], strides = [1, 1]} : vector<5x32xf32> to vector<5x8xf32>
    %521 = vector.shape_cast %517 : vector<5x8xf32> to vector<1x5x8xf32>
    %522 = vector.shape_cast %518 : vector<5x8xf32> to vector<1x5x8xf32>
    %523 = vector.shape_cast %519 : vector<5x8xf32> to vector<1x5x8xf32>
    %524 = vector.shape_cast %520 : vector<5x8xf32> to vector<1x5x8xf32>
    %525 = tpu.concatenate %521, %522, %523, %524 in 0 : vector<1x5x8xf32>, vector<1x5x8xf32>, vector<1x5x8xf32>, vector<1x5x8xf32> -> vector<4x5x8xf32>
    %526 = arith.truncf %525 : vector<4x5x8xf32> to vector<4x5x8xbf16>
    %cst_162 = arith.constant dense<0.000000e+00> : vector<4x5x5xf32>
    %527 = tpu.matmul %506, %516, %cst_162 {dimension_numbers = #tpu.dot_dimension_numbers<[2], [2], [1], [1], [0, 0, 0, 1, 1, 1], [0], [0]>} : vector<4x5x8xbf16>, vector<4x5x8xbf16>, vector<4x5x5xf32> -> vector<4x5x5xf32>
    %cst_163 = arith.constant dense<0xFF800000> : vector<4x5xf32>
    %528 = vector.multi_reduction <maximumf>, %527, %cst_163 [2] : vector<4x5x5xf32> to vector<4x5xf32>
    %529 = vector.shape_cast %528 : vector<4x5xf32> to vector<4x5x1xf32>
    %530 = vector.broadcast %529 : vector<4x5x1xf32> to vector<4x5x5xf32>
    %531 = arith.subf %527, %530 : vector<4x5x5xf32>
    %532 = math.exp %531 : vector<4x5x5xf32>
    %cst_164 = arith.constant dense<0.000000e+00> : vector<4x5xf32>
    %533 = vector.multi_reduction <add>, %532, %cst_164 [2] : vector<4x5x5xf32> to vector<4x5xf32>
    %534 = vector.shape_cast %533 : vector<4x5xf32> to vector<4x5x1xf32>
    %535 = tpu.reciprocal %534 {approx = true} : vector<4x5x1xf32> -> vector<4x5x1xf32>
    %536 = vector.broadcast %535 : vector<4x5x1xf32> to vector<4x5x5xf32>
    %537 = arith.mulf %532, %536 : vector<4x5x5xf32>
    %538 = arith.truncf %537 : vector<4x5x5xf32> to vector<4x5x5xbf16>
    %cst_165 = arith.constant dense<0.000000e+00> : vector<4x5x8xf32>
    %539 = tpu.matmul %538, %526, %cst_165 {dimension_numbers = #tpu.dot_dimension_numbers<[2], [1], [1], [2], [0, 0, 0, 1, 1, 2], [0], [0]>} : vector<4x5x5xbf16>, vector<4x5x8xbf16>, vector<4x5x8xf32> -> vector<4x5x8xf32>
    %540 = arith.truncf %539 : vector<4x5x8xf32> to vector<4x5x8xbf16>
    %cst_166 = arith.constant dense<0.000000e+00> : vector<4x5x32xf32>
    %541 = tpu.matmul %540, %70, %cst_166 {dimension_numbers = #tpu.dot_dimension_numbers<[2], [1], [1], [2], [0, 0, 0, 1, 1, 2], [0], [0]>} : vector<4x5x8xbf16>, vector<4x8x32xbf16>, vector<4x5x32xf32> -> vector<4x5x32xf32>
    %cst_167 = arith.constant dense<0.000000e+00> : vector<5x32xf32>
    %542 = vector.multi_reduction <add>, %541, %cst_167 [0] : vector<4x5x32xf32> to vector<5x32xf32>
    %543 = vector.extract_strided_slice %491 {offsets = [5, 0], sizes = [5, 32], strides = [1, 1]} : vector<10x32xf32> to vector<5x32xf32>
    %544 = vector.extract_strided_slice %492 {offsets = [5, 0], sizes = [5, 32], strides = [1, 1]} : vector<10x32xf32> to vector<5x32xf32>
    %545 = vector.extract_strided_slice %493 {offsets = [5, 0], sizes = [5, 32], strides = [1, 1]} : vector<10x32xf32> to vector<5x32xf32>
    %546 = vector.extract_strided_slice %543 {offsets = [0, 0], sizes = [5, 8], strides = [1, 1]} : vector<5x32xf32> to vector<5x8xf32>
    %547 = vector.extract_strided_slice %543 {offsets = [0, 8], sizes = [5, 8], strides = [1, 1]} : vector<5x32xf32> to vector<5x8xf32>
    %548 = vector.extract_strided_slice %543 {offsets = [0, 16], sizes = [5, 8], strides = [1, 1]} : vector<5x32xf32> to vector<5x8xf32>
    %549 = vector.extract_strided_slice %543 {offsets = [0, 24], sizes = [5, 8], strides = [1, 1]} : vector<5x32xf32> to vector<5x8xf32>
    %550 = vector.shape_cast %546 : vector<5x8xf32> to vector<1x5x8xf32>
    %551 = vector.shape_cast %547 : vector<5x8xf32> to vector<1x5x8xf32>
    %552 = vector.shape_cast %548 : vector<5x8xf32> to vector<1x5x8xf32>
    %553 = vector.shape_cast %549 : vector<5x8xf32> to vector<1x5x8xf32>
    %554 = tpu.concatenate %550, %551, %552, %553 in 0 : vector<1x5x8xf32>, vector<1x5x8xf32>, vector<1x5x8xf32>, vector<1x5x8xf32> -> vector<4x5x8xf32>
    %555 = arith.truncf %554 : vector<4x5x8xf32> to vector<4x5x8xbf16>
    %556 = vector.extract_strided_slice %544 {offsets = [0, 0], sizes = [5, 8], strides = [1, 1]} : vector<5x32xf32> to vector<5x8xf32>
    %557 = vector.extract_strided_slice %544 {offsets = [0, 8], sizes = [5, 8], strides = [1, 1]} : vector<5x32xf32> to vector<5x8xf32>
    %558 = vector.extract_strided_slice %544 {offsets = [0, 16], sizes = [5, 8], strides = [1, 1]} : vector<5x32xf32> to vector<5x8xf32>
    %559 = vector.extract_strided_slice %544 {offsets = [0, 24], sizes = [5, 8], strides = [1, 1]} : vector<5x32xf32> to vector<5x8xf32>
    %560 = vector.shape_cast %556 : vector<5x8xf32> to vector<1x5x8xf32>
    %561 = vector.shape_cast %557 : vector<5x8xf32> to vector<1x5x8xf32>
    %562 = vector.shape_cast %558 : vector<5x8xf32> to vector<1x5x8xf32>
    %563 = vector.shape_cast %559 : vector<5x8xf32> to vector<1x5x8xf32>
    %564 = tpu.concatenate %560, %561, %562, %563 in 0 : vector<1x5x8xf32>, vector<1x5x8xf32>, vector<1x5x8xf32>, vector<1x5x8xf32> -> vector<4x5x8xf32>
    %565 = arith.truncf %564 : vector<4x5x8xf32> to vector<4x5x8xbf16>
    %566 = vector.extract_strided_slice %545 {offsets = [0, 0], sizes = [5, 8], strides = [1, 1]} : vector<5x32xf32> to vector<5x8xf32>
    %567 = vector.extract_strided_slice %545 {offsets = [0, 8], sizes = [5, 8], strides = [1, 1]} : vector<5x32xf32> to vector<5x8xf32>
    %568 = vector.extract_strided_slice %545 {offsets = [0, 16], sizes = [5, 8], strides = [1, 1]} : vector<5x32xf32> to vector<5x8xf32>
    %569 = vector.extract_strided_slice %545 {offsets = [0, 24], sizes = [5, 8], strides = [1, 1]} : vector<5x32xf32> to vector<5x8xf32>
    %570 = vector.shape_cast %566 : vector<5x8xf32> to vector<1x5x8xf32>
    %571 = vector.shape_cast %567 : vector<5x8xf32> to vector<1x5x8xf32>
    %572 = vector.shape_cast %568 : vector<5x8xf32> to vector<1x5x8xf32>
    %573 = vector.shape_cast %569 : vector<5x8xf32> to vector<1x5x8xf32>
    %574 = tpu.concatenate %570, %571, %572, %573 in 0 : vector<1x5x8xf32>, vector<1x5x8xf32>, vector<1x5x8xf32>, vector<1x5x8xf32> -> vector<4x5x8xf32>
    %575 = arith.truncf %574 : vector<4x5x8xf32> to vector<4x5x8xbf16>
    %cst_168 = arith.constant dense<0.000000e+00> : vector<4x5x5xf32>
    %576 = tpu.matmul %555, %565, %cst_168 {dimension_numbers = #tpu.dot_dimension_numbers<[2], [2], [1], [1], [0, 0, 0, 1, 1, 1], [0], [0]>} : vector<4x5x8xbf16>, vector<4x5x8xbf16>, vector<4x5x5xf32> -> vector<4x5x5xf32>
    %cst_169 = arith.constant dense<0xFF800000> : vector<4x5xf32>
    %577 = vector.multi_reduction <maximumf>, %576, %cst_169 [2] : vector<4x5x5xf32> to vector<4x5xf32>
    %578 = vector.shape_cast %577 : vector<4x5xf32> to vector<4x5x1xf32>
    %579 = vector.broadcast %578 : vector<4x5x1xf32> to vector<4x5x5xf32>
    %580 = arith.subf %576, %579 : vector<4x5x5xf32>
    %581 = math.exp %580 : vector<4x5x5xf32>
    %cst_170 = arith.constant dense<0.000000e+00> : vector<4x5xf32>
    %582 = vector.multi_reduction <add>, %581, %cst_170 [2] : vector<4x5x5xf32> to vector<4x5xf32>
    %583 = vector.shape_cast %582 : vector<4x5xf32> to vector<4x5x1xf32>
    %584 = tpu.reciprocal %583 {approx = true} : vector<4x5x1xf32> -> vector<4x5x1xf32>
    %585 = vector.broadcast %584 : vector<4x5x1xf32> to vector<4x5x5xf32>
    %586 = arith.mulf %581, %585 : vector<4x5x5xf32>
    %587 = arith.truncf %586 : vector<4x5x5xf32> to vector<4x5x5xbf16>
    %cst_171 = arith.constant dense<0.000000e+00> : vector<4x5x8xf32>
    %588 = tpu.matmul %587, %575, %cst_171 {dimension_numbers = #tpu.dot_dimension_numbers<[2], [1], [1], [2], [0, 0, 0, 1, 1, 2], [0], [0]>} : vector<4x5x5xbf16>, vector<4x5x8xbf16>, vector<4x5x8xf32> -> vector<4x5x8xf32>
    %589 = arith.truncf %588 : vector<4x5x8xf32> to vector<4x5x8xbf16>
    %cst_172 = arith.constant dense<0.000000e+00> : vector<4x5x32xf32>
    %590 = tpu.matmul %589, %70, %cst_172 {dimension_numbers = #tpu.dot_dimension_numbers<[2], [1], [1], [2], [0, 0, 0, 1, 1, 2], [0], [0]>} : vector<4x5x8xbf16>, vector<4x8x32xbf16>, vector<4x5x32xf32> -> vector<4x5x32xf32>
    %cst_173 = arith.constant dense<0.000000e+00> : vector<5x32xf32>
    %591 = vector.multi_reduction <add>, %590, %cst_173 [0] : vector<4x5x32xf32> to vector<5x32xf32>
    %592 = tpu.concatenate %542, %591 in 0 : vector<5x32xf32>, vector<5x32xf32> -> vector<10x32xf32>
    %593 = arith.addf %462, %592 : vector<10x32xf32>
    %594 = vector.broadcast %71 : vector<1x32xf32> to vector<10x32xf32>
    %595 = arith.addf %593, %594 : vector<10x32xf32>
    %cst_174 = arith.constant dense<0.000000e+00> : vector<10xf32>
    %596 = vector.multi_reduction <add>, %595, %cst_174 [1] : vector<10x32xf32> to vector<10xf32>
    %597 = vector.shape_cast %596 : vector<10xf32> to vector<10x1xf32>
    %cst_175 = arith.constant 3.200000e+01 : f32
    %598 = vector.broadcast %cst_175 : f32 to vector<10x1xf32>
    %599 = arith.divf %597, %598 : vector<10x1xf32>
    %600 = vector.broadcast %599 : vector<10x1xf32> to vector<10x32xf32>
    %601 = arith.subf %595, %600 : vector<10x32xf32>
    %602 = arith.mulf %601, %601 : vector<10x32xf32>
    %cst_176 = arith.constant dense<0.000000e+00> : vector<10xf32>
    %603 = vector.multi_reduction <add>, %602, %cst_176 [1] : vector<10x32xf32> to vector<10xf32>
    %604 = vector.shape_cast %603 : vector<10xf32> to vector<10x1xf32>
    %cst_177 = arith.constant 3.200000e+01 : f32
    %605 = vector.broadcast %cst_177 : f32 to vector<10x1xf32>
    %606 = arith.divf %604, %605 : vector<10x1xf32>
    %607 = vector.broadcast %599 : vector<10x1xf32> to vector<10x32xf32>
    %608 = arith.subf %595, %607 : vector<10x32xf32>
    %cst_178 = arith.constant 9.99999974E-6 : f32
    %609 = vector.broadcast %cst_178 : f32 to vector<10x1xf32>
    %610 = arith.addf %606, %609 : vector<10x1xf32>
    %611 = math.rsqrt %610 : vector<10x1xf32>
    %612 = vector.broadcast %611 : vector<10x1xf32> to vector<10x32xf32>
    %613 = arith.mulf %608, %612 : vector<10x32xf32>
    %614 = vector.broadcast %96 : vector<1x32xf32> to vector<10x32xf32>
    %615 = arith.mulf %613, %614 : vector<10x32xf32>
    %616 = vector.broadcast %97 : vector<1x32xf32> to vector<10x32xf32>
    %617 = arith.addf %615, %616 : vector<10x32xf32>
    %618 = arith.truncf %617 : vector<10x32xf32> to vector<10x32xbf16>
    %cst_179 = arith.constant dense<0.000000e+00> : vector<10x32xf32>
    %619 = tpu.matmul %618, %72, %cst_179 {dimension_numbers = #tpu.dot_dimension_numbers<[1], [0], [0], [1], [0, 0, 1, 1], [], []>} : vector<10x32xbf16>, vector<32x32xbf16>, vector<10x32xf32> -> vector<10x32xf32>
    %620 = vector.broadcast %73 : vector<1x32xf32> to vector<10x32xf32>
    %621 = arith.addf %619, %620 : vector<10x32xf32>
    %cst_180 = arith.constant 0.353553385 : f32
    %622 = vector.broadcast %cst_180 : f32 to vector<10x32xf32>
    %623 = arith.mulf %621, %622 : vector<10x32xf32>
    %624 = vector.extract_strided_slice %623 {offsets = [0, 0], sizes = [5, 32], strides = [1, 1]} : vector<10x32xf32> to vector<5x32xf32>
    %625 = vector.extract_strided_slice %132 {offsets = [0, 0], sizes = [8, 32], strides = [1, 1]} : vector<16x32xf32> to vector<8x32xf32>
    %626 = vector.extract_strided_slice %133 {offsets = [0, 0], sizes = [8, 32], strides = [1, 1]} : vector<16x32xf32> to vector<8x32xf32>
    %627 = vector.extract_strided_slice %624 {offsets = [0, 0], sizes = [5, 8], strides = [1, 1]} : vector<5x32xf32> to vector<5x8xf32>
    %628 = vector.extract_strided_slice %624 {offsets = [0, 8], sizes = [5, 8], strides = [1, 1]} : vector<5x32xf32> to vector<5x8xf32>
    %629 = vector.extract_strided_slice %624 {offsets = [0, 16], sizes = [5, 8], strides = [1, 1]} : vector<5x32xf32> to vector<5x8xf32>
    %630 = vector.extract_strided_slice %624 {offsets = [0, 24], sizes = [5, 8], strides = [1, 1]} : vector<5x32xf32> to vector<5x8xf32>
    %631 = vector.shape_cast %627 : vector<5x8xf32> to vector<1x5x8xf32>
    %632 = vector.shape_cast %628 : vector<5x8xf32> to vector<1x5x8xf32>
    %633 = vector.shape_cast %629 : vector<5x8xf32> to vector<1x5x8xf32>
    %634 = vector.shape_cast %630 : vector<5x8xf32> to vector<1x5x8xf32>
    %635 = tpu.concatenate %631, %632, %633, %634 in 0 : vector<1x5x8xf32>, vector<1x5x8xf32>, vector<1x5x8xf32>, vector<1x5x8xf32> -> vector<4x5x8xf32>
    %636 = arith.truncf %635 : vector<4x5x8xf32> to vector<4x5x8xbf16>
    %637 = vector.extract_strided_slice %625 {offsets = [0, 0], sizes = [8, 8], strides = [1, 1]} : vector<8x32xf32> to vector<8x8xf32>
    %638 = vector.extract_strided_slice %625 {offsets = [0, 8], sizes = [8, 8], strides = [1, 1]} : vector<8x32xf32> to vector<8x8xf32>
    %639 = vector.extract_strided_slice %625 {offsets = [0, 16], sizes = [8, 8], strides = [1, 1]} : vector<8x32xf32> to vector<8x8xf32>
    %640 = vector.extract_strided_slice %625 {offsets = [0, 24], sizes = [8, 8], strides = [1, 1]} : vector<8x32xf32> to vector<8x8xf32>
    %641 = vector.shape_cast %637 : vector<8x8xf32> to vector<1x8x8xf32>
    %642 = vector.shape_cast %638 : vector<8x8xf32> to vector<1x8x8xf32>
    %643 = vector.shape_cast %639 : vector<8x8xf32> to vector<1x8x8xf32>
    %644 = vector.shape_cast %640 : vector<8x8xf32> to vector<1x8x8xf32>
    %645 = tpu.concatenate %641, %642, %643, %644 in 0 : vector<1x8x8xf32>, vector<1x8x8xf32>, vector<1x8x8xf32>, vector<1x8x8xf32> -> vector<4x8x8xf32>
    %646 = arith.truncf %645 : vector<4x8x8xf32> to vector<4x8x8xbf16>
    %647 = vector.extract_strided_slice %626 {offsets = [0, 0], sizes = [8, 8], strides = [1, 1]} : vector<8x32xf32> to vector<8x8xf32>
    %648 = vector.extract_strided_slice %626 {offsets = [0, 8], sizes = [8, 8], strides = [1, 1]} : vector<8x32xf32> to vector<8x8xf32>
    %649 = vector.extract_strided_slice %626 {offsets = [0, 16], sizes = [8, 8], strides = [1, 1]} : vector<8x32xf32> to vector<8x8xf32>
    %650 = vector.extract_strided_slice %626 {offsets = [0, 24], sizes = [8, 8], strides = [1, 1]} : vector<8x32xf32> to vector<8x8xf32>
    %651 = vector.shape_cast %647 : vector<8x8xf32> to vector<1x8x8xf32>
    %652 = vector.shape_cast %648 : vector<8x8xf32> to vector<1x8x8xf32>
    %653 = vector.shape_cast %649 : vector<8x8xf32> to vector<1x8x8xf32>
    %654 = vector.shape_cast %650 : vector<8x8xf32> to vector<1x8x8xf32>
    %655 = tpu.concatenate %651, %652, %653, %654 in 0 : vector<1x8x8xf32>, vector<1x8x8xf32>, vector<1x8x8xf32>, vector<1x8x8xf32> -> vector<4x8x8xf32>
    %656 = arith.truncf %655 : vector<4x8x8xf32> to vector<4x8x8xbf16>
    %cst_181 = arith.constant dense<0.000000e+00> : vector<4x5x8xf32>
    %657 = tpu.matmul %636, %646, %cst_181 {dimension_numbers = #tpu.dot_dimension_numbers<[2], [2], [1], [1], [0, 0, 0, 1, 1, 1], [0], [0]>} : vector<4x5x8xbf16>, vector<4x8x8xbf16>, vector<4x5x8xf32> -> vector<4x5x8xf32>
    %cst_182 = arith.constant dense<0xFF800000> : vector<4x5xf32>
    %658 = vector.multi_reduction <maximumf>, %657, %cst_182 [2] : vector<4x5x8xf32> to vector<4x5xf32>
    %659 = vector.shape_cast %658 : vector<4x5xf32> to vector<4x5x1xf32>
    %660 = vector.broadcast %659 : vector<4x5x1xf32> to vector<4x5x8xf32>
    %661 = arith.subf %657, %660 : vector<4x5x8xf32>
    %662 = math.exp %661 : vector<4x5x8xf32>
    %cst_183 = arith.constant dense<0.000000e+00> : vector<4x5xf32>
    %663 = vector.multi_reduction <add>, %662, %cst_183 [2] : vector<4x5x8xf32> to vector<4x5xf32>
    %664 = vector.shape_cast %663 : vector<4x5xf32> to vector<4x5x1xf32>
    %665 = tpu.reciprocal %664 {approx = true} : vector<4x5x1xf32> -> vector<4x5x1xf32>
    %666 = vector.broadcast %665 : vector<4x5x1xf32> to vector<4x5x8xf32>
    %667 = arith.mulf %662, %666 : vector<4x5x8xf32>
    %668 = arith.truncf %667 : vector<4x5x8xf32> to vector<4x5x8xbf16>
    %cst_184 = arith.constant dense<0.000000e+00> : vector<4x5x8xf32>
    %669 = tpu.matmul %668, %656, %cst_184 {dimension_numbers = #tpu.dot_dimension_numbers<[2], [1], [1], [2], [0, 0, 0, 1, 1, 2], [0], [0]>} : vector<4x5x8xbf16>, vector<4x8x8xbf16>, vector<4x5x8xf32> -> vector<4x5x8xf32>
    %670 = arith.truncf %669 : vector<4x5x8xf32> to vector<4x5x8xbf16>
    %cst_185 = arith.constant dense<0.000000e+00> : vector<4x5x32xf32>
    %671 = tpu.matmul %670, %86, %cst_185 {dimension_numbers = #tpu.dot_dimension_numbers<[2], [1], [1], [2], [0, 0, 0, 1, 1, 2], [0], [0]>} : vector<4x5x8xbf16>, vector<4x8x32xbf16>, vector<4x5x32xf32> -> vector<4x5x32xf32>
    %cst_186 = arith.constant dense<0.000000e+00> : vector<5x32xf32>
    %672 = vector.multi_reduction <add>, %671, %cst_186 [0] : vector<4x5x32xf32> to vector<5x32xf32>
    %673 = vector.extract_strided_slice %623 {offsets = [5, 0], sizes = [5, 32], strides = [1, 1]} : vector<10x32xf32> to vector<5x32xf32>
    %674 = vector.extract_strided_slice %132 {offsets = [8, 0], sizes = [8, 32], strides = [1, 1]} : vector<16x32xf32> to vector<8x32xf32>
    %675 = vector.extract_strided_slice %133 {offsets = [8, 0], sizes = [8, 32], strides = [1, 1]} : vector<16x32xf32> to vector<8x32xf32>
    %676 = vector.extract_strided_slice %673 {offsets = [0, 0], sizes = [5, 8], strides = [1, 1]} : vector<5x32xf32> to vector<5x8xf32>
    %677 = vector.extract_strided_slice %673 {offsets = [0, 8], sizes = [5, 8], strides = [1, 1]} : vector<5x32xf32> to vector<5x8xf32>
    %678 = vector.extract_strided_slice %673 {offsets = [0, 16], sizes = [5, 8], strides = [1, 1]} : vector<5x32xf32> to vector<5x8xf32>
    %679 = vector.extract_strided_slice %673 {offsets = [0, 24], sizes = [5, 8], strides = [1, 1]} : vector<5x32xf32> to vector<5x8xf32>
    %680 = vector.shape_cast %676 : vector<5x8xf32> to vector<1x5x8xf32>
    %681 = vector.shape_cast %677 : vector<5x8xf32> to vector<1x5x8xf32>
    %682 = vector.shape_cast %678 : vector<5x8xf32> to vector<1x5x8xf32>
    %683 = vector.shape_cast %679 : vector<5x8xf32> to vector<1x5x8xf32>
    %684 = tpu.concatenate %680, %681, %682, %683 in 0 : vector<1x5x8xf32>, vector<1x5x8xf32>, vector<1x5x8xf32>, vector<1x5x8xf32> -> vector<4x5x8xf32>
    %685 = arith.truncf %684 : vector<4x5x8xf32> to vector<4x5x8xbf16>
    %686 = vector.extract_strided_slice %674 {offsets = [0, 0], sizes = [8, 8], strides = [1, 1]} : vector<8x32xf32> to vector<8x8xf32>
    %687 = vector.extract_strided_slice %674 {offsets = [0, 8], sizes = [8, 8], strides = [1, 1]} : vector<8x32xf32> to vector<8x8xf32>
    %688 = vector.extract_strided_slice %674 {offsets = [0, 16], sizes = [8, 8], strides = [1, 1]} : vector<8x32xf32> to vector<8x8xf32>
    %689 = vector.extract_strided_slice %674 {offsets = [0, 24], sizes = [8, 8], strides = [1, 1]} : vector<8x32xf32> to vector<8x8xf32>
    %690 = vector.shape_cast %686 : vector<8x8xf32> to vector<1x8x8xf32>
    %691 = vector.shape_cast %687 : vector<8x8xf32> to vector<1x8x8xf32>
    %692 = vector.shape_cast %688 : vector<8x8xf32> to vector<1x8x8xf32>
    %693 = vector.shape_cast %689 : vector<8x8xf32> to vector<1x8x8xf32>
    %694 = tpu.concatenate %690, %691, %692, %693 in 0 : vector<1x8x8xf32>, vector<1x8x8xf32>, vector<1x8x8xf32>, vector<1x8x8xf32> -> vector<4x8x8xf32>
    %695 = arith.truncf %694 : vector<4x8x8xf32> to vector<4x8x8xbf16>
    %696 = vector.extract_strided_slice %675 {offsets = [0, 0], sizes = [8, 8], strides = [1, 1]} : vector<8x32xf32> to vector<8x8xf32>
    %697 = vector.extract_strided_slice %675 {offsets = [0, 8], sizes = [8, 8], strides = [1, 1]} : vector<8x32xf32> to vector<8x8xf32>
    %698 = vector.extract_strided_slice %675 {offsets = [0, 16], sizes = [8, 8], strides = [1, 1]} : vector<8x32xf32> to vector<8x8xf32>
    %699 = vector.extract_strided_slice %675 {offsets = [0, 24], sizes = [8, 8], strides = [1, 1]} : vector<8x32xf32> to vector<8x8xf32>
    %700 = vector.shape_cast %696 : vector<8x8xf32> to vector<1x8x8xf32>
    %701 = vector.shape_cast %697 : vector<8x8xf32> to vector<1x8x8xf32>
    %702 = vector.shape_cast %698 : vector<8x8xf32> to vector<1x8x8xf32>
    %703 = vector.shape_cast %699 : vector<8x8xf32> to vector<1x8x8xf32>
    %704 = tpu.concatenate %700, %701, %702, %703 in 0 : vector<1x8x8xf32>, vector<1x8x8xf32>, vector<1x8x8xf32>, vector<1x8x8xf32> -> vector<4x8x8xf32>
    %705 = arith.truncf %704 : vector<4x8x8xf32> to vector<4x8x8xbf16>
    %cst_187 = arith.constant dense<0.000000e+00> : vector<4x5x8xf32>
    %706 = tpu.matmul %685, %695, %cst_187 {dimension_numbers = #tpu.dot_dimension_numbers<[2], [2], [1], [1], [0, 0, 0, 1, 1, 1], [0], [0]>} : vector<4x5x8xbf16>, vector<4x8x8xbf16>, vector<4x5x8xf32> -> vector<4x5x8xf32>
    %cst_188 = arith.constant dense<0xFF800000> : vector<4x5xf32>
    %707 = vector.multi_reduction <maximumf>, %706, %cst_188 [2] : vector<4x5x8xf32> to vector<4x5xf32>
    %708 = vector.shape_cast %707 : vector<4x5xf32> to vector<4x5x1xf32>
    %709 = vector.broadcast %708 : vector<4x5x1xf32> to vector<4x5x8xf32>
    %710 = arith.subf %706, %709 : vector<4x5x8xf32>
    %711 = math.exp %710 : vector<4x5x8xf32>
    %cst_189 = arith.constant dense<0.000000e+00> : vector<4x5xf32>
    %712 = vector.multi_reduction <add>, %711, %cst_189 [2] : vector<4x5x8xf32> to vector<4x5xf32>
    %713 = vector.shape_cast %712 : vector<4x5xf32> to vector<4x5x1xf32>
    %714 = tpu.reciprocal %713 {approx = true} : vector<4x5x1xf32> -> vector<4x5x1xf32>
    %715 = vector.broadcast %714 : vector<4x5x1xf32> to vector<4x5x8xf32>
    %716 = arith.mulf %711, %715 : vector<4x5x8xf32>
    %717 = arith.truncf %716 : vector<4x5x8xf32> to vector<4x5x8xbf16>
    %cst_190 = arith.constant dense<0.000000e+00> : vector<4x5x8xf32>
    %718 = tpu.matmul %717, %705, %cst_190 {dimension_numbers = #tpu.dot_dimension_numbers<[2], [1], [1], [2], [0, 0, 0, 1, 1, 2], [0], [0]>} : vector<4x5x8xbf16>, vector<4x8x8xbf16>, vector<4x5x8xf32> -> vector<4x5x8xf32>
    %719 = arith.truncf %718 : vector<4x5x8xf32> to vector<4x5x8xbf16>
    %cst_191 = arith.constant dense<0.000000e+00> : vector<4x5x32xf32>
    %720 = tpu.matmul %719, %86, %cst_191 {dimension_numbers = #tpu.dot_dimension_numbers<[2], [1], [1], [2], [0, 0, 0, 1, 1, 2], [0], [0]>} : vector<4x5x8xbf16>, vector<4x8x32xbf16>, vector<4x5x32xf32> -> vector<4x5x32xf32>
    %cst_192 = arith.constant dense<0.000000e+00> : vector<5x32xf32>
    %721 = vector.multi_reduction <add>, %720, %cst_192 [0] : vector<4x5x32xf32> to vector<5x32xf32>
    %722 = tpu.concatenate %672, %721 in 0 : vector<5x32xf32>, vector<5x32xf32> -> vector<10x32xf32>
    %723 = arith.addf %595, %722 : vector<10x32xf32>
    %724 = vector.broadcast %87 : vector<1x32xf32> to vector<10x32xf32>
    %725 = arith.addf %723, %724 : vector<10x32xf32>
    %cst_193 = arith.constant dense<0.000000e+00> : vector<10xf32>
    %726 = vector.multi_reduction <add>, %725, %cst_193 [1] : vector<10x32xf32> to vector<10xf32>
    %727 = vector.shape_cast %726 : vector<10xf32> to vector<10x1xf32>
    %cst_194 = arith.constant 3.200000e+01 : f32
    %728 = vector.broadcast %cst_194 : f32 to vector<10x1xf32>
    %729 = arith.divf %727, %728 : vector<10x1xf32>
    %730 = vector.broadcast %729 : vector<10x1xf32> to vector<10x32xf32>
    %731 = arith.subf %725, %730 : vector<10x32xf32>
    %732 = arith.mulf %731, %731 : vector<10x32xf32>
    %cst_195 = arith.constant dense<0.000000e+00> : vector<10xf32>
    %733 = vector.multi_reduction <add>, %732, %cst_195 [1] : vector<10x32xf32> to vector<10xf32>
    %734 = vector.shape_cast %733 : vector<10xf32> to vector<10x1xf32>
    %cst_196 = arith.constant 3.200000e+01 : f32
    %735 = vector.broadcast %cst_196 : f32 to vector<10x1xf32>
    %736 = arith.divf %734, %735 : vector<10x1xf32>
    %737 = vector.broadcast %729 : vector<10x1xf32> to vector<10x32xf32>
    %738 = arith.subf %725, %737 : vector<10x32xf32>
    %cst_197 = arith.constant 9.99999974E-6 : f32
    %739 = vector.broadcast %cst_197 : f32 to vector<10x1xf32>
    %740 = arith.addf %736, %739 : vector<10x1xf32>
    %741 = math.rsqrt %740 : vector<10x1xf32>
    %742 = vector.broadcast %741 : vector<10x1xf32> to vector<10x32xf32>
    %743 = arith.mulf %738, %742 : vector<10x32xf32>
    %744 = vector.broadcast %98 : vector<1x32xf32> to vector<10x32xf32>
    %745 = arith.mulf %743, %744 : vector<10x32xf32>
    %746 = vector.broadcast %99 : vector<1x32xf32> to vector<10x32xf32>
    %747 = arith.addf %745, %746 : vector<10x32xf32>
    %748 = arith.truncf %747 : vector<10x32xf32> to vector<10x32xbf16>
    %cst_198 = arith.constant dense<0.000000e+00> : vector<10x64xf32>
    %749 = tpu.matmul %748, %89, %cst_198 {dimension_numbers = #tpu.dot_dimension_numbers<[1], [0], [0], [1], [0, 0, 1, 1], [], []>} : vector<10x32xbf16>, vector<32x64xbf16>, vector<10x64xf32> -> vector<10x64xf32>
    %750 = vector.broadcast %90 : vector<1x64xf32> to vector<10x64xf32>
    %751 = arith.addf %749, %750 : vector<10x64xf32>
    %cst_199 = arith.constant 0.000000e+00 : f32
    %752 = vector.broadcast %cst_199 : f32 to vector<10x64xf32>
    %753 = arith.maximumf %751, %752 : vector<10x64xf32>
    %754 = arith.truncf %753 : vector<10x64xf32> to vector<10x64xbf16>
    %cst_200 = arith.constant dense<0.000000e+00> : vector<10x32xf32>
    %755 = tpu.matmul %754, %92, %cst_200 {dimension_numbers = #tpu.dot_dimension_numbers<[1], [0], [0], [1], [0, 0, 1, 1], [], []>} : vector<10x64xbf16>, vector<64x32xbf16>, vector<10x32xf32> -> vector<10x32xf32>
    %756 = arith.addf %725, %755 : vector<10x32xf32>
    %757 = vector.broadcast %93 : vector<1x32xf32> to vector<10x32xf32>
    %758 = arith.addf %756, %757 : vector<10x32xf32>
    %cst_201 = arith.constant dense<0.000000e+00> : vector<10xf32>
    %759 = vector.multi_reduction <add>, %758, %cst_201 [1] : vector<10x32xf32> to vector<10xf32>
    %760 = vector.shape_cast %759 : vector<10xf32> to vector<10x1xf32>
    %cst_202 = arith.constant 3.200000e+01 : f32
    %761 = vector.broadcast %cst_202 : f32 to vector<10x1xf32>
    %762 = arith.divf %760, %761 : vector<10x1xf32>
    %763 = vector.broadcast %762 : vector<10x1xf32> to vector<10x32xf32>
    %764 = arith.subf %758, %763 : vector<10x32xf32>
    %765 = arith.mulf %764, %764 : vector<10x32xf32>
    %cst_203 = arith.constant dense<0.000000e+00> : vector<10xf32>
    %766 = vector.multi_reduction <add>, %765, %cst_203 [1] : vector<10x32xf32> to vector<10xf32>
    %767 = vector.shape_cast %766 : vector<10xf32> to vector<10x1xf32>
    %cst_204 = arith.constant 3.200000e+01 : f32
    %768 = vector.broadcast %cst_204 : f32 to vector<10x1xf32>
    %769 = arith.divf %767, %768 : vector<10x1xf32>
    %770 = vector.broadcast %762 : vector<10x1xf32> to vector<10x32xf32>
    %771 = arith.subf %758, %770 : vector<10x32xf32>
    %cst_205 = arith.constant 9.99999974E-6 : f32
    %772 = vector.broadcast %cst_205 : f32 to vector<10x1xf32>
    %773 = arith.addf %769, %772 : vector<10x1xf32>
    %774 = math.rsqrt %773 : vector<10x1xf32>
    %775 = vector.broadcast %774 : vector<10x1xf32> to vector<10x32xf32>
    %776 = arith.mulf %771, %775 : vector<10x32xf32>
    %777 = vector.broadcast %100 : vector<1x32xf32> to vector<10x32xf32>
    %778 = arith.mulf %776, %777 : vector<10x32xf32>
    %779 = vector.broadcast %101 : vector<1x32xf32> to vector<10x32xf32>
    %780 = arith.addf %778, %779 : vector<10x32xf32>
    %c16_206 = arith.constant 16 : index
    %c0_207 = arith.constant 0 : index
    %781 = vector.load %arg13[%c16_206, %c0_207] : memref<48x32xf32, #tpu.memory_space<vmem>>, vector<10x32xf32>
    tpu.vector_store %arg13[%c16_206, %c0_207], %780 {strides = array<i32>} : memref<48x32xf32, #tpu.memory_space<vmem>>, vector<10x32xf32>,
    %c0_208 = arith.constant 0 : index
    %c0_209 = arith.constant 0 : index
    %c0_210 = arith.constant 0 : index
    %782 = vector.load %arg3[%c0_208, %c0_209, %c0_210] : memref<2x4x32xf32, #tpu.memory_space<vmem>>, vector<1x4x32xf32>
    %783 = vector.shape_cast %782 : vector<1x4x32xf32> to vector<4x32xf32>
    %c1_211 = arith.constant 1 : index
    %c0_212 = arith.constant 0 : index
    %c0_213 = arith.constant 0 : index
    %784 = vector.load %arg3[%c1_211, %c0_212, %c0_213] : memref<2x4x32xf32, #tpu.memory_space<vmem>>, vector<1x4x32xf32>
    %785 = vector.shape_cast %784 : vector<1x4x32xf32> to vector<4x32xf32>
    %786 = tpu.concatenate %783, %785 in 0 : vector<4x32xf32>, vector<4x32xf32> -> vector<8x32xf32>
    %cst_214 = arith.constant dense<0.000000e+00> : vector<8xf32>
    %787 = vector.multi_reduction <add>, %786, %cst_214 [1] : vector<8x32xf32> to vector<8xf32>
    %788 = vector.shape_cast %787 : vector<8xf32> to vector<8x1xf32>
    %cst_215 = arith.constant 3.200000e+01 : f32
    %789 = vector.broadcast %cst_215 : f32 to vector<8x1xf32>
    %790 = arith.divf %788, %789 : vector<8x1xf32>
    %791 = vector.broadcast %790 : vector<8x1xf32> to vector<8x32xf32>
    %792 = arith.subf %786, %791 : vector<8x32xf32>
    %793 = arith.mulf %792, %792 : vector<8x32xf32>
    %cst_216 = arith.constant dense<0.000000e+00> : vector<8xf32>
    %794 = vector.multi_reduction <add>, %793, %cst_216 [1] : vector<8x32xf32> to vector<8xf32>
    %795 = vector.shape_cast %794 : vector<8xf32> to vector<8x1xf32>
    %cst_217 = arith.constant 3.200000e+01 : f32
    %796 = vector.broadcast %cst_217 : f32 to vector<8x1xf32>
    %797 = arith.divf %795, %796 : vector<8x1xf32>
    %798 = vector.broadcast %790 : vector<8x1xf32> to vector<8x32xf32>
    %799 = arith.subf %786, %798 : vector<8x32xf32>
    %cst_218 = arith.constant 9.99999974E-6 : f32
    %800 = vector.broadcast %cst_218 : f32 to vector<8x1xf32>
    %801 = arith.addf %797, %800 : vector<8x1xf32>
    %802 = math.rsqrt %801 : vector<8x1xf32>
    %803 = vector.broadcast %802 : vector<8x1xf32> to vector<8x32xf32>
    %804 = arith.mulf %799, %803 : vector<8x32xf32>
    %805 = vector.broadcast %43 : vector<1x32xf32> to vector<8x32xf32>
    %806 = arith.mulf %804, %805 : vector<8x32xf32>
    %807 = vector.broadcast %44 : vector<1x32xf32> to vector<8x32xf32>
    %808 = arith.addf %806, %807 : vector<8x32xf32>
    %809 = arith.truncf %808 : vector<8x32xf32> to vector<8x32xbf16>
    %cst_219 = arith.constant dense<0.000000e+00> : vector<8x96xf32>
    %810 = tpu.matmul %809, %7, %cst_219 {dimension_numbers = #tpu.dot_dimension_numbers<[1], [0], [0], [1], [0, 0, 1, 1], [], []>} : vector<8x32xbf16>, vector<32x96xbf16>, vector<8x96xf32> -> vector<8x96xf32>
    %811 = vector.broadcast %8 : vector<1x96xf32> to vector<8x96xf32>
    %812 = arith.addf %810, %811 : vector<8x96xf32>
    %813 = vector.extract_strided_slice %812 {offsets = [0, 0], sizes = [8, 32], strides = [1, 1]} : vector<8x96xf32> to vector<8x32xf32>
    %cst_220 = arith.constant 0.353553385 : f32
    %814 = vector.broadcast %cst_220 : f32 to vector<8x32xf32>
    %815 = arith.mulf %813, %814 : vector<8x32xf32>
    %816 = vector.extract_strided_slice %812 {offsets = [0, 32], sizes = [8, 32], strides = [1, 1]} : vector<8x96xf32> to vector<8x32xf32>
    %817 = vector.extract_strided_slice %812 {offsets = [0, 64], sizes = [8, 32], strides = [1, 1]} : vector<8x96xf32> to vector<8x32xf32>
    %818 = vector.extract_strided_slice %815 {offsets = [0, 0], sizes = [4, 32], strides = [1, 1]} : vector<8x32xf32> to vector<4x32xf32>
    %819 = vector.extract_strided_slice %816 {offsets = [0, 0], sizes = [4, 32], strides = [1, 1]} : vector<8x32xf32> to vector<4x32xf32>
    %820 = vector.extract_strided_slice %817 {offsets = [0, 0], sizes = [4, 32], strides = [1, 1]} : vector<8x32xf32> to vector<4x32xf32>
    %821 = vector.extract_strided_slice %818 {offsets = [0, 0], sizes = [4, 8], strides = [1, 1]} : vector<4x32xf32> to vector<4x8xf32>
    %822 = vector.extract_strided_slice %818 {offsets = [0, 8], sizes = [4, 8], strides = [1, 1]} : vector<4x32xf32> to vector<4x8xf32>
    %823 = vector.extract_strided_slice %818 {offsets = [0, 16], sizes = [4, 8], strides = [1, 1]} : vector<4x32xf32> to vector<4x8xf32>
    %824 = vector.extract_strided_slice %818 {offsets = [0, 24], sizes = [4, 8], strides = [1, 1]} : vector<4x32xf32> to vector<4x8xf32>
    %825 = vector.shape_cast %821 : vector<4x8xf32> to vector<1x4x8xf32>
    %826 = vector.shape_cast %822 : vector<4x8xf32> to vector<1x4x8xf32>
    %827 = vector.shape_cast %823 : vector<4x8xf32> to vector<1x4x8xf32>
    %828 = vector.shape_cast %824 : vector<4x8xf32> to vector<1x4x8xf32>
    %829 = tpu.concatenate %825, %826, %827, %828 in 0 : vector<1x4x8xf32>, vector<1x4x8xf32>, vector<1x4x8xf32>, vector<1x4x8xf32> -> vector<4x4x8xf32>
    %830 = arith.truncf %829 : vector<4x4x8xf32> to vector<4x4x8xbf16>
    %831 = vector.extract_strided_slice %819 {offsets = [0, 0], sizes = [4, 8], strides = [1, 1]} : vector<4x32xf32> to vector<4x8xf32>
    %832 = vector.extract_strided_slice %819 {offsets = [0, 8], sizes = [4, 8], strides = [1, 1]} : vector<4x32xf32> to vector<4x8xf32>
    %833 = vector.extract_strided_slice %819 {offsets = [0, 16], sizes = [4, 8], strides = [1, 1]} : vector<4x32xf32> to vector<4x8xf32>
    %834 = vector.extract_strided_slice %819 {offsets = [0, 24], sizes = [4, 8], strides = [1, 1]} : vector<4x32xf32> to vector<4x8xf32>
    %835 = vector.shape_cast %831 : vector<4x8xf32> to vector<1x4x8xf32>
    %836 = vector.shape_cast %832 : vector<4x8xf32> to vector<1x4x8xf32>
    %837 = vector.shape_cast %833 : vector<4x8xf32> to vector<1x4x8xf32>
    %838 = vector.shape_cast %834 : vector<4x8xf32> to vector<1x4x8xf32>
    %839 = tpu.concatenate %835, %836, %837, %838 in 0 : vector<1x4x8xf32>, vector<1x4x8xf32>, vector<1x4x8xf32>, vector<1x4x8xf32> -> vector<4x4x8xf32>
    %840 = arith.truncf %839 : vector<4x4x8xf32> to vector<4x4x8xbf16>
    %841 = vector.extract_strided_slice %820 {offsets = [0, 0], sizes = [4, 8], strides = [1, 1]} : vector<4x32xf32> to vector<4x8xf32>
    %842 = vector.extract_strided_slice %820 {offsets = [0, 8], sizes = [4, 8], strides = [1, 1]} : vector<4x32xf32> to vector<4x8xf32>
    %843 = vector.extract_strided_slice %820 {offsets = [0, 16], sizes = [4, 8], strides = [1, 1]} : vector<4x32xf32> to vector<4x8xf32>
    %844 = vector.extract_strided_slice %820 {offsets = [0, 24], sizes = [4, 8], strides = [1, 1]} : vector<4x32xf32> to vector<4x8xf32>
    %845 = vector.shape_cast %841 : vector<4x8xf32> to vector<1x4x8xf32>
    %846 = vector.shape_cast %842 : vector<4x8xf32> to vector<1x4x8xf32>
    %847 = vector.shape_cast %843 : vector<4x8xf32> to vector<1x4x8xf32>
    %848 = vector.shape_cast %844 : vector<4x8xf32> to vector<1x4x8xf32>
    %849 = tpu.concatenate %845, %846, %847, %848 in 0 : vector<1x4x8xf32>, vector<1x4x8xf32>, vector<1x4x8xf32>, vector<1x4x8xf32> -> vector<4x4x8xf32>
    %850 = arith.truncf %849 : vector<4x4x8xf32> to vector<4x4x8xbf16>
    %cst_221 = arith.constant dense<0.000000e+00> : vector<4x4x4xf32>
    %851 = tpu.matmul %830, %840, %cst_221 {dimension_numbers = #tpu.dot_dimension_numbers<[2], [2], [1], [1], [0, 0, 0, 1, 1, 1], [0], [0]>} : vector<4x4x8xbf16>, vector<4x4x8xbf16>, vector<4x4x4xf32> -> vector<4x4x4xf32>
    %cst_222 = arith.constant dense<0xFF800000> : vector<4x4xf32>
    %852 = vector.multi_reduction <maximumf>, %851, %cst_222 [2] : vector<4x4x4xf32> to vector<4x4xf32>
    %853 = vector.shape_cast %852 : vector<4x4xf32> to vector<4x4x1xf32>
    %854 = vector.broadcast %853 : vector<4x4x1xf32> to vector<4x4x4xf32>
    %855 = arith.subf %851, %854 : vector<4x4x4xf32>
    %856 = math.exp %855 : vector<4x4x4xf32>
    %cst_223 = arith.constant dense<0.000000e+00> : vector<4x4xf32>
    %857 = vector.multi_reduction <add>, %856, %cst_223 [2] : vector<4x4x4xf32> to vector<4x4xf32>
    %858 = vector.shape_cast %857 : vector<4x4xf32> to vector<4x4x1xf32>
    %859 = tpu.reciprocal %858 {approx = true} : vector<4x4x1xf32> -> vector<4x4x1xf32>
    %860 = vector.broadcast %859 : vector<4x4x1xf32> to vector<4x4x4xf32>
    %861 = arith.mulf %856, %860 : vector<4x4x4xf32>
    %862 = arith.truncf %861 : vector<4x4x4xf32> to vector<4x4x4xbf16>
    %cst_224 = arith.constant dense<0.000000e+00> : vector<4x4x8xf32>
    %863 = tpu.matmul %862, %850, %cst_224 {dimension_numbers = #tpu.dot_dimension_numbers<[2], [1], [1], [2], [0, 0, 0, 1, 1, 2], [0], [0]>} : vector<4x4x4xbf16>, vector<4x4x8xbf16>, vector<4x4x8xf32> -> vector<4x4x8xf32>
    %864 = arith.truncf %863 : vector<4x4x8xf32> to vector<4x4x8xbf16>
    %cst_225 = arith.constant dense<0.000000e+00> : vector<4x4x32xf32>
    %865 = tpu.matmul %864, %19, %cst_225 {dimension_numbers = #tpu.dot_dimension_numbers<[2], [1], [1], [2], [0, 0, 0, 1, 1, 2], [0], [0]>} : vector<4x4x8xbf16>, vector<4x8x32xbf16>, vector<4x4x32xf32> -> vector<4x4x32xf32>
    %cst_226 = arith.constant dense<0.000000e+00> : vector<4x32xf32>
    %866 = vector.multi_reduction <add>, %865, %cst_226 [0] : vector<4x4x32xf32> to vector<4x32xf32>
    %867 = vector.extract_strided_slice %815 {offsets = [4, 0], sizes = [4, 32], strides = [1, 1]} : vector<8x32xf32> to vector<4x32xf32>
    %868 = vector.extract_strided_slice %816 {offsets = [4, 0], sizes = [4, 32], strides = [1, 1]} : vector<8x32xf32> to vector<4x32xf32>
    %869 = vector.extract_strided_slice %817 {offsets = [4, 0], sizes = [4, 32], strides = [1, 1]} : vector<8x32xf32> to vector<4x32xf32>
    %870 = vector.extract_strided_slice %867 {offsets = [0, 0], sizes = [4, 8], strides = [1, 1]} : vector<4x32xf32> to vector<4x8xf32>
    %871 = vector.extract_strided_slice %867 {offsets = [0, 8], sizes = [4, 8], strides = [1, 1]} : vector<4x32xf32> to vector<4x8xf32>
    %872 = vector.extract_strided_slice %867 {offsets = [0, 16], sizes = [4, 8], strides = [1, 1]} : vector<4x32xf32> to vector<4x8xf32>
    %873 = vector.extract_strided_slice %867 {offsets = [0, 24], sizes = [4, 8], strides = [1, 1]} : vector<4x32xf32> to vector<4x8xf32>
    %874 = vector.shape_cast %870 : vector<4x8xf32> to vector<1x4x8xf32>
    %875 = vector.shape_cast %871 : vector<4x8xf32> to vector<1x4x8xf32>
    %876 = vector.shape_cast %872 : vector<4x8xf32> to vector<1x4x8xf32>
    %877 = vector.shape_cast %873 : vector<4x8xf32> to vector<1x4x8xf32>
    %878 = tpu.concatenate %874, %875, %876, %877 in 0 : vector<1x4x8xf32>, vector<1x4x8xf32>, vector<1x4x8xf32>, vector<1x4x8xf32> -> vector<4x4x8xf32>
    %879 = arith.truncf %878 : vector<4x4x8xf32> to vector<4x4x8xbf16>
    %880 = vector.extract_strided_slice %868 {offsets = [0, 0], sizes = [4, 8], strides = [1, 1]} : vector<4x32xf32> to vector<4x8xf32>
    %881 = vector.extract_strided_slice %868 {offsets = [0, 8], sizes = [4, 8], strides = [1, 1]} : vector<4x32xf32> to vector<4x8xf32>
    %882 = vector.extract_strided_slice %868 {offsets = [0, 16], sizes = [4, 8], strides = [1, 1]} : vector<4x32xf32> to vector<4x8xf32>
    %883 = vector.extract_strided_slice %868 {offsets = [0, 24], sizes = [4, 8], strides = [1, 1]} : vector<4x32xf32> to vector<4x8xf32>
    %884 = vector.shape_cast %880 : vector<4x8xf32> to vector<1x4x8xf32>
    %885 = vector.shape_cast %881 : vector<4x8xf32> to vector<1x4x8xf32>
    %886 = vector.shape_cast %882 : vector<4x8xf32> to vector<1x4x8xf32>
    %887 = vector.shape_cast %883 : vector<4x8xf32> to vector<1x4x8xf32>
    %888 = tpu.concatenate %884, %885, %886, %887 in 0 : vector<1x4x8xf32>, vector<1x4x8xf32>, vector<1x4x8xf32>, vector<1x4x8xf32> -> vector<4x4x8xf32>
    %889 = arith.truncf %888 : vector<4x4x8xf32> to vector<4x4x8xbf16>
    %890 = vector.extract_strided_slice %869 {offsets = [0, 0], sizes = [4, 8], strides = [1, 1]} : vector<4x32xf32> to vector<4x8xf32>
    %891 = vector.extract_strided_slice %869 {offsets = [0, 8], sizes = [4, 8], strides = [1, 1]} : vector<4x32xf32> to vector<4x8xf32>
    %892 = vector.extract_strided_slice %869 {offsets = [0, 16], sizes = [4, 8], strides = [1, 1]} : vector<4x32xf32> to vector<4x8xf32>
    %893 = vector.extract_strided_slice %869 {offsets = [0, 24], sizes = [4, 8], strides = [1, 1]} : vector<4x32xf32> to vector<4x8xf32>
    %894 = vector.shape_cast %890 : vector<4x8xf32> to vector<1x4x8xf32>
    %895 = vector.shape_cast %891 : vector<4x8xf32> to vector<1x4x8xf32>
    %896 = vector.shape_cast %892 : vector<4x8xf32> to vector<1x4x8xf32>
    %897 = vector.shape_cast %893 : vector<4x8xf32> to vector<1x4x8xf32>
    %898 = tpu.concatenate %894, %895, %896, %897 in 0 : vector<1x4x8xf32>, vector<1x4x8xf32>, vector<1x4x8xf32>, vector<1x4x8xf32> -> vector<4x4x8xf32>
    %899 = arith.truncf %898 : vector<4x4x8xf32> to vector<4x4x8xbf16>
    %cst_227 = arith.constant dense<0.000000e+00> : vector<4x4x4xf32>
    %900 = tpu.matmul %879, %889, %cst_227 {dimension_numbers = #tpu.dot_dimension_numbers<[2], [2], [1], [1], [0, 0, 0, 1, 1, 1], [0], [0]>} : vector<4x4x8xbf16>, vector<4x4x8xbf16>, vector<4x4x4xf32> -> vector<4x4x4xf32>
    %cst_228 = arith.constant dense<0xFF800000> : vector<4x4xf32>
    %901 = vector.multi_reduction <maximumf>, %900, %cst_228 [2] : vector<4x4x4xf32> to vector<4x4xf32>
    %902 = vector.shape_cast %901 : vector<4x4xf32> to vector<4x4x1xf32>
    %903 = vector.broadcast %902 : vector<4x4x1xf32> to vector<4x4x4xf32>
    %904 = arith.subf %900, %903 : vector<4x4x4xf32>
    %905 = math.exp %904 : vector<4x4x4xf32>
    %cst_229 = arith.constant dense<0.000000e+00> : vector<4x4xf32>
    %906 = vector.multi_reduction <add>, %905, %cst_229 [2] : vector<4x4x4xf32> to vector<4x4xf32>
    %907 = vector.shape_cast %906 : vector<4x4xf32> to vector<4x4x1xf32>
    %908 = tpu.reciprocal %907 {approx = true} : vector<4x4x1xf32> -> vector<4x4x1xf32>
    %909 = vector.broadcast %908 : vector<4x4x1xf32> to vector<4x4x4xf32>
    %910 = arith.mulf %905, %909 : vector<4x4x4xf32>
    %911 = arith.truncf %910 : vector<4x4x4xf32> to vector<4x4x4xbf16>
    %cst_230 = arith.constant dense<0.000000e+00> : vector<4x4x8xf32>
    %912 = tpu.matmul %911, %899, %cst_230 {dimension_numbers = #tpu.dot_dimension_numbers<[2], [1], [1], [2], [0, 0, 0, 1, 1, 2], [0], [0]>} : vector<4x4x4xbf16>, vector<4x4x8xbf16>, vector<4x4x8xf32> -> vector<4x4x8xf32>
    %913 = arith.truncf %912 : vector<4x4x8xf32> to vector<4x4x8xbf16>
    %cst_231 = arith.constant dense<0.000000e+00> : vector<4x4x32xf32>
    %914 = tpu.matmul %913, %19, %cst_231 {dimension_numbers = #tpu.dot_dimension_numbers<[2], [1], [1], [2], [0, 0, 0, 1, 1, 2], [0], [0]>} : vector<4x4x8xbf16>, vector<4x8x32xbf16>, vector<4x4x32xf32> -> vector<4x4x32xf32>
    %cst_232 = arith.constant dense<0.000000e+00> : vector<4x32xf32>
    %915 = vector.multi_reduction <add>, %914, %cst_232 [0] : vector<4x4x32xf32> to vector<4x32xf32>
    %916 = tpu.concatenate %866, %915 in 0 : vector<4x32xf32>, vector<4x32xf32> -> vector<8x32xf32>
    %917 = arith.addf %786, %916 : vector<8x32xf32>
    %918 = vector.broadcast %20 : vector<1x32xf32> to vector<8x32xf32>
    %919 = arith.addf %917, %918 : vector<8x32xf32>
    %cst_233 = arith.constant dense<0.000000e+00> : vector<8xf32>
    %920 = vector.multi_reduction <add>, %919, %cst_233 [1] : vector<8x32xf32> to vector<8xf32>
    %921 = vector.shape_cast %920 : vector<8xf32> to vector<8x1xf32>
    %cst_234 = arith.constant 3.200000e+01 : f32
    %922 = vector.broadcast %cst_234 : f32 to vector<8x1xf32>
    %923 = arith.divf %921, %922 : vector<8x1xf32>
    %924 = vector.broadcast %923 : vector<8x1xf32> to vector<8x32xf32>
    %925 = arith.subf %919, %924 : vector<8x32xf32>
    %926 = arith.mulf %925, %925 : vector<8x32xf32>
    %cst_235 = arith.constant dense<0.000000e+00> : vector<8xf32>
    %927 = vector.multi_reduction <add>, %926, %cst_235 [1] : vector<8x32xf32> to vector<8xf32>
    %928 = vector.shape_cast %927 : vector<8xf32> to vector<8x1xf32>
    %cst_236 = arith.constant 3.200000e+01 : f32
    %929 = vector.broadcast %cst_236 : f32 to vector<8x1xf32>
    %930 = arith.divf %928, %929 : vector<8x1xf32>
    %931 = vector.broadcast %923 : vector<8x1xf32> to vector<8x32xf32>
    %932 = arith.subf %919, %931 : vector<8x32xf32>
    %cst_237 = arith.constant 9.99999974E-6 : f32
    %933 = vector.broadcast %cst_237 : f32 to vector<8x1xf32>
    %934 = arith.addf %930, %933 : vector<8x1xf32>
    %935 = math.rsqrt %934 : vector<8x1xf32>
    %936 = vector.broadcast %935 : vector<8x1xf32> to vector<8x32xf32>
    %937 = arith.mulf %932, %936 : vector<8x32xf32>
    %938 = vector.broadcast %45 : vector<1x32xf32> to vector<8x32xf32>
    %939 = arith.mulf %937, %938 : vector<8x32xf32>
    %940 = vector.broadcast %46 : vector<1x32xf32> to vector<8x32xf32>
    %941 = arith.addf %939, %940 : vector<8x32xf32>
    %942 = arith.truncf %941 : vector<8x32xf32> to vector<8x32xbf16>
    %cst_238 = arith.constant dense<0.000000e+00> : vector<8x32xf32>
    %943 = tpu.matmul %942, %21, %cst_238 {dimension_numbers = #tpu.dot_dimension_numbers<[1], [0], [0], [1], [0, 0, 1, 1], [], []>} : vector<8x32xbf16>, vector<32x32xbf16>, vector<8x32xf32> -> vector<8x32xf32>
    %944 = vector.broadcast %22 : vector<1x32xf32> to vector<8x32xf32>
    %945 = arith.addf %943, %944 : vector<8x32xf32>
    %cst_239 = arith.constant 0.353553385 : f32
    %946 = vector.broadcast %cst_239 : f32 to vector<8x32xf32>
    %947 = arith.mulf %945, %946 : vector<8x32xf32>
    %948 = vector.extract_strided_slice %947 {offsets = [0, 0], sizes = [4, 32], strides = [1, 1]} : vector<8x32xf32> to vector<4x32xf32>
    %949 = vector.extract_strided_slice %117 {offsets = [0, 0], sizes = [5, 32], strides = [1, 1]} : vector<10x32xf32> to vector<5x32xf32>
    %950 = vector.extract_strided_slice %118 {offsets = [0, 0], sizes = [5, 32], strides = [1, 1]} : vector<10x32xf32> to vector<5x32xf32>
    %951 = vector.extract_strided_slice %948 {offsets = [0, 0], sizes = [4, 8], strides = [1, 1]} : vector<4x32xf32> to vector<4x8xf32>
    %952 = vector.extract_strided_slice %948 {offsets = [0, 8], sizes = [4, 8], strides = [1, 1]} : vector<4x32xf32> to vector<4x8xf32>
    %953 = vector.extract_strided_slice %948 {offsets = [0, 16], sizes = [4, 8], strides = [1, 1]} : vector<4x32xf32> to vector<4x8xf32>
    %954 = vector.extract_strided_slice %948 {offsets = [0, 24], sizes = [4, 8], strides = [1, 1]} : vector<4x32xf32> to vector<4x8xf32>
    %955 = vector.shape_cast %951 : vector<4x8xf32> to vector<1x4x8xf32>
    %956 = vector.shape_cast %952 : vector<4x8xf32> to vector<1x4x8xf32>
    %957 = vector.shape_cast %953 : vector<4x8xf32> to vector<1x4x8xf32>
    %958 = vector.shape_cast %954 : vector<4x8xf32> to vector<1x4x8xf32>
    %959 = tpu.concatenate %955, %956, %957, %958 in 0 : vector<1x4x8xf32>, vector<1x4x8xf32>, vector<1x4x8xf32>, vector<1x4x8xf32> -> vector<4x4x8xf32>
    %960 = arith.truncf %959 : vector<4x4x8xf32> to vector<4x4x8xbf16>
    %961 = vector.extract_strided_slice %949 {offsets = [0, 0], sizes = [5, 8], strides = [1, 1]} : vector<5x32xf32> to vector<5x8xf32>
    %962 = vector.extract_strided_slice %949 {offsets = [0, 8], sizes = [5, 8], strides = [1, 1]} : vector<5x32xf32> to vector<5x8xf32>
    %963 = vector.extract_strided_slice %949 {offsets = [0, 16], sizes = [5, 8], strides = [1, 1]} : vector<5x32xf32> to vector<5x8xf32>
    %964 = vector.extract_strided_slice %949 {offsets = [0, 24], sizes = [5, 8], strides = [1, 1]} : vector<5x32xf32> to vector<5x8xf32>
    %965 = vector.shape_cast %961 : vector<5x8xf32> to vector<1x5x8xf32>
    %966 = vector.shape_cast %962 : vector<5x8xf32> to vector<1x5x8xf32>
    %967 = vector.shape_cast %963 : vector<5x8xf32> to vector<1x5x8xf32>
    %968 = vector.shape_cast %964 : vector<5x8xf32> to vector<1x5x8xf32>
    %969 = tpu.concatenate %965, %966, %967, %968 in 0 : vector<1x5x8xf32>, vector<1x5x8xf32>, vector<1x5x8xf32>, vector<1x5x8xf32> -> vector<4x5x8xf32>
    %970 = arith.truncf %969 : vector<4x5x8xf32> to vector<4x5x8xbf16>
    %971 = vector.extract_strided_slice %950 {offsets = [0, 0], sizes = [5, 8], strides = [1, 1]} : vector<5x32xf32> to vector<5x8xf32>
    %972 = vector.extract_strided_slice %950 {offsets = [0, 8], sizes = [5, 8], strides = [1, 1]} : vector<5x32xf32> to vector<5x8xf32>
    %973 = vector.extract_strided_slice %950 {offsets = [0, 16], sizes = [5, 8], strides = [1, 1]} : vector<5x32xf32> to vector<5x8xf32>
    %974 = vector.extract_strided_slice %950 {offsets = [0, 24], sizes = [5, 8], strides = [1, 1]} : vector<5x32xf32> to vector<5x8xf32>
    %975 = vector.shape_cast %971 : vector<5x8xf32> to vector<1x5x8xf32>
    %976 = vector.shape_cast %972 : vector<5x8xf32> to vector<1x5x8xf32>
    %977 = vector.shape_cast %973 : vector<5x8xf32> to vector<1x5x8xf32>
    %978 = vector.shape_cast %974 : vector<5x8xf32> to vector<1x5x8xf32>
    %979 = tpu.concatenate %975, %976, %977, %978 in 0 : vector<1x5x8xf32>, vector<1x5x8xf32>, vector<1x5x8xf32>, vector<1x5x8xf32> -> vector<4x5x8xf32>
    %980 = arith.truncf %979 : vector<4x5x8xf32> to vector<4x5x8xbf16>
    %cst_240 = arith.constant dense<0.000000e+00> : vector<4x4x5xf32>
    %981 = tpu.matmul %960, %970, %cst_240 {dimension_numbers = #tpu.dot_dimension_numbers<[2], [2], [1], [1], [0, 0, 0, 1, 1, 1], [0], [0]>} : vector<4x4x8xbf16>, vector<4x5x8xbf16>, vector<4x4x5xf32> -> vector<4x4x5xf32>
    %cst_241 = arith.constant dense<0xFF800000> : vector<4x4xf32>
    %982 = vector.multi_reduction <maximumf>, %981, %cst_241 [2] : vector<4x4x5xf32> to vector<4x4xf32>
    %983 = vector.shape_cast %982 : vector<4x4xf32> to vector<4x4x1xf32>
    %984 = vector.broadcast %983 : vector<4x4x1xf32> to vector<4x4x5xf32>
    %985 = arith.subf %981, %984 : vector<4x4x5xf32>
    %986 = math.exp %985 : vector<4x4x5xf32>
    %cst_242 = arith.constant dense<0.000000e+00> : vector<4x4xf32>
    %987 = vector.multi_reduction <add>, %986, %cst_242 [2] : vector<4x4x5xf32> to vector<4x4xf32>
    %988 = vector.shape_cast %987 : vector<4x4xf32> to vector<4x4x1xf32>
    %989 = tpu.reciprocal %988 {approx = true} : vector<4x4x1xf32> -> vector<4x4x1xf32>
    %990 = vector.broadcast %989 : vector<4x4x1xf32> to vector<4x4x5xf32>
    %991 = arith.mulf %986, %990 : vector<4x4x5xf32>
    %992 = arith.truncf %991 : vector<4x4x5xf32> to vector<4x4x5xbf16>
    %cst_243 = arith.constant dense<0.000000e+00> : vector<4x4x8xf32>
    %993 = tpu.matmul %992, %980, %cst_243 {dimension_numbers = #tpu.dot_dimension_numbers<[2], [1], [1], [2], [0, 0, 0, 1, 1, 2], [0], [0]>} : vector<4x4x5xbf16>, vector<4x5x8xbf16>, vector<4x4x8xf32> -> vector<4x4x8xf32>
    %994 = arith.truncf %993 : vector<4x4x8xf32> to vector<4x4x8xbf16>
    %cst_244 = arith.constant dense<0.000000e+00> : vector<4x4x32xf32>
    %995 = tpu.matmul %994, %35, %cst_244 {dimension_numbers = #tpu.dot_dimension_numbers<[2], [1], [1], [2], [0, 0, 0, 1, 1, 2], [0], [0]>} : vector<4x4x8xbf16>, vector<4x8x32xbf16>, vector<4x4x32xf32> -> vector<4x4x32xf32>
    %cst_245 = arith.constant dense<0.000000e+00> : vector<4x32xf32>
    %996 = vector.multi_reduction <add>, %995, %cst_245 [0] : vector<4x4x32xf32> to vector<4x32xf32>
    %997 = vector.extract_strided_slice %947 {offsets = [4, 0], sizes = [4, 32], strides = [1, 1]} : vector<8x32xf32> to vector<4x32xf32>
    %998 = vector.extract_strided_slice %117 {offsets = [5, 0], sizes = [5, 32], strides = [1, 1]} : vector<10x32xf32> to vector<5x32xf32>
    %999 = vector.extract_strided_slice %118 {offsets = [5, 0], sizes = [5, 32], strides = [1, 1]} : vector<10x32xf32> to vector<5x32xf32>
    %1000 = vector.extract_strided_slice %997 {offsets = [0, 0], sizes = [4, 8], strides = [1, 1]} : vector<4x32xf32> to vector<4x8xf32>
    %1001 = vector.extract_strided_slice %997 {offsets = [0, 8], sizes = [4, 8], strides = [1, 1]} : vector<4x32xf32> to vector<4x8xf32>
    %1002 = vector.extract_strided_slice %997 {offsets = [0, 16], sizes = [4, 8], strides = [1, 1]} : vector<4x32xf32> to vector<4x8xf32>
    %1003 = vector.extract_strided_slice %997 {offsets = [0, 24], sizes = [4, 8], strides = [1, 1]} : vector<4x32xf32> to vector<4x8xf32>
    %1004 = vector.shape_cast %1000 : vector<4x8xf32> to vector<1x4x8xf32>
    %1005 = vector.shape_cast %1001 : vector<4x8xf32> to vector<1x4x8xf32>
    %1006 = vector.shape_cast %1002 : vector<4x8xf32> to vector<1x4x8xf32>
    %1007 = vector.shape_cast %1003 : vector<4x8xf32> to vector<1x4x8xf32>
    %1008 = tpu.concatenate %1004, %1005, %1006, %1007 in 0 : vector<1x4x8xf32>, vector<1x4x8xf32>, vector<1x4x8xf32>, vector<1x4x8xf32> -> vector<4x4x8xf32>
    %1009 = arith.truncf %1008 : vector<4x4x8xf32> to vector<4x4x8xbf16>
    %1010 = vector.extract_strided_slice %998 {offsets = [0, 0], sizes = [5, 8], strides = [1, 1]} : vector<5x32xf32> to vector<5x8xf32>
    %1011 = vector.extract_strided_slice %998 {offsets = [0, 8], sizes = [5, 8], strides = [1, 1]} : vector<5x32xf32> to vector<5x8xf32>
    %1012 = vector.extract_strided_slice %998 {offsets = [0, 16], sizes = [5, 8], strides = [1, 1]} : vector<5x32xf32> to vector<5x8xf32>
    %1013 = vector.extract_strided_slice %998 {offsets = [0, 24], sizes = [5, 8], strides = [1, 1]} : vector<5x32xf32> to vector<5x8xf32>
    %1014 = vector.shape_cast %1010 : vector<5x8xf32> to vector<1x5x8xf32>
    %1015 = vector.shape_cast %1011 : vector<5x8xf32> to vector<1x5x8xf32>
    %1016 = vector.shape_cast %1012 : vector<5x8xf32> to vector<1x5x8xf32>
    %1017 = vector.shape_cast %1013 : vector<5x8xf32> to vector<1x5x8xf32>
    %1018 = tpu.concatenate %1014, %1015, %1016, %1017 in 0 : vector<1x5x8xf32>, vector<1x5x8xf32>, vector<1x5x8xf32>, vector<1x5x8xf32> -> vector<4x5x8xf32>
    %1019 = arith.truncf %1018 : vector<4x5x8xf32> to vector<4x5x8xbf16>
    %1020 = vector.extract_strided_slice %999 {offsets = [0, 0], sizes = [5, 8], strides = [1, 1]} : vector<5x32xf32> to vector<5x8xf32>
    %1021 = vector.extract_strided_slice %999 {offsets = [0, 8], sizes = [5, 8], strides = [1, 1]} : vector<5x32xf32> to vector<5x8xf32>
    %1022 = vector.extract_strided_slice %999 {offsets = [0, 16], sizes = [5, 8], strides = [1, 1]} : vector<5x32xf32> to vector<5x8xf32>
    %1023 = vector.extract_strided_slice %999 {offsets = [0, 24], sizes = [5, 8], strides = [1, 1]} : vector<5x32xf32> to vector<5x8xf32>
    %1024 = vector.shape_cast %1020 : vector<5x8xf32> to vector<1x5x8xf32>
    %1025 = vector.shape_cast %1021 : vector<5x8xf32> to vector<1x5x8xf32>
    %1026 = vector.shape_cast %1022 : vector<5x8xf32> to vector<1x5x8xf32>
    %1027 = vector.shape_cast %1023 : vector<5x8xf32> to vector<1x5x8xf32>
    %1028 = tpu.concatenate %1024, %1025, %1026, %1027 in 0 : vector<1x5x8xf32>, vector<1x5x8xf32>, vector<1x5x8xf32>, vector<1x5x8xf32> -> vector<4x5x8xf32>
    %1029 = arith.truncf %1028 : vector<4x5x8xf32> to vector<4x5x8xbf16>
    %cst_246 = arith.constant dense<0.000000e+00> : vector<4x4x5xf32>
    %1030 = tpu.matmul %1009, %1019, %cst_246 {dimension_numbers = #tpu.dot_dimension_numbers<[2], [2], [1], [1], [0, 0, 0, 1, 1, 1], [0], [0]>} : vector<4x4x8xbf16>, vector<4x5x8xbf16>, vector<4x4x5xf32> -> vector<4x4x5xf32>
    %cst_247 = arith.constant dense<0xFF800000> : vector<4x4xf32>
    %1031 = vector.multi_reduction <maximumf>, %1030, %cst_247 [2] : vector<4x4x5xf32> to vector<4x4xf32>
    %1032 = vector.shape_cast %1031 : vector<4x4xf32> to vector<4x4x1xf32>
    %1033 = vector.broadcast %1032 : vector<4x4x1xf32> to vector<4x4x5xf32>
    %1034 = arith.subf %1030, %1033 : vector<4x4x5xf32>
    %1035 = math.exp %1034 : vector<4x4x5xf32>
    %cst_248 = arith.constant dense<0.000000e+00> : vector<4x4xf32>
    %1036 = vector.multi_reduction <add>, %1035, %cst_248 [2] : vector<4x4x5xf32> to vector<4x4xf32>
    %1037 = vector.shape_cast %1036 : vector<4x4xf32> to vector<4x4x1xf32>
    %1038 = tpu.reciprocal %1037 {approx = true} : vector<4x4x1xf32> -> vector<4x4x1xf32>
    %1039 = vector.broadcast %1038 : vector<4x4x1xf32> to vector<4x4x5xf32>
    %1040 = arith.mulf %1035, %1039 : vector<4x4x5xf32>
    %1041 = arith.truncf %1040 : vector<4x4x5xf32> to vector<4x4x5xbf16>
    %cst_249 = arith.constant dense<0.000000e+00> : vector<4x4x8xf32>
    %1042 = tpu.matmul %1041, %1029, %cst_249 {dimension_numbers = #tpu.dot_dimension_numbers<[2], [1], [1], [2], [0, 0, 0, 1, 1, 2], [0], [0]>} : vector<4x4x5xbf16>, vector<4x5x8xbf16>, vector<4x4x8xf32> -> vector<4x4x8xf32>
    %1043 = arith.truncf %1042 : vector<4x4x8xf32> to vector<4x4x8xbf16>
    %cst_250 = arith.constant dense<0.000000e+00> : vector<4x4x32xf32>
    %1044 = tpu.matmul %1043, %35, %cst_250 {dimension_numbers = #tpu.dot_dimension_numbers<[2], [1], [1], [2], [0, 0, 0, 1, 1, 2], [0], [0]>} : vector<4x4x8xbf16>, vector<4x8x32xbf16>, vector<4x4x32xf32> -> vector<4x4x32xf32>
    %cst_251 = arith.constant dense<0.000000e+00> : vector<4x32xf32>
    %1045 = vector.multi_reduction <add>, %1044, %cst_251 [0] : vector<4x4x32xf32> to vector<4x32xf32>
    %1046 = tpu.concatenate %996, %1045 in 0 : vector<4x32xf32>, vector<4x32xf32> -> vector<8x32xf32>
    %1047 = arith.addf %919, %1046 : vector<8x32xf32>
    %1048 = vector.broadcast %36 : vector<1x32xf32> to vector<8x32xf32>
    %1049 = arith.addf %1047, %1048 : vector<8x32xf32>
    %cst_252 = arith.constant dense<0.000000e+00> : vector<8xf32>
    %1050 = vector.multi_reduction <add>, %1049, %cst_252 [1] : vector<8x32xf32> to vector<8xf32>
    %1051 = vector.shape_cast %1050 : vector<8xf32> to vector<8x1xf32>
    %cst_253 = arith.constant 3.200000e+01 : f32
    %1052 = vector.broadcast %cst_253 : f32 to vector<8x1xf32>
    %1053 = arith.divf %1051, %1052 : vector<8x1xf32>
    %1054 = vector.broadcast %1053 : vector<8x1xf32> to vector<8x32xf32>
    %1055 = arith.subf %1049, %1054 : vector<8x32xf32>
    %1056 = arith.mulf %1055, %1055 : vector<8x32xf32>
    %cst_254 = arith.constant dense<0.000000e+00> : vector<8xf32>
    %1057 = vector.multi_reduction <add>, %1056, %cst_254 [1] : vector<8x32xf32> to vector<8xf32>
    %1058 = vector.shape_cast %1057 : vector<8xf32> to vector<8x1xf32>
    %cst_255 = arith.constant 3.200000e+01 : f32
    %1059 = vector.broadcast %cst_255 : f32 to vector<8x1xf32>
    %1060 = arith.divf %1058, %1059 : vector<8x1xf32>
    %1061 = vector.broadcast %1053 : vector<8x1xf32> to vector<8x32xf32>
    %1062 = arith.subf %1049, %1061 : vector<8x32xf32>
    %cst_256 = arith.constant 9.99999974E-6 : f32
    %1063 = vector.broadcast %cst_256 : f32 to vector<8x1xf32>
    %1064 = arith.addf %1060, %1063 : vector<8x1xf32>
    %1065 = math.rsqrt %1064 : vector<8x1xf32>
    %1066 = vector.broadcast %1065 : vector<8x1xf32> to vector<8x32xf32>
    %1067 = arith.mulf %1062, %1066 : vector<8x32xf32>
    %1068 = vector.broadcast %47 : vector<1x32xf32> to vector<8x32xf32>
    %1069 = arith.mulf %1067, %1068 : vector<8x32xf32>
    %1070 = vector.broadcast %48 : vector<1x32xf32> to vector<8x32xf32>
    %1071 = arith.addf %1069, %1070 : vector<8x32xf32>
    %1072 = arith.truncf %1071 : vector<8x32xf32> to vector<8x32xbf16>
    %cst_257 = arith.constant dense<0.000000e+00> : vector<8x64xf32>
    %1073 = tpu.matmul %1072, %38, %cst_257 {dimension_numbers = #tpu.dot_dimension_numbers<[1], [0], [0], [1], [0, 0, 1, 1], [], []>} : vector<8x32xbf16>, vector<32x64xbf16>, vector<8x64xf32> -> vector<8x64xf32>
    %1074 = vector.broadcast %39 : vector<1x64xf32> to vector<8x64xf32>
    %1075 = arith.addf %1073, %1074 : vector<8x64xf32>
    %cst_258 = arith.constant 0.000000e+00 : f32
    %1076 = vector.broadcast %cst_258 : f32 to vector<8x64xf32>
    %1077 = arith.maximumf %1075, %1076 : vector<8x64xf32>
    %1078 = arith.truncf %1077 : vector<8x64xf32> to vector<8x64xbf16>
    %cst_259 = arith.constant dense<0.000000e+00> : vector<8x32xf32>
    %1079 = tpu.matmul %1078, %41, %cst_259 {dimension_numbers = #tpu.dot_dimension_numbers<[1], [0], [0], [1], [0, 0, 1, 1], [], []>} : vector<8x64xbf16>, vector<64x32xbf16>, vector<8x32xf32> -> vector<8x32xf32>
    %1080 = arith.addf %1049, %1079 : vector<8x32xf32>
    %1081 = vector.broadcast %42 : vector<1x32xf32> to vector<8x32xf32>
    %1082 = arith.addf %1080, %1081 : vector<8x32xf32>
    %cst_260 = arith.constant dense<0.000000e+00> : vector<8xf32>
    %1083 = vector.multi_reduction <add>, %1082, %cst_260 [1] : vector<8x32xf32> to vector<8xf32>
    %1084 = vector.shape_cast %1083 : vector<8xf32> to vector<8x1xf32>
    %cst_261 = arith.constant 3.200000e+01 : f32
    %1085 = vector.broadcast %cst_261 : f32 to vector<8x1xf32>
    %1086 = arith.divf %1084, %1085 : vector<8x1xf32>
    %1087 = vector.broadcast %1086 : vector<8x1xf32> to vector<8x32xf32>
    %1088 = arith.subf %1082, %1087 : vector<8x32xf32>
    %1089 = arith.mulf %1088, %1088 : vector<8x32xf32>
    %cst_262 = arith.constant dense<0.000000e+00> : vector<8xf32>
    %1090 = vector.multi_reduction <add>, %1089, %cst_262 [1] : vector<8x32xf32> to vector<8xf32>
    %1091 = vector.shape_cast %1090 : vector<8xf32> to vector<8x1xf32>
    %cst_263 = arith.constant 3.200000e+01 : f32
    %1092 = vector.broadcast %cst_263 : f32 to vector<8x1xf32>
    %1093 = arith.divf %1091, %1092 : vector<8x1xf32>
    %1094 = vector.broadcast %1086 : vector<8x1xf32> to vector<8x32xf32>
    %1095 = arith.subf %1082, %1094 : vector<8x32xf32>
    %cst_264 = arith.constant 9.99999974E-6 : f32
    %1096 = vector.broadcast %cst_264 : f32 to vector<8x1xf32>
    %1097 = arith.addf %1093, %1096 : vector<8x1xf32>
    %1098 = math.rsqrt %1097 : vector<8x1xf32>
    %1099 = vector.broadcast %1098 : vector<8x1xf32> to vector<8x32xf32>
    %1100 = arith.mulf %1095, %1099 : vector<8x32xf32>
    %1101 = vector.broadcast %49 : vector<1x32xf32> to vector<8x32xf32>
    %1102 = arith.mulf %1100, %1101 : vector<8x32xf32>
    %1103 = vector.broadcast %50 : vector<1x32xf32> to vector<8x32xf32>
    %1104 = arith.addf %1102, %1103 : vector<8x32xf32>
    %c32 = arith.constant 32 : index
    %c0_265 = arith.constant 0 : index
    %1105 = vector.load %arg13[%c32, %c0_265] : memref<48x32xf32, #tpu.memory_space<vmem>>, vector<8x32xf32>
    tpu.vector_store %arg13[%c32, %c0_265], %1104 {strides = array<i32>} : memref<48x32xf32, #tpu.memory_space<vmem>>, vector<8x32xf32>,
    %c0_266 = arith.constant 0 : index
    %c0_267 = arith.constant 0 : index
    %c0_268 = arith.constant 0 : index
    %1106 = vector.load %arg4[%c0_266, %c0_267, %c0_268] : memref<2x3x32xf32, #tpu.memory_space<vmem>>, vector<1x3x32xf32>
    %1107 = vector.shape_cast %1106 : vector<1x3x32xf32> to vector<3x32xf32>
    %c1_269 = arith.constant 1 : index
    %c0_270 = arith.constant 0 : index
    %c0_271 = arith.constant 0 : index
    %1108 = vector.load %arg4[%c1_269, %c0_270, %c0_271] : memref<2x3x32xf32, #tpu.memory_space<vmem>>, vector<1x3x32xf32>
    %1109 = vector.shape_cast %1108 : vector<1x3x32xf32> to vector<3x32xf32>
    %1110 = tpu.concatenate %1107, %1109 in 0 : vector<3x32xf32>, vector<3x32xf32> -> vector<6x32xf32>
    %cst_272 = arith.constant dense<0.000000e+00> : vector<6xf32>
    %1111 = vector.multi_reduction <add>, %1110, %cst_272 [1] : vector<6x32xf32> to vector<6xf32>
    %1112 = vector.shape_cast %1111 : vector<6xf32> to vector<6x1xf32>
    %cst_273 = arith.constant 3.200000e+01 : f32
    %1113 = vector.broadcast %cst_273 : f32 to vector<6x1xf32>
    %1114 = arith.divf %1112, %1113 : vector<6x1xf32>
    %1115 = vector.broadcast %1114 : vector<6x1xf32> to vector<6x32xf32>
    %1116 = arith.subf %1110, %1115 : vector<6x32xf32>
    %1117 = arith.mulf %1116, %1116 : vector<6x32xf32>
    %cst_274 = arith.constant dense<0.000000e+00> : vector<6xf32>
    %1118 = vector.multi_reduction <add>, %1117, %cst_274 [1] : vector<6x32xf32> to vector<6xf32>
    %1119 = vector.shape_cast %1118 : vector<6xf32> to vector<6x1xf32>
    %cst_275 = arith.constant 3.200000e+01 : f32
    %1120 = vector.broadcast %cst_275 : f32 to vector<6x1xf32>
    %1121 = arith.divf %1119, %1120 : vector<6x1xf32>
    %1122 = vector.broadcast %1114 : vector<6x1xf32> to vector<6x32xf32>
    %1123 = arith.subf %1110, %1122 : vector<6x32xf32>
    %cst_276 = arith.constant 9.99999974E-6 : f32
    %1124 = vector.broadcast %cst_276 : f32 to vector<6x1xf32>
    %1125 = arith.addf %1121, %1124 : vector<6x1xf32>
    %1126 = math.rsqrt %1125 : vector<6x1xf32>
    %1127 = vector.broadcast %1126 : vector<6x1xf32> to vector<6x32xf32>
    %1128 = arith.mulf %1123, %1127 : vector<6x32xf32>
    %1129 = vector.broadcast %94 : vector<1x32xf32> to vector<6x32xf32>
    %1130 = arith.mulf %1128, %1129 : vector<6x32xf32>
    %1131 = vector.broadcast %95 : vector<1x32xf32> to vector<6x32xf32>
    %1132 = arith.addf %1130, %1131 : vector<6x32xf32>
    %1133 = arith.truncf %1132 : vector<6x32xf32> to vector<6x32xbf16>
    %cst_277 = arith.constant dense<0.000000e+00> : vector<6x96xf32>
    %1134 = tpu.matmul %1133, %58, %cst_277 {dimension_numbers = #tpu.dot_dimension_numbers<[1], [0], [0], [1], [0, 0, 1, 1], [], []>} : vector<6x32xbf16>, vector<32x96xbf16>, vector<6x96xf32> -> vector<6x96xf32>
    %1135 = vector.broadcast %59 : vector<1x96xf32> to vector<6x96xf32>
    %1136 = arith.addf %1134, %1135 : vector<6x96xf32>
    %1137 = vector.extract_strided_slice %1136 {offsets = [0, 0], sizes = [6, 32], strides = [1, 1]} : vector<6x96xf32> to vector<6x32xf32>
    %cst_278 = arith.constant 0.353553385 : f32
    %1138 = vector.broadcast %cst_278 : f32 to vector<6x32xf32>
    %1139 = arith.mulf %1137, %1138 : vector<6x32xf32>
    %1140 = vector.extract_strided_slice %1136 {offsets = [0, 32], sizes = [6, 32], strides = [1, 1]} : vector<6x96xf32> to vector<6x32xf32>
    %1141 = vector.extract_strided_slice %1136 {offsets = [0, 64], sizes = [6, 32], strides = [1, 1]} : vector<6x96xf32> to vector<6x32xf32>
    %1142 = vector.extract_strided_slice %1139 {offsets = [0, 0], sizes = [3, 32], strides = [1, 1]} : vector<6x32xf32> to vector<3x32xf32>
    %1143 = vector.extract_strided_slice %1140 {offsets = [0, 0], sizes = [3, 32], strides = [1, 1]} : vector<6x32xf32> to vector<3x32xf32>
    %1144 = vector.extract_strided_slice %1141 {offsets = [0, 0], sizes = [3, 32], strides = [1, 1]} : vector<6x32xf32> to vector<3x32xf32>
    %1145 = vector.extract_strided_slice %1142 {offsets = [0, 0], sizes = [3, 8], strides = [1, 1]} : vector<3x32xf32> to vector<3x8xf32>
    %1146 = vector.extract_strided_slice %1142 {offsets = [0, 8], sizes = [3, 8], strides = [1, 1]} : vector<3x32xf32> to vector<3x8xf32>
    %1147 = vector.extract_strided_slice %1142 {offsets = [0, 16], sizes = [3, 8], strides = [1, 1]} : vector<3x32xf32> to vector<3x8xf32>
    %1148 = vector.extract_strided_slice %1142 {offsets = [0, 24], sizes = [3, 8], strides = [1, 1]} : vector<3x32xf32> to vector<3x8xf32>
    %1149 = vector.shape_cast %1145 : vector<3x8xf32> to vector<1x3x8xf32>
    %1150 = vector.shape_cast %1146 : vector<3x8xf32> to vector<1x3x8xf32>
    %1151 = vector.shape_cast %1147 : vector<3x8xf32> to vector<1x3x8xf32>
    %1152 = vector.shape_cast %1148 : vector<3x8xf32> to vector<1x3x8xf32>
    %1153 = tpu.concatenate %1149, %1150, %1151, %1152 in 0 : vector<1x3x8xf32>, vector<1x3x8xf32>, vector<1x3x8xf32>, vector<1x3x8xf32> -> vector<4x3x8xf32>
    %1154 = arith.truncf %1153 : vector<4x3x8xf32> to vector<4x3x8xbf16>
    %1155 = vector.extract_strided_slice %1143 {offsets = [0, 0], sizes = [3, 8], strides = [1, 1]} : vector<3x32xf32> to vector<3x8xf32>
    %1156 = vector.extract_strided_slice %1143 {offsets = [0, 8], sizes = [3, 8], strides = [1, 1]} : vector<3x32xf32> to vector<3x8xf32>
    %1157 = vector.extract_strided_slice %1143 {offsets = [0, 16], sizes = [3, 8], strides = [1, 1]} : vector<3x32xf32> to vector<3x8xf32>
    %1158 = vector.extract_strided_slice %1143 {offsets = [0, 24], sizes = [3, 8], strides = [1, 1]} : vector<3x32xf32> to vector<3x8xf32>
    %1159 = vector.shape_cast %1155 : vector<3x8xf32> to vector<1x3x8xf32>
    %1160 = vector.shape_cast %1156 : vector<3x8xf32> to vector<1x3x8xf32>
    %1161 = vector.shape_cast %1157 : vector<3x8xf32> to vector<1x3x8xf32>
    %1162 = vector.shape_cast %1158 : vector<3x8xf32> to vector<1x3x8xf32>
    %1163 = tpu.concatenate %1159, %1160, %1161, %1162 in 0 : vector<1x3x8xf32>, vector<1x3x8xf32>, vector<1x3x8xf32>, vector<1x3x8xf32> -> vector<4x3x8xf32>
    %1164 = arith.truncf %1163 : vector<4x3x8xf32> to vector<4x3x8xbf16>
    %1165 = vector.extract_strided_slice %1144 {offsets = [0, 0], sizes = [3, 8], strides = [1, 1]} : vector<3x32xf32> to vector<3x8xf32>
    %1166 = vector.extract_strided_slice %1144 {offsets = [0, 8], sizes = [3, 8], strides = [1, 1]} : vector<3x32xf32> to vector<3x8xf32>
    %1167 = vector.extract_strided_slice %1144 {offsets = [0, 16], sizes = [3, 8], strides = [1, 1]} : vector<3x32xf32> to vector<3x8xf32>
    %1168 = vector.extract_strided_slice %1144 {offsets = [0, 24], sizes = [3, 8], strides = [1, 1]} : vector<3x32xf32> to vector<3x8xf32>
    %1169 = vector.shape_cast %1165 : vector<3x8xf32> to vector<1x3x8xf32>
    %1170 = vector.shape_cast %1166 : vector<3x8xf32> to vector<1x3x8xf32>
    %1171 = vector.shape_cast %1167 : vector<3x8xf32> to vector<1x3x8xf32>
    %1172 = vector.shape_cast %1168 : vector<3x8xf32> to vector<1x3x8xf32>
    %1173 = tpu.concatenate %1169, %1170, %1171, %1172 in 0 : vector<1x3x8xf32>, vector<1x3x8xf32>, vector<1x3x8xf32>, vector<1x3x8xf32> -> vector<4x3x8xf32>
    %1174 = arith.truncf %1173 : vector<4x3x8xf32> to vector<4x3x8xbf16>
    %cst_279 = arith.constant dense<0.000000e+00> : vector<4x3x3xf32>
    %1175 = tpu.matmul %1154, %1164, %cst_279 {dimension_numbers = #tpu.dot_dimension_numbers<[2], [2], [1], [1], [0, 0, 0, 1, 1, 1], [0], [0]>} : vector<4x3x8xbf16>, vector<4x3x8xbf16>, vector<4x3x3xf32> -> vector<4x3x3xf32>
    %cst_280 = arith.constant dense<0xFF800000> : vector<4x3xf32>
    %1176 = vector.multi_reduction <maximumf>, %1175, %cst_280 [2] : vector<4x3x3xf32> to vector<4x3xf32>
    %1177 = vector.shape_cast %1176 : vector<4x3xf32> to vector<4x3x1xf32>
    %1178 = vector.broadcast %1177 : vector<4x3x1xf32> to vector<4x3x3xf32>
    %1179 = arith.subf %1175, %1178 : vector<4x3x3xf32>
    %1180 = math.exp %1179 : vector<4x3x3xf32>
    %cst_281 = arith.constant dense<0.000000e+00> : vector<4x3xf32>
    %1181 = vector.multi_reduction <add>, %1180, %cst_281 [2] : vector<4x3x3xf32> to vector<4x3xf32>
    %1182 = vector.shape_cast %1181 : vector<4x3xf32> to vector<4x3x1xf32>
    %1183 = tpu.reciprocal %1182 {approx = true} : vector<4x3x1xf32> -> vector<4x3x1xf32>
    %1184 = vector.broadcast %1183 : vector<4x3x1xf32> to vector<4x3x3xf32>
    %1185 = arith.mulf %1180, %1184 : vector<4x3x3xf32>
    %1186 = arith.truncf %1185 : vector<4x3x3xf32> to vector<4x3x3xbf16>
    %cst_282 = arith.constant dense<0.000000e+00> : vector<4x3x8xf32>
    %1187 = tpu.matmul %1186, %1174, %cst_282 {dimension_numbers = #tpu.dot_dimension_numbers<[2], [1], [1], [2], [0, 0, 0, 1, 1, 2], [0], [0]>} : vector<4x3x3xbf16>, vector<4x3x8xbf16>, vector<4x3x8xf32> -> vector<4x3x8xf32>
    %1188 = arith.truncf %1187 : vector<4x3x8xf32> to vector<4x3x8xbf16>
    %cst_283 = arith.constant dense<0.000000e+00> : vector<4x3x32xf32>
    %1189 = tpu.matmul %1188, %70, %cst_283 {dimension_numbers = #tpu.dot_dimension_numbers<[2], [1], [1], [2], [0, 0, 0, 1, 1, 2], [0], [0]>} : vector<4x3x8xbf16>, vector<4x8x32xbf16>, vector<4x3x32xf32> -> vector<4x3x32xf32>
    %cst_284 = arith.constant dense<0.000000e+00> : vector<3x32xf32>
    %1190 = vector.multi_reduction <add>, %1189, %cst_284 [0] : vector<4x3x32xf32> to vector<3x32xf32>
    %1191 = vector.extract_strided_slice %1139 {offsets = [3, 0], sizes = [3, 32], strides = [1, 1]} : vector<6x32xf32> to vector<3x32xf32>
    %1192 = vector.extract_strided_slice %1140 {offsets = [3, 0], sizes = [3, 32], strides = [1, 1]} : vector<6x32xf32> to vector<3x32xf32>
    %1193 = vector.extract_strided_slice %1141 {offsets = [3, 0], sizes = [3, 32], strides = [1, 1]} : vector<6x32xf32> to vector<3x32xf32>
    %1194 = vector.extract_strided_slice %1191 {offsets = [0, 0], sizes = [3, 8], strides = [1, 1]} : vector<3x32xf32> to vector<3x8xf32>
    %1195 = vector.extract_strided_slice %1191 {offsets = [0, 8], sizes = [3, 8], strides = [1, 1]} : vector<3x32xf32> to vector<3x8xf32>
    %1196 = vector.extract_strided_slice %1191 {offsets = [0, 16], sizes = [3, 8], strides = [1, 1]} : vector<3x32xf32> to vector<3x8xf32>
    %1197 = vector.extract_strided_slice %1191 {offsets = [0, 24], sizes = [3, 8], strides = [1, 1]} : vector<3x32xf32> to vector<3x8xf32>
    %1198 = vector.shape_cast %1194 : vector<3x8xf32> to vector<1x3x8xf32>
    %1199 = vector.shape_cast %1195 : vector<3x8xf32> to vector<1x3x8xf32>
    %1200 = vector.shape_cast %1196 : vector<3x8xf32> to vector<1x3x8xf32>
    %1201 = vector.shape_cast %1197 : vector<3x8xf32> to vector<1x3x8xf32>
    %1202 = tpu.concatenate %1198, %1199, %1200, %1201 in 0 : vector<1x3x8xf32>, vector<1x3x8xf32>, vector<1x3x8xf32>, vector<1x3x8xf32> -> vector<4x3x8xf32>
    %1203 = arith.truncf %1202 : vector<4x3x8xf32> to vector<4x3x8xbf16>
    %1204 = vector.extract_strided_slice %1192 {offsets = [0, 0], sizes = [3, 8], strides = [1, 1]} : vector<3x32xf32> to vector<3x8xf32>
    %1205 = vector.extract_strided_slice %1192 {offsets = [0, 8], sizes = [3, 8], strides = [1, 1]} : vector<3x32xf32> to vector<3x8xf32>
    %1206 = vector.extract_strided_slice %1192 {offsets = [0, 16], sizes = [3, 8], strides = [1, 1]} : vector<3x32xf32> to vector<3x8xf32>
    %1207 = vector.extract_strided_slice %1192 {offsets = [0, 24], sizes = [3, 8], strides = [1, 1]} : vector<3x32xf32> to vector<3x8xf32>
    %1208 = vector.shape_cast %1204 : vector<3x8xf32> to vector<1x3x8xf32>
    %1209 = vector.shape_cast %1205 : vector<3x8xf32> to vector<1x3x8xf32>
    %1210 = vector.shape_cast %1206 : vector<3x8xf32> to vector<1x3x8xf32>
    %1211 = vector.shape_cast %1207 : vector<3x8xf32> to vector<1x3x8xf32>
    %1212 = tpu.concatenate %1208, %1209, %1210, %1211 in 0 : vector<1x3x8xf32>, vector<1x3x8xf32>, vector<1x3x8xf32>, vector<1x3x8xf32> -> vector<4x3x8xf32>
    %1213 = arith.truncf %1212 : vector<4x3x8xf32> to vector<4x3x8xbf16>
    %1214 = vector.extract_strided_slice %1193 {offsets = [0, 0], sizes = [3, 8], strides = [1, 1]} : vector<3x32xf32> to vector<3x8xf32>
    %1215 = vector.extract_strided_slice %1193 {offsets = [0, 8], sizes = [3, 8], strides = [1, 1]} : vector<3x32xf32> to vector<3x8xf32>
    %1216 = vector.extract_strided_slice %1193 {offsets = [0, 16], sizes = [3, 8], strides = [1, 1]} : vector<3x32xf32> to vector<3x8xf32>
    %1217 = vector.extract_strided_slice %1193 {offsets = [0, 24], sizes = [3, 8], strides = [1, 1]} : vector<3x32xf32> to vector<3x8xf32>
    %1218 = vector.shape_cast %1214 : vector<3x8xf32> to vector<1x3x8xf32>
    %1219 = vector.shape_cast %1215 : vector<3x8xf32> to vector<1x3x8xf32>
    %1220 = vector.shape_cast %1216 : vector<3x8xf32> to vector<1x3x8xf32>
    %1221 = vector.shape_cast %1217 : vector<3x8xf32> to vector<1x3x8xf32>
    %1222 = tpu.concatenate %1218, %1219, %1220, %1221 in 0 : vector<1x3x8xf32>, vector<1x3x8xf32>, vector<1x3x8xf32>, vector<1x3x8xf32> -> vector<4x3x8xf32>
    %1223 = arith.truncf %1222 : vector<4x3x8xf32> to vector<4x3x8xbf16>
    %cst_285 = arith.constant dense<0.000000e+00> : vector<4x3x3xf32>
    %1224 = tpu.matmul %1203, %1213, %cst_285 {dimension_numbers = #tpu.dot_dimension_numbers<[2], [2], [1], [1], [0, 0, 0, 1, 1, 1], [0], [0]>} : vector<4x3x8xbf16>, vector<4x3x8xbf16>, vector<4x3x3xf32> -> vector<4x3x3xf32>
    %cst_286 = arith.constant dense<0xFF800000> : vector<4x3xf32>
    %1225 = vector.multi_reduction <maximumf>, %1224, %cst_286 [2] : vector<4x3x3xf32> to vector<4x3xf32>
    %1226 = vector.shape_cast %1225 : vector<4x3xf32> to vector<4x3x1xf32>
    %1227 = vector.broadcast %1226 : vector<4x3x1xf32> to vector<4x3x3xf32>
    %1228 = arith.subf %1224, %1227 : vector<4x3x3xf32>
    %1229 = math.exp %1228 : vector<4x3x3xf32>
    %cst_287 = arith.constant dense<0.000000e+00> : vector<4x3xf32>
    %1230 = vector.multi_reduction <add>, %1229, %cst_287 [2] : vector<4x3x3xf32> to vector<4x3xf32>
    %1231 = vector.shape_cast %1230 : vector<4x3xf32> to vector<4x3x1xf32>
    %1232 = tpu.reciprocal %1231 {approx = true} : vector<4x3x1xf32> -> vector<4x3x1xf32>
    %1233 = vector.broadcast %1232 : vector<4x3x1xf32> to vector<4x3x3xf32>
    %1234 = arith.mulf %1229, %1233 : vector<4x3x3xf32>
    %1235 = arith.truncf %1234 : vector<4x3x3xf32> to vector<4x3x3xbf16>
    %cst_288 = arith.constant dense<0.000000e+00> : vector<4x3x8xf32>
    %1236 = tpu.matmul %1235, %1223, %cst_288 {dimension_numbers = #tpu.dot_dimension_numbers<[2], [1], [1], [2], [0, 0, 0, 1, 1, 2], [0], [0]>} : vector<4x3x3xbf16>, vector<4x3x8xbf16>, vector<4x3x8xf32> -> vector<4x3x8xf32>
    %1237 = arith.truncf %1236 : vector<4x3x8xf32> to vector<4x3x8xbf16>
    %cst_289 = arith.constant dense<0.000000e+00> : vector<4x3x32xf32>
    %1238 = tpu.matmul %1237, %70, %cst_289 {dimension_numbers = #tpu.dot_dimension_numbers<[2], [1], [1], [2], [0, 0, 0, 1, 1, 2], [0], [0]>} : vector<4x3x8xbf16>, vector<4x8x32xbf16>, vector<4x3x32xf32> -> vector<4x3x32xf32>
    %cst_290 = arith.constant dense<0.000000e+00> : vector<3x32xf32>
    %1239 = vector.multi_reduction <add>, %1238, %cst_290 [0] : vector<4x3x32xf32> to vector<3x32xf32>
    %1240 = tpu.concatenate %1190, %1239 in 0 : vector<3x32xf32>, vector<3x32xf32> -> vector<6x32xf32>
    %1241 = arith.addf %1110, %1240 : vector<6x32xf32>
    %1242 = vector.broadcast %71 : vector<1x32xf32> to vector<6x32xf32>
    %1243 = arith.addf %1241, %1242 : vector<6x32xf32>
    %cst_291 = arith.constant dense<0.000000e+00> : vector<6xf32>
    %1244 = vector.multi_reduction <add>, %1243, %cst_291 [1] : vector<6x32xf32> to vector<6xf32>
    %1245 = vector.shape_cast %1244 : vector<6xf32> to vector<6x1xf32>
    %cst_292 = arith.constant 3.200000e+01 : f32
    %1246 = vector.broadcast %cst_292 : f32 to vector<6x1xf32>
    %1247 = arith.divf %1245, %1246 : vector<6x1xf32>
    %1248 = vector.broadcast %1247 : vector<6x1xf32> to vector<6x32xf32>
    %1249 = arith.subf %1243, %1248 : vector<6x32xf32>
    %1250 = arith.mulf %1249, %1249 : vector<6x32xf32>
    %cst_293 = arith.constant dense<0.000000e+00> : vector<6xf32>
    %1251 = vector.multi_reduction <add>, %1250, %cst_293 [1] : vector<6x32xf32> to vector<6xf32>
    %1252 = vector.shape_cast %1251 : vector<6xf32> to vector<6x1xf32>
    %cst_294 = arith.constant 3.200000e+01 : f32
    %1253 = vector.broadcast %cst_294 : f32 to vector<6x1xf32>
    %1254 = arith.divf %1252, %1253 : vector<6x1xf32>
    %1255 = vector.broadcast %1247 : vector<6x1xf32> to vector<6x32xf32>
    %1256 = arith.subf %1243, %1255 : vector<6x32xf32>
    %cst_295 = arith.constant 9.99999974E-6 : f32
    %1257 = vector.broadcast %cst_295 : f32 to vector<6x1xf32>
    %1258 = arith.addf %1254, %1257 : vector<6x1xf32>
    %1259 = math.rsqrt %1258 : vector<6x1xf32>
    %1260 = vector.broadcast %1259 : vector<6x1xf32> to vector<6x32xf32>
    %1261 = arith.mulf %1256, %1260 : vector<6x32xf32>
    %1262 = vector.broadcast %96 : vector<1x32xf32> to vector<6x32xf32>
    %1263 = arith.mulf %1261, %1262 : vector<6x32xf32>
    %1264 = vector.broadcast %97 : vector<1x32xf32> to vector<6x32xf32>
    %1265 = arith.addf %1263, %1264 : vector<6x32xf32>
    %1266 = arith.truncf %1265 : vector<6x32xf32> to vector<6x32xbf16>
    %cst_296 = arith.constant dense<0.000000e+00> : vector<6x32xf32>
    %1267 = tpu.matmul %1266, %72, %cst_296 {dimension_numbers = #tpu.dot_dimension_numbers<[1], [0], [0], [1], [0, 0, 1, 1], [], []>} : vector<6x32xbf16>, vector<32x32xbf16>, vector<6x32xf32> -> vector<6x32xf32>
    %1268 = vector.broadcast %73 : vector<1x32xf32> to vector<6x32xf32>
    %1269 = arith.addf %1267, %1268 : vector<6x32xf32>
    %cst_297 = arith.constant 0.353553385 : f32
    %1270 = vector.broadcast %cst_297 : f32 to vector<6x32xf32>
    %1271 = arith.mulf %1269, %1270 : vector<6x32xf32>
    %1272 = vector.extract_strided_slice %1271 {offsets = [0, 0], sizes = [3, 32], strides = [1, 1]} : vector<6x32xf32> to vector<3x32xf32>
    %1273 = vector.extract_strided_slice %132 {offsets = [0, 0], sizes = [8, 32], strides = [1, 1]} : vector<16x32xf32> to vector<8x32xf32>
    %1274 = vector.extract_strided_slice %133 {offsets = [0, 0], sizes = [8, 32], strides = [1, 1]} : vector<16x32xf32> to vector<8x32xf32>
    %1275 = vector.extract_strided_slice %1272 {offsets = [0, 0], sizes = [3, 8], strides = [1, 1]} : vector<3x32xf32> to vector<3x8xf32>
    %1276 = vector.extract_strided_slice %1272 {offsets = [0, 8], sizes = [3, 8], strides = [1, 1]} : vector<3x32xf32> to vector<3x8xf32>
    %1277 = vector.extract_strided_slice %1272 {offsets = [0, 16], sizes = [3, 8], strides = [1, 1]} : vector<3x32xf32> to vector<3x8xf32>
    %1278 = vector.extract_strided_slice %1272 {offsets = [0, 24], sizes = [3, 8], strides = [1, 1]} : vector<3x32xf32> to vector<3x8xf32>
    %1279 = vector.shape_cast %1275 : vector<3x8xf32> to vector<1x3x8xf32>
    %1280 = vector.shape_cast %1276 : vector<3x8xf32> to vector<1x3x8xf32>
    %1281 = vector.shape_cast %1277 : vector<3x8xf32> to vector<1x3x8xf32>
    %1282 = vector.shape_cast %1278 : vector<3x8xf32> to vector<1x3x8xf32>
    %1283 = tpu.concatenate %1279, %1280, %1281, %1282 in 0 : vector<1x3x8xf32>, vector<1x3x8xf32>, vector<1x3x8xf32>, vector<1x3x8xf32> -> vector<4x3x8xf32>
    %1284 = arith.truncf %1283 : vector<4x3x8xf32> to vector<4x3x8xbf16>
    %1285 = vector.extract_strided_slice %1273 {offsets = [0, 0], sizes = [8, 8], strides = [1, 1]} : vector<8x32xf32> to vector<8x8xf32>
    %1286 = vector.extract_strided_slice %1273 {offsets = [0, 8], sizes = [8, 8], strides = [1, 1]} : vector<8x32xf32> to vector<8x8xf32>
    %1287 = vector.extract_strided_slice %1273 {offsets = [0, 16], sizes = [8, 8], strides = [1, 1]} : vector<8x32xf32> to vector<8x8xf32>
    %1288 = vector.extract_strided_slice %1273 {offsets = [0, 24], sizes = [8, 8], strides = [1, 1]} : vector<8x32xf32> to vector<8x8xf32>
    %1289 = vector.shape_cast %1285 : vector<8x8xf32> to vector<1x8x8xf32>
    %1290 = vector.shape_cast %1286 : vector<8x8xf32> to vector<1x8x8xf32>
    %1291 = vector.shape_cast %1287 : vector<8x8xf32> to vector<1x8x8xf32>
    %1292 = vector.shape_cast %1288 : vector<8x8xf32> to vector<1x8x8xf32>
    %1293 = tpu.concatenate %1289, %1290, %1291, %1292 in 0 : vector<1x8x8xf32>, vector<1x8x8xf32>, vector<1x8x8xf32>, vector<1x8x8xf32> -> vector<4x8x8xf32>
    %1294 = arith.truncf %1293 : vector<4x8x8xf32> to vector<4x8x8xbf16>
    %1295 = vector.extract_strided_slice %1274 {offsets = [0, 0], sizes = [8, 8], strides = [1, 1]} : vector<8x32xf32> to vector<8x8xf32>
    %1296 = vector.extract_strided_slice %1274 {offsets = [0, 8], sizes = [8, 8], strides = [1, 1]} : vector<8x32xf32> to vector<8x8xf32>
    %1297 = vector.extract_strided_slice %1274 {offsets = [0, 16], sizes = [8, 8], strides = [1, 1]} : vector<8x32xf32> to vector<8x8xf32>
    %1298 = vector.extract_strided_slice %1274 {offsets = [0, 24], sizes = [8, 8], strides = [1, 1]} : vector<8x32xf32> to vector<8x8xf32>
    %1299 = vector.shape_cast %1295 : vector<8x8xf32> to vector<1x8x8xf32>
    %1300 = vector.shape_cast %1296 : vector<8x8xf32> to vector<1x8x8xf32>
    %1301 = vector.shape_cast %1297 : vector<8x8xf32> to vector<1x8x8xf32>
    %1302 = vector.shape_cast %1298 : vector<8x8xf32> to vector<1x8x8xf32>
    %1303 = tpu.concatenate %1299, %1300, %1301, %1302 in 0 : vector<1x8x8xf32>, vector<1x8x8xf32>, vector<1x8x8xf32>, vector<1x8x8xf32> -> vector<4x8x8xf32>
    %1304 = arith.truncf %1303 : vector<4x8x8xf32> to vector<4x8x8xbf16>
    %cst_298 = arith.constant dense<0.000000e+00> : vector<4x3x8xf32>
    %1305 = tpu.matmul %1284, %1294, %cst_298 {dimension_numbers = #tpu.dot_dimension_numbers<[2], [2], [1], [1], [0, 0, 0, 1, 1, 1], [0], [0]>} : vector<4x3x8xbf16>, vector<4x8x8xbf16>, vector<4x3x8xf32> -> vector<4x3x8xf32>
    %cst_299 = arith.constant dense<0xFF800000> : vector<4x3xf32>
    %1306 = vector.multi_reduction <maximumf>, %1305, %cst_299 [2] : vector<4x3x8xf32> to vector<4x3xf32>
    %1307 = vector.shape_cast %1306 : vector<4x3xf32> to vector<4x3x1xf32>
    %1308 = vector.broadcast %1307 : vector<4x3x1xf32> to vector<4x3x8xf32>
    %1309 = arith.subf %1305, %1308 : vector<4x3x8xf32>
    %1310 = math.exp %1309 : vector<4x3x8xf32>
    %cst_300 = arith.constant dense<0.000000e+00> : vector<4x3xf32>
    %1311 = vector.multi_reduction <add>, %1310, %cst_300 [2] : vector<4x3x8xf32> to vector<4x3xf32>
    %1312 = vector.shape_cast %1311 : vector<4x3xf32> to vector<4x3x1xf32>
    %1313 = tpu.reciprocal %1312 {approx = true} : vector<4x3x1xf32> -> vector<4x3x1xf32>
    %1314 = vector.broadcast %1313 : vector<4x3x1xf32> to vector<4x3x8xf32>
    %1315 = arith.mulf %1310, %1314 : vector<4x3x8xf32>
    %1316 = arith.truncf %1315 : vector<4x3x8xf32> to vector<4x3x8xbf16>
    %cst_301 = arith.constant dense<0.000000e+00> : vector<4x3x8xf32>
    %1317 = tpu.matmul %1316, %1304, %cst_301 {dimension_numbers = #tpu.dot_dimension_numbers<[2], [1], [1], [2], [0, 0, 0, 1, 1, 2], [0], [0]>} : vector<4x3x8xbf16>, vector<4x8x8xbf16>, vector<4x3x8xf32> -> vector<4x3x8xf32>
    %1318 = arith.truncf %1317 : vector<4x3x8xf32> to vector<4x3x8xbf16>
    %cst_302 = arith.constant dense<0.000000e+00> : vector<4x3x32xf32>
    %1319 = tpu.matmul %1318, %86, %cst_302 {dimension_numbers = #tpu.dot_dimension_numbers<[2], [1], [1], [2], [0, 0, 0, 1, 1, 2], [0], [0]>} : vector<4x3x8xbf16>, vector<4x8x32xbf16>, vector<4x3x32xf32> -> vector<4x3x32xf32>
    %cst_303 = arith.constant dense<0.000000e+00> : vector<3x32xf32>
    %1320 = vector.multi_reduction <add>, %1319, %cst_303 [0] : vector<4x3x32xf32> to vector<3x32xf32>
    %1321 = vector.extract_strided_slice %1271 {offsets = [3, 0], sizes = [3, 32], strides = [1, 1]} : vector<6x32xf32> to vector<3x32xf32>
    %1322 = vector.extract_strided_slice %132 {offsets = [8, 0], sizes = [8, 32], strides = [1, 1]} : vector<16x32xf32> to vector<8x32xf32>
    %1323 = vector.extract_strided_slice %133 {offsets = [8, 0], sizes = [8, 32], strides = [1, 1]} : vector<16x32xf32> to vector<8x32xf32>
    %1324 = vector.extract_strided_slice %1321 {offsets = [0, 0], sizes = [3, 8], strides = [1, 1]} : vector<3x32xf32> to vector<3x8xf32>
    %1325 = vector.extract_strided_slice %1321 {offsets = [0, 8], sizes = [3, 8], strides = [1, 1]} : vector<3x32xf32> to vector<3x8xf32>
    %1326 = vector.extract_strided_slice %1321 {offsets = [0, 16], sizes = [3, 8], strides = [1, 1]} : vector<3x32xf32> to vector<3x8xf32>
    %1327 = vector.extract_strided_slice %1321 {offsets = [0, 24], sizes = [3, 8], strides = [1, 1]} : vector<3x32xf32> to vector<3x8xf32>
    %1328 = vector.shape_cast %1324 : vector<3x8xf32> to vector<1x3x8xf32>
    %1329 = vector.shape_cast %1325 : vector<3x8xf32> to vector<1x3x8xf32>
    %1330 = vector.shape_cast %1326 : vector<3x8xf32> to vector<1x3x8xf32>
    %1331 = vector.shape_cast %1327 : vector<3x8xf32> to vector<1x3x8xf32>
    %1332 = tpu.concatenate %1328, %1329, %1330, %1331 in 0 : vector<1x3x8xf32>, vector<1x3x8xf32>, vector<1x3x8xf32>, vector<1x3x8xf32> -> vector<4x3x8xf32>
    %1333 = arith.truncf %1332 : vector<4x3x8xf32> to vector<4x3x8xbf16>
    %1334 = vector.extract_strided_slice %1322 {offsets = [0, 0], sizes = [8, 8], strides = [1, 1]} : vector<8x32xf32> to vector<8x8xf32>
    %1335 = vector.extract_strided_slice %1322 {offsets = [0, 8], sizes = [8, 8], strides = [1, 1]} : vector<8x32xf32> to vector<8x8xf32>
    %1336 = vector.extract_strided_slice %1322 {offsets = [0, 16], sizes = [8, 8], strides = [1, 1]} : vector<8x32xf32> to vector<8x8xf32>
    %1337 = vector.extract_strided_slice %1322 {offsets = [0, 24], sizes = [8, 8], strides = [1, 1]} : vector<8x32xf32> to vector<8x8xf32>
    %1338 = vector.shape_cast %1334 : vector<8x8xf32> to vector<1x8x8xf32>
    %1339 = vector.shape_cast %1335 : vector<8x8xf32> to vector<1x8x8xf32>
    %1340 = vector.shape_cast %1336 : vector<8x8xf32> to vector<1x8x8xf32>
    %1341 = vector.shape_cast %1337 : vector<8x8xf32> to vector<1x8x8xf32>
    %1342 = tpu.concatenate %1338, %1339, %1340, %1341 in 0 : vector<1x8x8xf32>, vector<1x8x8xf32>, vector<1x8x8xf32>, vector<1x8x8xf32> -> vector<4x8x8xf32>
    %1343 = arith.truncf %1342 : vector<4x8x8xf32> to vector<4x8x8xbf16>
    %1344 = vector.extract_strided_slice %1323 {offsets = [0, 0], sizes = [8, 8], strides = [1, 1]} : vector<8x32xf32> to vector<8x8xf32>
    %1345 = vector.extract_strided_slice %1323 {offsets = [0, 8], sizes = [8, 8], strides = [1, 1]} : vector<8x32xf32> to vector<8x8xf32>
    %1346 = vector.extract_strided_slice %1323 {offsets = [0, 16], sizes = [8, 8], strides = [1, 1]} : vector<8x32xf32> to vector<8x8xf32>
    %1347 = vector.extract_strided_slice %1323 {offsets = [0, 24], sizes = [8, 8], strides = [1, 1]} : vector<8x32xf32> to vector<8x8xf32>
    %1348 = vector.shape_cast %1344 : vector<8x8xf32> to vector<1x8x8xf32>
    %1349 = vector.shape_cast %1345 : vector<8x8xf32> to vector<1x8x8xf32>
    %1350 = vector.shape_cast %1346 : vector<8x8xf32> to vector<1x8x8xf32>
    %1351 = vector.shape_cast %1347 : vector<8x8xf32> to vector<1x8x8xf32>
    %1352 = tpu.concatenate %1348, %1349, %1350, %1351 in 0 : vector<1x8x8xf32>, vector<1x8x8xf32>, vector<1x8x8xf32>, vector<1x8x8xf32> -> vector<4x8x8xf32>
    %1353 = arith.truncf %1352 : vector<4x8x8xf32> to vector<4x8x8xbf16>
    %cst_304 = arith.constant dense<0.000000e+00> : vector<4x3x8xf32>
    %1354 = tpu.matmul %1333, %1343, %cst_304 {dimension_numbers = #tpu.dot_dimension_numbers<[2], [2], [1], [1], [0, 0, 0, 1, 1, 1], [0], [0]>} : vector<4x3x8xbf16>, vector<4x8x8xbf16>, vector<4x3x8xf32> -> vector<4x3x8xf32>
    %cst_305 = arith.constant dense<0xFF800000> : vector<4x3xf32>
    %1355 = vector.multi_reduction <maximumf>, %1354, %cst_305 [2] : vector<4x3x8xf32> to vector<4x3xf32>
    %1356 = vector.shape_cast %1355 : vector<4x3xf32> to vector<4x3x1xf32>
    %1357 = vector.broadcast %1356 : vector<4x3x1xf32> to vector<4x3x8xf32>
    %1358 = arith.subf %1354, %1357 : vector<4x3x8xf32>
    %1359 = math.exp %1358 : vector<4x3x8xf32>
    %cst_306 = arith.constant dense<0.000000e+00> : vector<4x3xf32>
    %1360 = vector.multi_reduction <add>, %1359, %cst_306 [2] : vector<4x3x8xf32> to vector<4x3xf32>
    %1361 = vector.shape_cast %1360 : vector<4x3xf32> to vector<4x3x1xf32>
    %1362 = tpu.reciprocal %1361 {approx = true} : vector<4x3x1xf32> -> vector<4x3x1xf32>
    %1363 = vector.broadcast %1362 : vector<4x3x1xf32> to vector<4x3x8xf32>
    %1364 = arith.mulf %1359, %1363 : vector<4x3x8xf32>
    %1365 = arith.truncf %1364 : vector<4x3x8xf32> to vector<4x3x8xbf16>
    %cst_307 = arith.constant dense<0.000000e+00> : vector<4x3x8xf32>
    %1366 = tpu.matmul %1365, %1353, %cst_307 {dimension_numbers = #tpu.dot_dimension_numbers<[2], [1], [1], [2], [0, 0, 0, 1, 1, 2], [0], [0]>} : vector<4x3x8xbf16>, vector<4x8x8xbf16>, vector<4x3x8xf32> -> vector<4x3x8xf32>
    %1367 = arith.truncf %1366 : vector<4x3x8xf32> to vector<4x3x8xbf16>
    %cst_308 = arith.constant dense<0.000000e+00> : vector<4x3x32xf32>
    %1368 = tpu.matmul %1367, %86, %cst_308 {dimension_numbers = #tpu.dot_dimension_numbers<[2], [1], [1], [2], [0, 0, 0, 1, 1, 2], [0], [0]>} : vector<4x3x8xbf16>, vector<4x8x32xbf16>, vector<4x3x32xf32> -> vector<4x3x32xf32>
    %cst_309 = arith.constant dense<0.000000e+00> : vector<3x32xf32>
    %1369 = vector.multi_reduction <add>, %1368, %cst_309 [0] : vector<4x3x32xf32> to vector<3x32xf32>
    %1370 = tpu.concatenate %1320, %1369 in 0 : vector<3x32xf32>, vector<3x32xf32> -> vector<6x32xf32>
    %1371 = arith.addf %1243, %1370 : vector<6x32xf32>
    %1372 = vector.broadcast %87 : vector<1x32xf32> to vector<6x32xf32>
    %1373 = arith.addf %1371, %1372 : vector<6x32xf32>
    %cst_310 = arith.constant dense<0.000000e+00> : vector<6xf32>
    %1374 = vector.multi_reduction <add>, %1373, %cst_310 [1] : vector<6x32xf32> to vector<6xf32>
    %1375 = vector.shape_cast %1374 : vector<6xf32> to vector<6x1xf32>
    %cst_311 = arith.constant 3.200000e+01 : f32
    %1376 = vector.broadcast %cst_311 : f32 to vector<6x1xf32>
    %1377 = arith.divf %1375, %1376 : vector<6x1xf32>
    %1378 = vector.broadcast %1377 : vector<6x1xf32> to vector<6x32xf32>
    %1379 = arith.subf %1373, %1378 : vector<6x32xf32>
    %1380 = arith.mulf %1379, %1379 : vector<6x32xf32>
    %cst_312 = arith.constant dense<0.000000e+00> : vector<6xf32>
    %1381 = vector.multi_reduction <add>, %1380, %cst_312 [1] : vector<6x32xf32> to vector<6xf32>
    %1382 = vector.shape_cast %1381 : vector<6xf32> to vector<6x1xf32>
    %cst_313 = arith.constant 3.200000e+01 : f32
    %1383 = vector.broadcast %cst_313 : f32 to vector<6x1xf32>
    %1384 = arith.divf %1382, %1383 : vector<6x1xf32>
    %1385 = vector.broadcast %1377 : vector<6x1xf32> to vector<6x32xf32>
    %1386 = arith.subf %1373, %1385 : vector<6x32xf32>
    %cst_314 = arith.constant 9.99999974E-6 : f32
    %1387 = vector.broadcast %cst_314 : f32 to vector<6x1xf32>
    %1388 = arith.addf %1384, %1387 : vector<6x1xf32>
    %1389 = math.rsqrt %1388 : vector<6x1xf32>
    %1390 = vector.broadcast %1389 : vector<6x1xf32> to vector<6x32xf32>
    %1391 = arith.mulf %1386, %1390 : vector<6x32xf32>
    %1392 = vector.broadcast %98 : vector<1x32xf32> to vector<6x32xf32>
    %1393 = arith.mulf %1391, %1392 : vector<6x32xf32>
    %1394 = vector.broadcast %99 : vector<1x32xf32> to vector<6x32xf32>
    %1395 = arith.addf %1393, %1394 : vector<6x32xf32>
    %1396 = arith.truncf %1395 : vector<6x32xf32> to vector<6x32xbf16>
    %cst_315 = arith.constant dense<0.000000e+00> : vector<6x64xf32>
    %1397 = tpu.matmul %1396, %89, %cst_315 {dimension_numbers = #tpu.dot_dimension_numbers<[1], [0], [0], [1], [0, 0, 1, 1], [], []>} : vector<6x32xbf16>, vector<32x64xbf16>, vector<6x64xf32> -> vector<6x64xf32>
    %1398 = vector.broadcast %90 : vector<1x64xf32> to vector<6x64xf32>
    %1399 = arith.addf %1397, %1398 : vector<6x64xf32>
    %cst_316 = arith.constant 0.000000e+00 : f32
    %1400 = vector.broadcast %cst_316 : f32 to vector<6x64xf32>
    %1401 = arith.maximumf %1399, %1400 : vector<6x64xf32>
    %1402 = arith.truncf %1401 : vector<6x64xf32> to vector<6x64xbf16>
    %cst_317 = arith.constant dense<0.000000e+00> : vector<6x32xf32>
    %1403 = tpu.matmul %1402, %92, %cst_317 {dimension_numbers = #tpu.dot_dimension_numbers<[1], [0], [0], [1], [0, 0, 1, 1], [], []>} : vector<6x64xbf16>, vector<64x32xbf16>, vector<6x32xf32> -> vector<6x32xf32>
    %1404 = arith.addf %1373, %1403 : vector<6x32xf32>
    %1405 = vector.broadcast %93 : vector<1x32xf32> to vector<6x32xf32>
    %1406 = arith.addf %1404, %1405 : vector<6x32xf32>
    %cst_318 = arith.constant dense<0.000000e+00> : vector<6xf32>
    %1407 = vector.multi_reduction <add>, %1406, %cst_318 [1] : vector<6x32xf32> to vector<6xf32>
    %1408 = vector.shape_cast %1407 : vector<6xf32> to vector<6x1xf32>
    %cst_319 = arith.constant 3.200000e+01 : f32
    %1409 = vector.broadcast %cst_319 : f32 to vector<6x1xf32>
    %1410 = arith.divf %1408, %1409 : vector<6x1xf32>
    %1411 = vector.broadcast %1410 : vector<6x1xf32> to vector<6x32xf32>
    %1412 = arith.subf %1406, %1411 : vector<6x32xf32>
    %1413 = arith.mulf %1412, %1412 : vector<6x32xf32>
    %cst_320 = arith.constant dense<0.000000e+00> : vector<6xf32>
    %1414 = vector.multi_reduction <add>, %1413, %cst_320 [1] : vector<6x32xf32> to vector<6xf32>
    %1415 = vector.shape_cast %1414 : vector<6xf32> to vector<6x1xf32>
    %cst_321 = arith.constant 3.200000e+01 : f32
    %1416 = vector.broadcast %cst_321 : f32 to vector<6x1xf32>
    %1417 = arith.divf %1415, %1416 : vector<6x1xf32>
    %1418 = vector.broadcast %1410 : vector<6x1xf32> to vector<6x32xf32>
    %1419 = arith.subf %1406, %1418 : vector<6x32xf32>
    %cst_322 = arith.constant 9.99999974E-6 : f32
    %1420 = vector.broadcast %cst_322 : f32 to vector<6x1xf32>
    %1421 = arith.addf %1417, %1420 : vector<6x1xf32>
    %1422 = math.rsqrt %1421 : vector<6x1xf32>
    %1423 = vector.broadcast %1422 : vector<6x1xf32> to vector<6x32xf32>
    %1424 = arith.mulf %1419, %1423 : vector<6x32xf32>
    %1425 = vector.broadcast %100 : vector<1x32xf32> to vector<6x32xf32>
    %1426 = arith.mulf %1424, %1425 : vector<6x32xf32>
    %1427 = vector.broadcast %101 : vector<1x32xf32> to vector<6x32xf32>
    %1428 = arith.addf %1426, %1427 : vector<6x32xf32>
    %c40 = arith.constant 40 : index
    %c0_323 = arith.constant 0 : index
    %1429 = vector.load %arg13[%c40, %c0_323] : memref<48x32xf32, #tpu.memory_space<vmem>>, vector<6x32xf32>
    tpu.vector_store %arg13[%c40, %c0_323], %1428 {strides = array<i32>} : memref<48x32xf32, #tpu.memory_space<vmem>>, vector<6x32xf32>,
    return
  }
  func.func @transform_0(%arg0: i32) -> (i32, i32, i32) {
    %c0_i32 = arith.constant 0 : i32
    %c0_i32_0 = arith.constant 0 : i32
    %c0_i32_1 = arith.constant 0 : i32
    %c0_i32_2 = arith.constant 0 : i32
    return %c0_i32, %c0_i32_0, %c0_i32_1 : i32, i32, i32
  }
  func.func @transform_1(%arg0: i32) -> (i32, i32, i32) {
    %c0_i32 = arith.constant 0 : i32
    %c0_i32_0 = arith.constant 0 : i32
    %c0_i32_1 = arith.constant 0 : i32
    %c0_i32_2 = arith.constant 0 : i32
    return %c0_i32, %c0_i32_0, %c0_i32_1 : i32, i32, i32
  }
  func.func @transform_2(%arg0: i32) -> (i32, i32, i32) {
    %c0_i32 = arith.constant 0 : i32
    %c0_i32_0 = arith.constant 0 : i32
    %c0_i32_1 = arith.constant 0 : i32
    %c0_i32_2 = arith.constant 0 : i32
    return %c0_i32, %c0_i32_0, %c0_i32_1 : i32, i32, i32
  }
  func.func @transform_3(%arg0: i32) -> (i32, i32, i32) {
    %c0_i32 = arith.constant 0 : i32
    %c0_i32_0 = arith.constant 0 : i32
    %c0_i32_1 = arith.constant 0 : i32
    %c0_i32_2 = arith.constant 0 : i32
    return %c0_i32, %c0_i32_0, %c0_i32_1 : i32, i32, i32
  }
  func.func @transform_4(%arg0: i32) -> (i32, i32, i32) {
    %c0_i32 = arith.constant 0 : i32
    %c0_i32_0 = arith.constant 0 : i32
    %c0_i32_1 = arith.constant 0 : i32
    %c0_i32_2 = arith.constant 0 : i32
    return %c0_i32, %c0_i32_0, %c0_i32_1 : i32, i32, i32
  }
  func.func @transform_5(%arg0: i32) -> (i32, i32, i32) {
    %c0_i32 = arith.constant 0 : i32
    %c0_i32_0 = arith.constant 0 : i32
    %c0_i32_1 = arith.constant 0 : i32
    %c0_i32_2 = arith.constant 0 : i32
    return %c0_i32, %c0_i32_0, %c0_i32_1 : i32, i32, i32
  }
  func.func @transform_6(%arg0: i32) -> (i32, i32, i32) {
    %c0_i32 = arith.constant 0 : i32
    %c0_i32_0 = arith.constant 0 : i32
    %c0_i32_1 = arith.constant 0 : i32
    %c0_i32_2 = arith.constant 0 : i32
    return %c0_i32, %c0_i32_0, %c0_i32_1 : i32, i32, i32
  }
  func.func @transform_7(%arg0: i32) -> (i32, i32, i32) {
    %c0_i32 = arith.constant 0 : i32
    %c0_i32_0 = arith.constant 0 : i32
    %c0_i32_1 = arith.constant 0 : i32
    %c0_i32_2 = arith.constant 0 : i32
    return %c0_i32, %c0_i32_0, %c0_i32_1 : i32, i32, i32
  }
  func.func @transform_8(%arg0: i32) -> (i32, i32, i32) {
    %c0_i32 = arith.constant 0 : i32
    %c0_i32_0 = arith.constant 0 : i32
    %c0_i32_1 = arith.constant 0 : i32
    %c0_i32_2 = arith.constant 0 : i32
    return %c0_i32, %c0_i32_0, %c0_i32_1 : i32, i32, i32
  }
  func.func @transform_9(%arg0: i32) -> (i32, i32, i32) {
    %c0_i32 = arith.constant 0 : i32
    %c0_i32_0 = arith.constant 0 : i32
    %c0_i32_1 = arith.constant 0 : i32
    %c0_i32_2 = arith.constant 0 : i32
    return %c0_i32, %c0_i32_0, %c0_i32_1 : i32, i32, i32
  }
  func.func @transform_10(%arg0: i32) -> (i32, i32, i32) {
    %c0_i32 = arith.constant 0 : i32
    %c0_i32_0 = arith.constant 0 : i32
    %c0_i32_1 = arith.constant 0 : i32
    %c0_i32_2 = arith.constant 0 : i32
    return %c0_i32, %c0_i32_0, %c0_i32_1 : i32, i32, i32
  }
  func.func @transform_11(%arg0: i32) -> (i32, i32) {
    %c0_i32 = arith.constant 0 : i32
    %c0_i32_0 = arith.constant 0 : i32
    %c0_i32_1 = arith.constant 0 : i32
    return %c0_i32, %c0_i32_0 : i32, i32
  }
  func.func @transform_12(%arg0: i32) -> (i32, i32) {
    %c0_i32 = arith.constant 0 : i32
    %c0_i32_0 = arith.constant 0 : i32
    %c0_i32_1 = arith.constant 0 : i32
    return %c0_i32, %c0_i32_0 : i32, i32
  }
}

</mosaic_0001>

<bundles_post_ra>
// kernel: forward.1
= control target key start
LH: loop header
LB: loop body
LE: loop exit
PB: predicated region body
PF: predicated region fallthrough
CT: control target
= control target key end

     0   :  { %vm143_vm0 = vcmask 261120   ;;  %v17366_v15 = vmov 0.0   ;;  %vm14572_vm1 = vmmov 0   ;;  %vm156_vm2 = vcmask 1044480   ;;  %s14573_s14 = smov 112   ;;  %s14574_s15 = smov 120   ;;  %s17352_s0 = inlined_call_operand.vmem [shape: f32[2,8,32], index: 0, kind: input, shape index: {}]   ;;  %s17353_s4 = inlined_call_operand.vmem [shape: bf16[2,32,32], index: 4, kind: input, shape index: {}]   ;;  %s17354_s5 = inlined_call_operand.vmem [shape: bf16[2,32,96], index: 5, kind: input, shape index: {}]   ;;  %s17355_s1 = inlined_call_operand.vmem [shape: f32[2,5,32], index: 1, kind: input, shape index: {}]   ;;  %s17356_s11 = inlined_call_operand.vmem [shape: f32[30,128], index: 11, kind: input, shape index: {}]   ;;  %s17357_s7 = inlined_call_operand.vmem [shape: bf16[2,32,96], index: 7, kind: input, shape index: {}]   ;;  %s17358_s6 = inlined_call_operand.vmem [shape: bf16[2,32,32], index: 6, kind: input, shape index: {}]   ;;  %s17359_s8 = inlined_call_operand.vmem [shape: bf16[2,32,32], index: 8, kind: input, shape index: {}]   ;;  %s17360_s9 = inlined_call_operand.vmem [shape: bf16[2,32,64], index: 9, kind: input, shape index: {}]   ;;  %s17361_s10 = inlined_call_operand.vmem [shape: bf16[2,64,32], index: 10, kind: input, shape index: {}]   ;;  %s17362_s2 = inlined_call_operand.vmem [shape: f32[2,4,32], index: 2, kind: input, shape index: {}]   ;;  %s17363_s3 = inlined_call_operand.vmem [shape: f32[2,3,32], index: 3, kind: input, shape index: {}]   ;;  %s17364_s12 = inlined_call_operand.vmem [shape: f32[48,32], index: 12, kind: output, shape index: {}]  }
   0x1   :  { %v14647_v0 = vld [vmem:[%s17352_s0] sm:$0xff]  ;;  %v12143_v1 = vld [vmem:[%s17352_s0 + $0x8] sm:$0xff]  ;;  %v14198_v14 = vld [vmem:[%s17353_s4 + $0x10] sm:$0xff]   ;;  %12873 = vmatprep.subr.bf16.mxu0 %v17366_v15  ;;  %12857 = vmatprep.subr.bf16.mxu1 %v17366_v15  ;;  %s14575_s18 = smov 104   ;;  %s14576_s21 = smov 96   ;;  %vm554_vm3 = vcmask 64512  }
   0x2   :  { %v421_v2 = vsel %vm143_vm0, %v14647_v0, 0.0  ;;  %v424_v3 = vsel %vm143_vm0, %v12143_v1, 0.0  ;;  %12874 = vmatpush3.bf16.msra.mxu0 %v14198_v14  ;;  %v14199_v16 = vld [vmem:[%s17353_s4 + $0x18] sm:$0xff]   ;;  %v291_v17 = vpack.c.bf16 %v12143_v1, %v14647_v0  ;;  %12877 = vmatprep.mubr.msk.bf16.mxu0 %vm14572_vm1, %v17366_v15  ;;  %v14200_v18 = vld [vmem:[%s17354_s5] sm:$0xff]   ;;  %v14201_v19 = vld [vmem:[%s17354_s5 + $0x8] sm:$0xff]   ;;  %s14577_s25 = smov 64  }
   0x3   :  { %422 = vadd.xlane.f32.xlu0 %v421_v2  ;;  %12875 = vmatprep.subr.bf16.mxu0 %v17366_v15  ;;  %v14202_v20 = vld [vmem:[%s17353_s4] sm:$0xff]   ;;  %v12134_v22 = vld [vmem:[%s17355_s1 + $0x8] sm:$0x1f]  ;;  %v12144_v44 = vld [vmem:[%s17356_s11 + $0xf] ss:$0 sm:$0xff]  ;;  %vm801_vm4 = vcmask 1043456  }
   0x4   :  { %12861 = vmatprep.mubr.msk.bf16.mxu1 %vm14572_vm1, %v17366_v15  ;;  %v150_v21 = vld [vmem:[%s17355_s1] sm:$0x1f]  ;;  %12858 = vmatpush3.bf16.msra.mxu1 %v14202_v20  ;;  %v14203_v23 = vld [vmem:[%s17353_s4 + $0x8] sm:$0xff]   ;;  %v154_v24 = vrot.slane %v12134_v22, 3  ;;  %v12152_v35 = vld [vmem:[%s17356_s11 + $0x7] ss:$0 sm:$0xff] }
   0x5   :  { %12859 = vmatprep.subr.bf16.mxu1 %v17366_v15  ;;  %v12153_v39 = vld [vmem:[%s17356_s11 + $0x8] ss:$0 sm:$0xff]  ;;  %v12135_v52 = vld [vmem:[%s17356_s11] ss:$0 sm:$0xff]  ;;  %v14726_v54 = vld [vmem:[%s17356_s11 + $0x1] ss:$0 sm:$0xff] }
   0x6   :  { %12876 = vmatpush3.bf16.msra.mxu0 %v14199_v16  ;;  %v157_v25 = vsel %vm156_vm2, %v150_v21, %v154_v24  ;;  %vm2138_vm5 = vcmask 39936   ;;  %vm2193_vm6 = vcmask 1041408   ;;  %vm2194_vm7 = vcmask 1042432  }
   0x7   :  { %425 = vadd.xlane.f32.xlu0 %v424_v3  ;;  %12889 = vmatprep.subr.bf16.mxu0 %v17366_v15  ;;  %v158_v26 = vpack.c.bf16 %v154_v24, %v157_v25  ;;  %v14736_v3 = vld [vmem:[%s17357_s7 + $0x8] sm:$0xff]   ;;  %vm3485_vm8 = vcmask 254976   ;;  %vm3383_vm9 = vcmask 523264   ;;  %vm3808_vm10 = vcmask 36864  }
   0x8   :  { %12860 = vmatpush3.bf16.msra.mxu1 %v14203_v23  ;;  %vm4237_vm11 = vcmask 258048   ;;  %vm5263_vm12 = vcmask 61440   ;;  %vm6895_vm13 = vcmask 27648   ;;  %vm6946_vm14 = vcmask 31744  }
   0x9   :  { %12878 = vmatmul.mubr.msk.bf16.vlgmr.msra.gmra.mrb[0].mxu0 %vm143_vm0, %v291_v17  ;;  %12865 = vmatprep.subr.bf16.mxu1 %v17366_v15  ;;  %vm7313_vm15 = vcmask 257024  }
   0xa   :  { %12893 = vmatprep.mubr.msk.bf16.mxu0 %vm14572_vm1, %v17366_v15  ;;  %12890 = vmatpush3.bf16.msra.mxu0 %v14200_v18 }
   0xb   :  { %12891 = vmatprep.subr.bf16.mxu0 %v17366_v15  ;;  %12862 = vmatmul.mubr.msk.bf16.vlgmr.msra.gmra.mrb[0].mxu1 %vm143_vm0, %v158_v26 }
   0xc   :  { %12869 = vmatprep.mubr.msk.bf16.mxu1 %vm14572_vm1, %v17366_v15 }
   0xe   :  { %12892 = vmatpush3.bf16.msra.mxu0 %v14201_v19 }
   0xf   :  { %12903 = vmatprep.subr.bf16.mxu0 %v17366_v15 }
  0x90   :  { %v423_v4 = vpop.xlane.xlu0 %422 }
  0x91   :  { %v428_v5 = vmul.f32 0.03125, %v423_v4  ;;  %v14742_v4 = vld [vmem:[%s17357_s7] sm:$0xff]  }
  0x93   :  { %v430_v6 = vsub.f32 %v14647_v0, %v428_v5  ;;  %v14207_v5 = vld [vmem:[%s17357_s7 + $0x18] sm:$0xff]  }
  0x94   :  { %v426_v7 = vpop.xlane.xlu0 %425 }
  0x95   :  { %v429_v8 = vmul.f32 0.03125, %v426_v7  ;;  %v432_v9 = vmul.f32 %v430_v6, %v430_v6 }
  0x97   :  { %v431_v10 = vsub.f32 %v12143_v1, %v429_v8  ;;  %v434_v11 = vsel %vm143_vm0, %v432_v9, 0.0 }
  0x98   :  { %435 = vadd.xlane.f32.xlu1 %v434_v11 }
  0x99   :  { %v433_v12 = vmul.f32 %v431_v10, %v431_v10 }
  0x9b   :  { %v437_v13 = vsel %vm143_vm0, %v433_v12, 0.0 }
  0x9c   :  { %438 = vadd.xlane.f32.xlu1 %v437_v13 }
  0xdc   :  { %v345_v45 = vpop.f32.mrb[0].mxu0 }
  0xdd   :  { %v14714_v46 = vadd.f32 %v12144_v44, %v345_v45  ;;  %v12879_v47 = vpop.f32.mrb[1].mxu0 }
  0xde   :  { %v348_v48 = vpop.f32.mrb[2].mxu0  ;;  %v212_v53 = vpop.f32.mrb[0].mxu1 }
  0xdf   :  { %v14716_v49 = vadd.f32 %v12144_v44, %v348_v48  ;;  %v12880_v50 = vpop.f32.mrb[3].mxu0  ;;  %v213_v55 = vadd.f32 %v12135_v52, %v212_v53  ;;  %v12863_v56 = vpop.f32.mrb[1].mxu1 }
  0xe0   :  { %v215_v57 = vpop.f32.mrb[2].mxu1 }
  0xe1   :  { %v352_v51 = vpack.c.bf16 %v14716_v49, %v14714_v46  ;;  %v216_v59 = vadd.f32 %v12135_v52, %v215_v57  ;;  %v12864_v60 = vpop.f32.mrb[3].mxu1 }
  0xe3   :  { %v219_v1 = vpack.c.bf16 %v216_v59, %v213_v55 }
 0x125   :  { %v436_v27 = vpop.xlane.xlu1 %435 }
 0x126   :  { %v440_v28 = vmul.f32 0.03125, %v436_v27 }
 0x128   :  { %v442_v29 = vadd.f32 1e-05, %v440_v28 }
 0x129   :  { %v439_v30 = vpop.xlane.xlu1 %438 }
 0x12a   :  { %14222 = vrsqrt.f32 %v442_v29  ;;  %v441_v31 = vmul.f32 0.03125, %v439_v30 }
 0x12c   :  { %v443_v32 = vadd.f32 1e-05, %v441_v31 }
 0x12e   :  { %14224 = vrsqrt.f32 %v443_v32 }
 0x134   :  { %v14223_v33 = vpop.eup %14222 }
 0x135   :  { %v446_v34 = vmul.f32 %v14223_v33, %v430_v6  ;;  %v14205_v6 = vld [vmem:[%s17357_s7 + $0x10] sm:$0xff]  }
 0x137   :  { %v452_v37 = vmul.f32 %v12152_v35, %v446_v34 }
 0x138   :  { %v14225_v36 = vpop.eup %14224 }
 0x139   :  { %v447_v38 = vmul.f32 %v14225_v36, %v431_v10  ;;  %v458_v41 = vadd.f32 %v12153_v39, %v452_v37 }
 0x13b   :  { %v453_v40 = vmul.f32 %v12152_v35, %v447_v38 }
 0x13d   :  { %v459_v42 = vadd.f32 %v12153_v39, %v453_v40 }
 0x13f   :  { %v460_v43 = vpack.c.bf16 %v459_v42, %v458_v41 }
 0x141   :  { %12894 = vmatmul.mubr.msk.bf16.vlgmr.msra.gmra.mrb[4].mxu0 %vm143_vm0, %v460_v43 }
 0x142   :  { %12905 = vmatprep.mubr.msk.bf16.mxu0 %vm14572_vm1, %v17366_v15 }
 0x214   :  { %v514_v58 = vpop.f32.mrb[4].mxu0 }
 0x215   :  { %v515_v61 = vadd.f32 %v14726_v54, %v514_v58  ;;  %v12895_v62 = vpop.f32.mrb[5].mxu0 }
 0x216   :  { %v14729_v63 = vpop.f32.mrb[6].mxu0 }
 0x217   :  { %541 = vrot.lane.b32.xlu1 %v515_v61, %s14573_s14  ;;  %538 = vrot.lane.b32.xlu0 %v515_v61, %s14574_s15  ;;  %v12896_v2 = vpop.f32.mrb[7].mxu0  ;;  %v14756_v7 = vpack.c.bf16 %v515_v61, %v515_v61  ;;  %v521_v8 = vmul.f32 0.35355338, %v515_v61 }
 0x219   :  { %v533_v22 = vpack.c.bf16 %v521_v8, %v521_v8 }
 0x21b   :  { %544 = vrot.lane.b32.xlu1 %v515_v61, %s14575_s18  ;;  %236 = vrot.lane.b32.xlu0 %v14736_v3, %s14576_s21 }
 0x21f   :  { %234 = vrot.lane.b32.xlu1 %v14742_v4, %s14576_s21  ;;  %369 = vrot.lane.b32.xlu0 %v14207_v5, %s14576_s21 }
 0x223   :  { %367 = vrot.lane.b32.xlu1 %v14205_v6, %s14576_s21 }
 0x227   :  { %552 = vrot.lane.b32.xlu1 %v14756_v7, %s14576_s21 }
 0x22b   :  { %524 = vrot.lane.b32.xlu1 %v521_v8, %s14574_s15 }
 0x289   :  { %v542_v9 = vpop.permute.xlu1 %541  ;;  %v539_v10 = vpop.permute.xlu0 %538 }
 0x28a   :  { %v14761_v11 = vpack.c.bf16 %v539_v10, %v539_v10  ;;  %v14765_v13 = vpack.c.bf16 %v542_v9, %v542_v9 }
 0x28c   :  { %602 = vrot.lane.b32.xlu0 %v14761_v11, %s14576_s21 }
 0x28d   :  { %v545_v12 = vpop.permute.xlu1 %544  ;;  %v237_v17 = vpop.permute.xlu0 %236 }
 0x28e   :  { %v14767_v14 = vpack.c.bf16 %v545_v12, %v545_v12 }
 0x290   :  { %651 = vrot.lane.b32.xlu0 %v14765_v13, %s14576_s21  ;;  %700 = vrot.lane.b32.xlu1 %v14767_v14, %s14576_s21 }
 0x291   :  { %v235_v16 = vpop.permute.xlu1 %234  ;;  %v370_v19 = vpop.permute.xlu0 %369 }
 0x292   :  { %12866 = vmatpush3.bf16.msra.mxu1 %v235_v16 }
 0x293   :  { %12867 = vmatprep.subr.bf16.mxu1 %v17366_v15 }
 0x294   :  { %527 = vrot.lane.b32.xlu0 %v521_v8, %s14573_s14  ;;  %530 = vrot.lane.b32.xlu1 %v521_v8, %s14575_s18 }
 0x295   :  { %v368_v18 = vpop.permute.xlu1 %367 }
 0x296   :  { %12868 = vmatpush3.bf16.msra.mxu1 %v237_v17 }
 0x297   :  { %12881 = vmatprep.subr.bf16.mxu1 %v17366_v15 }
 0x299   :  { %12870 = vmatmul.mubr.msk.bf16.vlgmr.msra.gmra.mrb[4].mxu1 %vm143_vm0, %v219_v1  ;;  %v553_v20 = vpop.permute.xlu1 %552 }
 0x29a   :  { %12882 = vmatpush3.bf16.msra.mxu1 %v368_v18  ;;  %12885 = vmatprep.mubr.msk.bf16.mxu1 %vm14572_vm1, %v17366_v15  ;;  %v559_v21 = vsel %vm554_vm3, %v553_v20, 0 }
 0x29b   :  { %12883 = vmatprep.subr.bf16.mxu1 %v17366_v15 }
 0x29d   :  { %v525_v25 = vpop.permute.xlu1 %524 }
 0x29e   :  { %12884 = vmatpush3.bf16.msra.mxu1 %v370_v19  ;;  %v534_v29 = vpack.c.bf16 %v525_v25, %v525_v25 }
 0x29f   :  { %12897 = vmatprep.subr.bf16.mxu1 %v17366_v15 }
 0x2a1   :  { %12886 = vmatmul.mubr.msk.bf16.vlgmr.msra.gmra.mrb[8].mxu1 %vm143_vm0, %v352_v51 }
 0x2a2   :  { %12899 = vmatprep.mubr.msk.bf16.mxu1 %vm14572_vm1, %v17366_v15 }
 0x2a7   :  { %12898 = vmatpush3.bf16.xpose.msra.mxu1 %v559_v21 }
 0x2a8   :  { %12909 = vmatprep.subr.bf16.mxu1 %v17366_v15 }
 0x2ae   :  { %12900 = vmatmul.mubr.msk.bf16.vlgmr.msra.gmra.mrb[12].mxu1 %vm554_vm3, %v533_v22 }
 0x2af   :  { %12911 = vmatprep.mubr.msk.bf16.mxu1 %vm14572_vm1, %v17366_v15 }
 0x2fe   :  { %v603_v23 = vpop.permute.xlu0 %602 }
 0x2ff   :  { %v608_v24 = vsel %vm554_vm3, %v603_v23, 0 }
 0x300   :  { %12904 = vmatpush3.bf16.xpose.msra.mxu0 %v608_v24  ;;  %v518_v24 = vadd.f32 %v14726_v54, %v14729_v63 }
 0x301   :  { %12915 = vmatprep.subr.bf16.mxu0 %v17366_v15 }
 0x302   :  { %v652_v26 = vpop.permute.xlu0 %651  ;;  %v701_v28 = vpop.permute.xlu1 %700  ;;  %v14837_v54 = vpack.c.bf16 %v518_v24, %v518_v24  ;;  %v14841_v63 = vmul.f32 0.35355338, %v518_v24 }
 0x303   :  { %v657_v27 = vsel %vm554_vm3, %v652_v26, 0  ;;  %v706_v31 = vsel %vm554_vm3, %v701_v28, 0 }
 0x304   :  { %12910 = vmatpush3.bf16.xpose.msra.mxu1 %v657_v27 }
 0x305   :  { %12921 = vmatprep.subr.bf16.mxu1 %v17366_v15 }
 0x306   :  { %v528_v30 = vpop.permute.xlu0 %527  ;;  %v531_v33 = vpop.permute.xlu1 %530 }
 0x307   :  { %12906 = vmatmul.mubr.msk.bf16.vlgmr.msra.gmra.mrb[8].mxu0 %vm554_vm3, %v534_v29  ;;  %v535_v32 = vpack.c.bf16 %v528_v30, %v528_v30  ;;  %v536_v34 = vpack.c.bf16 %v531_v33, %v531_v33 }
 0x308   :  { %12916 = vmatpush3.bf16.xpose.msra.mxu0 %v706_v31  ;;  %12917 = vmatprep.mubr.msk.bf16.mxu0 %vm14572_vm1, %v17366_v15 }
 0x309   :  { %12927 = vmatprep.subr.bf16.mxu0 %v17366_v15 }
 0x30b   :  { %12912 = vmatmul.mubr.msk.bf16.vlgmr.msra.gmra.mrb[16].mxu1 %vm554_vm3, %v535_v32 }
 0x30c   :  { %12923 = vmatprep.mubr.msk.bf16.mxu1 %vm14572_vm1, %v17366_v15 }
 0x30f   :  { %12918 = vmatmul.mubr.msk.bf16.vlgmr.msra.gmra.mrb[12].mxu0 %vm554_vm3, %v536_v34 }
 0x310   :  { %12929 = vmatprep.mubr.msk.bf16.mxu0 %vm14572_vm1, %v17366_v15 }
 0x36c   :  { %v14805_v35 = vpop.f32.mrb[4].mxu1 }
 0x36d   :  { %v12871_v36 = vpop.f32.mrb[5].mxu1 }
 0x36e   :  { %v14807_v37 = vpop.f32.mrb[6].mxu1 }
 0x36f   :  { %v12872_v38 = vpop.f32.mrb[7].mxu1 }
 0x374   :  { %v14809_v39 = vpop.f32.mrb[8].mxu1 }
 0x375   :  { %v12887_v40 = vpop.f32.mrb[9].mxu1 }
 0x376   :  { %v14811_v41 = vpop.f32.mrb[10].mxu1 }
 0x377   :  { %v12888_v42 = vpop.f32.mrb[11].mxu1 }
 0x381   :  { %v595_v43 = vpop.f32.mrb[12].mxu1 }
 0x382   :  { %v12901_v44 = vpop.f32.mrb[13].mxu1  ;;  %v748_v45 = vsel %vm554_vm3, %v595_v43, -inf }
 0x383   :  { %749 = vmax.xlane.f32.xlu0 %v748_v45  ;;  %v598_v46 = vpop.f32.mrb[14].mxu1 }
 0x384   :  { %v12902_v47 = vpop.f32.mrb[15].mxu1 }
 0x3da   :  { %v644_v48 = vpop.f32.mrb[8].mxu0 }
 0x3db   :  { %v12907_v49 = vpop.f32.mrb[9].mxu0  ;;  %v751_v50 = vsel %vm554_vm3, %v644_v48, -inf }
 0x3dc   :  { %752 = vmax.xlane.f32.xlu1 %v751_v50  ;;  %v647_v51 = vpop.f32.mrb[10].mxu0 }
 0x3dd   :  { %v12908_v52 = vpop.f32.mrb[11].mxu0 }
 0x3de   :  { %v693_v53 = vpop.f32.mrb[16].mxu1 }
 0x3df   :  { %v12913_v55 = vpop.f32.mrb[17].mxu1  ;;  %v754_v56 = vsel %vm554_vm3, %v693_v53, -inf }
 0x3e0   :  { %755 = vmax.xlane.f32.xlu0 %v754_v56  ;;  %v696_v57 = vpop.f32.mrb[18].mxu1 }
 0x3e1   :  { %v12914_v58 = vpop.f32.mrb[19].mxu1 }
 0x3e2   :  { %v742_v59 = vpop.f32.mrb[12].mxu0 }
 0x3e3   :  { %v12919_v60 = vpop.f32.mrb[13].mxu0  ;;  %v757_v61 = vsel %vm554_vm3, %v742_v59, -inf }
 0x3e4   :  { %758 = vmax.xlane.f32.xlu0 %v757_v61  ;;  %v745_v62 = vpop.f32.mrb[14].mxu0 }
 0x3e5   :  { %v12920_v1 = vpop.f32.mrb[15].mxu0 }
 0x3e6   :  { %v58_v1 = vld [vmem:[%s17358_s6 + $0x4] sm:$0xf] }
 0x410   :  { %v750_v2 = vpop.xlane.xlu0 %749 }
 0x411   :  { %v760_v5 = vsub.f32 %v595_v43, %v750_v2  ;;  %v14894_v2 = vsel %vm801_vm4, %v58_v1, 0 }
 0x413   :  { %v764_v6 = vmul.f32 1.442695, %v760_v5  ;;  %v59_v5 = vld [vmem:[%s17358_s6 + $0x8] sm:$0xf] }
 0x415   :  { %14226 = vpow2.f32 %v764_v6 }
 0x41f   :  { %v14227_v8 = vpop.eup %14226 }
 0x420   :  { %v772_v9 = vsel %vm554_vm3, %v14227_v8, 0.0 }
 0x421   :  { %773 = vadd.xlane.f32.xlu0 %v772_v9 }
 0x469   :  { %v753_v10 = vpop.xlane.xlu1 %752 }
 0x46a   :  { %v761_v12 = vsub.f32 %v644_v48, %v753_v10  ;;  %v14902_v10 = vsel %vm801_vm4, %v59_v5, 0 }
 0x46c   :  { %v766_v16 = vmul.f32 1.442695, %v761_v12  ;;  %v60_v12 = vld [vmem:[%s17358_s6 + $0xc] sm:$0xf] }
 0x46d   :  { %v756_v17 = vpop.xlane.xlu0 %755 }
 0x46e   :  { %14228 = vpow2.f32 %v766_v16  ;;  %v762_v18 = vsub.f32 %v693_v53, %v756_v17  ;;  %v57_v53 = vld [vmem:[%s17358_s6] sm:$0xf] }
 0x46f   :  { %v14874_v56 = vsel %vm801_vm4, %v57_v53, 0 }
 0x470   :  { %v768_v19 = vmul.f32 1.442695, %v762_v18 }
 0x471   :  { %v759_v25 = vpop.xlane.xlu0 %758 }
 0x472   :  { %14230 = vpow2.f32 %v768_v19  ;;  %v763_v26 = vsub.f32 %v742_v59, %v759_v25 }
 0x474   :  { %v770_v27 = vmul.f32 1.442695, %v763_v26 }
 0x476   :  { %14232 = vpow2.f32 %v770_v27 }
 0x478   :  { %v14229_v20 = vpop.eup %14228 }
 0x479   :  { %v775_v21 = vsel %vm554_vm3, %v14229_v20, 0.0 }
 0x47a   :  { %776 = vadd.xlane.f32.xlu1 %v775_v21  ;;  %v14912_v21 = vsel %vm801_vm4, %v60_v12, 0 }
 0x47c   :  { %v14231_v22 = vpop.eup %14230 }
 0x47d   :  { %v778_v23 = vsel %vm554_vm3, %v14231_v22, 0.0 }
 0x47e   :  { %779 = vadd.xlane.f32.xlu0 %v778_v23 }
 0x480   :  { %v14830_v28 = vpop.eup %14232 }
 0x48b   :  { %845 = vrot.lane.b32.xlu1 %v14761_v11, %s14577_s25  ;;  %v781_v11 = vsel %vm554_vm3, %v14830_v28, 0.0 }
 0x48f   :  { %893 = vrot.lane.b32.xlu1 %v14765_v13, %s14577_s25 }
 0x494   :  { %796 = vrot.lane.b32.xlu0 %v14756_v7, %s14577_s25 }
 0x498   :  { %1199 = vrot.lane.b32.xlu0 %v518_v24, %s14574_s15 }
 0x49c   :  { %1205 = vrot.lane.b32.xlu0 %v518_v24, %s14575_s18 }
 0x4ae   :  { %v774_v7 = vpop.xlane.xlu0 %773 }
 0x4af   :  { %14234 = vrcp.f32 %v774_v7 }
 0x4b3   :  { %782 = vadd.xlane.f32.xlu1 %v781_v11 }
 0x4b9   :  { %v14235_v29 = vpop.eup %14234 }
 0x4ba   :  { %v788_v32 = vmul.f32 %v14235_v29, %v14227_v8 }
 0x4bc   :  { %v792_v40 = vpack.c.bf16 %v788_v32, %v788_v32 }
 0x4c4   :  { %941 = vrot.lane.b32.xlu1 %v14767_v14, %s14577_s25 }
 0x4c8   :  { %1202 = vrot.lane.b32.xlu1 %v518_v24, %s14573_s14 }
 0x4cc   :  { %1213 = vrot.lane.b32.xlu1 %v14837_v54, %s14576_s21 }
 0x4d0   :  { %1185 = vrot.lane.b32.xlu1 %v14841_v63, %s14574_s15 }
 0x507   :  { %v777_v13 = vpop.xlane.xlu1 %776 }
 0x508   :  { %14236 = vrcp.f32 %v777_v13 }
 0x50b   :  { %v846_v30 = vpop.permute.xlu1 %845  ;;  %v780_v14 = vpop.xlane.xlu0 %779 }
 0x50c   :  { %v851_v31 = vsel %vm801_vm4, %v846_v30, 0  ;;  %14238 = vrcp.f32 %v780_v14  ;;  %v1194_v30 = vpack.c.bf16 %v14841_v63, %v14841_v63 }
 0x50d   :  { %12928 = vmatpush3.bf16.msra.mxu0 %v851_v31 }
 0x50e   :  { %12939 = vmatprep.subr.bf16.mxu0 %v17366_v15 }
 0x50f   :  { %v797_v33 = vpop.permute.xlu0 %796  ;;  %v894_v36 = vpop.permute.xlu1 %893 }
 0x510   :  { %v803_v34 = vsel %vm801_vm4, %v797_v33, 0  ;;  %v899_v44 = vsel %vm801_vm4, %v894_v36, 0 }
 0x511   :  { %12922 = vmatpush3.bf16.msra.mxu1 %v803_v34 }
 0x512   :  { %v14237_v38 = vpop.eup %14236  ;;  %12933 = vmatprep.subr.bf16.mxu1 %v17366_v15 }
 0x513   :  { %v1200_v42 = vpop.permute.xlu0 %1199  ;;  %v789_v43 = vmul.f32 %v14237_v38, %v14229_v20 }
 0x514   :  { %v14850_v45 = vpack.c.bf16 %v1200_v42, %v1200_v42  ;;  %12924 = vmatmul.mubr.msk.bf16.vlgmr.msra.gmra.mrb[20].mxu1 %vm554_vm3, %v792_v40 }
 0x515   :  { %12934 = vmatpush3.bf16.msra.mxu1 %v899_v44  ;;  %v793_v46 = vpack.c.bf16 %v789_v43, %v789_v43  ;;  %12935 = vmatprep.mubr.msk.bf16.mxu1 %vm14572_vm1, %v17366_v15 }
 0x516   :  { %v14239_v47 = vpop.eup %14238  ;;  %1262 = vrot.lane.b32.xlu0 %v14850_v45, %s14576_s21  ;;  %12945 = vmatprep.subr.bf16.mxu1 %v17366_v15 }
 0x517   :  { %12930 = vmatmul.mubr.msk.bf16.vlgmr.msra.gmra.mrb[16].mxu0 %vm554_vm3, %v793_v46  ;;  %v1206_v48 = vpop.permute.xlu0 %1205  ;;  %v790_v49 = vmul.f32 %v14239_v47, %v14231_v22 }
 0x518   :  { %v14859_v50 = vpack.c.bf16 %v1206_v48, %v1206_v48  ;;  %12941 = vmatprep.mubr.msk.bf16.mxu0 %vm14572_vm1, %v17366_v15 }
 0x519   :  { %v794_v51 = vpack.c.bf16 %v790_v49, %v790_v49 }
 0x51a   :  { %1360 = vrot.lane.b32.xlu1 %v14859_v50, %s14576_s21 }
 0x51c   :  { %12936 = vmatmul.mubr.msk.bf16.vlgmr.msra.gmra.mrb[24].mxu1 %vm554_vm3, %v794_v51 }
 0x51d   :  { %12947 = vmatprep.mubr.msk.bf16.mxu1 %vm14572_vm1, %v17366_v15  ;;  %12946 = vmatpush3.bf16.msra.mxu1 %v14874_v56 }
 0x51e   :  { %1191 = vrot.lane.b32.xlu1 %v14841_v63, %s14575_s18  ;;  %12957 = vmatprep.subr.bf16.mxu1 %v17366_v15 }
 0x540   :  { %v783_v52 = vpop.xlane.xlu1 %782 }
 0x541   :  { %14240 = vrcp.f32 %v783_v52 }
 0x544   :  { %v942_v55 = vpop.permute.xlu1 %941 }
 0x545   :  { %v947_v57 = vsel %vm801_vm4, %v942_v55, 0 }
 0x546   :  { %12940 = vmatpush3.bf16.msra.mxu0 %v947_v57 }
 0x547   :  { %12951 = vmatprep.subr.bf16.mxu0 %v17366_v15 }
 0x548   :  { %v1203_v58 = vpop.permute.xlu1 %1202 }
 0x549   :  { %v14880_v59 = vpack.c.bf16 %v1203_v58, %v1203_v58 }
 0x54b   :  { %v14241_v60 = vpop.eup %14240  ;;  %1311 = vrot.lane.b32.xlu0 %v14880_v59, %s14576_s21 }
 0x54c   :  { %v791_v61 = vmul.f32 %v14241_v60, %v14830_v28  ;;  %v1214_v25 = vpop.permute.xlu1 %1213 }
 0x54d   :  { %v1219_v7 = vsel %vm554_vm3, %v1214_v25, 0 }
 0x54e   :  { %v795_v62 = vpack.c.bf16 %v791_v61, %v791_v61 }
 0x54f   :  { %1188 = vrot.lane.b32.xlu0 %v14841_v63, %s14573_s14 }
 0x550   :  { %12942 = vmatmul.mubr.msk.bf16.vlgmr.msra.gmra.mrb[20].mxu0 %vm554_vm3, %v795_v62  ;;  %v1186_v42 = vpop.permute.xlu1 %1185 }
 0x551   :  { %12953 = vmatprep.mubr.msk.bf16.mxu0 %vm14572_vm1, %v17366_v15  ;;  %12952 = vmatpush3.bf16.msra.mxu0 %v14894_v2  ;;  %v1195_v44 = vpack.c.bf16 %v1186_v42, %v1186_v42 }
 0x552   :  { %12963 = vmatprep.subr.bf16.mxu0 %v17366_v15 }
 0x588   :  { %v1263_v13 = vpop.permute.xlu0 %1262 }
 0x589   :  { %v1268_v38 = vsel %vm554_vm3, %v1263_v13, 0 }
 0x58c   :  { %v1361_v43 = vpop.permute.xlu1 %1360 }
 0x58d   :  { %v1366_v46 = vsel %vm554_vm3, %v1361_v43, 0 }
 0x590   :  { %v1192_v47 = vpop.permute.xlu1 %1191 }
 0x591   :  { %v1197_v48 = vpack.c.bf16 %v1192_v47, %v1192_v47 }
 0x5bd   :  { %v1312_v29 = vpop.permute.xlu0 %1311 }
 0x5be   :  { %v1317_v14 = vsel %vm554_vm3, %v1312_v29, 0 }
 0x5c1   :  { %v1189_v31 = vpop.permute.xlu0 %1188 }
 0x5c2   :  { %v1196_v32 = vpack.c.bf16 %v1189_v31, %v1189_v31 }
 0x5e7   :  { %v839_v6 = vpop.f32.mrb[20].mxu1 }
 0x5e8   :  { %v989_v8 = vpack.c.bf16 %v839_v6, %v839_v6  ;;  %v12925_v9 = vpop.f32.mrb[21].mxu1 }
 0x5e9   :  { %v842_v16 = vpop.f32.mrb[22].mxu1 }
 0x5ea   :  { %v12926_v17 = vpop.f32.mrb[23].mxu1  ;;  %v887_v18 = vpop.f32.mrb[16].mxu0  ;;  %12948 = vmatmul.mubr.msk.bf16.vlgmr.msra.gmra.mrb[28].mxu1 %vm554_vm3, %v989_v8 }
 0x5eb   :  { %v990_v19 = vpack.c.bf16 %v887_v18, %v887_v18  ;;  %12958 = vmatpush3.bf16.msra.mxu1 %v14902_v10  ;;  %v12931_v20 = vpop.f32.mrb[17].mxu0  ;;  %12959 = vmatprep.mubr.msk.bf16.mxu1 %vm14572_vm1, %v17366_v15 }
 0x5ec   :  { %v890_v22 = vpop.f32.mrb[18].mxu0  ;;  %12969 = vmatprep.subr.bf16.mxu1 %v17366_v15 }
 0x5ed   :  { %v12932_v23 = vpop.f32.mrb[19].mxu0  ;;  %12954 = vmatmul.mubr.msk.bf16.vlgmr.msra.gmra.mrb[24].mxu0 %vm554_vm3, %v990_v19 }
 0x5ee   :  { %12964 = vmatpush3.bf16.msra.mxu0 %v14912_v21  ;;  %12965 = vmatprep.mubr.msk.bf16.mxu0 %vm14572_vm1, %v17366_v15 }
 0x5ef   :  { %v935_v24 = vpop.f32.mrb[24].mxu1  ;;  %12975 = vmatprep.subr.bf16.mxu0 %v17366_v15 }
 0x5f0   :  { %v991_v26 = vpack.c.bf16 %v935_v24, %v935_v24  ;;  %v12937_v27 = vpop.f32.mrb[25].mxu1 }
 0x5f1   :  { %v938_v28 = vpop.f32.mrb[26].mxu1 }
 0x5f2   :  { %v12938_v11 = vpop.f32.mrb[27].mxu1  ;;  %12960 = vmatmul.mubr.msk.bf16.vlgmr.msra.gmra.mrb[32].mxu1 %vm554_vm3, %v991_v26 }
 0x5f3   :  { %12971 = vmatprep.mubr.msk.bf16.mxu1 %vm14572_vm1, %v17366_v15 }
 0x5f4   :  { %12970 = vmatpush3.bf16.xpose.msra.mxu1 %v1219_v7 }
 0x5f5   :  { %12981 = vmatprep.subr.bf16.mxu1 %v17366_v15 }
 0x5fb   :  { %12972 = vmatmul.mubr.msk.bf16.vlgmr.msra.gmra.mrb[36].mxu1 %vm554_vm3, %v1194_v30 }
 0x5fc   :  { %12982 = vmatpush3.bf16.xpose.msra.mxu1 %v1317_v14  ;;  %12983 = vmatprep.mubr.msk.bf16.mxu1 %vm14572_vm1, %v17366_v15 }
 0x5fd   :  { %12993 = vmatprep.subr.bf16.mxu1 %v17366_v15 }
 0x603   :  { %12984 = vmatmul.mubr.msk.bf16.vlgmr.msra.gmra.mrb[40].mxu1 %vm554_vm3, %v1196_v32 }
 0x604   :  { %12995 = vmatprep.mubr.msk.bf16.mxu1 %vm14572_vm1, %v17366_v15 }
 0x623   :  { %v983_v33 = vpop.f32.mrb[20].mxu0 }
 0x624   :  { %v992_v34 = vpack.c.bf16 %v983_v33, %v983_v33  ;;  %v12943_v63 = vpop.f32.mrb[21].mxu0 }
 0x625   :  { %v986_v36 = vpop.f32.mrb[22].mxu0 }
 0x626   :  { %v12944_v40 = vpop.f32.mrb[23].mxu0  ;;  %12966 = vmatmul.mubr.msk.bf16.vlgmr.msra.gmra.mrb[28].mxu0 %vm554_vm3, %v992_v34 }
 0x627   :  { %12976 = vmatpush3.bf16.xpose.msra.mxu0 %v1268_v38  ;;  %12977 = vmatprep.mubr.msk.bf16.mxu0 %vm14572_vm1, %v17366_v15 }
 0x628   :  { %12987 = vmatprep.subr.bf16.mxu0 %v17366_v15 }
 0x62e   :  { %12978 = vmatmul.mubr.msk.bf16.vlgmr.msra.gmra.mrb[32].mxu0 %vm554_vm3, %v1195_v44 }
 0x62f   :  { %12988 = vmatpush3.bf16.xpose.msra.mxu0 %v1366_v46  ;;  %12989 = vmatprep.mubr.msk.bf16.mxu0 %vm14572_vm1, %v17366_v15 }
 0x630   :  { %12999 = vmatprep.subr.bf16.mxu0 %v17366_v15 }
 0x636   :  { %12990 = vmatmul.mubr.msk.bf16.vlgmr.msra.gmra.mrb[36].mxu0 %vm554_vm3, %v1197_v48 }
 0x637   :  { %13001 = vmatprep.mubr.msk.bf16.mxu0 %vm14572_vm1, %v17366_v15 }
 0x6bd   :  { %v1033_v49 = vpop.f32.mrb[28].mxu1 }
 0x6be   :  { %v12949_v51 = vpop.f32.mrb[29].mxu1  ;;  %v1177_v57 = vsel %vm143_vm0, %v1033_v49, 0.0 }
 0x6bf   :  { %v1036_v52 = vpop.f32.mrb[30].mxu1 }
 0x6c0   :  { %v12950_v53 = vpop.f32.mrb[31].mxu1  ;;  %v1079_v55 = vpop.f32.mrb[24].mxu0 }
 0x6c1   :  { %v1178_v58 = vsel %vm143_vm0, %v1079_v55, 0.0  ;;  %v12955_v60 = vpop.f32.mrb[25].mxu0 }
 0x6c2   :  { %v1179_v61 = vadd.f32 %v1178_v58, %v1177_v57  ;;  %v1082_v62 = vpop.f32.mrb[26].mxu0 }
 0x6c3   :  { %v12956_v1 = vpop.f32.mrb[27].mxu0 }
 0x6c5   :  { %v1125_v5 = vpop.f32.mrb[32].mxu1 }
 0x6c6   :  { %v1180_v6 = vsel %vm143_vm0, %v1125_v5, 0.0  ;;  %v12961_v8 = vpop.f32.mrb[33].mxu1  ;;  %v14965_v5 = vld [vmem:[%s17356_s11 + $0x2] ss:$0 sm:$0xff] }
 0x6c7   :  { %v1181_v9 = vadd.f32 %v1180_v6, %v1179_v61  ;;  %v1128_v12 = vpop.f32.mrb[34].mxu1 }
 0x6c8   :  { %v12962_v16 = vpop.f32.mrb[35].mxu1 }
 0x6ce   :  { %v1255_v17 = vpop.f32.mrb[36].mxu1 }
 0x6cf   :  { %v12973_v18 = vpop.f32.mrb[37].mxu1  ;;  %v1408_v19 = vsel %vm554_vm3, %v1255_v17, -inf }
 0x6d0   :  { %v1258_v20 = vpop.f32.mrb[38].mxu1  ;;  %1409 = vmax.xlane.f32.xlu0 %v1408_v19 }
 0x6d1   :  { %v12974_v22 = vpop.f32.mrb[39].mxu1 }
 0x6d6   :  { %v1353_v23 = vpop.f32.mrb[40].mxu1 }
 0x6d7   :  { %v12985_v24 = vpop.f32.mrb[41].mxu1  ;;  %v1414_v25 = vsel %vm554_vm3, %v1353_v23, -inf }
 0x6d8   :  { %1415 = vmax.xlane.f32.xlu0 %v1414_v25  ;;  %v1356_v26 = vpop.f32.mrb[42].mxu1 }
 0x6d9   :  { %v12986_v27 = vpop.f32.mrb[43].mxu1 }
 0x6f9   :  { %v1171_v28 = vpop.f32.mrb[28].mxu0 }
 0x6fa   :  { %v1182_v11 = vsel %vm143_vm0, %v1171_v28, 0.0  ;;  %v12967_v7 = vpop.f32.mrb[29].mxu0 }
 0x6fb   :  { %v1183_v13 = vadd.f32 %v1182_v11, %v1181_v9  ;;  %v1174_v29 = vpop.f32.mrb[30].mxu0 }
 0x6fc   :  { %v12968_v30 = vpop.f32.mrb[31].mxu0 }
 0x6fd   :  { %v1831_v1 = vadd.f32 %v1183_v13, %v14647_v0 }
 0x6ff   :  { %v14968_v6 = vadd.f32 %v14965_v5, %v1831_v1 }
 0x701   :  { %v1304_v14 = vpop.f32.mrb[32].mxu0 }
 0x702   :  { %v12979_v31 = vpop.f32.mrb[33].mxu0  ;;  %v1411_v32 = vsel %vm554_vm3, %v1304_v14, -inf }
 0x703   :  { %1412 = vmax.xlane.f32.xlu1 %v1411_v32  ;;  %v1307_v33 = vpop.f32.mrb[34].mxu0 }
 0x704   :  { %v12980_v34 = vpop.f32.mrb[35].mxu0 }
 0x709   :  { %v1402_v63 = vpop.f32.mrb[36].mxu0 }
 0x70a   :  { %v12991_v36 = vpop.f32.mrb[37].mxu0  ;;  %v1417_v38 = vsel %vm554_vm3, %v1402_v63, -inf }
 0x70b   :  { %1418 = vmax.xlane.f32.xlu0 %v1417_v38  ;;  %v1405_v40 = vpop.f32.mrb[38].mxu0 }
 0x70c   :  { %v12992_v42 = vpop.f32.mrb[39].mxu0 }
 0x75d   :  { %v1410_v43 = vpop.xlane.xlu0 %1409 }
 0x75e   :  { %v1420_v44 = vsub.f32 %v1255_v17, %v1410_v43 }
 0x760   :  { %v1424_v46 = vmul.f32 1.442695, %v1420_v44 }
 0x762   :  { %14242 = vpow2.f32 %v1424_v46 }
 0x765   :  { %v1416_v47 = vpop.xlane.xlu0 %1415 }
 0x766   :  { %v1422_v48 = vsub.f32 %v1353_v23, %v1416_v47 }
 0x768   :  { %v1428_v49 = vmul.f32 1.442695, %v1422_v48 }
 0x76a   :  { %14244 = vpow2.f32 %v1428_v49 }
 0x76c   :  { %v14243_v51 = vpop.eup %14242 }
 0x76d   :  { %v1432_v52 = vsel %vm554_vm3, %v14243_v51, 0.0 }
 0x76e   :  { %1433 = vadd.xlane.f32.xlu0 %v1432_v52 }
 0x774   :  { %v14245_v53 = vpop.eup %14244 }
 0x775   :  { %v1438_v55 = vsel %vm554_vm3, %v14245_v53, 0.0 }
 0x776   :  { %1439 = vadd.xlane.f32.xlu0 %v1438_v55 }
 0x78c   :  { %1456 = vrot.lane.b32.xlu0 %v14837_v54, %s14577_s25  ;;  %v1839_v54 = vsel %vm143_vm0, %v14968_v6, 0.0 }
 0x790   :  { %v1413_v57 = vpop.xlane.xlu1 %1412 }
 0x791   :  { %v1421_v58 = vsub.f32 %v1304_v14, %v1413_v57 }
 0x793   :  { %v1426_v60 = vmul.f32 1.442695, %v1421_v58 }
 0x795   :  { %14246 = vpow2.f32 %v1426_v60 }
 0x798   :  { %v1419_v8 = vpop.xlane.xlu0 %1418 }
 0x799   :  { %v1423_v0 = vsub.f32 %v1402_v63, %v1419_v8 }
 0x79b   :  { %v1430_v9 = vmul.f32 1.442695, %v1423_v0 }
 0x79d   :  { %14248 = vpow2.f32 %v1430_v9 }
 0x79f   :  { %v14247_v61 = vpop.eup %14246 }
 0x7a0   :  { %v1435_v62 = vsel %vm554_vm3, %v14247_v61, 0.0 }
 0x7a1   :  { %1436 = vadd.xlane.f32.xlu1 %v1435_v62 }
 0x7a7   :  { %v14249_v12 = vpop.eup %14248 }
 0x7a8   :  { %v1441_v16 = vsel %vm554_vm3, %v14249_v12, 0.0 }
 0x7ab   :  { %1840 = vadd.xlane.f32.xlu0 %v1839_v54 }
 0x7b2   :  { %1504 = vrot.lane.b32.xlu1 %v14850_v45, %s14577_s25 }
 0x7b6   :  { %1552 = vrot.lane.b32.xlu1 %v14880_v59, %s14577_s25 }
 0x7da   :  { %1442 = vadd.xlane.f32.xlu1 %v1441_v16 }
 0x7eb   :  { %1600 = vrot.lane.b32.xlu1 %v14859_v50, %s14577_s25 }
 0x7fb   :  { %v1434_v17 = vpop.xlane.xlu0 %1433 }
 0x7fc   :  { %14250 = vrcp.f32 %v1434_v17 }
 0x803   :  { %v1440_v18 = vpop.xlane.xlu0 %1439 }
 0x804   :  { %14252 = vrcp.f32 %v1440_v18 }
 0x806   :  { %v14251_v19 = vpop.eup %14250 }
 0x807   :  { %v1457_v20 = vpop.permute.xlu0 %1456  ;;  %v1448_v45 = vmul.f32 %v14251_v19, %v14243_v51 }
 0x808   :  { %v1462_v22 = vsel %vm801_vm4, %v1457_v20, 0 }
 0x809   :  { %12994 = vmatpush3.bf16.msra.mxu1 %v1462_v22  ;;  %v1452_v59 = vpack.c.bf16 %v1448_v45, %v1448_v45 }
 0x80a   :  { %13005 = vmatprep.subr.bf16.mxu1 %v17366_v15 }
 0x80c   :  { %12996 = vmatmul.mubr.msk.bf16.vlgmr.msra.gmra.mrb[44].mxu1 %vm554_vm3, %v1452_v59 }
 0x80d   :  { %13007 = vmatprep.mubr.msk.bf16.mxu1 %vm14572_vm1, %v17366_v15 }
 0x80e   :  { %v14253_v50 = vpop.eup %14252 }
 0x80f   :  { %v1450_v26 = vmul.f32 %v14253_v50, %v14245_v53 }
 0x811   :  { %v1454_v29 = vpack.c.bf16 %v1450_v26, %v1450_v26 }
 0x82e   :  { %v1437_v23 = vpop.xlane.xlu1 %1436 }
 0x82f   :  { %14254 = vrcp.f32 %v1437_v23 }
 0x832   :  { %v1505_v24 = vpop.permute.xlu1 %1504 }
 0x833   :  { %v1510_v25 = vsel %vm801_vm4, %v1505_v24, 0 }
 0x834   :  { %13000 = vmatpush3.bf16.msra.mxu0 %v1510_v25 }
 0x835   :  { %13011 = vmatprep.subr.bf16.mxu0 %v17366_v15 }
 0x836   :  { %v1553_v27 = vpop.permute.xlu1 %1552 }
 0x837   :  { %v1558_v28 = vsel %vm801_vm4, %v1553_v27, 0 }
 0x838   :  { %v1841_v11 = vpop.xlane.xlu0 %1840  ;;  %13006 = vmatpush3.bf16.msra.mxu1 %v1558_v28 }
 0x839   :  { %v14255_v7 = vpop.eup %14254  ;;  %v1845_v13 = vmul.f32 0.03125, %v1841_v11  ;;  %13017 = vmatprep.subr.bf16.mxu1 %v17366_v15 }
 0x83a   :  { %v1449_v30 = vmul.f32 %v14255_v7, %v14247_v61 }
 0x83b   :  { %v14989_v14 = vsub.f32 %v14968_v6, %v1845_v13  ;;  %13008 = vmatmul.mubr.msk.bf16.vlgmr.msra.gmra.mrb[48].mxu1 %vm554_vm3, %v1454_v29 }
 0x83c   :  { %v1453_v31 = vpack.c.bf16 %v1449_v30, %v1449_v30  ;;  %13018 = vmatpush3.bf16.msra.mxu1 %v14874_v56  ;;  %13019 = vmatprep.mubr.msk.bf16.mxu1 %vm14572_vm1, %v17366_v15 }
 0x83d   :  { %v1849_v32 = vmul.f32 %v14989_v14, %v14989_v14  ;;  %13029 = vmatprep.subr.bf16.mxu1 %v17366_v15 }
 0x83e   :  { %13002 = vmatmul.mubr.msk.bf16.vlgmr.msra.gmra.mrb[40].mxu0 %vm554_vm3, %v1453_v31  ;;  %v14526_v31 = vld [vmem:[%s17352_s0 + $0x8] sm:$0xff] }
 0x83f   :  { %v1851_v33 = vsel %vm143_vm0, %v1849_v32, 0.0  ;;  %13013 = vmatprep.mubr.msk.bf16.mxu0 %vm14572_vm1, %v17366_v15 }
 0x840   :  { %1852 = vadd.xlane.f32.xlu0 %v1851_v33 }
 0x867   :  { %v1443_v34 = vpop.xlane.xlu1 %1442 }
 0x868   :  { %14256 = vrcp.f32 %v1443_v34 }
 0x86b   :  { %v1601_v63 = vpop.permute.xlu1 %1600 }
 0x86c   :  { %v1606_v36 = vsel %vm801_vm4, %v1601_v63, 0 }
 0x86d   :  { %13012 = vmatpush3.bf16.msra.mxu0 %v1606_v36 }
 0x86e   :  { %13023 = vmatprep.subr.bf16.mxu0 %v17366_v15 }
 0x872   :  { %v14257_v38 = vpop.eup %14256 }
 0x873   :  { %v1451_v40 = vmul.f32 %v14257_v38, %v14249_v12 }
 0x875   :  { %v1455_v42 = vpack.c.bf16 %v1451_v40, %v1451_v40 }
 0x877   :  { %13014 = vmatmul.mubr.msk.bf16.vlgmr.msra.gmra.mrb[44].mxu0 %vm554_vm3, %v1455_v42 }
 0x878   :  { %13024 = vmatpush3.bf16.msra.mxu0 %v14894_v2  ;;  %13025 = vmatprep.mubr.msk.bf16.mxu0 %vm14572_vm1, %v17366_v15 }
 0x879   :  { %13035 = vmatprep.subr.bf16.mxu0 %v17366_v15 }
 0x8df   :  { %v1498_v43 = vpop.f32.mrb[44].mxu1 }
 0x8e0   :  { %v1648_v44 = vpack.c.bf16 %v1498_v43, %v1498_v43  ;;  %v12997_v46 = vpop.f32.mrb[45].mxu1  ;;  %v15046_v43 = vld [vmem:[%s17356_s11 + $0x3] ss:$0 sm:$0xff] }
 0x8e1   :  { %v1501_v47 = vpop.f32.mrb[46].mxu1 }
 0x8e2   :  { %v12998_v48 = vpop.f32.mrb[47].mxu1  ;;  %13020 = vmatmul.mubr.msk.bf16.vlgmr.msra.gmra.mrb[52].mxu1 %vm554_vm3, %v1648_v44 }
 0x8e3   :  { %13030 = vmatpush3.bf16.msra.mxu1 %v14902_v10  ;;  %13031 = vmatprep.mubr.msk.bf16.mxu1 %vm14572_vm1, %v17366_v15 }
 0x8e4   :  { %13041 = vmatprep.subr.bf16.mxu1 %v17366_v15 }
 0x90e   :  { %v1594_v49 = vpop.f32.mrb[48].mxu1 }
 0x90f   :  { %v1650_v51 = vpack.c.bf16 %v1594_v49, %v1594_v49  ;;  %v13009_v52 = vpop.f32.mrb[49].mxu1 }
 0x910   :  { %v1597_v53 = vpop.f32.mrb[50].mxu1 }
 0x911   :  { %v1546_v55 = vpop.f32.mrb[40].mxu0  ;;  %v13010_v57 = vpop.f32.mrb[51].mxu1  ;;  %13032 = vmatmul.mubr.msk.bf16.vlgmr.msra.gmra.mrb[56].mxu1 %vm554_vm3, %v1650_v51 }
 0x912   :  { %v1649_v58 = vpack.c.bf16 %v1546_v55, %v1546_v55  ;;  %v13003_v60 = vpop.f32.mrb[41].mxu0  ;;  %13042 = vmatpush3.bf16.msra.mxu1 %v14742_v4  ;;  %13045 = vmatprep.mubr.msk.bf16.mxu1 %vm14572_vm1, %v17366_v15 }
 0x913   :  { %v1549_v61 = vpop.f32.mrb[42].mxu0  ;;  %13043 = vmatprep.subr.bf16.mxu1 %v17366_v15 }
 0x914   :  { %v13004_v62 = vpop.f32.mrb[43].mxu0  ;;  %13026 = vmatmul.mubr.msk.bf16.vlgmr.msra.gmra.mrb[48].mxu0 %vm554_vm3, %v1649_v58  ;;  %v12183_v58 = vld [vmem:[%s17356_s11 + $0x9] ss:$0 sm:$0xff] }
 0x915   :  { %13036 = vmatpush3.bf16.msra.mxu0 %v14912_v21  ;;  %13037 = vmatprep.mubr.msk.bf16.mxu0 %vm14572_vm1, %v17366_v15 }
 0x916   :  { %13049 = vmatprep.subr.bf16.mxu0 %v17366_v15  ;;  %13044 = vmatpush3.bf16.msra.mxu1 %v14736_v3 }
 0x917   :  { %13055 = vmatprep.subr.bf16.mxu1 %v17366_v15 }
 0x94a   :  { %v1642_v4 = vpop.f32.mrb[44].mxu0 }
 0x94b   :  { %v1651_v1 = vpack.c.bf16 %v1642_v4, %v1642_v4  ;;  %v13015_v54 = vpop.f32.mrb[45].mxu0  ;;  %v12184_v4 = vld [vmem:[%s17356_s11 + $0xa] ss:$0 sm:$0xff] }
 0x94c   :  { %v1645_v8 = vpop.f32.mrb[46].mxu0 }
 0x94d   :  { %v13016_v0 = vpop.f32.mrb[47].mxu0  ;;  %13038 = vmatmul.mubr.msk.bf16.vlgmr.msra.gmra.mrb[52].mxu0 %vm554_vm3, %v1651_v1 }
 0x94e   :  { %13051 = vmatprep.mubr.msk.bf16.mxu0 %vm14572_vm1, %v17366_v15 }
 0x9b5   :  { %v1689_v9 = vpop.f32.mrb[52].mxu1 }
 0x9b6   :  { %v13021_v12 = vpop.f32.mrb[53].mxu1  ;;  %v1824_v22 = vsel %vm143_vm0, %v1689_v9, 0.0 }
 0x9b7   :  { %v1692_v16 = vpop.f32.mrb[54].mxu1 }
 0x9b8   :  { %v13022_v17 = vpop.f32.mrb[55].mxu1 }
 0x9e4   :  { %v1775_v18 = vpop.f32.mrb[56].mxu1 }
 0x9e5   :  { %v13033_v19 = vpop.f32.mrb[57].mxu1  ;;  %v1827_v25 = vsel %vm143_vm0, %v1775_v18, 0.0 }
 0x9e6   :  { %v1778_v20 = vpop.f32.mrb[58].mxu1 }
 0x9e7   :  { %v1732_v3 = vpop.f32.mrb[48].mxu0  ;;  %v13034_v45 = vpop.f32.mrb[59].mxu1 }
 0x9e8   :  { %v1825_v59 = vsel %vm143_vm0, %v1732_v3, 0.0  ;;  %v13027_v23 = vpop.f32.mrb[49].mxu0 }
 0x9e9   :  { %v1826_v50 = vadd.f32 %v1825_v59, %v1824_v22  ;;  %v1735_v24 = vpop.f32.mrb[50].mxu0 }
 0x9ea   :  { %v13028_v26 = vpop.f32.mrb[51].mxu0 }
 0x9eb   :  { %v1828_v27 = vadd.f32 %v1827_v25, %v1826_v50 }
 0xa20   :  { %v1818_v28 = vpop.f32.mrb[52].mxu0 }
 0xa21   :  { %v1829_v11 = vsel %vm143_vm0, %v1818_v28, 0.0  ;;  %v13039_v7 = vpop.f32.mrb[53].mxu0 }
 0xa22   :  { %v1830_v13 = vadd.f32 %v1829_v11, %v1828_v27  ;;  %v1821_v29 = vpop.f32.mrb[54].mxu0 }
 0xa23   :  { %v13040_v30 = vpop.f32.mrb[55].mxu0 }
 0xa24   :  { %v1832_v32 = vadd.f32 %v14526_v31, %v1830_v13 }
 0xa26   :  { %v15037_v33 = vadd.f32 %v14965_v5, %v1832_v32  ;;  %v1853_v5 = vpop.xlane.xlu0 %1852 }
 0xa27   :  { %v1857_v44 = vmul.f32 0.03125, %v1853_v5 }
 0xa28   :  { %v1842_v34 = vsel %vm143_vm0, %v15037_v33, 0.0 }
 0xa29   :  { %1843 = vadd.xlane.f32.xlu1 %v1842_v34  ;;  %v1859_v46 = vadd.f32 1e-05, %v1857_v44 }
 0xa2b   :  { %14258 = vrsqrt.f32 %v1859_v46 }
 0xa35   :  { %v14259_v55 = vpop.eup %14258 }
 0xab6   :  { %v1844_v63 = vpop.xlane.xlu1 %1843 }
 0xab7   :  { %v1846_v36 = vmul.f32 0.03125, %v1844_v63 }
 0xab9   :  { %v1848_v38 = vsub.f32 %v15037_v33, %v1846_v36 }
 0xabb   :  { %v1850_v40 = vmul.f32 %v1848_v38, %v1848_v38 }
 0xabd   :  { %v1854_v42 = vsel %vm143_vm0, %v1850_v40, 0.0 }
 0xabe   :  { %1855 = vadd.xlane.f32.xlu0 %v1854_v42 }
 0xad4   :  { %241 = vrot.lane.b32.xlu0 %v15046_v43, %s14576_s21 }
 0xb4b   :  { %v1856_v47 = vpop.xlane.xlu0 %1855 }
 0xb4c   :  { %v1858_v48 = vmul.f32 0.03125, %v1856_v47 }
 0xb4e   :  { %v1860_v49 = vadd.f32 1e-05, %v1858_v48 }
 0xb4f   :  { %v15050_v51 = vpop.permute.xlu0 %241 }
 0xb50   :  { %14260 = vrsqrt.f32 %v1860_v49  ;;  %v15054_v52 = vadd.f32 %v14805_v35, %v15050_v51  ;;  %v1863_v35 = vmul.f32 %v14259_v55, %v14989_v14 }
 0xb52   :  { %1947 = vrot.lane.b32.xlu0 %v15054_v52, %s14575_s18  ;;  %1941 = vrot.lane.b32.xlu1 %v15054_v52, %s14574_s15  ;;  %v15062_v53 = vpack.c.bf16 %v15054_v52, %v15054_v52  ;;  %v1869_v61 = vmul.f32 %v12183_v58, %v1863_v35 }
 0xb54   :  { %v15066_v57 = vsel %vm554_vm3, %v15062_v53, 0  ;;  %v1875_v54 = vadd.f32 %v12184_v4, %v1869_v61 }
 0xb55   :  { %13050 = vmatpush3.bf16.xpose.msra.mxu0 %v15066_v57 }
 0xb56   :  { %1944 = vrot.lane.b32.xlu1 %v15054_v52, %s14573_s14  ;;  %13061 = vmatprep.subr.bf16.mxu0 %v17366_v15 }
 0xb5a   :  { %v14261_v60 = vpop.eup %14260 }
 0xb5b   :  { %v1864_v62 = vmul.f32 %v14261_v60, %v1848_v38  ;;  %v17365_v60 = vmov 65535  }
 0xb5c   :  { %v2195_v61 = vsel %vm2193_vm6, 4294967295, %v17365_v60 }
 0xb5d   :  { %v1870_v1 = vmul.f32 %v12183_v58, %v1864_v62 }
 0xb5f   :  { %v1876_v8 = vadd.f32 %v12184_v4, %v1870_v1  ;;  %v15145_v1 = vsel %vm2194_vm7, %v2195_v61, 0 }
 0xb61   :  { %v1877_v0 = vpack.c.bf16 %v1876_v8, %v1875_v54 }
 0xb63   :  { %13046 = vmatmul.mubr.msk.bf16.vlgmr.msra.gmra.mrb[60].mxu1 %vm143_vm0, %v1877_v0 }
 0xb64   :  { %13057 = vmatprep.mubr.msk.bf16.mxu1 %vm14572_vm1, %v17366_v15 }
 0xbc4   :  { %v15082_v14 = vpop.permute.xlu1 %1941  ;;  %v15115_v50 = vpop.permute.xlu0 %1947 }
 0xbc5   :  { %v15086_v9 = vpack.c.bf16 %v15082_v14, %v15082_v14  ;;  %v15119_v24 = vpack.c.bf16 %v15115_v50, %v15115_v50 }
 0xbc7   :  { %v15090_v12 = vsel %vm554_vm3, %v15086_v9, 0  ;;  %v15124_v27 = vsel %vm554_vm3, %v15119_v24, 0 }
 0xbc8   :  { %13056 = vmatpush3.bf16.xpose.msra.mxu1 %v15090_v12  ;;  %v15094_v16 = vpop.permute.xlu1 %1944 }
 0xbc9   :  { %13067 = vmatprep.subr.bf16.mxu1 %v17366_v15  ;;  %v15101_v3 = vpack.c.bf16 %v15094_v16, %v15094_v16 }
 0xbcb   :  { %v15108_v23 = vsel %vm554_vm3, %v15101_v3, 0 }
 0xc36   :  { %v1917_v17 = vpop.f32.mrb[60].mxu1 }
 0xc37   :  { %v1918_v18 = vadd.f32 %v15046_v43, %v1917_v17  ;;  %v13047_v19 = vpop.f32.mrb[61].mxu1 }
 0xc38   :  { %v15097_v20 = vpop.f32.mrb[62].mxu1 }
 0xc39   :  { %v1924_v45 = vmul.f32 0.35355338, %v1918_v18  ;;  %v13048_v22 = vpop.f32.mrb[63].mxu1 }
 0xc3b   :  { %1933 = vrot.lane.b32.xlu0 %v1924_v45, %s14575_s18  ;;  %1927 = vrot.lane.b32.xlu1 %v1924_v45, %s14574_s15  ;;  %v1936_v59 = vpack.c.bf16 %v1924_v45, %v1924_v45 }
 0xc3d   :  { %13052 = vmatmul.mubr.msk.bf16.vlgmr.msra.gmra.mrb[56].mxu0 %vm554_vm3, %v1936_v59 }
 0xc3e   :  { %13062 = vmatpush3.bf16.xpose.msra.mxu0 %v15108_v23  ;;  %13063 = vmatprep.mubr.msk.bf16.mxu0 %vm14572_vm1, %v17366_v15 }
 0xc3f   :  { %1930 = vrot.lane.b32.xlu1 %v1924_v45, %s14573_s14  ;;  %13073 = vmatprep.subr.bf16.mxu0 %v17366_v15 }
 0xcad   :  { %v1928_v25 = vpop.permute.xlu1 %1927  ;;  %v1934_v7 = vpop.permute.xlu0 %1933 }
 0xcae   :  { %v1937_v26 = vpack.c.bf16 %v1928_v25, %v1928_v25  ;;  %v1939_v13 = vpack.c.bf16 %v1934_v7, %v1934_v7 }
 0xcb0   :  { %13058 = vmatmul.mubr.msk.bf16.vlgmr.msra.gmra.mrb[64].mxu1 %vm554_vm3, %v1937_v26 }
 0xcb1   :  { %13068 = vmatpush3.bf16.xpose.msra.mxu1 %v15124_v27  ;;  %v1931_v28 = vpop.permute.xlu1 %1930  ;;  %13069 = vmatprep.mubr.msk.bf16.mxu1 %vm14572_vm1, %v17366_v15 }
 0xcb2   :  { %v1938_v11 = vpack.c.bf16 %v1931_v28, %v1931_v28  ;;  %13079 = vmatprep.subr.bf16.mxu1 %v17366_v15 }
 0xcb4   :  { %13064 = vmatmul.mubr.msk.bf16.vlgmr.msra.gmra.mrb[60].mxu0 %vm554_vm3, %v1938_v11 }
 0xcb5   :  { %13075 = vmatprep.mubr.msk.bf16.mxu0 %vm14572_vm1, %v17366_v15 }
 0xcb8   :  { %13070 = vmatmul.mubr.msk.bf16.vlgmr.msra.gmra.mrb[68].mxu1 %vm554_vm3, %v1939_v13 }
 0xcb9   :  { %13081 = vmatprep.mubr.msk.bf16.mxu1 %vm14572_vm1, %v17366_v15 }
 0xd10   :  { %v1994_v29 = vpop.f32.mrb[56].mxu0 }
 0xd11   :  { %v13053_v30 = vpop.f32.mrb[57].mxu0  ;;  %v2139_v31 = vsel %vm2138_vm5, %v1994_v29, -inf }
 0xd12   :  { %2140 = vmax.xlane.f32.xlu1 %v2139_v31  ;;  %v1997_v32 = vpop.f32.mrb[58].mxu0 }
 0xd13   :  { %v13054_v34 = vpop.f32.mrb[59].mxu0 }
 0xd23   :  { %2188 = vrot.lane.b32.xlu1 %v15062_v53, %s14576_s21 }
 0xd83   :  { %v2040_v63 = vpop.f32.mrb[64].mxu1 }
 0xd84   :  { %v13059_v36 = vpop.f32.mrb[65].mxu1  ;;  %v2142_v38 = vsel %vm2138_vm5, %v2040_v63, -inf }
 0xd85   :  { %2143 = vmax.xlane.f32.xlu0 %v2142_v38  ;;  %v2043_v40 = vpop.f32.mrb[66].mxu1  ;;  %v15162_v36 = vadd.f32 %v14807_v37, %v15050_v51  ;;  %v1921_v38 = vadd.f32 %v15046_v43, %v15097_v20 }
 0xd86   :  { %v13060_v42 = vpop.f32.mrb[67].mxu1 }
 0xd87   :  { %v2086_v5 = vpop.f32.mrb[60].mxu0 }
 0xd88   :  { %v13065_v44 = vpop.f32.mrb[61].mxu0  ;;  %v2145_v46 = vsel %vm2138_vm5, %v2086_v5, -inf }
 0xd89   :  { %2146 = vmax.xlane.f32.xlu0 %v2145_v46  ;;  %v2089_v47 = vpop.f32.mrb[62].mxu0 }
 0xd8a   :  { %v13066_v48 = vpop.f32.mrb[63].mxu0 }
 0xd8b   :  { %v2132_v49 = vpop.f32.mrb[68].mxu1 }
 0xd8c   :  { %v13071_v55 = vpop.f32.mrb[69].mxu1  ;;  %v2148_v35 = vsel %vm2138_vm5, %v2132_v49, -inf }
 0xd8d   :  { %v2135_v58 = vpop.f32.mrb[70].mxu1  ;;  %2149 = vmax.xlane.f32.xlu0 %v2148_v35  ;;  %v62_v55 = vld [vmem:[%s17359_s8] sm:$0xf] }
 0xd8e   :  { %v13072_v53 = vpop.f32.mrb[71].mxu1 }
 0xd9f   :  { %v2141_v62 = vpop.xlane.xlu1 %2140 }
 0xda0   :  { %v2151_v4 = vsub.f32 %v1994_v29, %v2141_v62  ;;  %v15203_v62 = vsel %vm801_vm4, %v62_v55, 0 }
 0xda2   :  { %v2155_v54 = vmul.f32 1.442695, %v2151_v4 }
 0xda3   :  { %v2189_v8 = vpop.permute.xlu1 %2188 }
 0xda4   :  { %14262 = vpow2.f32 %v2155_v54  ;;  %v15148_v0 = vand.u32 %v15145_v1, %v2189_v8  ;;  %v63_v8 = vld [vmem:[%s17359_s8 + $0x4] sm:$0xf] }
 0xda6   :  { %13074 = vmatpush3.bf16.msra.mxu0 %v15148_v0 }
 0xda7   :  { %13085 = vmatprep.subr.bf16.mxu0 %v17366_v15 }
 0xdae   :  { %v14263_v17 = vpop.eup %14262 }
 0xdaf   :  { %v2163_v18 = vsel %vm2138_vm5, %v14263_v17, 0.0 }
 0xdb0   :  { %2164 = vadd.xlane.f32.xlu1 %v2163_v18  ;;  %v15218_v18 = vsel %vm801_vm4, %v63_v8, 0 }
 0xe12   :  { %v2144_v19 = vpop.xlane.xlu0 %2143 }
 0xe13   :  { %v2152_v45 = vsub.f32 %v2040_v63, %v2144_v19  ;;  %v64_v19 = vld [vmem:[%s17359_s8 + $0x8] sm:$0xf] }
 0xe15   :  { %v2157_v22 = vmul.f32 1.442695, %v2152_v45 }
 0xe16   :  { %v2147_v59 = vpop.xlane.xlu0 %2146 }
 0xe17   :  { %14264 = vpow2.f32 %v2157_v22  ;;  %v2153_v25 = vsub.f32 %v2086_v5, %v2147_v59 }
 0xe19   :  { %v2159_v26 = vmul.f32 1.442695, %v2153_v25  ;;  %v15229_v25 = vsel %vm801_vm4, %v64_v19, 0 }
 0xe1a   :  { %v2150_v28 = vpop.xlane.xlu0 %2149 }
 0xe1b   :  { %14266 = vpow2.f32 %v2159_v26  ;;  %v2154_v11 = vsub.f32 %v2132_v49, %v2150_v28 }
 0xe1d   :  { %v2161_v7 = vmul.f32 1.442695, %v2154_v11  ;;  %v2606_v11 = vpack.c.bf16 %v15162_v36, %v15054_v52 }
 0xe1f   :  { %14268 = vpow2.f32 %v2161_v7  ;;  %v2611_v7 = vshrl.u32 %v2606_v11, 16 }
 0xe21   :  { %v14265_v13 = vpop.eup %14264 }
 0xe22   :  { %v2166_v29 = vsel %vm2138_vm5, %v14265_v13, 0.0 }
 0xe23   :  { %2167 = vadd.xlane.f32.xlu0 %v2166_v29 }
 0xe25   :  { %v14267_v30 = vpop.eup %14266 }
 0xe26   :  { %v2169_v31 = vsel %vm2138_vm5, %v14267_v30, 0.0 }
 0xe27   :  { %2170 = vadd.xlane.f32.xlu1 %v2169_v31 }
 0xe29   :  { %v14269_v32 = vpop.eup %14268 }
 0xe2a   :  { %v2172_v34 = vsel %vm2138_vm5, %v14269_v32, 0.0 }
 0xe2b   :  { %2173 = vadd.xlane.f32.xlu0 %v2172_v34 }
 0xe38   :  { %2290 = vrot.lane.b32.xlu1 %v15101_v3, %s14576_s21  ;;  %v15174_v3 = vmul.f32 0.35355338, %v1921_v38  ;;  %v65_v38 = vld [vmem:[%s17359_s8 + $0xc] sm:$0xf] }
 0xe3c   :  { %2339 = vrot.lane.b32.xlu1 %v15119_v24, %s14576_s21 }
 0xe3d   :  { %v2165_v63 = vpop.xlane.xlu1 %2164 }
 0xe3e   :  { %14270 = vrcp.f32 %v2165_v63 }
 0xe40   :  { %2597 = vrot.lane.b32.xlu1 %v15162_v36, %s14574_s15 }
 0xe41   :  { %2241 = vrot.lane.b32.xlu0 %v15086_v9, %s14576_s21 }
 0xe44   :  { %2603 = vrot.lane.b32.xlu1 %v15162_v36, %s14575_s18 }
 0xe45   :  { %2600 = vrot.lane.b32.xlu0 %v15162_v36, %s14573_s14 }
 0xe48   :  { %v14271_v37 = vpop.eup %14270  ;;  %2586 = vrot.lane.b32.xlu1 %v15174_v3, %s14573_s14 }
 0xe49   :  { %2583 = vrot.lane.b32.xlu0 %v15174_v3, %s14574_s15  ;;  %v2179_v51 = vmul.f32 %v14271_v37, %v14263_v17 }
 0xe4b   :  { %v2183_v9 = vpack.c.bf16 %v2179_v51, %v2179_v51 }
 0xe4d   :  { %13076 = vmatmul.mubr.msk.bf16.vlgmr.msra.gmra.mrb[64].mxu0 %vm2138_vm5, %v2183_v9  ;;  %2589 = vrot.lane.b32.xlu0 %v15174_v3, %s14575_s18 }
 0xe4e   :  { %13087 = vmatprep.mubr.msk.bf16.mxu0 %vm14572_vm1, %v17366_v15 }
 0xeb0   :  { %v2168_v43 = vpop.xlane.xlu0 %2167 }
 0xeb1   :  { %14272 = vrcp.f32 %v2168_v43 }
 0xeb4   :  { %v2171_v20 = vpop.xlane.xlu1 %2170 }
 0xeb5   :  { %14274 = vrcp.f32 %v2171_v20 }
 0xeb8   :  { %v2291_v24 = vpop.permute.xlu1 %2290  ;;  %v2174_v40 = vpop.xlane.xlu0 %2173 }
 0xeb9   :  { %v15186_v42 = vand.u32 %v2291_v24, %v15145_v1  ;;  %14276 = vrcp.f32 %v2174_v40 }
 0xebb   :  { %v14273_v5 = vpop.eup %14272  ;;  %13086 = vmatpush3.bf16.msra.mxu0 %v15186_v42 }
 0xebc   :  { %v2242_v44 = vpop.permute.xlu0 %2241  ;;  %v2180_v46 = vmul.f32 %v14273_v5, %v14265_v13  ;;  %13097 = vmatprep.subr.bf16.mxu0 %v17366_v15  ;;  %v2340_v48 = vpop.permute.xlu1 %2339  ;;  %v2614_v13 = vshll.u32 %v2606_v11, 16 }
 0xebd   :  { %v15191_v47 = vand.u32 %v2242_v44, %v15145_v1  ;;  %v15199_v53 = vand.u32 %v2340_v48, %v15145_v1 }
 0xebe   :  { %v2184_v35 = vpack.c.bf16 %v2180_v46, %v2180_v46  ;;  %v2616_v34 = vrot.slane %v2614_v13, 3 }
 0xebf   :  { %v14275_v49 = vpop.eup %14274  ;;  %13080 = vmatpush3.bf16.msra.mxu1 %v15191_v47 }
 0xec0   :  { %13091 = vmatprep.subr.bf16.mxu1 %v17366_v15  ;;  %v2181_v58 = vmul.f32 %v14275_v49, %v14267_v30  ;;  %v2598_v29 = vpop.permute.xlu1 %2597  ;;  %v2601_v30 = vpop.permute.xlu0 %2600 }
 0xec1   :  { %v2607_v31 = vpack.c.bf16 %v2598_v29, %v15082_v14  ;;  %v2608_v63 = vpack.c.bf16 %v2601_v30, %v15094_v16  ;;  %v15246_v14 = vsel %vm801_vm4, %v65_v38, 0 }
 0xec2   :  { %13082 = vmatmul.mubr.msk.bf16.vlgmr.msra.gmra.mrb[72].mxu1 %vm2138_vm5, %v2184_v35  ;;  %v2185_v61 = vpack.c.bf16 %v2181_v58, %v2181_v58 }
 0xec3   :  { %v14277_v4 = vpop.eup %14276  ;;  %13092 = vmatpush3.bf16.msra.mxu1 %v15199_v53  ;;  %13093 = vmatprep.mubr.msk.bf16.mxu1 %vm14572_vm1, %v17366_v15  ;;  %v2665_v37 = vshrl.u32 %v2607_v31, 16  ;;  %v2668_v51 = vshll.u32 %v2607_v31, 16  ;;  %v2719_v52 = vshrl.u32 %v2608_v63, 16  ;;  %v2722_v36 = vshll.u32 %v2608_v63, 16 }
 0xec4   :  { %13088 = vmatmul.mubr.msk.bf16.vlgmr.msra.gmra.mrb[68].mxu0 %vm2138_vm5, %v2185_v61  ;;  %v2182_v54 = vmul.f32 %v14277_v4, %v14269_v32  ;;  %13103 = vmatprep.subr.bf16.mxu1 %v17366_v15  ;;  %v2613_v32 = vrot.slane %v2611_v7, 2  ;;  %v2604_v20 = vpop.permute.xlu1 %2603  ;;  %v2592_v7 = vpack.c.bf16 %v15174_v3, %v15174_v3  ;;  %v2584_v3 = vpop.permute.xlu0 %2583 }
 0xec5   :  { %13098 = vmatpush3.bf16.msra.mxu0 %v15203_v62  ;;  %13099 = vmatprep.mubr.msk.bf16.mxu0 %vm14572_vm1, %v17366_v15  ;;  %v2667_v49 = vrot.slane %v2665_v37, 2  ;;  %v2670_v55 = vrot.slane %v2668_v51, 3  ;;  %v2609_v35 = vpack.c.bf16 %v2604_v20, %v15115_v50  ;;  %v2721_v61 = vrot.slane %v2719_v52, 2 }
 0xec6   :  { %13109 = vmatprep.subr.bf16.mxu0 %v17366_v15  ;;  %v2186_v17 = vpack.c.bf16 %v2182_v54, %v2182_v54  ;;  %v15243_v43 = vor.u32 %v2616_v34, %v2613_v32  ;;  %v2724_v4 = vrot.slane %v2722_v36, 3  ;;  %v2593_v63 = vpack.c.bf16 %v2584_v3, %v2584_v3 }
 0xec7   :  { %v2773_v50 = vshrl.u32 %v2609_v35, 16 }
 0xec8   :  { %v15256_v8 = vsel %vm554_vm3, %v15243_v43, 0  ;;  %v2587_v32 = vpop.permute.xlu1 %2586  ;;  %v2590_v51 = vpop.permute.xlu0 %2589 }
 0xec9   :  { %v2775_v13 = vrot.slane %v2773_v50, 2  ;;  %v2594_v38 = vpack.c.bf16 %v2587_v32, %v2587_v32 }
 0xeca   :  { %13094 = vmatmul.mubr.msk.bf16.vlgmr.msra.gmra.mrb[76].mxu1 %vm2138_vm5, %v2186_v17  ;;  %v2776_v17 = vshll.u32 %v2609_v35, 16 }
 0xecb   :  { %13104 = vmatpush3.bf16.msra.mxu1 %v15218_v18  ;;  %13105 = vmatprep.mubr.msk.bf16.mxu1 %vm14572_vm1, %v17366_v15 }
 0xecc   :  { %13115 = vmatprep.subr.bf16.mxu1 %v17366_v15  ;;  %v2778_v29 = vrot.slane %v2776_v17, 3 }
 0xece   :  { %v15287_v34 = vor.u32 %v2778_v29, %v2775_v13 }
 0xed0   :  { %v15292_v37 = vsel %vm554_vm3, %v15287_v34, 0 }
 0xf20   :  { %v2234_v45 = vpop.f32.mrb[64].mxu0 }
 0xf21   :  { %v2387_v22 = vpack.c.bf16 %v2234_v45, %v2234_v45  ;;  %v13077_v59 = vpop.f32.mrb[65].mxu0  ;;  %v15263_v45 = vor.u32 %v2670_v55, %v2667_v49 }
 0xf22   :  { %v2237_v26 = vpop.f32.mrb[66].mxu0 }
 0xf23   :  { %v13078_v28 = vpop.f32.mrb[67].mxu0  ;;  %13100 = vmatmul.mubr.msk.bf16.vlgmr.msra.gmra.mrb[72].mxu0 %vm554_vm3, %v2387_v22  ;;  %v15265_v26 = vor.u32 %v2724_v4, %v2721_v61  ;;  %v15272_v30 = vsel %vm554_vm3, %v15263_v45, 0 }
 0xf24   :  { %13110 = vmatpush3.bf16.msra.mxu0 %v15229_v25  ;;  %13111 = vmatprep.mubr.msk.bf16.mxu0 %vm14572_vm1, %v17366_v15 }
 0xf25   :  { %13121 = vmatprep.subr.bf16.mxu0 %v17366_v15  ;;  %v15280_v31 = vsel %vm554_vm3, %v15265_v26, 0 }
 0xf95   :  { %v2283_v9 = vpop.f32.mrb[72].mxu1 }
 0xf96   :  { %v2388_v24 = vpack.c.bf16 %v2283_v9, %v2283_v9  ;;  %v13083_v40 = vpop.f32.mrb[73].mxu1  ;;  %v2595_v9 = vpack.c.bf16 %v2590_v51, %v2590_v51 }
 0xf97   :  { %v2286_v5 = vpop.f32.mrb[74].mxu1  ;;  %v2332_v44 = vpop.f32.mrb[68].mxu0 }
 0xf98   :  { %v2389_v16 = vpack.c.bf16 %v2332_v44, %v2332_v44  ;;  %v13084_v46 = vpop.f32.mrb[75].mxu1  ;;  %v13089_v48 = vpop.f32.mrb[69].mxu0  ;;  %13106 = vmatmul.mubr.msk.bf16.vlgmr.msra.gmra.mrb[80].mxu1 %vm554_vm3, %v2388_v24 }
 0xf99   :  { %13116 = vmatpush3.bf16.msra.mxu1 %v15246_v14  ;;  %v2335_v58 = vpop.f32.mrb[70].mxu0  ;;  %13117 = vmatprep.mubr.msk.bf16.mxu1 %vm14572_vm1, %v17366_v15 }
 0xf9a   :  { %v13090_v54 = vpop.f32.mrb[71].mxu0  ;;  %13112 = vmatmul.mubr.msk.bf16.vlgmr.msra.gmra.mrb[76].mxu0 %vm554_vm3, %v2389_v16  ;;  %13127 = vmatprep.subr.bf16.mxu1 %v17366_v15 }
 0xf9b   :  { %13122 = vmatpush3.bf16.xpose.msra.mxu0 %v15256_v8  ;;  %13123 = vmatprep.mubr.msk.bf16.mxu0 %vm14572_vm1, %v17366_v15 }
 0xf9c   :  { %13133 = vmatprep.subr.bf16.mxu0 %v17366_v15 }
 0xf9d   :  { %v2381_v19 = vpop.f32.mrb[76].mxu1 }
 0xf9e   :  { %v2390_v22 = vpack.c.bf16 %v2381_v19, %v2381_v19  ;;  %v13095_v59 = vpop.f32.mrb[77].mxu1 }
 0xf9f   :  { %v2384_v28 = vpop.f32.mrb[78].mxu1 }
 0xfa0   :  { %v13096_v11 = vpop.f32.mrb[79].mxu1  ;;  %13118 = vmatmul.mubr.msk.bf16.vlgmr.msra.gmra.mrb[84].mxu1 %vm554_vm3, %v2390_v22 }
 0xfa1   :  { %13129 = vmatprep.mubr.msk.bf16.mxu1 %vm14572_vm1, %v17366_v15 }
 0xfa2   :  { %13128 = vmatpush3.bf16.xpose.msra.mxu1 %v15272_v30  ;;  %13124 = vmatmul.mubr.msk.bf16.vlgmr.msra.gmra.mrb[80].mxu0 %vm554_vm3, %v2592_v7 }
 0xfa3   :  { %13134 = vmatpush3.bf16.xpose.msra.mxu0 %v15280_v31  ;;  %13139 = vmatprep.subr.bf16.mxu1 %v17366_v15 }
 0xfa4   :  { %13135 = vmatprep.mubr.msk.bf16.mxu0 %vm14572_vm1, %v17366_v15  ;;  %13145 = vmatprep.subr.bf16.mxu0 %v17366_v15 }
 0xfa9   :  { %13130 = vmatmul.mubr.msk.bf16.vlgmr.msra.gmra.mrb[88].mxu1 %vm554_vm3, %v2593_v63 }
 0xfaa   :  { %13140 = vmatpush3.bf16.xpose.msra.mxu1 %v15292_v37  ;;  %13136 = vmatmul.mubr.msk.bf16.vlgmr.msra.gmra.mrb[84].mxu0 %vm554_vm3, %v2594_v38 }
 0xfab   :  { %13141 = vmatprep.mubr.msk.bf16.mxu1 %vm14572_vm1, %v17366_v15  ;;  %13147 = vmatprep.mubr.msk.bf16.mxu0 %vm14572_vm1, %v17366_v15 }
 0xfac   :  { %13151 = vmatprep.subr.bf16.mxu1 %v17366_v15 }
 0xfb1   :  { %13142 = vmatmul.mubr.msk.bf16.vlgmr.msra.gmra.mrb[92].mxu1 %vm554_vm3, %v2595_v9 }
 0xfb2   :  { %13153 = vmatprep.mubr.msk.bf16.mxu1 %vm14572_vm1, %v17366_v15 }
 0xff6   :  { %v2431_v52 = vpop.f32.mrb[72].mxu0 }
 0xff7   :  { %v13101_v36 = vpop.f32.mrb[73].mxu0  ;;  %v2575_v5 = vsel %vm143_vm0, %v2431_v52, 0.0 }
 0xff8   :  { %v2434_v20 = vpop.f32.mrb[74].mxu0 }
 0xff9   :  { %v13102_v24 = vpop.f32.mrb[75].mxu0 }
0x106b   :  { %v2477_v40 = vpop.f32.mrb[80].mxu1 }
0x106c   :  { %v2576_v44 = vsel %vm143_vm0, %v2477_v40, 0.0  ;;  %v13107_v16 = vpop.f32.mrb[81].mxu1 }
0x106d   :  { %v2577_v46 = vadd.f32 %v2576_v44, %v2575_v5  ;;  %v2480_v48 = vpop.f32.mrb[82].mxu1  ;;  %v2523_v49 = vpop.f32.mrb[76].mxu0 }
0x106e   :  { %v2578_v55 = vsel %vm143_vm0, %v2523_v49, 0.0  ;;  %v13108_v35 = vpop.f32.mrb[83].mxu1  ;;  %v13113_v58 = vpop.f32.mrb[77].mxu0 }
0x106f   :  { %v2579_v61 = vadd.f32 %v2578_v55, %v2577_v46  ;;  %v2526_v4 = vpop.f32.mrb[78].mxu0 }
0x1070   :  { %v13114_v54 = vpop.f32.mrb[79].mxu0 }
0x1073   :  { %v2569_v50 = vpop.f32.mrb[84].mxu1 }
0x1074   :  { %v2580_v17 = vsel %vm143_vm0, %v2569_v50, 0.0  ;;  %v13119_v19 = vpop.f32.mrb[85].mxu1 }
0x1075   :  { %v15308_v22 = vadd.f32 %v2580_v17, %v2579_v61  ;;  %v2572_v59 = vpop.f32.mrb[86].mxu1  ;;  %v2658_v28 = vpop.f32.mrb[80].mxu0 }
0x1076   :  { %v13120_v11 = vpop.f32.mrb[87].mxu1  ;;  %v13125_v7 = vpop.f32.mrb[81].mxu0  ;;  %v2826_v13 = vsel %vm2138_vm5, %v2658_v28, -inf }
0x1077   :  { %2827 = vmax.xlane.f32.xlu1 %v2826_v13  ;;  %v2661_v29 = vpop.f32.mrb[82].mxu0 }
0x1078   :  { %v13126_v3 = vpop.f32.mrb[83].mxu0 }
0x107c   :  { %v2712_v32 = vpop.f32.mrb[88].mxu1 }
0x107d   :  { %v13131_v63 = vpop.f32.mrb[89].mxu1  ;;  %v2829_v38 = vsel %vm2138_vm5, %v2712_v32, -inf  ;;  %v2766_v51 = vpop.f32.mrb[84].mxu0 }
0x107e   :  { %2830 = vmax.xlane.f32.xlu0 %v2829_v38  ;;  %v2715_v9 = vpop.f32.mrb[90].mxu1  ;;  %v13137_v52 = vpop.f32.mrb[85].mxu0  ;;  %v2832_v40 = vsel %vm2138_vm5, %v2766_v51, -inf }
0x107f   :  { %v13132_v36 = vpop.f32.mrb[91].mxu1  ;;  %v2769_v20 = vpop.f32.mrb[86].mxu0  ;;  %v3249_v9 = vadd.f32 %v15308_v22, %v14968_v6  ;;  %v15336_v52 = vld [vmem:[%s17356_s11 + $0x4] ss:$0 sm:$0xff] }
0x1080   :  { %v13138_v24 = vpop.f32.mrb[87].mxu0 }
0x1081   :  { %v15339_v36 = vadd.f32 %v15336_v52, %v3249_v9 }
0x1082   :  { %2833 = vmax.xlane.f32.xlu0 %v2832_v40 }
0x1083   :  { %17386 = vst [vmem:[#allocation2_spill] sm:$0xff] %v15339_v36 }
0x1084   :  { %v2820_v5 = vpop.f32.mrb[92].mxu1 }
0x1085   :  { %v13143_v44 = vpop.f32.mrb[93].mxu1  ;;  %v2835_v16 = vsel %vm2138_vm5, %v2820_v5, -inf }
0x1086   :  { %v2823_v46 = vpop.f32.mrb[94].mxu1  ;;  %2836 = vmax.xlane.f32.xlu0 %v2835_v16 }
0x1087   :  { %v13144_v48 = vpop.f32.mrb[95].mxu1 }
0x1088   :  { %2874 = vrot.lane.b32.xlu1 %v15243_v43, %s14576_s21 }
0x1104   :  { %v2828_v49 = vpop.xlane.xlu1 %2827 }
0x1105   :  { %v2838_v55 = vsub.f32 %v2658_v28, %v2828_v49 }
0x1107   :  { %v2842_v35 = vmul.f32 1.442695, %v2838_v55 }
0x1108   :  { %v2875_v58 = vpop.permute.xlu1 %2874 }
0x1109   :  { %14278 = vpow2.f32 %v2842_v35  ;;  %v15317_v61 = vand.u32 %v2875_v58, %v15145_v1 }
0x110b   :  { %v2831_v4 = vpop.xlane.xlu0 %2830  ;;  %13146 = vmatpush3.bf16.msra.mxu0 %v15317_v61 }
0x110c   :  { %v2839_v54 = vsub.f32 %v2712_v32, %v2831_v4  ;;  %13157 = vmatprep.subr.bf16.mxu0 %v17366_v15 }
0x110e   :  { %v2844_v50 = vmul.f32 1.442695, %v2839_v54 }
0x110f   :  { %v2834_v17 = vpop.xlane.xlu0 %2833 }
0x1110   :  { %14280 = vpow2.f32 %v2844_v50  ;;  %v2840_v19 = vsub.f32 %v2766_v51, %v2834_v17 }
0x1112   :  { %v2846_v59 = vmul.f32 1.442695, %v2840_v19 }
0x1113   :  { %v14279_v43 = vpop.eup %14278  ;;  %v2837_v11 = vpop.xlane.xlu0 %2836 }
0x1114   :  { %14282 = vpow2.f32 %v2846_v59  ;;  %v2841_v28 = vsub.f32 %v2820_v5, %v2837_v11  ;;  %v2850_v7 = vsel %vm2138_vm5, %v14279_v43, 0.0 }
0x1115   :  { %2851 = vadd.xlane.f32.xlu1 %v2850_v7 }
0x1116   :  { %v2848_v13 = vmul.f32 1.442695, %v2841_v28 }
0x1118   :  { %14284 = vpow2.f32 %v2848_v13 }
0x111a   :  { %v14281_v29 = vpop.eup %14280 }
0x111b   :  { %v2853_v3 = vsel %vm2138_vm5, %v14281_v29, 0.0 }
0x111c   :  { %2854 = vadd.xlane.f32.xlu0 %v2853_v3 }
0x111e   :  { %v14283_v32 = vpop.eup %14282 }
0x111f   :  { %v2856_v63 = vsel %vm2138_vm5, %v14283_v32, 0.0 }
0x1120   :  { %2857 = vadd.xlane.f32.xlu1 %v2856_v63 }
0x1122   :  { %v14285_v38 = vpop.eup %14284 }
0x1123   :  { %v2859_v51 = vsel %vm2138_vm5, %v14285_v38, 0.0 }
0x1124   :  { %2860 = vadd.xlane.f32.xlu0 %v2859_v51 }
0x1131   :  { %2970 = vrot.lane.b32.xlu1 %v15265_v26, %s14576_s21  ;;  %v3257_v26 = vsel %vm143_vm0, %v15339_v36, 0.0 }
0x1135   :  { %3018 = vrot.lane.b32.xlu1 %v15287_v34, %s14576_s21 }
0x113a   :  { %2922 = vrot.lane.b32.xlu0 %v15263_v45, %s14576_s21 }
0x1159   :  { %3258 = vadd.xlane.f32.xlu1 %v3257_v26 }
0x11a2   :  { %v2852_v20 = vpop.xlane.xlu1 %2851 }
0x11a3   :  { %14286 = vrcp.f32 %v2852_v20 }
0x11a9   :  { %v2855_v34 = vpop.xlane.xlu0 %2854 }
0x11aa   :  { %14288 = vrcp.f32 %v2855_v34 }
0x11ad   :  { %v14287_v45 = vpop.eup %14286  ;;  %v2858_v24 = vpop.xlane.xlu1 %2857 }
0x11ae   :  { %14290 = vrcp.f32 %v2858_v24  ;;  %v2866_v6 = vmul.f32 %v14287_v45, %v14279_v43 }
0x11b0   :  { %v2870_v22 = vpack.c.bf16 %v2866_v6, %v2866_v6 }
0x11b1   :  { %v2971_v40 = vpop.permute.xlu1 %2970  ;;  %v2861_v5 = vpop.xlane.xlu0 %2860 }
0x11b2   :  { %v15344_v44 = vand.u32 %v2971_v40, %v15145_v1  ;;  %14292 = vrcp.f32 %v2861_v5  ;;  %13148 = vmatmul.mubr.msk.bf16.vlgmr.msra.gmra.mrb[88].mxu0 %vm2138_vm5, %v2870_v22 }
0x11b3   :  { %13159 = vmatprep.mubr.msk.bf16.mxu0 %vm14572_vm1, %v17366_v15 }
0x11b4   :  { %v14289_v16 = vpop.eup %14288  ;;  %13158 = vmatpush3.bf16.msra.mxu0 %v15344_v44 }
0x11b5   :  { %v2923_v46 = vpop.permute.xlu0 %2922  ;;  %v2867_v48 = vmul.f32 %v14289_v16, %v14281_v29  ;;  %13169 = vmatprep.subr.bf16.mxu0 %v17366_v15  ;;  %v3019_v55 = vpop.permute.xlu1 %3018 }
0x11b6   :  { %v15352_v49 = vand.u32 %v2923_v46, %v15145_v1  ;;  %v15357_v54 = vand.u32 %v3019_v55, %v15145_v1 }
0x11b7   :  { %v2871_v58 = vpack.c.bf16 %v2867_v48, %v2867_v48 }
0x11b8   :  { %v14291_v35 = vpop.eup %14290  ;;  %13152 = vmatpush3.bf16.msra.mxu1 %v15352_v49 }
0x11b9   :  { %13163 = vmatprep.subr.bf16.mxu1 %v17366_v15  ;;  %v2868_v4 = vmul.f32 %v14291_v35, %v14283_v32 }
0x11bb   :  { %13154 = vmatmul.mubr.msk.bf16.vlgmr.msra.gmra.mrb[96].mxu1 %vm2138_vm5, %v2871_v58  ;;  %v2872_v50 = vpack.c.bf16 %v2868_v4, %v2868_v4 }
0x11bc   :  { %v14293_v17 = vpop.eup %14292  ;;  %13164 = vmatpush3.bf16.msra.mxu1 %v15357_v54  ;;  %13165 = vmatprep.mubr.msk.bf16.mxu1 %vm14572_vm1, %v17366_v15 }
0x11bd   :  { %13160 = vmatmul.mubr.msk.bf16.vlgmr.msra.gmra.mrb[92].mxu0 %vm2138_vm5, %v2872_v50  ;;  %v2869_v19 = vmul.f32 %v14293_v17, %v14285_v38  ;;  %13175 = vmatprep.subr.bf16.mxu1 %v17366_v15 }
0x11be   :  { %13170 = vmatpush3.bf16.msra.mxu0 %v15203_v62  ;;  %13171 = vmatprep.mubr.msk.bf16.mxu0 %vm14572_vm1, %v17366_v15 }
0x11bf   :  { %13181 = vmatprep.subr.bf16.mxu0 %v17366_v15  ;;  %v2873_v59 = vpack.c.bf16 %v2869_v19, %v2869_v19 }
0x11c3   :  { %13166 = vmatmul.mubr.msk.bf16.vlgmr.msra.gmra.mrb[100].mxu1 %vm2138_vm5, %v2873_v59 }
0x11c4   :  { %13176 = vmatpush3.bf16.msra.mxu1 %v15218_v18  ;;  %13177 = vmatprep.mubr.msk.bf16.mxu1 %vm14572_vm1, %v17366_v15 }
0x11c5   :  { %13187 = vmatprep.subr.bf16.mxu1 %v17366_v15 }
0x11e6   :  { %v3259_v43 = vpop.xlane.xlu1 %3258 }
0x11e7   :  { %v3263_v11 = vmul.f32 0.03125, %v3259_v43 }
0x11e9   :  { %v15375_v28 = vsub.f32 %v15339_v36, %v3263_v11 }
0x11eb   :  { %v3267_v7 = vmul.f32 %v15375_v28, %v15375_v28 }
0x11ed   :  { %v3269_v13 = vsel %vm143_vm0, %v3267_v7, 0.0 }
0x11ee   :  { %3270 = vadd.xlane.f32.xlu1 %v3269_v13 }
0x1285   :  { %v2916_v29 = vpop.f32.mrb[88].mxu0 }
0x1286   :  { %v3066_v3 = vpack.c.bf16 %v2916_v29, %v2916_v29  ;;  %v13149_v32 = vpop.f32.mrb[89].mxu0 }
0x1287   :  { %v2919_v63 = vpop.f32.mrb[90].mxu0 }
0x1288   :  { %v13150_v38 = vpop.f32.mrb[91].mxu0  ;;  %13172 = vmatmul.mubr.msk.bf16.vlgmr.msra.gmra.mrb[96].mxu0 %vm554_vm3, %v3066_v3 }
0x1289   :  { %13182 = vmatpush3.bf16.msra.mxu0 %v15229_v25  ;;  %13183 = vmatprep.mubr.msk.bf16.mxu0 %vm14572_vm1, %v17366_v15 }
0x128a   :  { %13193 = vmatprep.subr.bf16.mxu0 %v17366_v15 }
0x128e   :  { %v2964_v51 = vpop.f32.mrb[96].mxu1 }
0x128f   :  { %v3067_v9 = vpack.c.bf16 %v2964_v51, %v2964_v51  ;;  %v13155_v26 = vpop.f32.mrb[97].mxu1 }
0x1290   :  { %v2967_v20 = vpop.f32.mrb[98].mxu1  ;;  %v3012_v34 = vpop.f32.mrb[92].mxu0  ;;  %v12225_v26 = vld [vmem:[%s17355_s1 + $0x8] sm:$0x1f] }
0x1291   :  { %v3068_v45 = vpack.c.bf16 %v3012_v34, %v3012_v34  ;;  %v13156_v24 = vpop.f32.mrb[99].mxu1  ;;  %v13161_v6 = vpop.f32.mrb[93].mxu0  ;;  %13178 = vmatmul.mubr.msk.bf16.vlgmr.msra.gmra.mrb[104].mxu1 %vm554_vm3, %v3067_v9 }
0x1292   :  { %v3015_v22 = vpop.f32.mrb[94].mxu0  ;;  %13188 = vmatpush3.bf16.msra.mxu1 %v15246_v14  ;;  %13189 = vmatprep.mubr.msk.bf16.mxu1 %vm14572_vm1, %v17366_v15 }
0x1293   :  { %v13162_v40 = vpop.f32.mrb[95].mxu0  ;;  %13184 = vmatmul.mubr.msk.bf16.vlgmr.msra.gmra.mrb[100].mxu0 %vm554_vm3, %v3068_v45  ;;  %13201 = vmatprep.subr.bf16.mxu1 %v17366_v15  ;;  %v15403_v22 = vrot.slane %v12225_v26, 3  ;;  %v3271_v26 = vpop.xlane.xlu1 %3270 }
0x1294   :  { %13197 = vmatprep.mubr.msk.bf16.mxu0 %vm14572_vm1, %v17366_v15 }
0x1296   :  { %v3060_v5 = vpop.f32.mrb[100].mxu1 }
0x1297   :  { %v3069_v16 = vpack.c.bf16 %v3060_v5, %v3060_v5  ;;  %v13167_v46 = vpop.f32.mrb[101].mxu1  ;;  %v3476_v5 = vld [vmem:[%s17355_s1] sm:$0x1f] }
0x1298   :  { %v3063_v48 = vpop.f32.mrb[102].mxu1  ;;  %v15414_v46 = vsel %vm156_vm2, %v3476_v5, %v15403_v22 }
0x1299   :  { %v13168_v55 = vpop.f32.mrb[103].mxu1  ;;  %13190 = vmatmul.mubr.msk.bf16.vlgmr.msra.gmra.mrb[108].mxu1 %vm554_vm3, %v3069_v16 }
0x129a   :  { %13209 = vmatprep.mubr.msk.bf16.mxu1 %vm14572_vm1, %v17366_v15  ;;  %v3482_v55 = vsel %vm143_vm0, %v15414_v46, 0.0 }
0x135b   :  { %v3107_v35 = vpop.f32.mrb[96].mxu0 }
0x135c   :  { %v13173_v58 = vpop.f32.mrb[97].mxu0  ;;  %v3242_v19 = vsel %vm143_vm0, %v3107_v35, 0.0 }
0x135d   :  { %v3110_v4 = vpop.f32.mrb[98].mxu0 }
0x135e   :  { %v13174_v50 = vpop.f32.mrb[99].mxu0 }
0x1364   :  { %v3150_v17 = vpop.f32.mrb[104].mxu1 }
0x1365   :  { %v3243_v59 = vsel %vm143_vm0, %v3150_v17, 0.0  ;;  %v13179_v43 = vpop.f32.mrb[105].mxu1 }
0x1366   :  { %v3244_v11 = vadd.f32 %v3243_v59, %v3242_v19  ;;  %v3153_v7 = vpop.f32.mrb[106].mxu1  ;;  %v3193_v13 = vpop.f32.mrb[100].mxu0 }
0x1367   :  { %v3245_v29 = vsel %vm143_vm0, %v3193_v13, 0.0  ;;  %v13180_v3 = vpop.f32.mrb[107].mxu1  ;;  %v13185_v32 = vpop.f32.mrb[101].mxu0 }
0x1368   :  { %v3246_v63 = vadd.f32 %v3245_v29, %v3244_v11  ;;  %v3196_v38 = vpop.f32.mrb[102].mxu0 }
0x1369   :  { %v13186_v51 = vpop.f32.mrb[103].mxu0  ;;  %v14209_v38 = vld [vmem:[%s17360_s9 + $0x8] sm:$0xff]  }
0x136a   :  { %v14212_v51 = vld [vmem:[%s17361_s10] sm:$0xff]  }
0x136b   :  { %13202 = vmatpush3.bf16.msra.mxu1 %v14212_v51 }
0x136c   :  { %v3236_v9 = vpop.f32.mrb[108].mxu1  ;;  %13203 = vmatprep.subr.bf16.mxu1 %v17366_v15 }
0x136d   :  { %v3247_v20 = vsel %vm143_vm0, %v3236_v9, 0.0  ;;  %v13191_v34 = vpop.f32.mrb[109].mxu1  ;;  %v14213_v9 = vld [vmem:[%s17361_s10 + $0x8] sm:$0xff]  }
0x136e   :  { %v3248_v45 = vadd.f32 %v3247_v20, %v3246_v63  ;;  %v3239_v24 = vpop.f32.mrb[110].mxu1  ;;  %v14208_v63 = vld [vmem:[%s17360_s9] sm:$0xff]   ;;  %v3275_v20 = vmul.f32 0.03125, %v3271_v26 }
0x136f   :  { %v13192_v6 = vpop.f32.mrb[111].mxu1  ;;  %13194 = vmatpush3.bf16.msra.mxu0 %v14208_v63  ;;  %13204 = vmatpush3.bf16.msra.mxu1 %v14213_v9 }
0x1370   :  { %v3250_v40 = vadd.f32 %v3248_v45, %v15037_v33  ;;  %v3486_v33 = vsel %vm3485_vm8, %v15403_v22, 0.0  ;;  %13195 = vmatprep.subr.bf16.mxu0 %v17366_v15  ;;  %13205 = vmatprep.subr.bf16.mxu1 %v17366_v15  ;;  %v3277_v34 = vadd.f32 1e-05, %v3275_v20  ;;  %v12227_v20 = vld [vmem:[%s17356_s11 + $0x17] ss:$0 sm:$0xff] }
0x1372   :  { %v15410_v16 = vadd.f32 %v15336_v52, %v3250_v40  ;;  %14294 = vrsqrt.f32 %v3277_v34 }
0x1373   :  { %13196 = vmatpush3.bf16.msra.mxu0 %v14209_v38  ;;  %v14210_v38 = vld [vmem:[%s17354_s5 + $0x10] sm:$0xff]  }
0x1374   :  { %17387 = vst [vmem:[#allocation3_spill] sm:$0xff] %v15410_v16  ;;  %v3260_v48 = vsel %vm143_vm0, %v15410_v16, 0.0  ;;  %13213 = vmatprep.subr.bf16.mxu0 %v17366_v15 }
0x1375   :  { %3261 = vadd.xlane.f32.xlu0 %v3260_v48 }
0x1379   :  { %3483 = vadd.xlane.f32.xlu0 %v3482_v55 }
0x137d   :  { %3487 = vadd.xlane.f32.xlu0 %v3486_v33  ;;  %v14295_v33 = vpop.eup %14294 }
0x1402   :  { %v3262_v35 = vpop.xlane.xlu0 %3261 }
0x1403   :  { %v3264_v52 = vmul.f32 0.03125, %v3262_v35 }
0x1405   :  { %v3266_v58 = vsub.f32 %v15410_v16, %v3264_v52 }
0x1406   :  { %v3484_v4 = vpop.xlane.xlu0 %3483 }
0x1407   :  { %v3489_v50 = vmul.f32 0.03125, %v3484_v4  ;;  %v3268_v17 = vmul.f32 %v3266_v58, %v3266_v58  ;;  %v3281_v4 = vmul.f32 %v14295_v33, %v15375_v28  ;;  %v12226_v28 = vld [vmem:[%s17356_s11 + $0x16] ss:$0 sm:$0xff] }
0x1409   :  { %v3491_v19 = vsub.f32 %v15414_v46, %v3489_v50  ;;  %v3272_v59 = vsel %vm143_vm0, %v3268_v17, 0.0  ;;  %v12211_v50 = vld [vmem:[%s17356_s11 + $0xb] ss:$0 sm:$0xff] }
0x140a   :  { %3273 = vadd.xlane.f32.xlu0 %v3272_v59  ;;  %v3488_v43 = vpop.xlane.xlu0 %3487  ;;  %v3287_v59 = vmul.f32 %v12211_v50, %v3281_v4 }
0x140b   :  { %v3490_v11 = vmul.f32 0.03125, %v3488_v43  ;;  %v3493_v7 = vmul.f32 %v3491_v19, %v3491_v19 }
0x140d   :  { %v3492_v13 = vsub.f32 %v15403_v22, %v3490_v11  ;;  %v3495_v29 = vsel %vm143_vm0, %v3493_v7, 0.0  ;;  %v12212_v11 = vld [vmem:[%s17356_s11 + $0xc] ss:$0 sm:$0xff] }
0x140e   :  { %3496 = vadd.xlane.f32.xlu1 %v3495_v29 }
0x140f   :  { %v3494_v3 = vmul.f32 %v3492_v13, %v3492_v13 }
0x1411   :  { %v3498_v32 = vsel %vm3485_vm8, %v3494_v3, 0.0 }
0x1412   :  { %3499 = vadd.xlane.f32.xlu0 %v3498_v32  ;;  %v3293_v32 = vadd.f32 %v12212_v11, %v3287_v59  ;;  %v12228_v59 = vld [vmem:[%s17356_s11 + $0x10] ss:$0 sm:$0xff] }
0x1497   :  { %v3274_v45 = vpop.xlane.xlu0 %3273 }
0x1498   :  { %v3276_v24 = vmul.f32 0.03125, %v3274_v45 }
0x149a   :  { %v3278_v6 = vadd.f32 1e-05, %v3276_v24 }
0x149b   :  { %v3497_v40 = vpop.xlane.xlu1 %3496 }
0x149c   :  { %14296 = vrsqrt.f32 %v3278_v6  ;;  %v3501_v5 = vmul.f32 0.03125, %v3497_v40  ;;  %v14214_v6 = vld [vmem:[%s17361_s10 + $0x10] sm:$0xff]   ;;  %v14215_v40 = vld [vmem:[%s17361_s10 + $0x18] sm:$0xff]  }
0x149d   :  { %13206 = vmatpush3.bf16.msra.mxu1 %v14214_v6 }
0x149e   :  { %v3503_v48 = vadd.f32 1e-05, %v3501_v5  ;;  %13207 = vmatprep.subr.bf16.mxu1 %v17366_v15  ;;  %v12213_v5 = vld [vmem:[%s17356_s11 + $0x5] ss:$0 sm:$0xff] }
0x149f   :  { %v3500_v55 = vpop.xlane.xlu0 %3499 }
0x14a0   :  { %14298 = vrsqrt.f32 %v3503_v48  ;;  %v3502_v35 = vmul.f32 0.03125, %v3500_v55 }
0x14a1   :  { %13208 = vmatpush3.bf16.msra.mxu1 %v14215_v40 }
0x14a2   :  { %v3504_v52 = vadd.f32 1e-05, %v3502_v35  ;;  %13227 = vmatprep.subr.bf16.mxu1 %v17366_v15 }
0x14a4   :  { %14300 = vrsqrt.f32 %v3504_v52 }
0x14a6   :  { %v14297_v17 = vpop.eup %14296 }
0x14a7   :  { %v3282_v43 = vmul.f32 %v14297_v17, %v3266_v58 }
0x14a9   :  { %v3288_v7 = vmul.f32 %v12211_v50, %v3282_v43 }
0x14aa   :  { %v14299_v29 = vpop.eup %14298 }
0x14ab   :  { %v3507_v3 = vmul.f32 %v14299_v29, %v3491_v19  ;;  %v3294_v63 = vadd.f32 %v12212_v11, %v3288_v7  ;;  %v14211_v19 = vld [vmem:[%s17354_s5 + $0x18] sm:$0xff]  }
0x14ad   :  { %v3295_v51 = vpack.c.bf16 %v3294_v63, %v3293_v32  ;;  %v3513_v58 = vmul.f32 %v12226_v28, %v3507_v3 }
0x14ae   :  { %v14301_v9 = vpop.eup %14300 }
0x14af   :  { %v3508_v26 = vmul.f32 %v14301_v9, %v3492_v13  ;;  %13198 = vmatmul.mubr.msk.bf16.vlgmr.msra.gmra.mrb[104].mxu0 %vm143_vm0, %v3295_v51  ;;  %v3519_v45 = vadd.f32 %v12227_v20, %v3513_v58 }
0x14b0   :  { %13214 = vmatpush3.bf16.msra.mxu0 %v14210_v38  ;;  %13217 = vmatprep.mubr.msk.bf16.mxu0 %vm14572_vm1, %v17366_v15 }
0x14b1   :  { %v3514_v34 = vmul.f32 %v12226_v28, %v3508_v26  ;;  %13215 = vmatprep.subr.bf16.mxu0 %v17366_v15 }
0x14b3   :  { %v3520_v24 = vadd.f32 %v12227_v20, %v3514_v34 }
0x14b4   :  { %13216 = vmatpush3.bf16.msra.mxu0 %v14211_v19 }
0x14b5   :  { %v3521_v13 = vpack.c.bf16 %v3520_v24, %v3519_v45  ;;  %13221 = vmatprep.subr.bf16.mxu0 %v17366_v15 }
0x14b7   :  { %13218 = vmatmul.mubr.msk.bf16.vlgmr.msra.gmra.mrb[108].mxu0 %vm143_vm0, %v3521_v13 }
0x14b8   :  { %13223 = vmatprep.mubr.msk.bf16.mxu0 %vm14572_vm1, %v17366_v15 }
0x1582   :  { %v3349_v48 = vpop.f32.mrb[104].mxu0 }
0x1583   :  { %v3350_v55 = vadd.f32 %v12213_v5, %v3349_v48  ;;  %v13199_v33 = vpop.f32.mrb[105].mxu0 }
0x1584   :  { %v3352_v35 = vpop.f32.mrb[106].mxu0 }
0x1585   :  { %v3353_v52 = vadd.f32 %v12213_v5, %v3352_v35  ;;  %v13200_v4 = vpop.f32.mrb[107].mxu0  ;;  %v3356_v50 = vmax.f32 %v3350_v55, 0.0 }
0x1587   :  { %v3357_v17 = vmax.f32 %v3353_v52, 0.0 }
0x1589   :  { %v3358_v43 = vpack.c.bf16 %v3357_v17, %v3356_v50 }
0x158a   :  { %v3575_v11 = vpop.f32.mrb[108].mxu0 }
0x158b   :  { %v3576_v7 = vadd.f32 %v12228_v59, %v3575_v11  ;;  %13210 = vmatmul.mubr.msk.bf16.vlgmr.msra.gmra.mrb[112].mxu1 %vm3383_vm9, %v3358_v43  ;;  %v13219_v29 = vpop.f32.mrb[109].mxu0 }
0x158c   :  { %v3578_v3 = vpop.f32.mrb[110].mxu0  ;;  %13229 = vmatprep.mubr.msk.bf16.mxu1 %vm14572_vm1, %v17366_v15 }
0x158d   :  { %v15488_v32 = vadd.f32 %v12228_v59, %v3578_v3  ;;  %3602 = vrot.lane.b32.xlu0 %v3576_v7, %s14573_s14  ;;  %3599 = vrot.lane.b32.xlu1 %v3576_v7, %s14574_s15  ;;  %v13220_v63 = vpop.f32.mrb[111].mxu0  ;;  %v15492_v28 = vmul.f32 0.35355338, %v3576_v7  ;;  %v3608_v51 = vpack.c.bf16 %v3576_v7, %v3576_v7 }
0x158f   :  { %v15495_v38 = vpack.c.bf16 %v15488_v32, %v3576_v7  ;;  %v3594_v13 = vpack.c.bf16 %v15492_v28, %v15492_v28 }
0x1591   :  { %3605 = vrot.lane.b32.xlu1 %v3576_v7, %s14575_s18  ;;  %3585 = vrot.lane.b32.xlu0 %v15492_v28, %s14574_s15 }
0x1595   :  { %3613 = vrot.lane.b32.xlu1 %v3608_v51, %s14576_s21 }
0x15ff   :  { %v15501_v9 = vpop.permute.xlu1 %3599  ;;  %v15507_v26 = vpop.permute.xlu0 %3602 }
0x1600   :  { %v15505_v58 = vpack.c.bf16 %v15501_v9, %v15501_v9  ;;  %v15515_v20 = vpack.c.bf16 %v15507_v26, %v15507_v26 }
0x1602   :  { %3662 = vrot.lane.b32.xlu1 %v15505_v58, %s14576_s21 }
0x1603   :  { %v15511_v19 = vpop.permute.xlu1 %3605  ;;  %v15541_v35 = vpop.permute.xlu0 %3585 }
0x1604   :  { %v15519_v34 = vpack.c.bf16 %v15511_v19, %v15511_v19  ;;  %v3595_v17 = vpack.c.bf16 %v15541_v35, %v15541_v35 }
0x1606   :  { %3711 = vrot.lane.b32.xlu1 %v15515_v20, %s14576_s21  ;;  %3760 = vrot.lane.b32.xlu0 %v15519_v34, %s14576_s21 }
0x1607   :  { %v3614_v45 = vpop.permute.xlu1 %3613 }
0x1608   :  { %v3619_v24 = vsel %vm554_vm3, %v3614_v45, 0 }
0x1609   :  { %13222 = vmatpush3.bf16.xpose.msra.mxu0 %v3619_v24 }
0x160a   :  { %3588 = vrot.lane.b32.xlu1 %v15492_v28, %s14573_s14  ;;  %3591 = vrot.lane.b32.xlu0 %v15492_v28, %s14575_s18 }
0x160b   :  { %13233 = vmatprep.subr.bf16.mxu0 %v17366_v15 }
0x1610   :  { %13224 = vmatmul.mubr.msk.bf16.vlgmr.msra.gmra.mrb[112].mxu0 %vm554_vm3, %v3594_v13 }
0x1611   :  { %13235 = vmatprep.mubr.msk.bf16.mxu0 %vm14572_vm1, %v17366_v15 }
0x165e   :  { %v15536_v6 = vpop.f32.mrb[112].mxu1 }
0x165f   :  { %17388 = vst [vmem:[#allocation4_spill] sm:$0xff] %v15536_v6  ;;  %v13211_v40 = vpop.f32.mrb[113].mxu1 }
0x1660   :  { %v15538_v5 = vpop.f32.mrb[114].mxu1 }
0x1661   :  { %17389 = vst [vmem:[#allocation5_spill] sm:$0xff] %v15538_v5  ;;  %v13212_v48 = vpop.f32.mrb[115].mxu1 }
0x1674   :  { %v3663_v55 = vpop.permute.xlu1 %3662 }
0x1675   :  { %v3668_v33 = vsel %vm554_vm3, %v3663_v55, 0 }
0x1676   :  { %13228 = vmatpush3.bf16.xpose.msra.mxu1 %v3668_v33 }
0x1677   :  { %13239 = vmatprep.subr.bf16.mxu1 %v17366_v15 }
0x1678   :  { %v3712_v52 = vpop.permute.xlu1 %3711  ;;  %v3761_v50 = vpop.permute.xlu0 %3760 }
0x1679   :  { %v3717_v4 = vsel %vm554_vm3, %v3712_v52, 0  ;;  %v3766_v43 = vsel %vm554_vm3, %v3761_v50, 0 }
0x167a   :  { %13234 = vmatpush3.bf16.xpose.msra.mxu0 %v3717_v4 }
0x167b   :  { %13245 = vmatprep.subr.bf16.mxu0 %v17366_v15 }
0x167c   :  { %v15548_v59 = vpop.permute.xlu1 %3588  ;;  %v15557_v7 = vpop.permute.xlu0 %3591 }
0x167d   :  { %13230 = vmatmul.mubr.msk.bf16.vlgmr.msra.gmra.mrb[116].mxu1 %vm554_vm3, %v3595_v17  ;;  %v3596_v11 = vpack.c.bf16 %v15548_v59, %v15548_v59  ;;  %v3597_v29 = vpack.c.bf16 %v15557_v7, %v15557_v7 }
0x167e   :  { %13240 = vmatpush3.bf16.xpose.msra.mxu1 %v3766_v43  ;;  %13241 = vmatprep.mubr.msk.bf16.mxu1 %vm14572_vm1, %v17366_v15 }
0x167f   :  { %13251 = vmatprep.subr.bf16.mxu1 %v17366_v15 }
0x1681   :  { %13236 = vmatmul.mubr.msk.bf16.vlgmr.msra.gmra.mrb[116].mxu0 %vm554_vm3, %v3596_v11 }
0x1682   :  { %13247 = vmatprep.mubr.msk.bf16.mxu0 %vm14572_vm1, %v17366_v15 }
0x1685   :  { %13242 = vmatmul.mubr.msk.bf16.vlgmr.msra.gmra.mrb[120].mxu1 %vm554_vm3, %v3597_v29 }
0x1686   :  { %13253 = vmatprep.mubr.msk.bf16.mxu1 %vm14572_vm1, %v17366_v15 }
0x16e3   :  { %v3655_v3 = vpop.f32.mrb[112].mxu0 }
0x16e4   :  { %v13225_v63 = vpop.f32.mrb[113].mxu0  ;;  %v3809_v45 = vsel %vm3808_vm10, %v3655_v3, -inf }
0x16e5   :  { %3810 = vmax.xlane.f32.xlu1 %v3809_v45  ;;  %v3658_v24 = vpop.f32.mrb[114].mxu0 }
0x16e6   :  { %v13226_v13 = vpop.f32.mrb[115].mxu0 }
0x16f6   :  { %3857 = vrot.lane.b32.xlu1 %v3608_v51, %s14577_s25 }
0x1750   :  { %v3704_v40 = vpop.f32.mrb[116].mxu1 }
0x1751   :  { %v13231_v48 = vpop.f32.mrb[117].mxu1  ;;  %v3812_v55 = vsel %vm3808_vm10, %v3704_v40, -inf }
0x1752   :  { %3813 = vmax.xlane.f32.xlu0 %v3812_v55  ;;  %v3707_v33 = vpop.f32.mrb[118].mxu1 }
0x1753   :  { %v13232_v52 = vpop.f32.mrb[119].mxu1 }
0x1754   :  { %v3753_v4 = vpop.f32.mrb[116].mxu0 }
0x1755   :  { %v13237_v50 = vpop.f32.mrb[117].mxu0  ;;  %v3815_v17 = vsel %vm3808_vm10, %v3753_v4, -inf }
0x1756   :  { %3816 = vmax.xlane.f32.xlu0 %v3815_v17  ;;  %v3756_v43 = vpop.f32.mrb[118].mxu0 }
0x1757   :  { %v13238_v11 = vpop.f32.mrb[119].mxu0 }
0x1758   :  { %v3802_v29 = vpop.f32.mrb[120].mxu1 }
0x1759   :  { %v13243_v63 = vpop.f32.mrb[121].mxu1  ;;  %v3818_v45 = vsel %vm3808_vm10, %v3802_v29, -inf }
0x175a   :  { %v3805_v24 = vpop.f32.mrb[122].mxu1  ;;  %3819 = vmax.xlane.f32.xlu0 %v3818_v45 }
0x175b   :  { %v13244_v51 = vpop.f32.mrb[123].mxu1 }
0x1772   :  { %v3811_v13 = vpop.xlane.xlu1 %3810 }
0x1773   :  { %v3821_v48 = vsub.f32 %v3655_v3, %v3811_v13 }
0x1775   :  { %v3825_v60 = vmul.f32 1.442695, %v3821_v48 }
0x1776   :  { %v3858_v55 = vpop.permute.xlu1 %3857 }
0x1777   :  { %14302 = vpow2.f32 %v3825_v60  ;;  %v3863_v33 = vand.u32 %v3858_v55, %v15145_v1 }
0x1779   :  { %13246 = vmatpush3.bf16.msra.mxu0 %v3863_v33 }
0x177a   :  { %13257 = vmatprep.subr.bf16.mxu0 %v17366_v15 }
0x1781   :  { %v14303_v52 = vpop.eup %14302 }
0x1782   :  { %v3833_v50 = vsel %vm3808_vm10, %v14303_v52, 0.0 }
0x1783   :  { %3834 = vadd.xlane.f32.xlu1 %v3833_v50 }
0x17df   :  { %v3814_v17 = vpop.xlane.xlu0 %3813 }
0x17e0   :  { %v3822_v43 = vsub.f32 %v3704_v40, %v3814_v17 }
0x17e2   :  { %v3827_v11 = vmul.f32 1.442695, %v3822_v43 }
0x17e3   :  { %v3817_v63 = vpop.xlane.xlu0 %3816 }
0x17e4   :  { %14304 = vpow2.f32 %v3827_v11  ;;  %v3823_v45 = vsub.f32 %v3753_v4, %v3817_v63  ;;  %v4282_v4 = vshrl.u32 %v15495_v38, 16 }
0x17e6   :  { %v3829_v24 = vmul.f32 1.442695, %v3823_v45  ;;  %v4284_v43 = vrot.slane %v4282_v4, 2 }
0x17e7   :  { %v3820_v3 = vpop.xlane.xlu0 %3819 }
0x17e8   :  { %14306 = vpow2.f32 %v3829_v24  ;;  %v3824_v51 = vsub.f32 %v3802_v29, %v3820_v3  ;;  %v4285_v29 = vshll.u32 %v15495_v38, 16 }
0x17ea   :  { %v3831_v60 = vmul.f32 1.442695, %v3824_v51  ;;  %v4287_v11 = vrot.slane %v4285_v29, 3  ;;  %v12114_v29 = vld [vmem:[%s17358_s6 + $0x10] sm:$0xf] }
0x17ec   :  { %14308 = vpow2.f32 %v3831_v60  ;;  %v15598_v38 = vor.u32 %v4287_v11, %v4284_v43 }
0x17ee   :  { %v14305_v13 = vpop.eup %14304 }
0x17ef   :  { %v3836_v48 = vsel %vm3808_vm10, %v14305_v13, 0.0 }
0x17f0   :  { %3837 = vadd.xlane.f32.xlu0 %v3836_v48 }
0x17f2   :  { %v14307_v55 = vpop.eup %14306 }
0x17f3   :  { %v3839_v33 = vsel %vm3808_vm10, %v14307_v55, 0.0 }
0x17f4   :  { %3840 = vadd.xlane.f32.xlu1 %v3839_v33 }
0x17f6   :  { %v15577_v50 = vpop.eup %14308 }
0x17f7   :  { %v3842_v40 = vsel %vm3808_vm10, %v15577_v50, 0.0 }
0x17f8   :  { %3843 = vadd.xlane.f32.xlu0 %v3842_v40 }
0x1805   :  { %3953 = vrot.lane.b32.xlu1 %v15515_v20, %s14577_s25  ;;  %v15596_v20 = vmul.f32 0.35355338, %v15488_v32 }
0x1809   :  { %4001 = vrot.lane.b32.xlu1 %v15519_v34, %s14577_s25 }
0x180d   :  { %4260 = vrot.lane.b32.xlu1 %v15488_v32, %s14574_s15 }
0x180e   :  { %3905 = vrot.lane.b32.xlu0 %v15505_v58, %s14577_s25 }
0x1810   :  { %v3835_v17 = vpop.xlane.xlu1 %3834 }
0x1811   :  { %14310 = vrcp.f32 %v3835_v17  ;;  %4266 = vrot.lane.b32.xlu1 %v15488_v32, %s14575_s18 }
0x1812   :  { %4263 = vrot.lane.b32.xlu0 %v15488_v32, %s14573_s14 }
0x1815   :  { %4246 = vrot.lane.b32.xlu1 %v15596_v20, %s14574_s15 }
0x1816   :  { %4289 = vrot.lane.b32.xlu0 %v15598_v38, %s14576_s21 }
0x1819   :  { %4249 = vrot.lane.b32.xlu1 %v15596_v20, %s14573_s14 }
0x181b   :  { %v14311_v58 = vpop.eup %14310 }
0x181c   :  { %v3849_v34 = vmul.f32 %v14311_v58, %v14303_v52 }
0x181d   :  { %4252 = vrot.lane.b32.xlu1 %v15596_v20, %s14575_s18 }
0x181e   :  { %v3853_v63 = vpack.c.bf16 %v3849_v34, %v3849_v34 }
0x1820   :  { %13248 = vmatmul.mubr.msk.bf16.vlgmr.msra.gmra.mrb[120].mxu0 %vm2138_vm5, %v3853_v63 }
0x1821   :  { %13259 = vmatprep.mubr.msk.bf16.mxu0 %vm14572_vm1, %v17366_v15 }
0x187d   :  { %v3838_v32 = vpop.xlane.xlu0 %3837 }
0x187e   :  { %14312 = vrcp.f32 %v3838_v32 }
0x1881   :  { %v3841_v45 = vpop.xlane.xlu1 %3840 }
0x1882   :  { %14314 = vrcp.f32 %v3841_v45  ;;  %v15623_v45 = vsel %vm801_vm4, %v12114_v29, 0 }
0x1885   :  { %v3954_v24 = vpop.permute.xlu1 %3953  ;;  %v3844_v3 = vpop.xlane.xlu0 %3843 }
0x1886   :  { %v3959_v51 = vand.u32 %v3954_v24, %v15145_v1  ;;  %14316 = vrcp.f32 %v3844_v3 }
0x1888   :  { %v14313_v60 = vpop.eup %14312  ;;  %13258 = vmatpush3.bf16.msra.mxu0 %v3959_v51 }
0x1889   :  { %v4002_v52 = vpop.permute.xlu1 %4001  ;;  %v3906_v48 = vpop.permute.xlu0 %3905  ;;  %v3850_v33 = vmul.f32 %v14313_v60, %v14305_v13  ;;  %13269 = vmatprep.subr.bf16.mxu0 %v17366_v15 }
0x188a   :  { %v3911_v40 = vand.u32 %v3906_v48, %v15145_v1  ;;  %v4007_v34 = vand.u32 %v4002_v52, %v15145_v1 }
0x188b   :  { %v3854_v11 = vpack.c.bf16 %v3850_v33, %v3850_v33  ;;  %v12115_v33 = vld [vmem:[%s17358_s6 + $0x14] sm:$0xf] }
0x188c   :  { %v14315_v4 = vpop.eup %14314  ;;  %13252 = vmatpush3.bf16.msra.mxu1 %v3911_v40 }
0x188d   :  { %v4261_v17 = vpop.permute.xlu1 %4260  ;;  %v4264_v43 = vpop.permute.xlu0 %4263  ;;  %13263 = vmatprep.subr.bf16.mxu1 %v17366_v15  ;;  %v3851_v58 = vmul.f32 %v14315_v4, %v14307_v55 }
0x188e   :  { %v4270_v13 = vpack.c.bf16 %v4261_v17, %v15501_v9  ;;  %v4271_v63 = vpack.c.bf16 %v4264_v43, %v15507_v26 }
0x188f   :  { %13254 = vmatmul.mubr.msk.bf16.vlgmr.msra.gmra.mrb[124].mxu1 %vm2138_vm5, %v3854_v11  ;;  %v3855_v32 = vpack.c.bf16 %v3851_v58, %v3851_v58  ;;  %v15641_v58 = vsel %vm801_vm4, %v12115_v33, 0 }
0x1890   :  { %v14317_v24 = vpop.eup %14316  ;;  %v4346_v3 = vshrl.u32 %v4270_v13, 16  ;;  %v4349_v51 = vshll.u32 %v4270_v13, 16  ;;  %v4410_v60 = vshrl.u32 %v4271_v63, 16  ;;  %v4413_v48 = vshll.u32 %v4271_v63, 16  ;;  %13264 = vmatpush3.bf16.msra.mxu1 %v4007_v34  ;;  %13265 = vmatprep.mubr.msk.bf16.mxu1 %vm14572_vm1, %v17366_v15 }
0x1891   :  { %13260 = vmatmul.mubr.msk.bf16.vlgmr.msra.gmra.mrb[124].mxu0 %vm2138_vm5, %v3855_v32  ;;  %v4267_v9 = vpop.permute.xlu1 %4266  ;;  %v3852_v26 = vmul.f32 %v14317_v24, %v15577_v50  ;;  %13275 = vmatprep.subr.bf16.mxu1 %v17366_v15  ;;  %v12116_v32 = vld [vmem:[%s17358_s6 + $0x18] sm:$0xf]  ;;  %v4290_v33 = vpop.permute.xlu0 %4289 }
0x1892   :  { %v4348_v55 = vrot.slane %v4346_v3, 2  ;;  %v4351_v52 = vrot.slane %v4349_v51, 3  ;;  %13270 = vmatpush3.bf16.msra.mxu0 %v15623_v45  ;;  %13271 = vmatprep.mubr.msk.bf16.mxu0 %vm14572_vm1, %v17366_v15  ;;  %v4272_v40 = vpack.c.bf16 %v4267_v9, %v15511_v19  ;;  %v4412_v50 = vrot.slane %v4410_v60, 2 }
0x1893   :  { %13281 = vmatprep.subr.bf16.mxu0 %v17366_v15  ;;  %v4415_v29 = vrot.slane %v4413_v48, 3  ;;  %v3856_v11 = vpack.c.bf16 %v3852_v26, %v3852_v26  ;;  %v15662_v60 = vsel %vm801_vm4, %v12116_v32, 0 }
0x1894   :  { %v15638_v4 = vor.u32 %v4351_v52, %v4348_v55  ;;  %v4474_v17 = vshrl.u32 %v4272_v40, 16  ;;  %v4477_v43 = vshll.u32 %v4272_v40, 16  ;;  %v12117_v55 = vld [vmem:[%s17358_s6 + $0x1c] sm:$0xf]  ;;  %v4255_v52 = vpack.c.bf16 %v15596_v20, %v15492_v28 }
0x1895   :  { %v15646_v34 = vor.u32 %v4415_v29, %v4412_v50  ;;  %v4247_v26 = vpop.permute.xlu1 %4246  ;;  %v4295_v20 = vsel %vm554_vm3, %v4290_v33, 0 }
0x1896   :  { %4353 = vrot.lane.b32.xlu0 %v15638_v4, %s14576_s21  ;;  %v4476_v19 = vrot.slane %v4474_v17, 2  ;;  %v4479_v13 = vrot.slane %v4477_v43, 3  ;;  %v15675_v43 = vsel %vm801_vm4, %v12117_v55, 0  ;;  %v4256_v55 = vpack.c.bf16 %v4247_v26, %v15541_v35 }
0x1897   :  { %13266 = vmatmul.mubr.msk.bf16.vlgmr.msra.gmra.mrb[128].mxu1 %vm2138_vm5, %v3856_v11 }
0x1898   :  { %13276 = vmatpush3.bf16.msra.mxu1 %v15641_v58  ;;  %13277 = vmatprep.mubr.msk.bf16.mxu1 %vm14572_vm1, %v17366_v15  ;;  %v15654_v63 = vor.u32 %v4479_v13, %v4476_v19 }
0x1899   :  { %13287 = vmatprep.subr.bf16.mxu1 %v17366_v15  ;;  %v4250_v50 = vpop.permute.xlu1 %4249 }
0x189a   :  { %4417 = vrot.lane.b32.xlu0 %v15646_v34, %s14576_s21 }
0x189d   :  { %v4253_v35 = vpop.permute.xlu1 %4252 }
0x189e   :  { %4481 = vrot.lane.b32.xlu0 %v15654_v63, %s14576_s21 }
0x18f3   :  { %v3899_v24 = vpop.f32.mrb[120].mxu0 }
0x18f4   :  { %v4049_v3 = vpack.c.bf16 %v3899_v24, %v3899_v24  ;;  %v13249_v51 = vpop.f32.mrb[121].mxu0 }
0x18f5   :  { %v3902_v48 = vpop.f32.mrb[122].mxu0  ;;  %v4277_v51 = vshll.u32 %v4255_v52, 16 }
0x18f6   :  { %v13250_v9 = vpop.f32.mrb[123].mxu0  ;;  %13272 = vmatmul.mubr.msk.bf16.vlgmr.msra.gmra.mrb[128].mxu0 %vm554_vm3, %v4049_v3  ;;  %v4274_v3 = vshrl.u32 %v4255_v52, 16  ;;  %v4257_v52 = vpack.c.bf16 %v4250_v50, %v15548_v59 }
0x18f7   :  { %13282 = vmatpush3.bf16.msra.mxu0 %v15662_v60  ;;  %13283 = vmatprep.mubr.msk.bf16.mxu0 %vm14572_vm1, %v17366_v15 }
0x18f8   :  { %13293 = vmatprep.subr.bf16.mxu0 %v17366_v15 }
0x1908   :  { %v4354_v48 = vpop.permute.xlu0 %4353 }
0x1909   :  { %v4359_v59 = vsel %vm554_vm3, %v4354_v48, 0 }
0x1962   :  { %v3947_v40 = vpop.f32.mrb[124].mxu1 }
0x1963   :  { %v4050_v29 = vpack.c.bf16 %v3947_v40, %v3947_v40  ;;  %v13255_v17 = vpop.f32.mrb[125].mxu1  ;;  %v4276_v40 = vrot.slane %v4274_v3, 2 }
0x1964   :  { %v3950_v11 = vpop.f32.mrb[126].mxu1  ;;  %v3995_v19 = vpop.f32.mrb[124].mxu0 }
0x1965   :  { %v4051_v13 = vpack.c.bf16 %v3995_v19, %v3995_v19  ;;  %v13256_v32 = vpop.f32.mrb[127].mxu1  ;;  %v13261_v24 = vpop.f32.mrb[125].mxu0  ;;  %13278 = vmatmul.mubr.msk.bf16.vlgmr.msra.gmra.mrb[132].mxu1 %vm554_vm3, %v4050_v29  ;;  %v4279_v29 = vrot.slane %v4277_v51, 3  ;;  %v4338_v19 = vshrl.u32 %v4256_v55, 16 }
0x1966   :  { %13288 = vmatpush3.bf16.msra.mxu1 %v15675_v43  ;;  %v3998_v28 = vpop.f32.mrb[126].mxu0  ;;  %13289 = vmatprep.mubr.msk.bf16.mxu1 %vm14572_vm1, %v17366_v15  ;;  %v4341_v32 = vshll.u32 %v4256_v55, 16  ;;  %v4258_v55 = vpack.c.bf16 %v4253_v35, %v15557_v7 }
0x1967   :  { %v13262_v9 = vpop.f32.mrb[127].mxu0  ;;  %13284 = vmatmul.mubr.msk.bf16.vlgmr.msra.gmra.mrb[132].mxu0 %vm554_vm3, %v4051_v13  ;;  %13299 = vmatprep.subr.bf16.mxu1 %v17366_v15  ;;  %v4418_v13 = vpop.permute.xlu0 %4417  ;;  %v4402_v28 = vshrl.u32 %v4257_v52, 16  ;;  %v4340_v3 = vrot.slane %v4338_v19, 2 }
0x1968   :  { %13294 = vmatpush3.bf16.xpose.msra.mxu0 %v4295_v20  ;;  %13295 = vmatprep.mubr.msk.bf16.mxu0 %vm14572_vm1, %v17366_v15  ;;  %v4405_v9 = vshll.u32 %v4257_v52, 16  ;;  %v4280_v20 = vor.u32 %v4279_v29, %v4276_v40  ;;  %v4423_v50 = vsel %vm554_vm3, %v4418_v13, 0  ;;  %v4343_v51 = vrot.slane %v4341_v32, 3 }
0x1969   :  { %13305 = vmatprep.subr.bf16.mxu0 %v17366_v15  ;;  %v4404_v52 = vrot.slane %v4402_v28, 2  ;;  %v4466_v29 = vshrl.u32 %v4258_v55, 16 }
0x196a   :  { %v4043_v17 = vpop.f32.mrb[128].mxu1  ;;  %v4344_v40 = vor.u32 %v4343_v51, %v4340_v3 }
0x196b   :  { %v4052_v11 = vpack.c.bf16 %v4043_v17, %v4043_v17  ;;  %v13267_v33 = vpop.f32.mrb[129].mxu1  ;;  %v4407_v17 = vrot.slane %v4405_v9, 3  ;;  %v4482_v48 = vpop.permute.xlu0 %4481  ;;  %v4468_v7 = vrot.slane %v4466_v29, 2 }
0x196c   :  { %v4046_v24 = vpop.f32.mrb[130].mxu1  ;;  %v4487_v19 = vsel %vm554_vm3, %v4482_v48, 0 }
0x196d   :  { %v13268_v26 = vpop.f32.mrb[131].mxu1  ;;  %13290 = vmatmul.mubr.msk.bf16.vlgmr.msra.gmra.mrb[136].mxu1 %vm554_vm3, %v4052_v11  ;;  %v4469_v11 = vshll.u32 %v4258_v55, 16  ;;  %v4408_v33 = vor.u32 %v4407_v17, %v4404_v52 }
0x196e   :  { %13301 = vmatprep.mubr.msk.bf16.mxu1 %vm14572_vm1, %v17366_v15 }
0x196f   :  { %13300 = vmatpush3.bf16.xpose.msra.mxu1 %v4359_v59  ;;  %13296 = vmatmul.mubr.msk.bf16.vlgmr.msra.gmra.mrb[136].mxu0 %vm554_vm3, %v4280_v20  ;;  %v4471_v32 = vrot.slane %v4469_v11, 3 }
0x1970   :  { %13306 = vmatpush3.bf16.xpose.msra.mxu0 %v4423_v50  ;;  %13311 = vmatprep.subr.bf16.mxu1 %v17366_v15 }
0x1971   :  { %13307 = vmatprep.mubr.msk.bf16.mxu0 %vm14572_vm1, %v17366_v15  ;;  %13317 = vmatprep.subr.bf16.mxu0 %v17366_v15  ;;  %v4472_v13 = vor.u32 %v4471_v32, %v4468_v7 }
0x1976   :  { %13302 = vmatmul.mubr.msk.bf16.vlgmr.msra.gmra.mrb[140].mxu1 %vm554_vm3, %v4344_v40 }
0x1977   :  { %13312 = vmatpush3.bf16.xpose.msra.mxu1 %v4487_v19  ;;  %13308 = vmatmul.mubr.msk.bf16.vlgmr.msra.gmra.mrb[140].mxu0 %vm554_vm3, %v4408_v33 }
0x1978   :  { %13313 = vmatprep.mubr.msk.bf16.mxu1 %vm14572_vm1, %v17366_v15  ;;  %13319 = vmatprep.mubr.msk.bf16.mxu0 %vm14572_vm1, %v17366_v15 }
0x1979   :  { %13323 = vmatprep.subr.bf16.mxu1 %v17366_v15 }
0x197e   :  { %13314 = vmatmul.mubr.msk.bf16.vlgmr.msra.gmra.mrb[144].mxu1 %vm554_vm3, %v4472_v13 }
0x197f   :  { %13325 = vmatprep.mubr.msk.bf16.mxu1 %vm14572_vm1, %v17366_v15 }
0x19c9   :  { %v4093_v24 = vpop.f32.mrb[128].mxu0 }
0x19ca   :  { %v13273_v28 = vpop.f32.mrb[129].mxu0  ;;  %v4238_v20 = vsel %vm4237_vm11, %v4093_v24, 0.0 }
0x19cb   :  { %v4096_v9 = vpop.f32.mrb[130].mxu0 }
0x19cc   :  { %v13274_v35 = vpop.f32.mrb[131].mxu0 }
0x1a38   :  { %v4139_v26 = vpop.f32.mrb[132].mxu1 }
0x1a39   :  { %v4239_v59 = vsel %vm4237_vm11, %v4139_v26, 0.0  ;;  %v13279_v50 = vpop.f32.mrb[133].mxu1 }
0x1a3a   :  { %v4240_v3 = vadd.f32 %v4239_v59, %v4238_v20  ;;  %v4142_v51 = vpop.f32.mrb[134].mxu1  ;;  %v4185_v55 = vpop.f32.mrb[132].mxu0 }
0x1a3b   :  { %v4241_v52 = vsel %vm4237_vm11, %v4185_v55, 0.0  ;;  %v13280_v17 = vpop.f32.mrb[135].mxu1  ;;  %v13285_v48 = vpop.f32.mrb[133].mxu0 }
0x1a3c   :  { %v4242_v40 = vadd.f32 %v4241_v52, %v4240_v3  ;;  %v4188_v29 = vpop.f32.mrb[134].mxu0 }
0x1a3d   :  { %v13286_v11 = vpop.f32.mrb[135].mxu0 }
0x1a40   :  { %v4231_v33 = vpop.f32.mrb[136].mxu1 }
0x1a41   :  { %v4243_v19 = vsel %vm4237_vm11, %v4231_v33, 0.0  ;;  %v13291_v7 = vpop.f32.mrb[137].mxu1 }
0x1a42   :  { %v15715_v32 = vadd.f32 %v4243_v19, %v4242_v40  ;;  %v4234_v13 = vpop.f32.mrb[138].mxu1  ;;  %v4331_v24 = vpop.f32.mrb[136].mxu0 }
0x1a43   :  { %v13292_v28 = vpop.f32.mrb[139].mxu1  ;;  %v13297_v9 = vpop.f32.mrb[137].mxu0  ;;  %v4529_v35 = vsel %vm3808_vm10, %v4331_v24, -inf }
0x1a44   :  { %4530 = vmax.xlane.f32.xlu1 %v4529_v35  ;;  %v4334_v26 = vpop.f32.mrb[138].mxu0 }
0x1a45   :  { %v13298_v20 = vpop.f32.mrb[139].mxu0 }
0x1a49   :  { %v4395_v59 = vpop.f32.mrb[140].mxu1 }
0x1a4a   :  { %v13303_v50 = vpop.f32.mrb[141].mxu1  ;;  %v4532_v3 = vsel %vm3808_vm10, %v4395_v59, -inf  ;;  %v4459_v51 = vpop.f32.mrb[140].mxu0 }
0x1a4b   :  { %4533 = vmax.xlane.f32.xlu0 %v4532_v3  ;;  %v4398_v55 = vpop.f32.mrb[142].mxu1  ;;  %v13309_v52 = vpop.f32.mrb[141].mxu0  ;;  %v4535_v29 = vsel %vm3808_vm10, %v4459_v51, -inf }
0x1a4c   :  { %v13304_v17 = vpop.f32.mrb[143].mxu1  ;;  %v4462_v48 = vpop.f32.mrb[142].mxu0 }
0x1a4d   :  { %v13310_v40 = vpop.f32.mrb[143].mxu0 }
0x1a4f   :  { %4536 = vmax.xlane.f32.xlu0 %v4535_v29 }
0x1a51   :  { %v4523_v11 = vpop.f32.mrb[144].mxu1 }
0x1a52   :  { %v13315_v33 = vpop.f32.mrb[145].mxu1  ;;  %v4538_v19 = vsel %vm3808_vm10, %v4523_v11, -inf }
0x1a53   :  { %v4526_v7 = vpop.f32.mrb[146].mxu1  ;;  %4539 = vmax.xlane.f32.xlu0 %v4538_v19 }
0x1a54   :  { %v13316_v13 = vpop.f32.mrb[147].mxu1 }
0x1a55   :  { %4577 = vrot.lane.b32.xlu1 %v15598_v38, %s14577_s25 }
0x1ad1   :  { %v4531_v28 = vpop.xlane.xlu1 %4530 }
0x1ad2   :  { %v4541_v9 = vsub.f32 %v4331_v24, %v4531_v28 }
0x1ad4   :  { %v4545_v35 = vmul.f32 1.442695, %v4541_v9 }
0x1ad5   :  { %v4578_v26 = vpop.permute.xlu1 %4577 }
0x1ad6   :  { %14318 = vpow2.f32 %v4545_v35  ;;  %v4583_v20 = vand.u32 %v4578_v26, %v15145_v1 }
0x1ad8   :  { %v4534_v50 = vpop.xlane.xlu0 %4533  ;;  %13318 = vmatpush3.bf16.msra.mxu0 %v4583_v20 }
0x1ad9   :  { %v4542_v3 = vsub.f32 %v4395_v59, %v4534_v50  ;;  %13329 = vmatprep.subr.bf16.mxu0 %v17366_v15 }
0x1adb   :  { %v4547_v55 = vmul.f32 1.442695, %v4542_v3 }
0x1adc   :  { %v4537_v52 = vpop.xlane.xlu0 %4536 }
0x1add   :  { %14320 = vpow2.f32 %v4547_v55  ;;  %v4543_v17 = vsub.f32 %v4459_v51, %v4537_v52 }
0x1adf   :  { %v4549_v48 = vmul.f32 1.442695, %v4543_v17 }
0x1ae0   :  { %v14319_v40 = vpop.eup %14318  ;;  %v4540_v29 = vpop.xlane.xlu0 %4539 }
0x1ae1   :  { %14322 = vpow2.f32 %v4549_v48  ;;  %v4544_v38 = vsub.f32 %v4523_v11, %v4540_v29  ;;  %v4553_v24 = vsel %vm3808_vm10, %v14319_v40, 0.0 }
0x1ae2   :  { %4554 = vadd.xlane.f32.xlu1 %v4553_v24 }
0x1ae3   :  { %v4551_v33 = vmul.f32 1.442695, %v4544_v38 }
0x1ae5   :  { %14324 = vpow2.f32 %v4551_v33 }
0x1ae7   :  { %v14321_v19 = vpop.eup %14320 }
0x1ae8   :  { %v4556_v7 = vsel %vm3808_vm10, %v14321_v19, 0.0 }
0x1ae9   :  { %4557 = vadd.xlane.f32.xlu0 %v4556_v7 }
0x1aeb   :  { %v14323_v59 = vpop.eup %14322 }
0x1aec   :  { %v4559_v13 = vsel %vm3808_vm10, %v14323_v59, 0.0 }
0x1aed   :  { %4560 = vadd.xlane.f32.xlu1 %v4559_v13 }
0x1aef   :  { %v14325_v28 = vpop.eup %14324 }
0x1af0   :  { %v4562_v51 = vsel %vm3808_vm10, %v14325_v28, 0.0  ;;  %vm9322_vm10 = vcmask 259072  }
0x1af1   :  { %4563 = vadd.xlane.f32.xlu0 %v4562_v51 }
0x1afe   :  { %4673 = vrot.lane.b32.xlu1 %v15646_v34, %s14577_s25 }
0x1b02   :  { %4721 = vrot.lane.b32.xlu1 %v15654_v63, %s14577_s25 }
0x1b07   :  { %4625 = vrot.lane.b32.xlu0 %v15638_v4, %s14577_s25 }
0x1b6f   :  { %v4555_v11 = vpop.xlane.xlu1 %4554 }
0x1b70   :  { %14326 = vrcp.f32 %v4555_v11 }
0x1b76   :  { %v4558_v9 = vpop.xlane.xlu0 %4557 }
0x1b77   :  { %14328 = vrcp.f32 %v4558_v9 }
0x1b7a   :  { %v14327_v35 = vpop.eup %14326  ;;  %v4561_v26 = vpop.xlane.xlu1 %4560 }
0x1b7b   :  { %14330 = vrcp.f32 %v4561_v26  ;;  %v4569_v20 = vmul.f32 %v14327_v35, %v14319_v40 }
0x1b7d   :  { %v4573_v50 = vpack.c.bf16 %v4569_v20, %v4569_v20 }
0x1b7e   :  { %v4674_v3 = vpop.permute.xlu1 %4673  ;;  %v4564_v55 = vpop.xlane.xlu0 %4563 }
0x1b7f   :  { %v4679_v52 = vand.u32 %v4674_v3, %v15145_v1  ;;  %14332 = vrcp.f32 %v4564_v55  ;;  %13320 = vmatmul.mubr.msk.bf16.vlgmr.msra.gmra.mrb[144].mxu0 %vm2138_vm5, %v4573_v50 }
0x1b80   :  { %13331 = vmatprep.mubr.msk.bf16.mxu0 %vm14572_vm1, %v17366_v15 }
0x1b81   :  { %v14329_v4 = vpop.eup %14328  ;;  %13330 = vmatpush3.bf16.msra.mxu0 %v4679_v52 }
0x1b82   :  { %v4626_v34 = vpop.permute.xlu0 %4625  ;;  %v4570_v63 = vmul.f32 %v14329_v4, %v14321_v19  ;;  %13341 = vmatprep.subr.bf16.mxu0 %v17366_v15  ;;  %v4722_v48 = vpop.permute.xlu1 %4721 }
0x1b83   :  { %v4631_v17 = vand.u32 %v4626_v34, %v15145_v1  ;;  %v4727_v24 = vand.u32 %v4722_v48, %v15145_v1 }
0x1b84   :  { %v4574_v29 = vpack.c.bf16 %v4570_v63, %v4570_v63  ;;  %v14527_v63 = vld [vmem:[%s17357_s7 + $0x10] sm:$0xff]  }
0x1b85   :  { %v14331_v40 = vpop.eup %14330  ;;  %13324 = vmatpush3.bf16.msra.mxu1 %v4631_v17 }
0x1b86   :  { %13335 = vmatprep.subr.bf16.mxu1 %v17366_v15  ;;  %v4571_v38 = vmul.f32 %v14331_v40, %v14323_v59 }
0x1b88   :  { %13326 = vmatmul.mubr.msk.bf16.vlgmr.msra.gmra.mrb[148].mxu1 %vm2138_vm5, %v4574_v29  ;;  %v4575_v33 = vpack.c.bf16 %v4571_v38, %v4571_v38  ;;  %v14528_v38 = vld [vmem:[%s17357_s7 + $0x18] sm:$0xff]  }
0x1b89   :  { %v14333_v7 = vpop.eup %14332  ;;  %13336 = vmatpush3.bf16.msra.mxu1 %v4727_v24  ;;  %13337 = vmatprep.mubr.msk.bf16.mxu1 %vm14572_vm1, %v17366_v15 }
0x1b8a   :  { %13332 = vmatmul.mubr.msk.bf16.vlgmr.msra.gmra.mrb[148].mxu0 %vm2138_vm5, %v4575_v33  ;;  %v4572_v19 = vmul.f32 %v14333_v7, %v14325_v28  ;;  %13347 = vmatprep.subr.bf16.mxu1 %v17366_v15 }
0x1b8b   :  { %13342 = vmatpush3.bf16.msra.mxu0 %v15623_v45  ;;  %13343 = vmatprep.mubr.msk.bf16.mxu0 %vm14572_vm1, %v17366_v15 }
0x1b8c   :  { %13353 = vmatprep.subr.bf16.mxu0 %v17366_v15  ;;  %v4576_v1 = vpack.c.bf16 %v4572_v19, %v4572_v19 }
0x1b90   :  { %13338 = vmatmul.mubr.msk.bf16.vlgmr.msra.gmra.mrb[152].mxu1 %vm2138_vm5, %v4576_v1 }
0x1b91   :  { %13348 = vmatpush3.bf16.msra.mxu1 %v15641_v58  ;;  %13349 = vmatprep.mubr.msk.bf16.mxu1 %vm14572_vm1, %v17366_v15 }
0x1b92   :  { %13359 = vmatprep.subr.bf16.mxu1 %v17366_v15 }
0x1c52   :  { %v4619_v59 = vpop.f32.mrb[144].mxu0 }
0x1c53   :  { %v4769_v13 = vpack.c.bf16 %v4619_v59, %v4619_v59  ;;  %v13321_v28 = vpop.f32.mrb[145].mxu0 }
0x1c54   :  { %v4622_v51 = vpop.f32.mrb[146].mxu0 }
0x1c55   :  { %v13322_v11 = vpop.f32.mrb[147].mxu0  ;;  %13344 = vmatmul.mubr.msk.bf16.vlgmr.msra.gmra.mrb[152].mxu0 %vm554_vm3, %v4769_v13 }
0x1c56   :  { %13354 = vmatpush3.bf16.msra.mxu0 %v15662_v60  ;;  %13355 = vmatprep.mubr.msk.bf16.mxu0 %vm14572_vm1, %v17366_v15 }
0x1c57   :  { %13365 = vmatprep.subr.bf16.mxu0 %v17366_v15 }
0x1c5b   :  { %v4667_v9 = vpop.f32.mrb[148].mxu1 }
0x1c5c   :  { %v4770_v35 = vpack.c.bf16 %v4667_v9, %v4667_v9  ;;  %v13327_v26 = vpop.f32.mrb[149].mxu1 }
0x1c5d   :  { %v4670_v20 = vpop.f32.mrb[150].mxu1  ;;  %v4715_v50 = vpop.f32.mrb[148].mxu0 }
0x1c5e   :  { %v4771_v3 = vpack.c.bf16 %v4715_v50, %v4715_v50  ;;  %v13328_v55 = vpop.f32.mrb[151].mxu1  ;;  %v13333_v52 = vpop.f32.mrb[149].mxu0  ;;  %13350 = vmatmul.mubr.msk.bf16.vlgmr.msra.gmra.mrb[156].mxu1 %vm554_vm3, %v4770_v35 }
0x1c5f   :  { %v4718_v4 = vpop.f32.mrb[150].mxu0  ;;  %13360 = vmatpush3.bf16.msra.mxu1 %v15675_v43  ;;  %13361 = vmatprep.mubr.msk.bf16.mxu1 %vm14572_vm1, %v17366_v15 }
0x1c60   :  { %v13334_v34 = vpop.f32.mrb[151].mxu0  ;;  %13356 = vmatmul.mubr.msk.bf16.vlgmr.msra.gmra.mrb[156].mxu0 %vm554_vm3, %v4771_v3  ;;  %13373 = vmatprep.subr.bf16.mxu1 %v17366_v15 }
0x1c61   :  { %13366 = vmatpush3.bf16.msra.mxu0 %v14527_v63  ;;  %13369 = vmatprep.mubr.msk.bf16.mxu0 %vm14572_vm1, %v17366_v15 }
0x1c62   :  { %13367 = vmatprep.subr.bf16.mxu0 %v17366_v15 }
0x1c63   :  { %v4763_v17 = vpop.f32.mrb[152].mxu1 }
0x1c64   :  { %v4772_v48 = vpack.c.bf16 %v4763_v17, %v4763_v17  ;;  %v13339_v40 = vpop.f32.mrb[153].mxu1 }
0x1c65   :  { %v4766_v29 = vpop.f32.mrb[154].mxu1  ;;  %13368 = vmatpush3.bf16.msra.mxu0 %v14528_v38  ;;  %v12256_v38 = vld [vmem:[%s17356_s11 + $0x11] ss:$0 sm:$0xff] }
0x1c66   :  { %v13340_v24 = vpop.f32.mrb[155].mxu1  ;;  %13362 = vmatmul.mubr.msk.bf16.vlgmr.msra.gmra.mrb[160].mxu1 %vm554_vm3, %v4772_v48  ;;  %13379 = vmatprep.subr.bf16.mxu0 %v17366_v15 }
0x1c67   :  { %13375 = vmatprep.mubr.msk.bf16.mxu1 %vm14572_vm1, %v17366_v15 }
0x1d28   :  { %v4810_v33 = vpop.f32.mrb[152].mxu0 }
0x1d29   :  { %v13345_v7 = vpop.f32.mrb[153].mxu0  ;;  %v4945_v13 = vsel %vm4237_vm11, %v4810_v33, 0.0 }
0x1d2a   :  { %v4813_v19 = vpop.f32.mrb[154].mxu0 }
0x1d2b   :  { %v13346_v1 = vpop.f32.mrb[155].mxu0 }
0x1d31   :  { %v4853_v59 = vpop.f32.mrb[156].mxu1 }
0x1d32   :  { %v4946_v28 = vsel %vm4237_vm11, %v4853_v59, 0.0  ;;  %v13351_v51 = vpop.f32.mrb[157].mxu1 }
0x1d33   :  { %v4947_v11 = vadd.f32 %v4946_v28, %v4945_v13  ;;  %v4856_v9 = vpop.f32.mrb[158].mxu1  ;;  %v4896_v35 = vpop.f32.mrb[156].mxu0 }
0x1d34   :  { %v4948_v26 = vsel %vm4237_vm11, %v4896_v35, 0.0  ;;  %v13352_v20 = vpop.f32.mrb[159].mxu1  ;;  %v13357_v50 = vpop.f32.mrb[157].mxu0 }
0x1d35   :  { %v4949_v3 = vadd.f32 %v4948_v26, %v4947_v11  ;;  %v4899_v55 = vpop.f32.mrb[158].mxu0 }
0x1d36   :  { %v13358_v52 = vpop.f32.mrb[159].mxu0 }
0x1d39   :  { %v4939_v4 = vpop.f32.mrb[160].mxu1 }
0x1d3a   :  { %v4950_v34 = vsel %vm4237_vm11, %v4939_v4, 0.0  ;;  %v13363_v63 = vpop.f32.mrb[161].mxu1 }
0x1d3b   :  { %v4951_v17 = vadd.f32 %v4950_v34, %v4949_v3  ;;  %v4942_v48 = vpop.f32.mrb[162].mxu1 }
0x1d3c   :  { %v13364_v40 = vpop.f32.mrb[163].mxu1 }
0x1d3d   :  { %v4953_v29 = vrot.slane %v4951_v17, 3 }
0x1d3f   :  { %v4957_v24 = vadd.f32 %v4953_v29, %v15403_v22  ;;  %v4955_v33 = vsel %vm156_vm2, %v15715_v32, %v4953_v29  ;;  %v15803_v22 = vld [vmem:[%s17356_s11 + $0x12] ss:$0 sm:$0xff] }
0x1d40   :  { %v4956_v7 = vadd.f32 %v4955_v33, %v15414_v46 }
0x1d41   :  { %v15792_v19 = vadd.f32 %v12256_v38, %v4957_v24  ;;  %v12257_v24 = vld [vmem:[%s17356_s11 + $0x18] ss:$0 sm:$0xff] }
0x1d42   :  { %v15794_v1 = vadd.f32 %v12256_v38, %v4956_v7 }
0x1d43   :  { %v4967_v59 = vsel %vm3485_vm8, %v15792_v19, 0.0 }
0x1d44   :  { %4968 = vadd.xlane.f32.xlu0 %v4967_v59  ;;  %v4964_v13 = vsel %vm143_vm0, %v15794_v1, 0.0 }
0x1d45   :  { %4965 = vadd.xlane.f32.xlu1 %v4964_v13 }
0x1d56   :  { %374 = vrot.lane.b32.xlu1 %v15803_v22, %s14576_s21 }
0x1dd1   :  { %v4969_v46 = vpop.xlane.xlu0 %4968 }
0x1dd2   :  { %v4971_v32 = vmul.f32 0.03125, %v4969_v46  ;;  %v4966_v28 = vpop.xlane.xlu1 %4965  ;;  %v12258_v46 = vld [vmem:[%s17356_s11 + $0x19] ss:$0 sm:$0xff] }
0x1dd3   :  { %v4970_v51 = vmul.f32 0.03125, %v4966_v28 }
0x1dd4   :  { %v4973_v11 = vsub.f32 %v15792_v19, %v4971_v32 }
0x1dd5   :  { %v4972_v9 = vsub.f32 %v15794_v1, %v4970_v51 }
0x1dd6   :  { %v15809_v35 = vpop.permute.xlu1 %374  ;;  %v4975_v55 = vmul.f32 %v4973_v11, %v4973_v11 }
0x1dd7   :  { %v415_v26 = vadd.f32 %v14809_v39, %v15809_v35  ;;  %v4974_v20 = vmul.f32 %v4972_v9, %v4972_v9 }
0x1dd8   :  { %v4979_v4 = vsel %vm3485_vm8, %v4975_v55, 0.0 }
0x1dd9   :  { %5069 = vrot.lane.b32.xlu1 %v415_v26, %s14573_s14  ;;  %v4976_v50 = vsel %vm143_vm0, %v4974_v20, 0.0  ;;  %v15815_v3 = vpack.c.bf16 %v415_v26, %v415_v26 }
0x1dda   :  { %4977 = vadd.xlane.f32.xlu0 %v4976_v50 }
0x1ddb   :  { %v15819_v52 = vsel %vm554_vm3, %v15815_v3, 0 }
0x1ddc   :  { %13374 = vmatpush3.bf16.xpose.msra.mxu1 %v15819_v52 }
0x1ddd   :  { %13385 = vmatprep.subr.bf16.mxu1 %v17366_v15 }
0x1dde   :  { %4980 = vadd.xlane.f32.xlu0 %v4979_v4 }
0x1df4   :  { %5066 = vrot.lane.b32.xlu0 %v415_v26, %s14574_s15 }
0x1e67   :  { %v4978_v39 = vpop.xlane.xlu0 %4977 }
0x1e68   :  { %v4982_v34 = vmul.f32 0.03125, %v4978_v39 }
0x1e6a   :  { %v4984_v63 = vadd.f32 1e-05, %v4982_v34 }
0x1e6b   :  { %v4981_v17 = vpop.xlane.xlu0 %4980 }
0x1e6c   :  { %14334 = vrsqrt.f32 %v4984_v63  ;;  %v4983_v48 = vmul.f32 0.03125, %v4981_v17 }
0x1e6e   :  { %v4985_v40 = vadd.f32 1e-05, %v4983_v48 }
0x1e6f   :  { %v5067_v13 = vpop.permute.xlu0 %5066 }
0x1e70   :  { %14336 = vrsqrt.f32 %v4985_v40  ;;  %v15831_v28 = vpack.c.bf16 %v5067_v13, %v5067_v13 }
0x1e76   :  { %v14335_v29 = vpop.eup %14334 }
0x1e77   :  { %v4988_v38 = vmul.f32 %v14335_v29, %v4972_v9  ;;  %v15836_v9 = vsel %vm554_vm3, %v15831_v28, 0 }
0x1e79   :  { %v4994_v7 = vmul.f32 %v12257_v24, %v4988_v38 }
0x1e7a   :  { %v14337_v33 = vpop.eup %14336 }
0x1e7b   :  { %v4989_v59 = vmul.f32 %v14337_v33, %v4973_v11  ;;  %v5000_v51 = vadd.f32 %v12258_v46, %v4994_v7  ;;  %v5070_v11 = vpop.permute.xlu1 %5069 }
0x1e7c   :  { %v15845_v63 = vpack.c.bf16 %v5070_v11, %v5070_v11 }
0x1e7d   :  { %v4995_v32 = vmul.f32 %v12257_v24, %v4989_v59 }
0x1e7e   :  { %v15858_v29 = vsel %vm554_vm3, %v15845_v63, 0 }
0x1e7f   :  { %v5001_v20 = vadd.f32 %v12258_v46, %v4995_v32 }
0x1e81   :  { %v5002_v50 = vpack.c.bf16 %v5001_v20, %v5000_v51 }
0x1e83   :  { %13370 = vmatmul.mubr.msk.bf16.vlgmr.msra.gmra.mrb[160].mxu0 %vm143_vm0, %v5002_v50 }
0x1e84   :  { %13380 = vmatpush3.bf16.xpose.msra.mxu0 %v15836_v9  ;;  %13381 = vmatprep.mubr.msk.bf16.mxu0 %vm14572_vm1, %v17366_v15 }
0x1e85   :  { %13391 = vmatprep.subr.bf16.mxu0 %v17366_v15 }
0x1f56   :  { %v5042_v55 = vpop.f32.mrb[160].mxu0 }
0x1f57   :  { %v5043_v4 = vadd.f32 %v15803_v22, %v5042_v55  ;;  %v13371_v39 = vpop.f32.mrb[161].mxu0 }
0x1f58   :  { %v15843_v34 = vpop.f32.mrb[162].mxu0 }
0x1f59   :  { %v15847_v17 = vmul.f32 0.35355338, %v5043_v4  ;;  %v13372_v48 = vpop.f32.mrb[163].mxu0 }
0x1f5b   :  { %5055 = vrot.lane.b32.xlu0 %v15847_v17, %s14573_s14  ;;  %5052 = vrot.lane.b32.xlu1 %v15847_v17, %s14574_s15  ;;  %v5061_v40 = vpack.c.bf16 %v15847_v17, %v15847_v17 }
0x1f5d   :  { %13376 = vmatmul.mubr.msk.bf16.vlgmr.msra.gmra.mrb[164].mxu1 %vm554_vm3, %v5061_v40 }
0x1f5e   :  { %13386 = vmatpush3.bf16.xpose.msra.mxu1 %v15858_v29  ;;  %13387 = vmatprep.mubr.msk.bf16.mxu1 %vm14572_vm1, %v17366_v15 }
0x1f5f   :  { %5072 = vrot.lane.b32.xlu1 %v415_v26, %s14575_s18  ;;  %13397 = vmatprep.subr.bf16.mxu1 %v17366_v15 }
0x1f63   :  { %5058 = vrot.lane.b32.xlu1 %v15847_v17, %s14575_s18 }
0x1fcd   :  { %v15867_v38 = vpop.permute.xlu0 %5055  ;;  %v15869_v24 = vpop.permute.xlu1 %5052 }
0x1fce   :  { %v5063_v33 = vpack.c.bf16 %v15867_v38, %v15867_v38  ;;  %v5062_v7 = vpack.c.bf16 %v15869_v24, %v15869_v24 }
0x1fd0   :  { %13382 = vmatmul.mubr.msk.bf16.vlgmr.msra.gmra.mrb[164].mxu0 %vm554_vm3, %v5062_v7  ;;  %13388 = vmatmul.mubr.msk.bf16.vlgmr.msra.gmra.mrb[168].mxu1 %vm554_vm3, %v5063_v33 }
0x1fd1   :  { %v5073_v26 = vpop.permute.xlu1 %5072  ;;  %13393 = vmatprep.mubr.msk.bf16.mxu0 %vm14572_vm1, %v17366_v15  ;;  %13399 = vmatprep.mubr.msk.bf16.mxu1 %vm14572_vm1, %v17366_v15 }
0x1fd2   :  { %v15881_v59 = vpack.c.bf16 %v5073_v26, %v5073_v26 }
0x1fd4   :  { %v15885_v13 = vsel %vm554_vm3, %v15881_v59, 0 }
0x1fd5   :  { %17390 = vst [vmem:[#allocation6_spill] sm:$0xff] %v15885_v13  ;;  %13392 = vmatpush3.bf16.xpose.msra.mxu0 %v15885_v13  ;;  %v15889_v46 = vpop.permute.xlu1 %5058 }
0x1fd6   :  { %13403 = vmatprep.subr.bf16.mxu0 %v17366_v15  ;;  %v5064_v32 = vpack.c.bf16 %v15889_v46, %v15889_v46 }
0x1fdc   :  { %13394 = vmatmul.mubr.msk.bf16.vlgmr.msra.gmra.mrb[168].mxu0 %vm554_vm3, %v5064_v32 }
0x1fdd   :  { %13405 = vmatprep.mubr.msk.bf16.mxu0 %vm14572_vm1, %v17366_v15 }
0x2030   :  { %v5119_v51 = vpop.f32.mrb[164].mxu1 }
0x2031   :  { %v13377_v20 = vpop.f32.mrb[165].mxu1  ;;  %v5264_v50 = vsel %vm5263_vm12, %v5119_v51, -inf }
0x2032   :  { %5265 = vmax.xlane.f32.xlu0 %v5264_v50  ;;  %v5122_v11 = vpop.f32.mrb[166].mxu1 }
0x2033   :  { %v13378_v55 = vpop.f32.mrb[167].mxu1 }
0x20a3   :  { %v5165_v4 = vpop.f32.mrb[164].mxu0  ;;  %v5211_v39 = vpop.f32.mrb[168].mxu1 }
0x20a4   :  { %v13383_v48 = vpop.f32.mrb[165].mxu0  ;;  %v13389_v40 = vpop.f32.mrb[169].mxu1  ;;  %v5270_v33 = vsel %vm5263_vm12, %v5211_v39, -inf  ;;  %v5267_v7 = vsel %vm5263_vm12, %v5165_v4, -inf }
0x20a5   :  { %5271 = vmax.xlane.f32.xlu0 %v5270_v33  ;;  %v5214_v26 = vpop.f32.mrb[170].mxu1  ;;  %5268 = vmax.xlane.f32.xlu1 %v5267_v7  ;;  %v5168_v32 = vpop.f32.mrb[166].mxu0 }
0x20a6   :  { %v13384_v15 = vpop.f32.mrb[167].mxu0  ;;  %v13390_v5 = vpop.f32.mrb[171].mxu1 }
0x20af   :  { %v5257_v20 = vpop.f32.mrb[168].mxu0 }
0x20b0   :  { %v13395_v16 = vpop.f32.mrb[169].mxu0  ;;  %v5273_v50 = vsel %vm5263_vm12, %v5257_v20, -inf }
0x20b1   :  { %5274 = vmax.xlane.f32.xlu0 %v5273_v50  ;;  %v5260_v11 = vpop.f32.mrb[170].mxu0 }
0x20b2   :  { %v13396_v55 = vpop.f32.mrb[171].mxu0 }
0x20bf   :  { %v5266_v6 = vpop.xlane.xlu0 %5265 }
0x20c0   :  { %v5276_v48 = vsub.f32 %v5119_v51, %v5266_v6  ;;  %v15913_v51 = vadd.f32 %v14811_v41, %v15809_v35 }
0x20c2   :  { %v5280_v40 = vmul.f32 1.442695, %v5276_v48 }
0x20c4   :  { %14338 = vpow2.f32 %v5280_v40 }
0x20ce   :  { %v14339_v36 = vpop.eup %14338 }
0x20cf   :  { %v5288_v13 = vsel %vm5263_vm12, %v14339_v36, 0.0 }
0x20d0   :  { %5289 = vadd.xlane.f32.xlu0 %v5288_v13  ;;  %v5046_v13 = vadd.f32 %v15803_v22, %v15843_v34 }
0x2132   :  { %v5272_v33 = vpop.xlane.xlu0 %5271  ;;  %v5269_v7 = vpop.xlane.xlu1 %5268 }
0x2133   :  { %v5278_v26 = vsub.f32 %v5211_v39, %v5272_v33  ;;  %v5277_v15 = vsub.f32 %v5165_v4, %v5269_v7  ;;  %v15915_v4 = vmul.f32 0.35355338, %v5046_v13  ;;  %v12118_v13 = vld [vmem:[%s17359_s8 + $0x10] sm:$0xf] }
0x2135   :  { %v5284_v5 = vmul.f32 1.442695, %v5278_v26  ;;  %v5282_v32 = vmul.f32 1.442695, %v5277_v15  ;;  %v17391_v15 = vmov 0.0  }
0x2136   :  { %144 = vst.msk [vmem:[%s17364_s12] sm:$0xff] %vm143_vm0, %v17391_v15  ;;  %145 = vst.msk [vmem:[%s17364_s12 + $0x8] sm:$0xff] %vm143_vm0, %v17391_v15 }
0x2137   :  { %14340 = vpow2.f32 %v5284_v5  ;;  %146 = vst.msk [vmem:[%s17364_s12 + $0x10] sm:$0xff] %vm143_vm0, %v17391_v15  ;;  %147 = vst.msk [vmem:[%s17364_s12 + $0x18] sm:$0xff] %vm143_vm0, %v17391_v15 }
0x2138   :  { %14342 = vpow2.f32 %v5282_v32  ;;  %148 = vst.msk [vmem:[%s17364_s12 + $0x20] sm:$0xff] %vm143_vm0, %v17391_v15  ;;  %149 = vst.msk [vmem:[%s17364_s12 + $0x28] sm:$0xff] %vm143_vm0, %v17391_v15 }
0x213e   :  { %v5275_v22 = vpop.xlane.xlu0 %5274 }
0x213f   :  { %v5279_v34 = vsub.f32 %v5257_v20, %v5275_v22 }
0x2141   :  { %v14341_v16 = vpop.eup %14340 }
0x2142   :  { %v14343_v50 = vpop.eup %14342  ;;  %v5294_v11 = vsel %vm5263_vm12, %v14341_v16, 0.0 }
0x2143   :  { %v5291_v6 = vsel %vm5263_vm12, %v14343_v50, 0.0  ;;  %5295 = vadd.xlane.f32.xlu0 %v5294_v11 }
0x2144   :  { %5292 = vadd.xlane.f32.xlu1 %v5291_v6 }
0x2155   :  { %5362 = vrot.lane.b32.xlu1 %v15831_v28, %s14576_s21  ;;  %v14193_v28 = vpack.i.bf16 %v15915_v4, %v15913_v51 }
0x2159   :  { %5411 = vrot.lane.b32.xlu1 %v15845_v63, %s14576_s21  ;;  %5313 = vrot.lane.b32.xlu0 %v15815_v3, %s14576_s21  ;;  %v5286_v3 = vmul.f32 1.442695, %v5279_v34 }
0x215b   :  { %14344 = vpow2.f32 %v5286_v3  ;;  %v15953_v3 = vsel %vm801_vm4, %v12118_v13, 0  ;;  %v5713_v13 = vpack.c.bf16 %v15915_v4, %v15847_v17 }
0x215d   :  { %5718 = vrot.lane.b32.xlu0 %v15913_v51, %s14574_s15  ;;  %v5290_v35 = vpop.xlane.xlu0 %5289  ;;  %v5735_v17 = vshll.u32 %v5713_v13, 16 }
0x215e   :  { %14346 = vrcp.f32 %v5290_v35 }
0x2161   :  { %14194 = vrot.lane.b32.xlu0 %v14193_v28, %s14573_s14 }
0x2165   :  { %5710 = vrot.lane.b32.xlu0 %v15915_v4, %s14575_s18  ;;  %v14345_v63 = vpop.eup %14344 }
0x2166   :  { %v5297_v41 = vsel %vm5263_vm12, %v14345_v63, 0.0 }
0x2168   :  { %v14347_v39 = vpop.eup %14346 }
0x2169   :  { %v5304_v48 = vmul.f32 %v14347_v39, %v14339_v36 }
0x216b   :  { %v5308_v26 = vpack.c.bf16 %v5304_v48, %v5304_v48 }
0x217d   :  { %5298 = vadd.xlane.f32.xlu1 %v5297_v41 }
0x218e   :  { %5460 = vrot.lane.b32.xlu1 %v15881_v59, %s14576_s21 }
0x2192   :  { %5704 = vrot.lane.b32.xlu1 %v15915_v4, %s14574_s15 }
0x2196   :  { %5724 = vrot.lane.b32.xlu1 %v15913_v51, %s14575_s18 }
0x21d0   :  { %v5296_v55 = vpop.xlane.xlu0 %5295 }
0x21d1   :  { %v5293_v20 = vpop.xlane.xlu1 %5292  ;;  %14348 = vrcp.f32 %v5296_v55 }
0x21d2   :  { %14350 = vrcp.f32 %v5293_v20  ;;  %v12119_v20 = vld [vmem:[%s17359_s8 + $0x14] sm:$0xf] }
0x21d3   :  { %v15975_v48 = vsel %vm801_vm4, %v12119_v20, 0 }
0x21d4   :  { %v5314_v40 = vpop.permute.xlu0 %5313 }
0x21d5   :  { %v5363_v33 = vpop.permute.xlu1 %5362  ;;  %v15932_v7 = vsel %vm801_vm4, %v5314_v40, 0 }
0x21d6   :  { %v15935_v59 = vsel %vm801_vm4, %v5363_v33, 0  ;;  %13398 = vmatpush3.bf16.msra.mxu1 %v15932_v7 }
0x21d7   :  { %13404 = vmatpush3.bf16.msra.mxu0 %v15935_v59  ;;  %13409 = vmatprep.subr.bf16.mxu1 %v17391_v15 }
0x21d8   :  { %13415 = vmatprep.subr.bf16.mxu0 %v17391_v15  ;;  %v5719_v33 = vpop.permute.xlu0 %5718 }
0x21d9   :  { %v5412_v5 = vpop.permute.xlu1 %5411  ;;  %13400 = vmatmul.mubr.msk.bf16.vlgmr.msra.gmra.mrb[172].mxu1 %vm554_vm3, %v5308_v26 }
0x21da   :  { %v15943_v36 = vsel %vm801_vm4, %v5412_v5, 0  ;;  %13411 = vmatprep.mubr.msk.bf16.mxu1 %vm14572_vm1, %v17391_v15 }
0x21db   :  { %17392 = vst [vmem:[#allocation7_spill] sm:$0xff] %v15943_v36  ;;  %v14349_v32 = vpop.eup %14348  ;;  %13410 = vmatpush3.bf16.msra.mxu1 %v15943_v36 }
0x21dc   :  { %v14351_v11 = vpop.eup %14350  ;;  %v5306_v6 = vmul.f32 %v14349_v32, %v14341_v16  ;;  %13421 = vmatprep.subr.bf16.mxu1 %v17391_v15 }
0x21dd   :  { %v5305_v28 = vmul.f32 %v14351_v11, %v14343_v50 }
0x21de   :  { %v5310_v22 = vpack.c.bf16 %v5306_v6, %v5306_v6 }
0x21df   :  { %v5309_v34 = vpack.c.bf16 %v5305_v28, %v5305_v28  ;;  %v12121_v28 = vld [vmem:[%s17359_s8 + $0x1c] sm:$0xf] }
0x21e1   :  { %13406 = vmatmul.mubr.msk.bf16.vlgmr.msra.gmra.mrb[172].mxu0 %vm554_vm3, %v5309_v34  ;;  %13412 = vmatmul.mubr.msk.bf16.vlgmr.msra.gmra.mrb[176].mxu1 %vm554_vm3, %v5310_v22  ;;  %v14195_v22 = vpop.permute.xlu0 %14194 }
0x21e2   :  { %13417 = vmatprep.mubr.msk.bf16.mxu0 %vm14572_vm1, %v17391_v15  ;;  %13422 = vmatpush3.bf16.msra.mxu1 %v15953_v3  ;;  %v14197_v4 = vunpack.i.h.bf16 %v14195_v22 }
0x21e3   :  { %13423 = vmatprep.mubr.msk.bf16.mxu1 %vm14572_vm1, %v17391_v15  ;;  %13433 = vmatprep.subr.bf16.mxu1 %v17391_v15 }
0x220a   :  { %v5299_v16 = vpop.xlane.xlu1 %5298 }
0x220b   :  { %14352 = vrcp.f32 %v5299_v16 }
0x220e   :  { %v5461_v50 = vpop.permute.xlu1 %5460 }
0x220f   :  { %v15964_v41 = vsel %vm801_vm4, %v5461_v50, 0  ;;  %v15997_v50 = vpack.c.bf16 %v15913_v51, %v15913_v51  ;;  %v14196_v51 = vunpack.i.l.bf16 %v14195_v22 }
0x2210   :  { %17393 = vst [vmem:[#allocation8_spill] sm:$0xff] %v15964_v41  ;;  %13416 = vmatpush3.bf16.msra.mxu0 %v15964_v41 }
0x2211   :  { %13427 = vmatprep.subr.bf16.mxu0 %v17391_v15  ;;  %v16017_v22 = vpack.c.bf16 %v14196_v51, %v14196_v51 }
0x2215   :  { %v14353_v35 = vpop.eup %14352 }
0x2216   :  { %v5307_v39 = vmul.f32 %v14353_v35, %v14345_v63  ;;  %v12120_v63 = vld [vmem:[%s17359_s8 + $0x18] sm:$0xf] }
0x2217   :  { %v15983_v32 = vsel %vm801_vm4, %v12120_v63, 0  ;;  %v16000_v63 = vsel %vm801_vm4, %v12121_v28, 0 }
0x2218   :  { %v5311_v55 = vpack.c.bf16 %v5307_v39, %v5307_v39  ;;  %17394 = vst [vmem:[#allocation9_spill] sm:$0xff] %v16000_v63 }
0x221a   :  { %13418 = vmatmul.mubr.msk.bf16.vlgmr.msra.gmra.mrb[176].mxu0 %vm554_vm3, %v5311_v55 }
0x221b   :  { %13429 = vmatprep.mubr.msk.bf16.mxu0 %vm14572_vm1, %v17391_v15  ;;  %13428 = vmatpush3.bf16.msra.mxu0 %v15975_v48 }
0x221c   :  { %13439 = vmatprep.subr.bf16.mxu0 %v17391_v15 }
0x22ac   :  { %v5355_v40 = vpop.f32.mrb[172].mxu1 }
0x22ad   :  { %v5508_v26 = vpack.c.bf16 %v5355_v40, %v5355_v40  ;;  %v13401_v5 = vpop.f32.mrb[173].mxu1  ;;  %v5732_v40 = vshrl.u32 %v5713_v13, 16  ;;  %v5715_v13 = vpack.c.bf16 %v14197_v4, %v15867_v38  ;;  %v5705_v4 = vpop.permute.xlu1 %5704 }
0x22ae   :  { %v5358_v11 = vpop.f32.mrb[174].mxu1 }
0x22af   :  { %v13402_v6 = vpop.f32.mrb[175].mxu1  ;;  %13424 = vmatmul.mubr.msk.bf16.vlgmr.msra.gmra.mrb[180].mxu1 %vm554_vm3, %v5508_v26  ;;  %v5734_v28 = vrot.slane %v5732_v40, 2 }
0x22b0   :  { %13434 = vmatpush3.bf16.msra.mxu1 %v15983_v32  ;;  %13435 = vmatprep.mubr.msk.bf16.mxu1 %vm14572_vm1, %v17391_v15 }
0x22b1   :  { %13445 = vmatprep.subr.bf16.mxu1 %v17391_v15 }
0x22b4   :  { %v5404_v34 = vpop.f32.mrb[172].mxu0  ;;  %v5453_v16 = vpop.f32.mrb[176].mxu1 }
0x22b5   :  { %v5509_v35 = vpack.c.bf16 %v5404_v34, %v5404_v34  ;;  %v13407_v39 = vpop.f32.mrb[173].mxu0  ;;  %v5510_v55 = vpack.c.bf16 %v5453_v16, %v5453_v16  ;;  %v13413_v20 = vpop.f32.mrb[177].mxu1  ;;  %v16006_v34 = vsel %vm554_vm3, %v15997_v50, 0  ;;  %v5737_v16 = vrot.slane %v5735_v17, 3 }
0x22b6   :  { %v5407_v26 = vpop.f32.mrb[174].mxu0  ;;  %v5456_v5 = vpop.f32.mrb[178].mxu1  ;;  %17395 = vst [vmem:[#allocation10_spill] sm:$0xff] %v16006_v34  ;;  %v5843_v39 = vshll.u32 %v5715_v13, 16  ;;  %v16022_v20 = vsel %vm554_vm3, %v16017_v22, 0 }
0x22b7   :  { %v13408_v11 = vpop.f32.mrb[175].mxu0  ;;  %13430 = vmatmul.mubr.msk.bf16.vlgmr.msra.gmra.mrb[180].mxu0 %vm554_vm3, %v5509_v35  ;;  %v13414_v6 = vpop.f32.mrb[179].mxu1  ;;  %13436 = vmatmul.mubr.msk.bf16.vlgmr.msra.gmra.mrb[184].mxu1 %vm554_vm3, %v5510_v55  ;;  %v5840_v35 = vshrl.u32 %v5715_v13, 16  ;;  %v5738_v55 = vor.u32 %v5737_v16, %v5734_v28  ;;  %17396 = vst [vmem:[#allocation11_spill] sm:$0xff] %v16022_v20  ;;  %v5714_v26 = vpack.c.bf16 %v5705_v4, %v15869_v24 }
0x22b8   :  { %13447 = vmatprep.mubr.msk.bf16.mxu1 %vm14572_vm1, %v17391_v15  ;;  %13440 = vmatpush3.bf16.msra.mxu0 %v16000_v63  ;;  %v5845_v40 = vrot.slane %v5843_v39, 3  ;;  %v16032_v5 = vpack.c.bf16 %v5719_v33, %v5719_v33  ;;  %v5711_v16 = vpop.permute.xlu0 %5710 }
0x22b9   :  { %13446 = vmatpush3.bf16.xpose.msra.mxu1 %v16006_v34  ;;  %13441 = vmatprep.mubr.msk.bf16.mxu0 %vm14572_vm1, %v17391_v15  ;;  %v5842_v38 = vrot.slane %v5840_v35, 2  ;;  %v5786_v6 = vshrl.u32 %v5714_v26, 16  ;;  %v5789_v51 = vshll.u32 %v5714_v26, 16  ;;  %v5716_v24 = vpack.c.bf16 %v5711_v16, %v15889_v46 }
0x22ba   :  { %13457 = vmatprep.subr.bf16.mxu1 %v17391_v15  ;;  %13451 = vmatprep.subr.bf16.mxu0 %v17391_v15 }
0x22bb   :  { %v5846_v17 = vor.u32 %v5845_v40, %v5842_v38  ;;  %v5725_v38 = vpop.permute.xlu1 %5724  ;;  %v5788_v33 = vrot.slane %v5786_v6, 2  ;;  %v5791_v40 = vrot.slane %v5789_v51, 3  ;;  %v5894_v4 = vshrl.u32 %v5716_v24, 16 }
0x22bc   :  { %v5897_v26 = vshll.u32 %v5716_v24, 16 }
0x22bd   :  { %v5896_v46 = vrot.slane %v5894_v4, 2 }
0x22be   :  { %v5899_v6 = vrot.slane %v5897_v26, 3 }
0x22c0   :  { %13448 = vmatmul.mubr.msk.bf16.vlgmr.msra.gmra.mrb[188].mxu1 %vm554_vm3, %v5738_v55  ;;  %v16037_v55 = vsel %vm554_vm3, %v16032_v5, 0  ;;  %v5900_v51 = vor.u32 %v5899_v6, %v5896_v46 }
0x22c1   :  { %13458 = vmatpush3.bf16.xpose.msra.mxu1 %v16022_v20  ;;  %13459 = vmatprep.mubr.msk.bf16.mxu1 %vm14572_vm1, %v17391_v15  ;;  %17397 = vst [vmem:[#allocation12_spill] sm:$0xff] %v16037_v55 }
0x22c2   :  { %13469 = vmatprep.subr.bf16.mxu1 %v17391_v15 }
0x22c8   :  { %13460 = vmatmul.mubr.msk.bf16.vlgmr.msra.gmra.mrb[192].mxu1 %vm554_vm3, %v5846_v17  ;;  %v16044_v17 = vpack.c.bf16 %v5725_v38, %v5725_v38 }
0x22c9   :  { %13471 = vmatprep.mubr.msk.bf16.mxu1 %vm14572_vm1, %v17391_v15 }
0x22ed   :  { %v5502_v11 = vpop.f32.mrb[176].mxu0 }
0x22ee   :  { %v5511_v13 = vpack.c.bf16 %v5502_v11, %v5502_v11  ;;  %v13419_v28 = vpop.f32.mrb[177].mxu0  ;;  %v5792_v11 = vor.u32 %v5791_v40, %v5788_v33 }
0x22ef   :  { %v5505_v35 = vpop.f32.mrb[178].mxu0 }
0x22f0   :  { %v13420_v39 = vpop.f32.mrb[179].mxu0  ;;  %13442 = vmatmul.mubr.msk.bf16.vlgmr.msra.gmra.mrb[184].mxu0 %vm554_vm3, %v5511_v13  ;;  %v16049_v13 = vsel %vm554_vm3, %v16044_v17, 0 }
0x22f1   :  { %13452 = vmatpush3.bf16.xpose.msra.mxu0 %v16037_v55  ;;  %13453 = vmatprep.mubr.msk.bf16.mxu0 %vm14572_vm1, %v17391_v15  ;;  %17398 = vst [vmem:[#allocation13_spill] sm:$0xff] %v16049_v13 }
0x22f2   :  { %13463 = vmatprep.subr.bf16.mxu0 %v17391_v15 }
0x22f8   :  { %13454 = vmatmul.mubr.msk.bf16.vlgmr.msra.gmra.mrb[188].mxu0 %vm554_vm3, %v5792_v11 }
0x22f9   :  { %13464 = vmatpush3.bf16.xpose.msra.mxu0 %v16049_v13  ;;  %13465 = vmatprep.mubr.msk.bf16.mxu0 %vm14572_vm1, %v17391_v15 }
0x22fa   :  { %13475 = vmatprep.subr.bf16.mxu0 %v17391_v15 }
0x2300   :  { %13466 = vmatmul.mubr.msk.bf16.vlgmr.msra.gmra.mrb[192].mxu0 %vm554_vm3, %v5900_v51 }
0x2301   :  { %13477 = vmatprep.mubr.msk.bf16.mxu0 %vm14572_vm1, %v17391_v15 }
0x2382   :  { %v5552_v28 = vpop.f32.mrb[180].mxu1 }
0x2383   :  { %v13425_v16 = vpop.f32.mrb[181].mxu1  ;;  %v5696_v33 = vsel %vm4237_vm11, %v5552_v28, 0.0 }
0x2384   :  { %v5555_v35 = vpop.f32.mrb[182].mxu1 }
0x2385   :  { %v13426_v39 = vpop.f32.mrb[183].mxu1 }
0x238a   :  { %v5598_v38 = vpop.f32.mrb[180].mxu0  ;;  %v5644_v24 = vpop.f32.mrb[184].mxu1 }
0x238b   :  { %v5697_v40 = vsel %vm4237_vm11, %v5598_v38, 0.0  ;;  %v13431_v4 = vpop.f32.mrb[181].mxu0  ;;  %v5699_v26 = vsel %vm4237_vm11, %v5644_v24, 0.0  ;;  %v13437_v11 = vpop.f32.mrb[185].mxu1 }
0x238c   :  { %v5698_v46 = vadd.f32 %v5697_v40, %v5696_v33  ;;  %v5601_v6 = vpop.f32.mrb[182].mxu0  ;;  %v5647_v51 = vpop.f32.mrb[186].mxu1 }
0x238d   :  { %v13432_v13 = vpop.f32.mrb[183].mxu0  ;;  %v13438_v20 = vpop.f32.mrb[187].mxu1 }
0x238e   :  { %v5700_v55 = vadd.f32 %v5699_v26, %v5698_v46 }
0x2393   :  { %v5779_v34 = vpop.f32.mrb[188].mxu1 }
0x2394   :  { %v13449_v16 = vpop.f32.mrb[189].mxu1  ;;  %v5947_v35 = vsel %vm5263_vm12, %v5779_v34, -inf }
0x2395   :  { %5948 = vmax.xlane.f32.xlu1 %v5947_v35  ;;  %v5782_v39 = vpop.f32.mrb[190].mxu1 }
0x2396   :  { %v13450_v41 = vpop.f32.mrb[191].mxu1 }
0x239b   :  { %v5887_v28 = vpop.f32.mrb[192].mxu1 }
0x239c   :  { %v13461_v36 = vpop.f32.mrb[193].mxu1  ;;  %v5953_v51 = vsel %vm5263_vm12, %v5887_v28, -inf }
0x239d   :  { %v5890_v38 = vpop.f32.mrb[194].mxu1 }
0x239e   :  { %v13462_v4 = vpop.f32.mrb[195].mxu1 }
0x23a6   :  { %5996 = vrot.lane.b32.xlu1 %v15997_v50, %s14576_s21 }
0x23c3   :  { %v5690_v24 = vpop.f32.mrb[184].mxu0 }
0x23c4   :  { %v5701_v33 = vsel %vm4237_vm11, %v5690_v24, 0.0  ;;  %v13443_v13 = vpop.f32.mrb[185].mxu0 }
0x23c5   :  { %v16065_v20 = vadd.f32 %v5701_v33, %v5700_v55  ;;  %v5693_v40 = vpop.f32.mrb[186].mxu0 }
0x23c6   :  { %v13444_v26 = vpop.f32.mrb[187].mxu0 }
0x23cb   :  { %v5833_v11 = vpop.f32.mrb[188].mxu0 }
0x23cc   :  { %v13455_v46 = vpop.f32.mrb[189].mxu0  ;;  %v5950_v6 = vsel %vm5263_vm12, %v5833_v11, -inf }
0x23cd   :  { %5951 = vmax.xlane.f32.xlu0 %v5950_v6  ;;  %v5836_v41 = vpop.f32.mrb[190].mxu0 }
0x23ce   :  { %v13456_v36 = vpop.f32.mrb[191].mxu0 }
0x23d1   :  { %5954 = vmax.xlane.f32.xlu0 %v5953_v51 }
0x23d3   :  { %v5941_v16 = vpop.f32.mrb[192].mxu0 }
0x23d4   :  { %v13467_v50 = vpop.f32.mrb[193].mxu0  ;;  %v5956_v35 = vsel %vm5263_vm12, %v5941_v16, -inf }
0x23d5   :  { %5957 = vmax.xlane.f32.xlu0 %v5956_v35  ;;  %v5944_v39 = vpop.f32.mrb[194].mxu0 }
0x23d6   :  { %v13468_v55 = vpop.f32.mrb[195].mxu0 }
0x2422   :  { %v5949_v38 = vpop.xlane.xlu1 %5948 }
0x2423   :  { %v5959_v4 = vsub.f32 %v5779_v34, %v5949_v38 }
0x2425   :  { %v5963_v24 = vmul.f32 1.442695, %v5959_v4 }
0x2426   :  { %v5997_v33 = vpop.permute.xlu1 %5996 }
0x2427   :  { %14354 = vpow2.f32 %v5963_v24  ;;  %v16071_v13 = vsel %vm801_vm4, %v5997_v33, 0 }
0x2428   :  { %17399 = vst [vmem:[#allocation14_spill] sm:$0xff] %v16071_v13  ;;  %13470 = vmatpush3.bf16.msra.mxu1 %v16071_v13 }
0x2429   :  { %13481 = vmatprep.subr.bf16.mxu1 %v17391_v15 }
0x2431   :  { %v14355_v40 = vpop.eup %14354 }
0x2432   :  { %v5971_v26 = vsel %vm5263_vm12, %v14355_v40, 0.0 }
0x2433   :  { %5972 = vadd.xlane.f32.xlu1 %v5971_v26 }
0x245a   :  { %v5952_v46 = vpop.xlane.xlu0 %5951 }
0x245b   :  { %v5960_v6 = vsub.f32 %v5833_v11, %v5952_v46 }
0x245d   :  { %v5965_v41 = vmul.f32 1.442695, %v5960_v6 }
0x245e   :  { %v5955_v36 = vpop.xlane.xlu0 %5954 }
0x245f   :  { %14356 = vpow2.f32 %v5965_v41  ;;  %v5961_v34 = vsub.f32 %v5887_v28, %v5955_v36 }
0x2461   :  { %v5967_v51 = vmul.f32 1.442695, %v5961_v34 }
0x2462   :  { %v5958_v50 = vpop.xlane.xlu0 %5957 }
0x2463   :  { %14358 = vpow2.f32 %v5967_v51  ;;  %v5962_v35 = vsub.f32 %v5941_v16, %v5958_v50 }
0x2465   :  { %v5969_v39 = vmul.f32 1.442695, %v5962_v35 }
0x2467   :  { %14360 = vpow2.f32 %v5969_v39 }
0x2469   :  { %v14357_v55 = vpop.eup %14356 }
0x246a   :  { %v5974_v38 = vsel %vm5263_vm12, %v14357_v55, 0.0 }
0x246b   :  { %5975 = vadd.xlane.f32.xlu0 %v5974_v38 }
0x246d   :  { %v14359_v4 = vpop.eup %14358 }
0x246e   :  { %v5977_v24 = vsel %vm5263_vm12, %v14359_v4, 0.0 }
0x246f   :  { %5978 = vadd.xlane.f32.xlu1 %v5977_v24 }
0x2471   :  { %v14361_v33 = vpop.eup %14360 }
0x2472   :  { %v5980_v11 = vsel %vm5263_vm12, %v14361_v33, 0.0  ;;  %vm10963_vm12 = vcmask 59392  }
0x2473   :  { %5981 = vadd.xlane.f32.xlu0 %v5980_v11 }
0x2480   :  { %6094 = vrot.lane.b32.xlu1 %v16017_v22, %s14576_s21 }
0x2484   :  { %6143 = vrot.lane.b32.xlu1 %v16044_v17, %s14576_s21 }
0x2489   :  { %6045 = vrot.lane.b32.xlu0 %v16032_v5, %s14576_s21 }
0x24c0   :  { %v5973_v28 = vpop.xlane.xlu1 %5972 }
0x24c1   :  { %14362 = vrcp.f32 %v5973_v28 }
0x24cb   :  { %v14363_v16 = vpop.eup %14362 }
0x24cc   :  { %v5987_v26 = vmul.f32 %v14363_v16, %v14355_v40 }
0x24ce   :  { %v5991_v46 = vpack.c.bf16 %v5987_v26, %v5987_v26 }
0x24d0   :  { %13472 = vmatmul.mubr.msk.bf16.vlgmr.msra.gmra.mrb[196].mxu1 %vm554_vm3, %v5991_v46 }
0x24d1   :  { %13483 = vmatprep.mubr.msk.bf16.mxu1 %vm14572_vm1, %v17391_v15 }
0x24f8   :  { %v5976_v6 = vpop.xlane.xlu0 %5975 }
0x24f9   :  { %14364 = vrcp.f32 %v5976_v6 }
0x24fc   :  { %v5979_v41 = vpop.xlane.xlu1 %5978 }
0x24fd   :  { %14366 = vrcp.f32 %v5979_v41 }
0x2500   :  { %v6095_v22 = vpop.permute.xlu1 %6094  ;;  %v5982_v36 = vpop.xlane.xlu0 %5981 }
0x2501   :  { %v16089_v17 = vsel %vm801_vm4, %v6095_v22, 0  ;;  %14368 = vrcp.f32 %v5982_v36 }
0x2502   :  { %17400 = vst [vmem:[#allocation15_spill] sm:$0xff] %v16089_v17  ;;  %13482 = vmatpush3.bf16.msra.mxu1 %v16089_v17 }
0x2503   :  { %v14365_v5 = vpop.eup %14364  ;;  %13493 = vmatprep.subr.bf16.mxu1 %v17391_v15 }
0x2504   :  { %v6046_v40 = vpop.permute.xlu0 %6045  ;;  %v5988_v34 = vmul.f32 %v14365_v5, %v14357_v55  ;;  %v6144_v50 = vpop.permute.xlu1 %6143 }
0x2505   :  { %v16094_v51 = vsel %vm801_vm4, %v6046_v40, 0  ;;  %v16099_v24 = vsel %vm801_vm4, %v6144_v50, 0 }
0x2506   :  { %17401 = vst [vmem:[#allocation16_spill] sm:$0xff] %v16094_v51  ;;  %13476 = vmatpush3.bf16.msra.mxu0 %v16094_v51  ;;  %v5992_v35 = vpack.c.bf16 %v5988_v34, %v5988_v34  ;;  %17402 = vst [vmem:[#allocation17_spill] sm:$0xff] %v16099_v24 }
0x2507   :  { %v14367_v39 = vpop.eup %14366  ;;  %13487 = vmatprep.subr.bf16.mxu0 %v17391_v15 }
0x2508   :  { %v5989_v38 = vmul.f32 %v14367_v39, %v14359_v4 }
0x2509   :  { %13478 = vmatmul.mubr.msk.bf16.vlgmr.msra.gmra.mrb[196].mxu0 %vm554_vm3, %v5992_v35 }
0x250a   :  { %13488 = vmatpush3.bf16.msra.mxu0 %v16099_v24  ;;  %v5993_v11 = vpack.c.bf16 %v5989_v38, %v5989_v38  ;;  %13489 = vmatprep.mubr.msk.bf16.mxu0 %vm14572_vm1, %v17391_v15 }
0x250b   :  { %v14369_v55 = vpop.eup %14368  ;;  %13499 = vmatprep.subr.bf16.mxu0 %v17391_v15 }
0x250c   :  { %13484 = vmatmul.mubr.msk.bf16.vlgmr.msra.gmra.mrb[200].mxu1 %vm554_vm3, %v5993_v11  ;;  %v5990_v28 = vmul.f32 %v14369_v55, %v14361_v33 }
0x250d   :  { %13494 = vmatpush3.bf16.msra.mxu1 %v15953_v3  ;;  %13495 = vmatprep.mubr.msk.bf16.mxu1 %vm14572_vm1, %v17391_v15 }
0x250e   :  { %v5994_v4 = vpack.c.bf16 %v5990_v28, %v5990_v28  ;;  %13505 = vmatprep.subr.bf16.mxu1 %v17391_v15 }
0x2511   :  { %13490 = vmatmul.mubr.msk.bf16.vlgmr.msra.gmra.mrb[200].mxu0 %vm554_vm3, %v5994_v4 }
0x2512   :  { %13500 = vmatpush3.bf16.msra.mxu0 %v15975_v48  ;;  %13501 = vmatprep.mubr.msk.bf16.mxu0 %vm14572_vm1, %v17391_v15 }
0x2513   :  { %13511 = vmatprep.subr.bf16.mxu0 %v17391_v15 }
0x25a3   :  { %v6038_v16 = vpop.f32.mrb[196].mxu1 }
0x25a4   :  { %v6191_v26 = vpack.c.bf16 %v6038_v16, %v6038_v16  ;;  %v13473_v33 = vpop.f32.mrb[197].mxu1 }
0x25a5   :  { %v6041_v46 = vpop.f32.mrb[198].mxu1 }
0x25a6   :  { %v13474_v6 = vpop.f32.mrb[199].mxu1  ;;  %13496 = vmatmul.mubr.msk.bf16.vlgmr.msra.gmra.mrb[204].mxu1 %vm554_vm3, %v6191_v26 }
0x25a7   :  { %13506 = vmatpush3.bf16.msra.mxu1 %v15983_v32  ;;  %13507 = vmatprep.mubr.msk.bf16.mxu1 %vm14572_vm1, %v17391_v15 }
0x25a8   :  { %13517 = vmatprep.subr.bf16.mxu1 %v17391_v15 }
0x25dc   :  { %v6087_v41 = vpop.f32.mrb[196].mxu0 }
0x25dd   :  { %v6192_v22 = vpack.c.bf16 %v6087_v41, %v6087_v41  ;;  %v13479_v36 = vpop.f32.mrb[197].mxu0 }
0x25de   :  { %v6090_v5 = vpop.f32.mrb[198].mxu0 }
0x25df   :  { %v13480_v40 = vpop.f32.mrb[199].mxu0  ;;  %v6136_v34 = vpop.f32.mrb[200].mxu1  ;;  %13502 = vmatmul.mubr.msk.bf16.vlgmr.msra.gmra.mrb[204].mxu0 %vm554_vm3, %v6192_v22 }
0x25e0   :  { %v6193_v50 = vpack.c.bf16 %v6136_v34, %v6136_v34  ;;  %v13485_v35 = vpop.f32.mrb[201].mxu1  ;;  %13512 = vmatpush3.bf16.msra.mxu0 %v16000_v63  ;;  %13513 = vmatprep.mubr.msk.bf16.mxu0 %vm14572_vm1, %v17391_v15 }
0x25e1   :  { %v6139_v39 = vpop.f32.mrb[202].mxu1  ;;  %13525 = vmatprep.subr.bf16.mxu0 %v17391_v15 }
0x25e2   :  { %v13486_v38 = vpop.f32.mrb[203].mxu1  ;;  %13508 = vmatmul.mubr.msk.bf16.vlgmr.msra.gmra.mrb[208].mxu1 %vm554_vm3, %v6193_v50 }
0x25e3   :  { %13521 = vmatprep.mubr.msk.bf16.mxu1 %vm14572_vm1, %v17391_v15 }
0x25e4   :  { %v6185_v11 = vpop.f32.mrb[200].mxu0 }
0x25e5   :  { %v6194_v55 = vpack.c.bf16 %v6185_v11, %v6185_v11  ;;  %v13491_v28 = vpop.f32.mrb[201].mxu0 }
0x25e6   :  { %v6188_v4 = vpop.f32.mrb[202].mxu0 }
0x25e7   :  { %v13492_v16 = vpop.f32.mrb[203].mxu0  ;;  %13514 = vmatmul.mubr.msk.bf16.vlgmr.msra.gmra.mrb[208].mxu0 %vm554_vm3, %v6194_v55 }
0x25e8   :  { %13533 = vmatprep.mubr.msk.bf16.mxu0 %vm14572_vm1, %v17391_v15 }
0x2679   :  { %v6232_v26 = vpop.f32.mrb[204].mxu1 }
0x267a   :  { %v13497_v33 = vpop.f32.mrb[205].mxu1  ;;  %v6367_v22 = vsel %vm4237_vm11, %v6232_v26, 0.0  ;;  %v12299_v26 = vld [vmem:[%s17362_s2 + $0x4] sm:$0xf] }
0x267b   :  { %v6235_v46 = vpop.f32.mrb[206].mxu1 }
0x267c   :  { %v13498_v6 = vpop.f32.mrb[207].mxu1 }
0x26b2   :  { %v6275_v41 = vpop.f32.mrb[204].mxu0 }
0x26b3   :  { %v6368_v36 = vsel %vm4237_vm11, %v6275_v41, 0.0  ;;  %v13503_v5 = vpop.f32.mrb[205].mxu0 }
0x26b4   :  { %v6369_v40 = vadd.f32 %v6368_v36, %v6367_v22  ;;  %v6278_v34 = vpop.f32.mrb[206].mxu0  ;;  %v12284_v36 = vld [vmem:[%s17356_s11 + $0x13] ss:$0 sm:$0xff]  ;;  %v6608_v5 = vrot.slane %v12299_v26, 4 }
0x26b5   :  { %v13504_v50 = vpop.f32.mrb[207].mxu0  ;;  %v6318_v35 = vpop.f32.mrb[208].mxu1 }
0x26b6   :  { %v6370_v39 = vsel %vm4237_vm11, %v6318_v35, 0.0  ;;  %v13509_v38 = vpop.f32.mrb[209].mxu1  ;;  %v6604_v50 = vld [vmem:[%s17362_s2] sm:$0xf] }
0x26b7   :  { %v6371_v11 = vadd.f32 %v6370_v39, %v6369_v40  ;;  %v6321_v55 = vpop.f32.mrb[210].mxu1 }
0x26b8   :  { %v13510_v28 = vpop.f32.mrb[211].mxu1 }
0x26ba   :  { %v6361_v4 = vpop.f32.mrb[208].mxu0 }
0x26bb   :  { %v6372_v16 = vsel %vm4237_vm11, %v6361_v4, 0.0  ;;  %v13515_v33 = vpop.f32.mrb[209].mxu0  ;;  %vm9658_vm11 = vcmask 23552  }
0x26bc   :  { %v6373_v46 = vadd.f32 %v6372_v16, %v6371_v11  ;;  %v6364_v6 = vpop.f32.mrb[210].mxu0  ;;  %v16154_v11 = vsel %vm801_vm4, %v6604_v50, %v6608_v5 }
0x26bd   :  { %v13516_v41 = vpop.f32.mrb[211].mxu0 }
0x26be   :  { %v6375_v22 = vrot.slane %v6373_v46, 3 }
0x26c0   :  { %v6377_v40 = vsel %vm156_vm2, %v16065_v20, %v6375_v22  ;;  %v6379_v34 = vadd.f32 %v6375_v22, %v15792_v19  ;;  %v6611_v20 = vsel %vm143_vm0, %v16154_v11, 0.0  ;;  %vm8200_vm2 = vcmask 35840  }
0x26c1   :  { %v6378_v35 = vadd.f32 %v6377_v40, %v15794_v1 }
0x26c2   :  { %v16149_v39 = vadd.f32 %v12284_v36, %v6379_v34 }
0x26c3   :  { %v16151_v38 = vadd.f32 %v12284_v36, %v6378_v35  ;;  %v14216_v35 = vld [vmem:[%s17360_s9 + $0x10] sm:$0xff]  }
0x26c4   :  { %17403 = vst [vmem:[#allocation18_spill] sm:$0xff] %v16149_v39  ;;  %v6389_v55 = vsel %vm3485_vm8, %v16149_v39, 0.0  ;;  %13518 = vmatpush3.bf16.msra.mxu1 %v14216_v35 }
0x26c5   :  { %17404 = vst [vmem:[#allocation19_spill] sm:$0xff] %v16151_v38  ;;  %6390 = vadd.xlane.f32.xlu0 %v6389_v55  ;;  %v6386_v19 = vsel %vm143_vm0, %v16151_v38, 0.0  ;;  %13519 = vmatprep.subr.bf16.mxu1 %v17391_v15  ;;  %v14217_v55 = vld [vmem:[%s17360_s9 + $0x18] sm:$0xff]  }
0x26c6   :  { %6387 = vadd.xlane.f32.xlu1 %v6386_v19  ;;  %v14218_v19 = vld [vmem:[%s17361_s10 + $0x20] sm:$0xff]  }
0x26c7   :  { %13526 = vmatpush3.bf16.msra.mxu0 %v14218_v19  ;;  %v12286_v19 = vld [vmem:[%s17356_s11 + $0x1b] ss:$0 sm:$0xff] }
0x26c8   :  { %13520 = vmatpush3.bf16.msra.mxu1 %v14217_v55  ;;  %13527 = vmatprep.subr.bf16.mxu0 %v17391_v15 }
0x26c9   :  { %6612 = vadd.xlane.f32.xlu0 %v6611_v20  ;;  %13537 = vmatprep.subr.bf16.mxu1 %v17391_v15  ;;  %v14219_v20 = vld [vmem:[%s17361_s10 + $0x28] sm:$0xff]  }
0x26cb   :  { %13528 = vmatpush3.bf16.msra.mxu0 %v14219_v20 }
0x26cc   :  { %13529 = vmatprep.subr.bf16.mxu0 %v17391_v15 }
0x2752   :  { %v6391_v1 = vpop.xlane.xlu0 %6390 }
0x2753   :  { %v6393_v28 = vmul.f32 0.03125, %v6391_v1  ;;  %v6388_v4 = vpop.xlane.xlu1 %6387 }
0x2754   :  { %v6392_v16 = vmul.f32 0.03125, %v6388_v4 }
0x2755   :  { %v6395_v33 = vsub.f32 %v16149_v39, %v6393_v28 }
0x2756   :  { %v6394_v46 = vsub.f32 %v16151_v38, %v6392_v16  ;;  %v6613_v6 = vpop.xlane.xlu0 %6612 }
0x2757   :  { %v6614_v26 = vmul.f32 0.03125, %v6613_v6  ;;  %v6397_v41 = vmul.f32 %v6395_v33, %v6395_v33 }
0x2758   :  { %v6396_v22 = vmul.f32 %v6394_v46, %v6394_v46 }
0x2759   :  { %v6615_v36 = vsub.f32 %v16154_v11, %v6614_v26  ;;  %v6401_v5 = vsel %vm3485_vm8, %v6397_v41, 0.0 }
0x275a   :  { %6402 = vadd.xlane.f32.xlu1 %v6401_v5  ;;  %v6398_v40 = vsel %vm143_vm0, %v6396_v22, 0.0 }
0x275b   :  { %6399 = vadd.xlane.f32.xlu0 %v6398_v40  ;;  %v6616_v34 = vmul.f32 %v6615_v36, %v6615_v36 }
0x275d   :  { %v6617_v50 = vsel %vm143_vm0, %v6616_v34, 0.0  ;;  %v12285_v34 = vld [vmem:[%s17356_s11 + $0x1a] ss:$0 sm:$0xff] }
0x275f   :  { %6618 = vadd.xlane.f32.xlu0 %v6617_v50 }
0x27e7   :  { %v6403_v1 = vpop.xlane.xlu1 %6402 }
0x27e8   :  { %v6405_v28 = vmul.f32 0.03125, %v6403_v1  ;;  %v6400_v4 = vpop.xlane.xlu0 %6399 }
0x27e9   :  { %v6404_v16 = vmul.f32 0.03125, %v6400_v4 }
0x27ea   :  { %v6407_v6 = vadd.f32 1e-05, %v6405_v28 }
0x27eb   :  { %v6406_v26 = vadd.f32 1e-05, %v6404_v16 }
0x27ec   :  { %14370 = vrsqrt.f32 %v6407_v6  ;;  %v6619_v41 = vpop.xlane.xlu0 %6618 }
0x27ed   :  { %14372 = vrsqrt.f32 %v6406_v26  ;;  %v6620_v22 = vmul.f32 0.03125, %v6619_v41  ;;  %v14529_v41 = vld [vmem:[%s17356_s11 + $0x7] ss:$0 sm:$0xff] }
0x27ef   :  { %v6621_v5 = vadd.f32 1e-05, %v6620_v22 }
0x27f1   :  { %14374 = vrsqrt.f32 %v6621_v5  ;;  %v14532_v5 = vld [vmem:[%s17354_s5 + $0x8] sm:$0xff]  }
0x27f6   :  { %v14371_v40 = vpop.eup %14370 }
0x27f7   :  { %v14373_v50 = vpop.eup %14372  ;;  %v6411_v35 = vmul.f32 %v14371_v40, %v6395_v33  ;;  %v14530_v33 = vld [vmem:[%s17354_s5] sm:$0xff]  }
0x27f8   :  { %v6410_v55 = vmul.f32 %v14373_v50, %v6394_v46  ;;  %v14531_v46 = vld [vmem:[%s17356_s11 + $0x8] ss:$0 sm:$0xff]  ;;  %v14221_v50 = vld [vmem:[%s17361_s10 + $0x38] sm:$0xff]  }
0x27f9   :  { %v6417_v20 = vmul.f32 %v12285_v34, %v6411_v35  ;;  %v12287_v35 = vld [vmem:[%s17356_s11 + $0x14] ss:$0 sm:$0xff] }
0x27fa   :  { %v6416_v1 = vmul.f32 %v12285_v34, %v6410_v55  ;;  %v14220_v34 = vld [vmem:[%s17361_s10 + $0x30] sm:$0xff]  }
0x27fb   :  { %v14375_v28 = vpop.eup %14374  ;;  %v6423_v4 = vadd.f32 %v12286_v19, %v6417_v20  ;;  %13530 = vmatpush3.bf16.msra.mxu0 %v14220_v34 }
0x27fc   :  { %v6623_v16 = vmul.f32 %v14375_v28, %v6615_v36  ;;  %v6422_v6 = vadd.f32 %v12286_v19, %v6416_v1  ;;  %13531 = vmatprep.subr.bf16.mxu0 %v17391_v15 }
0x27fe   :  { %v6424_v26 = vpack.c.bf16 %v6423_v4, %v6422_v6  ;;  %v6624_v22 = vmul.f32 %v14529_v41, %v6623_v16 }
0x27ff   :  { %13532 = vmatpush3.bf16.msra.mxu0 %v14221_v50 }
0x2800   :  { %13522 = vmatmul.mubr.msk.bf16.vlgmr.msra.gmra.mrb[212].mxu1 %vm143_vm0, %v6424_v26  ;;  %v6625_v36 = vadd.f32 %v14531_v46, %v6624_v22  ;;  %13551 = vmatprep.subr.bf16.mxu0 %v17391_v15  ;;  %v14533_v22 = vld [vmem:[%s17356_s11 + $0x1] ss:$0 sm:$0xff] }
0x2801   :  { %13538 = vmatpush3.bf16.msra.mxu1 %v14530_v33  ;;  %13541 = vmatprep.mubr.msk.bf16.mxu1 %vm14572_vm1, %v17391_v15 }
0x2802   :  { %13539 = vmatprep.subr.bf16.mxu1 %v17391_v15  ;;  %v6626_v40 = vpack.c.bf16 %v6625_v36, %v6625_v36 }
0x2805   :  { %13540 = vmatpush3.bf16.msra.mxu1 %v14532_v5 }
0x2806   :  { %13545 = vmatprep.subr.bf16.mxu1 %v17391_v15 }
0x2808   :  { %13542 = vmatmul.mubr.msk.bf16.vlgmr.msra.gmra.mrb[216].mxu1 %vm143_vm0, %v6626_v40 }
0x2809   :  { %13547 = vmatprep.mubr.msk.bf16.mxu1 %vm14572_vm1, %v17391_v15 }
0x28d3   :  { %v6478_v55 = vpop.f32.mrb[212].mxu1 }
0x28d4   :  { %v6479_v19 = vadd.f32 %v12287_v35, %v6478_v55  ;;  %v13523_v20 = vpop.f32.mrb[213].mxu1 }
0x28d5   :  { %v6481_v1 = vpop.f32.mrb[214].mxu1 }
0x28d6   :  { %v6482_v28 = vadd.f32 %v12287_v35, %v6481_v1  ;;  %v13524_v4 = vpop.f32.mrb[215].mxu1  ;;  %v6485_v16 = vmax.f32 %v6479_v19, 0.0 }
0x28d8   :  { %v6486_v6 = vmax.f32 %v6482_v28, 0.0 }
0x28da   :  { %v6487_v26 = vpack.c.bf16 %v6486_v6, %v6485_v16 }
0x28db   :  { %v6664_v41 = vpop.f32.mrb[216].mxu1 }
0x28dc   :  { %v6665_v33 = vadd.f32 %v14533_v22, %v6664_v41  ;;  %13534 = vmatmul.mubr.msk.bf16.vlgmr.msra.gmra.mrb[212].mxu0 %vm3383_vm9, %v6487_v26  ;;  %v13543_v46 = vpop.f32.mrb[217].mxu1 }
0x28dd   :  { %v6667_v36 = vpop.f32.mrb[218].mxu1  ;;  %13553 = vmatprep.mubr.msk.bf16.mxu0 %vm14572_vm1, %v17391_v15 }
0x28de   :  { %6689 = vrot.lane.b32.xlu0 %v6665_v33, %s14573_s14  ;;  %6686 = vrot.lane.b32.xlu1 %v6665_v33, %s14574_s15  ;;  %v13544_v5 = vpop.f32.mrb[219].mxu1  ;;  %v6670_v40 = vmul.f32 0.35355338, %v6665_v33  ;;  %v16231_v34 = vpack.c.bf16 %v6665_v33, %v6665_v33 }
0x28e0   :  { %v16251_v16 = vpack.c.bf16 %v6670_v40, %v6670_v40 }
0x28e2   :  { %6692 = vrot.lane.b32.xlu1 %v6665_v33, %s14575_s18  ;;  %6672 = vrot.lane.b32.xlu0 %v6670_v40, %s14574_s15 }
0x28e6   :  { %6700 = vrot.lane.b32.xlu1 %v16231_v34, %s14576_s21 }
0x2950   :  { %v6687_v50 = vpop.permute.xlu1 %6686  ;;  %v6690_v55 = vpop.permute.xlu0 %6689 }
0x2951   :  { %v16235_v35 = vpack.c.bf16 %v6687_v50, %v6687_v50  ;;  %v16239_v20 = vpack.c.bf16 %v6690_v55, %v6690_v55 }
0x2953   :  { %6749 = vrot.lane.b32.xlu1 %v16235_v35, %s14576_s21 }
0x2954   :  { %v6693_v19 = vpop.permute.xlu1 %6692  ;;  %v6673_v36 = vpop.permute.xlu0 %6672 }
0x2955   :  { %v16241_v1 = vpack.c.bf16 %v6693_v19, %v6693_v19  ;;  %v16264_v55 = vpack.c.bf16 %v6673_v36, %v6673_v36 }
0x2957   :  { %6798 = vrot.lane.b32.xlu1 %v16239_v20, %s14576_s21  ;;  %6847 = vrot.lane.b32.xlu0 %v16241_v1, %s14576_s21 }
0x2958   :  { %v6701_v28 = vpop.permute.xlu1 %6700 }
0x2959   :  { %v6706_v4 = vsel %vm554_vm3, %v6701_v28, 0 }
0x295a   :  { %13546 = vmatpush3.bf16.xpose.msra.mxu1 %v6706_v4 }
0x295b   :  { %6675 = vrot.lane.b32.xlu1 %v6670_v40, %s14573_s14  ;;  %6678 = vrot.lane.b32.xlu0 %v6670_v40, %s14575_s18 }
0x295c   :  { %13557 = vmatprep.subr.bf16.mxu1 %v17391_v15 }
0x2961   :  { %13548 = vmatmul.mubr.msk.bf16.vlgmr.msra.gmra.mrb[220].mxu1 %vm554_vm3, %v16251_v16 }
0x2962   :  { %13559 = vmatprep.mubr.msk.bf16.mxu1 %vm14572_vm1, %v17391_v15 }
0x29af   :  { %v16257_v6 = vpop.f32.mrb[212].mxu0 }
0x29b0   :  { %17405 = vst [vmem:[#allocation20_spill] sm:$0xff] %v16257_v6  ;;  %v13535_v26 = vpop.f32.mrb[213].mxu0 }
0x29b1   :  { %v16259_v41 = vpop.f32.mrb[214].mxu0 }
0x29b2   :  { %17406 = vst [vmem:[#allocation21_spill] sm:$0xff] %v16259_v41  ;;  %v13536_v22 = vpop.f32.mrb[215].mxu0 }
0x29c5   :  { %v6750_v33 = vpop.permute.xlu1 %6749 }
0x29c6   :  { %v6755_v46 = vsel %vm554_vm3, %v6750_v33, 0 }
0x29c7   :  { %13552 = vmatpush3.bf16.xpose.msra.mxu0 %v6755_v46 }
0x29c8   :  { %13563 = vmatprep.subr.bf16.mxu0 %v17391_v15 }
0x29c9   :  { %v6799_v5 = vpop.permute.xlu1 %6798  ;;  %v6848_v50 = vpop.permute.xlu0 %6847 }
0x29ca   :  { %v6804_v40 = vsel %vm554_vm3, %v6799_v5, 0  ;;  %v6853_v28 = vsel %vm554_vm3, %v6848_v50, 0 }
0x29cb   :  { %13558 = vmatpush3.bf16.xpose.msra.mxu1 %v6804_v40 }
0x29cc   :  { %13569 = vmatprep.subr.bf16.mxu1 %v17391_v15 }
0x29cd   :  { %v6676_v19 = vpop.permute.xlu1 %6675  ;;  %v6679_v26 = vpop.permute.xlu0 %6678 }
0x29ce   :  { %13554 = vmatmul.mubr.msk.bf16.vlgmr.msra.gmra.mrb[216].mxu0 %vm554_vm3, %v16264_v55  ;;  %v16272_v4 = vpack.c.bf16 %v6676_v19, %v6676_v19  ;;  %v16279_v22 = vpack.c.bf16 %v6679_v26, %v6679_v26 }
0x29cf   :  { %13564 = vmatpush3.bf16.xpose.msra.mxu0 %v6853_v28  ;;  %13565 = vmatprep.mubr.msk.bf16.mxu0 %vm14572_vm1, %v17391_v15 }
0x29d0   :  { %13575 = vmatprep.subr.bf16.mxu0 %v17391_v15 }
0x29d2   :  { %13560 = vmatmul.mubr.msk.bf16.vlgmr.msra.gmra.mrb[224].mxu1 %vm554_vm3, %v16272_v4 }
0x29d3   :  { %13571 = vmatprep.mubr.msk.bf16.mxu1 %vm14572_vm1, %v17391_v15 }
0x29d6   :  { %13566 = vmatmul.mubr.msk.bf16.vlgmr.msra.gmra.mrb[220].mxu0 %vm554_vm3, %v16279_v22 }
0x29d7   :  { %13577 = vmatprep.mubr.msk.bf16.mxu0 %vm14572_vm1, %v17391_v15 }
0x2a34   :  { %v6742_v33 = vpop.f32.mrb[220].mxu1 }
0x2a35   :  { %v13549_v46 = vpop.f32.mrb[221].mxu1  ;;  %v6896_v36 = vsel %vm6895_vm13, %v6742_v33, -inf }
0x2a36   :  { %6897 = vmax.xlane.f32.xlu1 %v6896_v36  ;;  %v6745_v5 = vpop.f32.mrb[222].mxu1 }
0x2a37   :  { %v13550_v40 = vpop.f32.mrb[223].mxu1 }
0x2a47   :  { %6944 = vrot.lane.b32.xlu1 %v16231_v34, %s14577_s25 }
0x2aa1   :  { %v6791_v50 = vpop.f32.mrb[216].mxu0 }
0x2aa2   :  { %v13555_v19 = vpop.f32.mrb[217].mxu0  ;;  %v6899_v28 = vsel %vm6895_vm13, %v6791_v50, -inf }
0x2aa3   :  { %6900 = vmax.xlane.f32.xlu0 %v6899_v28  ;;  %v6794_v26 = vpop.f32.mrb[218].mxu0 }
0x2aa4   :  { %v13556_v41 = vpop.f32.mrb[219].mxu0 }
0x2aa5   :  { %v6840_v39 = vpop.f32.mrb[224].mxu1 }
0x2aa6   :  { %v13561_v6 = vpop.f32.mrb[225].mxu1  ;;  %v6902_v38 = vsel %vm6895_vm13, %v6840_v39, -inf }
0x2aa7   :  { %v6843_v46 = vpop.f32.mrb[226].mxu1  ;;  %6903 = vmax.xlane.f32.xlu0 %v6902_v38 }
0x2aa8   :  { %v13562_v24 = vpop.f32.mrb[227].mxu1 }
0x2aa9   :  { %v6889_v36 = vpop.f32.mrb[220].mxu0 }
0x2aaa   :  { %v13567_v5 = vpop.f32.mrb[221].mxu0  ;;  %v6905_v40 = vsel %vm6895_vm13, %v6889_v36, -inf }
0x2aab   :  { %6906 = vmax.xlane.f32.xlu0 %v6905_v40  ;;  %v6892_v17 = vpop.f32.mrb[222].mxu0 }
0x2aac   :  { %v13568_v51 = vpop.f32.mrb[223].mxu0 }
0x2ac3   :  { %v6898_v19 = vpop.xlane.xlu1 %6897 }
0x2ac4   :  { %v6908_v13 = vsub.f32 %v6742_v33, %v6898_v19 }
0x2ac6   :  { %v6912_v63 = vmul.f32 1.442695, %v6908_v13 }
0x2ac7   :  { %v6945_v28 = vpop.permute.xlu1 %6944 }
0x2ac8   :  { %14376 = vpow2.f32 %v6912_v63  ;;  %v6951_v41 = vsel %vm2193_vm6, %v6945_v28, 0 }
0x2ac9   :  { %13570 = vmatpush3.bf16.msra.mxu1 %v6951_v41 }
0x2aca   :  { %13581 = vmatprep.subr.bf16.mxu1 %v17391_v15 }
0x2ad2   :  { %v14377_v6 = vpop.eup %14376 }
0x2ad3   :  { %v6920_v24 = vsel %vm6895_vm13, %v14377_v6, 0.0 }
0x2ad4   :  { %6921 = vadd.xlane.f32.xlu1 %v6920_v24 }
0x2b30   :  { %v6901_v38 = vpop.xlane.xlu0 %6900 }
0x2b31   :  { %v6909_v26 = vsub.f32 %v6791_v50, %v6901_v38  ;;  %v17385_v38 = vrot.slane %v16235_v35, 2 }
0x2b33   :  { %v6914_v46 = vmul.f32 1.442695, %v6909_v26 }
0x2b34   :  { %v6904_v5 = vpop.xlane.xlu0 %6903 }
0x2b35   :  { %14378 = vpow2.f32 %v6914_v46  ;;  %v6910_v17 = vsub.f32 %v6840_v39, %v6904_v5  ;;  %v7323_v39 = vrot.slane %v16231_v34, 2  ;;  %v7476_v46 = vrot.slane %v16241_v1, 2 }
0x2b37   :  { %v6916_v51 = vmul.f32 1.442695, %v6910_v17 }
0x2b38   :  { %v6907_v33 = vpop.xlane.xlu0 %6906 }
0x2b39   :  { %14380 = vpow2.f32 %v6916_v51  ;;  %v6911_v13 = vsub.f32 %v6889_v36, %v6907_v33  ;;  %v7425_v36 = vrot.slane %v16239_v20, 2 }
0x2b3b   :  { %v6918_v63 = vmul.f32 1.442695, %v6911_v13 }
0x2b3d   :  { %14382 = vpow2.f32 %v6918_v63 }
0x2b3f   :  { %v14379_v40 = vpop.eup %14378 }
0x2b40   :  { %v6923_v19 = vsel %vm6895_vm13, %v14379_v40, 0.0 }
0x2b41   :  { %6924 = vadd.xlane.f32.xlu0 %v6923_v19 }
0x2b43   :  { %v14381_v28 = vpop.eup %14380 }
0x2b44   :  { %v6926_v41 = vsel %vm6895_vm13, %v14381_v28, 0.0 }
0x2b45   :  { %6927 = vadd.xlane.f32.xlu1 %v6926_v41 }
0x2b47   :  { %v14383_v24 = vpop.eup %14382 }
0x2b48   :  { %v6929_v50 = vsel %vm6895_vm13, %v14383_v24, 0.0 }
0x2b49   :  { %6930 = vadd.xlane.f32.xlu0 %v6929_v50 }
0x2b56   :  { %7041 = vrot.lane.b32.xlu1 %v16239_v20, %s14577_s25 }
0x2b5a   :  { %7089 = vrot.lane.b32.xlu1 %v16241_v1, %s14577_s25 }
0x2b5e   :  { %7324 = vrot.lane.b32.xlu1 %v7323_v39, %s14576_s21 }
0x2b5f   :  { %6993 = vrot.lane.b32.xlu0 %v16235_v35, %s14577_s25 }
0x2b61   :  { %v6922_v26 = vpop.xlane.xlu1 %6921 }
0x2b62   :  { %14384 = vrcp.f32 %v6922_v26  ;;  %7426 = vrot.lane.b32.xlu1 %v7425_v36, %s14576_s21 }
0x2b63   :  { %7375 = vrot.lane.b32.xlu0 %v17385_v38, %s14576_s21 }
0x2b67   :  { %7477 = vrot.lane.b32.xlu0 %v7476_v46, %s14576_s21 }
0x2b6c   :  { %v14385_v5 = vpop.eup %14384 }
0x2b6d   :  { %v6936_v17 = vmul.f32 %v14385_v5, %v14377_v6 }
0x2b6f   :  { %v6940_v51 = vpack.c.bf16 %v6936_v17, %v6936_v17 }
0x2b71   :  { %13572 = vmatmul.mubr.msk.bf16.vlgmr.msra.gmra.mrb[228].mxu1 %vm6946_vm14, %v6940_v51 }
0x2b72   :  { %13583 = vmatprep.mubr.msk.bf16.mxu1 %vm14572_vm1, %v17391_v15 }
0x2bce   :  { %v6925_v33 = vpop.xlane.xlu0 %6924 }
0x2bcf   :  { %14386 = vrcp.f32 %v6925_v33 }
0x2bd2   :  { %v6928_v13 = vpop.xlane.xlu1 %6927 }
0x2bd3   :  { %14388 = vrcp.f32 %v6928_v13 }
0x2bd6   :  { %v7042_v63 = vpop.permute.xlu1 %7041  ;;  %v6931_v19 = vpop.xlane.xlu0 %6930 }
0x2bd7   :  { %v7047_v41 = vsel %vm2193_vm6, %v7042_v63, 0  ;;  %14390 = vrcp.f32 %v6931_v19 }
0x2bd8   :  { %13582 = vmatpush3.bf16.msra.mxu1 %v7047_v41 }
0x2bd9   :  { %v14387_v50 = vpop.eup %14386  ;;  %13593 = vmatprep.subr.bf16.mxu1 %v17391_v15 }
0x2bda   :  { %v6994_v6 = vpop.permute.xlu0 %6993  ;;  %v6937_v26 = vmul.f32 %v14387_v50, %v14379_v40  ;;  %v7090_v17 = vpop.permute.xlu1 %7089 }
0x2bdb   :  { %v6999_v5 = vsel %vm2193_vm6, %v6994_v6, 0  ;;  %v7095_v13 = vsel %vm2193_vm6, %v7090_v17, 0 }
0x2bdc   :  { %13576 = vmatpush3.bf16.msra.mxu0 %v6999_v5  ;;  %v6941_v51 = vpack.c.bf16 %v6937_v26, %v6937_v26 }
0x2bdd   :  { %v14389_v38 = vpop.eup %14388  ;;  %13587 = vmatprep.subr.bf16.mxu0 %v17391_v15 }
0x2bde   :  { %v6938_v33 = vmul.f32 %v14389_v38, %v14381_v28 }
0x2bdf   :  { %13578 = vmatmul.mubr.msk.bf16.vlgmr.msra.gmra.mrb[224].mxu0 %vm6946_vm14, %v6941_v51  ;;  %v7325_v51 = vpop.permute.xlu1 %7324 }
0x2be0   :  { %13588 = vmatpush3.bf16.msra.mxu0 %v7095_v13  ;;  %v6942_v63 = vpack.c.bf16 %v6938_v33, %v6938_v33  ;;  %13589 = vmatprep.mubr.msk.bf16.mxu0 %vm14572_vm1, %v17391_v15 }
0x2be1   :  { %v14391_v19 = vpop.eup %14390  ;;  %13599 = vmatprep.subr.bf16.mxu0 %v17391_v15 }
0x2be2   :  { %13584 = vmatmul.mubr.msk.bf16.vlgmr.msra.gmra.mrb[232].mxu1 %vm6946_vm14, %v6942_v63  ;;  %v6939_v40 = vmul.f32 %v14391_v19, %v14383_v24 }
0x2be3   :  { %13594 = vmatpush3.bf16.msra.mxu1 %v14874_v56  ;;  %13595 = vmatprep.mubr.msk.bf16.mxu1 %vm14572_vm1, %v17391_v15 }
0x2be4   :  { %v6943_v28 = vpack.c.bf16 %v6939_v40, %v6939_v40  ;;  %13605 = vmatprep.subr.bf16.mxu1 %v17391_v15 }
0x2be7   :  { %13590 = vmatmul.mubr.msk.bf16.vlgmr.msra.gmra.mrb[228].mxu0 %vm6946_vm14, %v6943_v28 }
0x2be8   :  { %13600 = vmatpush3.bf16.msra.mxu0 %v14894_v2  ;;  %13601 = vmatprep.mubr.msk.bf16.mxu0 %vm14572_vm1, %v17391_v15 }
0x2be9   :  { %13611 = vmatprep.subr.bf16.mxu0 %v17391_v15 }
0x2c44   :  { %v6987_v38 = vpop.f32.mrb[228].mxu1 }
0x2c45   :  { %v7137_v41 = vpack.c.bf16 %v6987_v38, %v6987_v38  ;;  %v13573_v24 = vpop.f32.mrb[229].mxu1  ;;  %v7330_v38 = vsel %vm554_vm3, %v7325_v51, 0 }
0x2c46   :  { %v6990_v50 = vpop.f32.mrb[230].mxu1 }
0x2c47   :  { %v13574_v6 = vpop.f32.mrb[231].mxu1  ;;  %13596 = vmatmul.mubr.msk.bf16.vlgmr.msra.gmra.mrb[236].mxu1 %vm554_vm3, %v7137_v41  ;;  %v7376_v50 = vpop.permute.xlu0 %7375 }
0x2c48   :  { %13606 = vmatpush3.bf16.msra.mxu1 %v14902_v10  ;;  %13607 = vmatprep.mubr.msk.bf16.mxu1 %vm14572_vm1, %v17391_v15  ;;  %v7381_v51 = vsel %vm554_vm3, %v7376_v50, 0 }
0x2c49   :  { %13617 = vmatprep.subr.bf16.mxu1 %v17391_v15 }
0x2cb2   :  { %v7035_v26 = vpop.f32.mrb[224].mxu0 }
0x2cb3   :  { %v7138_v5 = vpack.c.bf16 %v7035_v26, %v7035_v26  ;;  %v13579_v17 = vpop.f32.mrb[225].mxu0 }
0x2cb4   :  { %v7038_v33 = vpop.f32.mrb[226].mxu0  ;;  %v7427_v17 = vpop.permute.xlu1 %7426 }
0x2cb5   :  { %v13580_v13 = vpop.f32.mrb[227].mxu0  ;;  %v7083_v63 = vpop.f32.mrb[232].mxu1  ;;  %13602 = vmatmul.mubr.msk.bf16.vlgmr.msra.gmra.mrb[232].mxu0 %vm554_vm3, %v7138_v5 }
0x2cb6   :  { %v7139_v19 = vpack.c.bf16 %v7083_v63, %v7083_v63  ;;  %13612 = vmatpush3.bf16.msra.mxu0 %v14912_v21  ;;  %v13585_v40 = vpop.f32.mrb[233].mxu1  ;;  %13613 = vmatprep.mubr.msk.bf16.mxu0 %vm14572_vm1, %v17391_v15  ;;  %v7322_v13 = vrot.slane %v16251_v16, 2  ;;  %v7432_v63 = vsel %vm554_vm3, %v7427_v17, 0  ;;  %v7424_v16 = vrot.slane %v16272_v4, 2 }
0x2cb7   :  { %v7086_v28 = vpop.f32.mrb[234].mxu1  ;;  %13623 = vmatprep.subr.bf16.mxu0 %v17391_v15  ;;  %v7373_v40 = vrot.slane %v16264_v55, 2 }
0x2cb8   :  { %v13586_v41 = vpop.f32.mrb[235].mxu1  ;;  %13608 = vmatmul.mubr.msk.bf16.vlgmr.msra.gmra.mrb[240].mxu1 %vm554_vm3, %v7139_v19  ;;  %v7478_v19 = vpop.permute.xlu0 %7477 }
0x2cb9   :  { %13618 = vmatpush3.bf16.xpose.msra.mxu1 %v7330_v38  ;;  %13619 = vmatprep.mubr.msk.bf16.mxu1 %vm14572_vm1, %v17391_v15  ;;  %v7483_v28 = vsel %vm554_vm3, %v7478_v19, 0  ;;  %v7475_v38 = vrot.slane %v16279_v22, 2 }
0x2cba   :  { %v7131_v24 = vpop.f32.mrb[228].mxu0  ;;  %13629 = vmatprep.subr.bf16.mxu1 %v17391_v15 }
0x2cbb   :  { %v7140_v6 = vpack.c.bf16 %v7131_v24, %v7131_v24  ;;  %v13591_v26 = vpop.f32.mrb[229].mxu0 }
0x2cbc   :  { %v7134_v5 = vpop.f32.mrb[230].mxu0 }
0x2cbd   :  { %v13592_v33 = vpop.f32.mrb[231].mxu0  ;;  %13614 = vmatmul.mubr.msk.bf16.vlgmr.msra.gmra.mrb[236].mxu0 %vm554_vm3, %v7140_v6 }
0x2cbe   :  { %13625 = vmatprep.mubr.msk.bf16.mxu0 %vm14572_vm1, %v17391_v15 }
0x2cbf   :  { %13624 = vmatpush3.bf16.xpose.msra.mxu0 %v7381_v51 }
0x2cc0   :  { %13620 = vmatmul.mubr.msk.bf16.vlgmr.msra.gmra.mrb[244].mxu1 %vm554_vm3, %v7322_v13  ;;  %13635 = vmatprep.subr.bf16.mxu0 %v17391_v15 }
0x2cc1   :  { %13630 = vmatpush3.bf16.xpose.msra.mxu1 %v7432_v63  ;;  %13631 = vmatprep.mubr.msk.bf16.mxu1 %vm14572_vm1, %v17391_v15 }
0x2cc2   :  { %13641 = vmatprep.subr.bf16.mxu1 %v17391_v15 }
0x2cc6   :  { %13626 = vmatmul.mubr.msk.bf16.vlgmr.msra.gmra.mrb[240].mxu0 %vm554_vm3, %v7373_v40 }
0x2cc7   :  { %13636 = vmatpush3.bf16.xpose.msra.mxu0 %v7483_v28  ;;  %13637 = vmatprep.mubr.msk.bf16.mxu0 %vm14572_vm1, %v17391_v15 }
0x2cc8   :  { %13632 = vmatmul.mubr.msk.bf16.vlgmr.msra.gmra.mrb[248].mxu1 %vm554_vm3, %v7424_v16  ;;  %13647 = vmatprep.subr.bf16.mxu0 %v17391_v15 }
0x2cc9   :  { %13643 = vmatprep.mubr.msk.bf16.mxu1 %vm14572_vm1, %v17391_v15 }
0x2cce   :  { %13638 = vmatmul.mubr.msk.bf16.vlgmr.msra.gmra.mrb[244].mxu0 %vm554_vm3, %v7475_v38 }
0x2ccf   :  { %13649 = vmatprep.mubr.msk.bf16.mxu0 %vm14572_vm1, %v17391_v15 }
0x2d1a   :  { %v7178_v55 = vpop.f32.mrb[236].mxu1 }
0x2d1b   :  { %v13597_v4 = vpop.f32.mrb[237].mxu1  ;;  %v7314_v6 = vsel %vm7313_vm15, %v7178_v55, 0.0 }
0x2d1c   :  { %v7181_v41 = vpop.f32.mrb[238].mxu1 }
0x2d1d   :  { %v13598_v24 = vpop.f32.mrb[239].mxu1 }
0x2d88   :  { %v7221_v50 = vpop.f32.mrb[232].mxu0 }
0x2d89   :  { %v7315_v26 = vsel %vm7313_vm15, %v7221_v50, 0.0  ;;  %v13603_v5 = vpop.f32.mrb[233].mxu0 }
0x2d8a   :  { %v7316_v17 = vadd.f32 %v7315_v26, %v7314_v6  ;;  %v7224_v33 = vpop.f32.mrb[234].mxu0 }
0x2d8b   :  { %v13604_v51 = vpop.f32.mrb[235].mxu0  ;;  %v7264_v22 = vpop.f32.mrb[240].mxu1 }
0x2d8c   :  { %v7317_v13 = vsel %vm7313_vm15, %v7264_v22, 0.0  ;;  %v13609_v63 = vpop.f32.mrb[241].mxu1 }
0x2d8d   :  { %v7318_v19 = vadd.f32 %v7317_v13, %v7316_v17  ;;  %v7267_v40 = vpop.f32.mrb[242].mxu1 }
0x2d8e   :  { %v13610_v16 = vpop.f32.mrb[243].mxu1 }
0x2d90   :  { %v7307_v28 = vpop.f32.mrb[236].mxu0 }
0x2d91   :  { %v7319_v38 = vsel %vm7313_vm15, %v7307_v28, 0.0  ;;  %v13615_v4 = vpop.f32.mrb[237].mxu0 }
0x2d92   :  { %v16385_v41 = vadd.f32 %v7319_v38, %v7318_v19  ;;  %v7310_v55 = vpop.f32.mrb[238].mxu0 }
0x2d93   :  { %v13616_v24 = vpop.f32.mrb[239].mxu0  ;;  %v7366_v50 = vpop.f32.mrb[244].mxu1 }
0x2d94   :  { %v13621_v5 = vpop.f32.mrb[245].mxu1  ;;  %v7525_v6 = vsel %vm6895_vm13, %v7366_v50, -inf }
0x2d95   :  { %7526 = vmax.xlane.f32.xlu1 %v7525_v6  ;;  %v7369_v26 = vpop.f32.mrb[246].mxu1 }
0x2d96   :  { %v13622_v33 = vpop.f32.mrb[247].mxu1 }
0x2d99   :  { %v7417_v51 = vpop.f32.mrb[240].mxu0 }
0x2d9a   :  { %v13627_v22 = vpop.f32.mrb[241].mxu0  ;;  %v7528_v17 = vsel %vm6895_vm13, %v7417_v51, -inf }
0x2d9b   :  { %7529 = vmax.xlane.f32.xlu0 %v7528_v17  ;;  %v7420_v13 = vpop.f32.mrb[242].mxu0  ;;  %v7468_v63 = vpop.f32.mrb[248].mxu1 }
0x2d9c   :  { %v13628_v40 = vpop.f32.mrb[243].mxu0  ;;  %v13633_v16 = vpop.f32.mrb[249].mxu1  ;;  %v7531_v19 = vsel %vm6895_vm13, %v7468_v63, -inf }
0x2d9d   :  { %v7471_v28 = vpop.f32.mrb[250].mxu1 }
0x2d9e   :  { %v13634_v38 = vpop.f32.mrb[251].mxu1 }
0x2d9f   :  { %7532 = vmax.xlane.f32.xlu0 %v7531_v19 }
0x2da1   :  { %v7519_v4 = vpop.f32.mrb[244].mxu0 }
0x2da2   :  { %v13639_v55 = vpop.f32.mrb[245].mxu0  ;;  %v7534_v24 = vsel %vm6895_vm13, %v7519_v4, -inf }
0x2da3   :  { %7535 = vmax.xlane.f32.xlu0 %v7534_v24  ;;  %v7522_v5 = vpop.f32.mrb[246].mxu0 }
0x2da4   :  { %v13640_v6 = vpop.f32.mrb[247].mxu0 }
0x2da6   :  { %7573 = vrot.lane.b32.xlu1 %v7323_v39, %s14577_s25 }
0x2e22   :  { %v7527_v26 = vpop.xlane.xlu1 %7526 }
0x2e23   :  { %v7537_v33 = vsub.f32 %v7366_v50, %v7527_v26 }
0x2e25   :  { %v7541_v22 = vmul.f32 1.442695, %v7537_v33 }
0x2e26   :  { %v7574_v17 = vpop.permute.xlu1 %7573 }
0x2e27   :  { %14392 = vpow2.f32 %v7541_v22  ;;  %v7579_v13 = vsel %vm2193_vm6, %v7574_v17, 0 }
0x2e28   :  { %v7530_v40 = vpop.xlane.xlu0 %7529  ;;  %13642 = vmatpush3.bf16.msra.mxu1 %v7579_v13 }
0x2e29   :  { %v7538_v16 = vsub.f32 %v7417_v51, %v7530_v40  ;;  %13653 = vmatprep.subr.bf16.mxu1 %v17391_v15 }
0x2e2b   :  { %v7543_v19 = vmul.f32 1.442695, %v7538_v16 }
0x2e2c   :  { %v7533_v28 = vpop.xlane.xlu0 %7532 }
0x2e2d   :  { %14394 = vpow2.f32 %v7543_v19  ;;  %v7539_v38 = vsub.f32 %v7468_v63, %v7533_v28 }
0x2e2f   :  { %v7545_v55 = vmul.f32 1.442695, %v7539_v38 }
0x2e30   :  { %v7536_v24 = vpop.xlane.xlu0 %7535 }
0x2e31   :  { %v14393_v34 = vpop.eup %14392  ;;  %14396 = vpow2.f32 %v7545_v55  ;;  %v7540_v39 = vsub.f32 %v7519_v4, %v7536_v24  ;;  %v17407_v4 = vrot.slane %v16235_v35, 2 }
0x2e32   :  { %v7549_v50 = vsel %vm6895_vm13, %v14393_v34, 0.0 }
0x2e33   :  { %v7547_v5 = vmul.f32 1.442695, %v7540_v39  ;;  %7550 = vadd.xlane.f32.xlu1 %v7549_v50 }
0x2e35   :  { %14398 = vpow2.f32 %v7547_v5 }
0x2e37   :  { %v14395_v6 = vpop.eup %14394 }
0x2e38   :  { %v7552_v26 = vsel %vm6895_vm13, %v14395_v6, 0.0 }
0x2e39   :  { %7553 = vadd.xlane.f32.xlu0 %v7552_v26 }
0x2e3b   :  { %v14397_v51 = vpop.eup %14396 }
0x2e3c   :  { %v7555_v33 = vsel %vm6895_vm13, %v14397_v51, 0.0 }
0x2e3d   :  { %7556 = vadd.xlane.f32.xlu1 %v7555_v33 }
0x2e3f   :  { %v14399_v22 = vpop.eup %14398 }
0x2e40   :  { %v7558_v63 = vsel %vm6895_vm13, %v14399_v22, 0.0 }
0x2e41   :  { %7559 = vadd.xlane.f32.xlu0 %v7558_v63 }
0x2e4e   :  { %7669 = vrot.lane.b32.xlu1 %v7425_v36, %s14577_s25 }
0x2e52   :  { %7717 = vrot.lane.b32.xlu1 %v7476_v46, %s14577_s25 }
0x2e57   :  { %7621 = vrot.lane.b32.xlu0 %v17407_v4, %s14577_s25 }
0x2ec0   :  { %v7551_v17 = vpop.xlane.xlu1 %7550 }
0x2ec1   :  { %14400 = vrcp.f32 %v7551_v17 }
0x2ec6   :  { %v7554_v13 = vpop.xlane.xlu0 %7553 }
0x2ec7   :  { %14402 = vrcp.f32 %v7554_v13 }
0x2eca   :  { %v7557_v40 = vpop.xlane.xlu1 %7556 }
0x2ecb   :  { %v14401_v16 = vpop.eup %14400  ;;  %14404 = vrcp.f32 %v7557_v40 }
0x2ecc   :  { %v7565_v19 = vmul.f32 %v14401_v16, %v14393_v34 }
0x2ece   :  { %v7670_v28 = vpop.permute.xlu1 %7669  ;;  %v7560_v38 = vpop.xlane.xlu0 %7559  ;;  %v7569_v20 = vpack.c.bf16 %v7565_v19, %v7565_v19 }
0x2ecf   :  { %v7675_v36 = vsel %vm2193_vm6, %v7670_v28, 0  ;;  %14406 = vrcp.f32 %v7560_v38 }
0x2ed0   :  { %13644 = vmatmul.mubr.msk.bf16.vlgmr.msra.gmra.mrb[252].mxu1 %vm6946_vm14, %v7569_v20 }
0x2ed1   :  { %v14403_v1 = vpop.eup %14402  ;;  %13654 = vmatpush3.bf16.msra.mxu1 %v7675_v36  ;;  %13655 = vmatprep.mubr.msk.bf16.mxu1 %vm14572_vm1, %v17391_v15 }
0x2ed2   :  { %v7622_v35 = vpop.permute.xlu0 %7621  ;;  %v7566_v46 = vmul.f32 %v14403_v1, %v14395_v6  ;;  %13665 = vmatprep.subr.bf16.mxu1 %v17391_v15  ;;  %v7718_v24 = vpop.permute.xlu1 %7717  ;;  %v14534_v1 = vld [vmem:[%s17357_s7] sm:$0xff]  }
0x2ed3   :  { %v7627_v55 = vsel %vm2193_vm6, %v7622_v35, 0  ;;  %v7723_v5 = vsel %vm2193_vm6, %v7718_v24, 0 }
0x2ed4   :  { %13648 = vmatpush3.bf16.msra.mxu0 %v7627_v55  ;;  %v7570_v34 = vpack.c.bf16 %v7566_v46, %v7566_v46 }
0x2ed5   :  { %v14405_v39 = vpop.eup %14404  ;;  %13659 = vmatprep.subr.bf16.mxu0 %v17391_v15 }
0x2ed6   :  { %v7567_v50 = vmul.f32 %v14405_v39, %v14397_v51 }
0x2ed7   :  { %13650 = vmatmul.mubr.msk.bf16.vlgmr.msra.gmra.mrb[248].mxu0 %vm6946_vm14, %v7570_v34  ;;  %v14535_v34 = vld [vmem:[%s17357_s7 + $0x8] sm:$0xff]  }
0x2ed8   :  { %v7571_v26 = vpack.c.bf16 %v7567_v50, %v7567_v50  ;;  %13660 = vmatpush3.bf16.msra.mxu0 %v7723_v5  ;;  %13661 = vmatprep.mubr.msk.bf16.mxu0 %vm14572_vm1, %v17391_v15 }
0x2ed9   :  { %v14407_v6 = vpop.eup %14406  ;;  %13671 = vmatprep.subr.bf16.mxu0 %v17391_v15 }
0x2eda   :  { %13656 = vmatmul.mubr.msk.bf16.vlgmr.msra.gmra.mrb[0].mxu1 %vm6946_vm14, %v7571_v26  ;;  %v7568_v33 = vmul.f32 %v14407_v6, %v14399_v22 }
0x2edb   :  { %13666 = vmatpush3.bf16.msra.mxu1 %v14874_v56  ;;  %13667 = vmatprep.mubr.msk.bf16.mxu1 %vm14572_vm1, %v17391_v15 }
0x2edc   :  { %v7572_v51 = vpack.c.bf16 %v7568_v33, %v7568_v33  ;;  %13677 = vmatprep.subr.bf16.mxu1 %v17391_v15 }
0x2edf   :  { %13662 = vmatmul.mubr.msk.bf16.vlgmr.msra.gmra.mrb[252].mxu0 %vm6946_vm14, %v7572_v51 }
0x2ee0   :  { %13672 = vmatpush3.bf16.msra.mxu0 %v14894_v2  ;;  %13673 = vmatprep.mubr.msk.bf16.mxu0 %vm14572_vm1, %v17391_v15 }
0x2ee1   :  { %13683 = vmatprep.subr.bf16.mxu0 %v17391_v15 }
0x2fa3   :  { %v7615_v63 = vpop.f32.mrb[252].mxu1 }
0x2fa4   :  { %v7765_v4 = vpack.c.bf16 %v7615_v63, %v7615_v63  ;;  %v13645_v22 = vpop.f32.mrb[253].mxu1 }
0x2fa5   :  { %v7618_v17 = vpop.f32.mrb[254].mxu1 }
0x2fa6   :  { %v13646_v56 = vpop.f32.mrb[255].mxu1  ;;  %13668 = vmatmul.mubr.msk.bf16.vlgmr.msra.gmra.mrb[4].mxu1 %vm554_vm3, %v7765_v4 }
0x2fa7   :  { %13678 = vmatpush3.bf16.msra.mxu1 %v14902_v10  ;;  %13679 = vmatprep.mubr.msk.bf16.mxu1 %vm14572_vm1, %v17391_v15 }
0x2fa8   :  { %13689 = vmatprep.subr.bf16.mxu1 %v17391_v15 }
0x2faa   :  { %v7663_v2 = vpop.f32.mrb[248].mxu0 }
0x2fab   :  { %v7766_v13 = vpack.c.bf16 %v7663_v2, %v7663_v2  ;;  %v13651_v40 = vpop.f32.mrb[249].mxu0 }
0x2fac   :  { %v7666_v16 = vpop.f32.mrb[250].mxu0 }
0x2fad   :  { %v13652_v19 = vpop.f32.mrb[251].mxu0  ;;  %v7711_v28 = vpop.f32.mrb[0].mxu1  ;;  %13674 = vmatmul.mubr.msk.bf16.vlgmr.msra.gmra.mrb[0].mxu0 %vm554_vm3, %v7766_v13 }
0x2fae   :  { %v7767_v38 = vpack.c.bf16 %v7711_v28, %v7711_v28  ;;  %13684 = vmatpush3.bf16.msra.mxu0 %v14912_v21  ;;  %v13657_v20 = vpop.f32.mrb[1].mxu1  ;;  %13685 = vmatprep.mubr.msk.bf16.mxu0 %vm14572_vm1, %v17391_v15 }
0x2faf   :  { %v7714_v10 = vpop.f32.mrb[2].mxu1  ;;  %13697 = vmatprep.subr.bf16.mxu0 %v17391_v15 }
0x2fb0   :  { %v13658_v36 = vpop.f32.mrb[3].mxu1  ;;  %13680 = vmatmul.mubr.msk.bf16.vlgmr.msra.gmra.mrb[8].mxu1 %vm554_vm3, %v7767_v38 }
0x2fb1   :  { %13690 = vmatpush3.bf16.msra.mxu1 %v14534_v1  ;;  %13693 = vmatprep.mubr.msk.bf16.mxu1 %vm14572_vm1, %v17391_v15 }
0x2fb2   :  { %v7759_v35 = vpop.f32.mrb[252].mxu0  ;;  %13691 = vmatprep.subr.bf16.mxu1 %v17391_v15 }
0x2fb3   :  { %v7768_v21 = vpack.c.bf16 %v7759_v35, %v7759_v35  ;;  %v13663_v46 = vpop.f32.mrb[253].mxu0 }
0x2fb4   :  { %v7762_v55 = vpop.f32.mrb[254].mxu0  ;;  %v14536_v46 = vld [vmem:[%s17356_s11 + $0x2] ss:$0 sm:$0xff] }
0x2fb5   :  { %v13664_v24 = vpop.f32.mrb[255].mxu0  ;;  %13686 = vmatmul.mubr.msk.bf16.vlgmr.msra.gmra.mrb[4].mxu0 %vm554_vm3, %v7768_v21  ;;  %13692 = vmatpush3.bf16.msra.mxu1 %v14535_v34 }
0x2fb6   :  { %13703 = vmatprep.subr.bf16.mxu1 %v17391_v15  ;;  %13699 = vmatprep.mubr.msk.bf16.mxu0 %vm14572_vm1, %v17391_v15 }
0x2fb7   :  { %13698 = vmatpush3.bf16.xpose.msra.mxu0 %v15066_v57 }
0x2fb8   :  { %13709 = vmatprep.subr.bf16.mxu0 %v17391_v15 }
0x3079   :  { %v7806_v39 = vpop.f32.mrb[4].mxu1 }
0x307a   :  { %v13669_v50 = vpop.f32.mrb[5].mxu1  ;;  %v7941_v33 = vsel %vm7313_vm15, %v7806_v39, 0.0 }
0x307b   :  { %v7809_v5 = vpop.f32.mrb[6].mxu1 }
0x307c   :  { %v13670_v26 = vpop.f32.mrb[7].mxu1 }
0x3080   :  { %v7849_v6 = vpop.f32.mrb[0].mxu0 }
0x3081   :  { %v7942_v51 = vsel %vm7313_vm15, %v7849_v6, 0.0  ;;  %v13675_v63 = vpop.f32.mrb[1].mxu0 }
0x3082   :  { %v7943_v4 = vadd.f32 %v7942_v51, %v7941_v33  ;;  %v7852_v22 = vpop.f32.mrb[2].mxu0  ;;  %v14537_v63 = vld [vmem:[%s17356_s11 + $0x9] ss:$0 sm:$0xff] }
0x3083   :  { %v13676_v17 = vpop.f32.mrb[3].mxu0  ;;  %v7892_v56 = vpop.f32.mrb[8].mxu1  ;;  %v14538_v22 = vld [vmem:[%s17356_s11 + $0xa] ss:$0 sm:$0xff] }
0x3084   :  { %v7944_v2 = vsel %vm7313_vm15, %v7892_v56, 0.0  ;;  %v13681_v13 = vpop.f32.mrb[9].mxu1 }
0x3085   :  { %v7945_v57 = vadd.f32 %v7944_v2, %v7943_v4  ;;  %v7895_v40 = vpop.f32.mrb[10].mxu1  ;;  %v14539_v13 = vld [vmem:[%s17356_s11 + $0x3] ss:$0 sm:$0xff] }
0x3086   :  { %v13682_v16 = vpop.f32.mrb[11].mxu1 }
0x3088   :  { %v7935_v19 = vpop.f32.mrb[4].mxu0 }
0x3089   :  { %v7946_v28 = vsel %vm7313_vm15, %v7935_v19, 0.0  ;;  %v13687_v38 = vpop.f32.mrb[5].mxu0 }
0x308a   :  { %v7947_v20 = vadd.f32 %v7946_v28, %v7945_v57  ;;  %v7938_v10 = vpop.f32.mrb[6].mxu0 }
0x308b   :  { %v13688_v36 = vpop.f32.mrb[7].mxu0 }
0x308c   :  { %v7949_v1 = vrot.slane %v7947_v20, 4 }
0x308e   :  { %v7951_v35 = vsel %vm801_vm4, %v16385_v41, %v7949_v1 }
0x308f   :  { %v7952_v21 = vadd.f32 %v7951_v35, %v16154_v11 }
0x3091   :  { %v16467_v55 = vadd.f32 %v14536_v46, %v7952_v21 }
0x3093   :  { %v7954_v24 = vsel %vm143_vm0, %v16467_v55, 0.0 }
0x3094   :  { %7955 = vadd.xlane.f32.xlu1 %v7954_v24 }
0x3121   :  { %v7956_v34 = vpop.xlane.xlu1 %7955 }
0x3122   :  { %v7957_v39 = vmul.f32 0.03125, %v7956_v34 }
0x3124   :  { %v7958_v50 = vsub.f32 %v16467_v55, %v7957_v39 }
0x3126   :  { %v7959_v5 = vmul.f32 %v7958_v50, %v7958_v50 }
0x3128   :  { %v7960_v26 = vsel %vm143_vm0, %v7959_v5, 0.0 }
0x3129   :  { %7961 = vadd.xlane.f32.xlu0 %v7960_v26 }
0x31b6   :  { %v7962_v41 = vpop.xlane.xlu0 %7961 }
0x31b7   :  { %v7963_v11 = vmul.f32 0.03125, %v7962_v41 }
0x31b9   :  { %v7964_v6 = vadd.f32 1e-05, %v7963_v11 }
0x31bb   :  { %14408 = vrsqrt.f32 %v7964_v6 }
0x31c5   :  { %v14409_v33 = vpop.eup %14408 }
0x31c6   :  { %v7966_v51 = vmul.f32 %v14409_v33, %v7958_v50 }
0x31c8   :  { %v7967_v4 = vmul.f32 %v14537_v63, %v7966_v51 }
0x31ca   :  { %v7968_v17 = vadd.f32 %v14538_v22, %v7967_v4 }
0x31cc   :  { %v7969_v56 = vpack.c.bf16 %v7968_v17, %v7968_v17 }
0x31ce   :  { %13694 = vmatmul.mubr.msk.bf16.vlgmr.msra.gmra.mrb[12].mxu1 %vm143_vm0, %v7969_v56 }
0x31cf   :  { %13704 = vmatpush3.bf16.xpose.msra.mxu1 %v15090_v12  ;;  %13705 = vmatprep.mubr.msk.bf16.mxu1 %vm14572_vm1, %v17391_v15 }
0x31d0   :  { %13715 = vmatprep.subr.bf16.mxu1 %v17391_v15 }
0x32a1   :  { %v8007_v2 = vpop.f32.mrb[12].mxu1 }
0x32a2   :  { %v8008_v57 = vadd.f32 %v14539_v13, %v8007_v2  ;;  %v13695_v40 = vpop.f32.mrb[13].mxu1 }
0x32a3   :  { %v8010_v16 = vpop.f32.mrb[14].mxu1 }
0x32a4   :  { %v8013_v19 = vmul.f32 0.35355338, %v8008_v57  ;;  %v13696_v28 = vpop.f32.mrb[15].mxu1 }
0x32a6   :  { %v16487_v38 = vpack.c.bf16 %v8013_v19, %v8013_v19  ;;  %8018 = vrot.lane.b32.xlu1 %v8013_v19, %s14573_s14  ;;  %8015 = vrot.lane.b32.xlu0 %v8013_v19, %s14574_s15 }
0x32a8   :  { %13700 = vmatmul.mubr.msk.bf16.vlgmr.msra.gmra.mrb[8].mxu0 %vm554_vm3, %v16487_v38 }
0x32a9   :  { %13710 = vmatpush3.bf16.xpose.msra.mxu0 %v15108_v23  ;;  %13711 = vmatprep.mubr.msk.bf16.mxu0 %vm14572_vm1, %v17391_v15 }
0x32aa   :  { %8021 = vrot.lane.b32.xlu1 %v8013_v19, %s14575_s18  ;;  %13721 = vmatprep.subr.bf16.mxu0 %v17391_v15 }
0x3318   :  { %v8019_v12 = vpop.permute.xlu1 %8018  ;;  %v8016_v20 = vpop.permute.xlu0 %8015 }
0x3319   :  { %v16498_v10 = vpack.c.bf16 %v8019_v12, %v8019_v12  ;;  %v16500_v36 = vpack.c.bf16 %v8016_v20, %v8016_v20 }
0x331b   :  { %13706 = vmatmul.mubr.msk.bf16.vlgmr.msra.gmra.mrb[16].mxu1 %vm554_vm3, %v16500_v36  ;;  %13712 = vmatmul.mubr.msk.bf16.vlgmr.msra.gmra.mrb[12].mxu0 %vm554_vm3, %v16498_v10 }
0x331c   :  { %13716 = vmatpush3.bf16.xpose.msra.mxu1 %v15124_v27  ;;  %13722 = vmatpush3.bf16.msra.mxu0 %v15148_v0  ;;  %v8022_v23 = vpop.permute.xlu1 %8021 }
0x331d   :  { %13717 = vmatprep.mubr.msk.bf16.mxu1 %vm14572_vm1, %v17391_v15  ;;  %13727 = vmatprep.subr.bf16.mxu1 %v17391_v15  ;;  %v16514_v1 = vpack.c.bf16 %v8022_v23, %v8022_v23 }
0x331e   :  { %13723 = vmatprep.mubr.msk.bf16.mxu0 %vm14572_vm1, %v17391_v15  ;;  %13733 = vmatprep.subr.bf16.mxu0 %v17391_v15 }
0x3323   :  { %13718 = vmatmul.mubr.msk.bf16.vlgmr.msra.gmra.mrb[20].mxu1 %vm554_vm3, %v16514_v1 }
0x3324   :  { %13728 = vmatpush3.bf16.msra.mxu1 %v15191_v47  ;;  %13729 = vmatprep.mubr.msk.bf16.mxu1 %vm14572_vm1, %v17391_v15 }
0x3325   :  { %13739 = vmatprep.subr.bf16.mxu1 %v17391_v15 }
0x337b   :  { %v8065_v27 = vpop.f32.mrb[8].mxu0 }
0x337c   :  { %v13701_v0 = vpop.f32.mrb[9].mxu0  ;;  %v8201_v35 = vsel %vm8200_vm2, %v8065_v27, -inf }
0x337d   :  { %8202 = vmax.xlane.f32.xlu0 %v8201_v35  ;;  %v8068_v21 = vpop.f32.mrb[10].mxu0 }
0x337e   :  { %v13702_v46 = vpop.f32.mrb[11].mxu0 }
0x33ee   :  { %v8108_v24 = vpop.f32.mrb[16].mxu1  ;;  %v8151_v34 = vpop.f32.mrb[12].mxu0 }
0x33ef   :  { %v13707_v39 = vpop.f32.mrb[17].mxu1  ;;  %v13713_v50 = vpop.f32.mrb[13].mxu0  ;;  %v8204_v5 = vsel %vm8200_vm2, %v8108_v24, -inf  ;;  %v8207_v47 = vsel %vm8200_vm2, %v8151_v34, -inf }
0x33f0   :  { %8205 = vmax.xlane.f32.xlu1 %v8204_v5  ;;  %v8111_v26 = vpop.f32.mrb[18].mxu1  ;;  %8208 = vmax.xlane.f32.xlu0 %v8207_v47  ;;  %v8154_v41 = vpop.f32.mrb[14].mxu0 }
0x33f1   :  { %v13708_v11 = vpop.f32.mrb[19].mxu1  ;;  %v13714_v6 = vpop.f32.mrb[15].mxu0 }
0x33f6   :  { %v8194_v33 = vpop.f32.mrb[20].mxu1 }
0x33f7   :  { %v13719_v51 = vpop.f32.mrb[21].mxu1  ;;  %v8210_v63 = vsel %vm8200_vm2, %v8194_v33, -inf }
0x33f8   :  { %v8197_v4 = vpop.f32.mrb[22].mxu1  ;;  %8211 = vmax.xlane.f32.xlu0 %v8210_v63 }
0x33f9   :  { %v13720_v22 = vpop.f32.mrb[23].mxu1 }
0x340a   :  { %v8203_v17 = vpop.xlane.xlu0 %8202 }
0x340b   :  { %v8213_v56 = vsub.f32 %v8065_v27, %v8203_v17 }
0x340d   :  { %v8217_v2 = vmul.f32 1.442695, %v8213_v56 }
0x340f   :  { %14410 = vpow2.f32 %v8217_v2 }
0x3419   :  { %v14411_v13 = vpop.eup %14410 }
0x341a   :  { %v8225_v57 = vsel %vm8200_vm2, %v14411_v13, 0.0 }
0x341b   :  { %8226 = vadd.xlane.f32.xlu0 %v8225_v57 }
0x347d   :  { %v8206_v40 = vpop.xlane.xlu1 %8205  ;;  %v8209_v16 = vpop.xlane.xlu0 %8208 }
0x347e   :  { %v8214_v19 = vsub.f32 %v8108_v24, %v8206_v40  ;;  %v8215_v28 = vsub.f32 %v8151_v34, %v8209_v16 }
0x3480   :  { %v8219_v12 = vmul.f32 1.442695, %v8214_v19  ;;  %v8221_v20 = vmul.f32 1.442695, %v8215_v28 }
0x3482   :  { %14412 = vpow2.f32 %v8219_v12 }
0x3483   :  { %14414 = vpow2.f32 %v8221_v20 }
0x3485   :  { %v8212_v23 = vpop.xlane.xlu0 %8211 }
0x3486   :  { %v8216_v0 = vsub.f32 %v8194_v33, %v8212_v23 }
0x3488   :  { %v8223_v35 = vmul.f32 1.442695, %v8216_v0 }
0x348a   :  { %14416 = vpow2.f32 %v8223_v35 }
0x348c   :  { %v14413_v21 = vpop.eup %14412 }
0x348d   :  { %v14415_v27 = vpop.eup %14414  ;;  %v8228_v46 = vsel %vm8200_vm2, %v14413_v21, 0.0 }
0x348e   :  { %8229 = vadd.xlane.f32.xlu1 %v8228_v46  ;;  %v8231_v39 = vsel %vm8200_vm2, %v14415_v27, 0.0 }
0x348f   :  { %8232 = vadd.xlane.f32.xlu0 %v8231_v39 }
0x3494   :  { %v14417_v50 = vpop.eup %14416 }
0x3495   :  { %v8234_v24 = vsel %vm8200_vm2, %v14417_v50, 0.0 }
0x3496   :  { %8235 = vadd.xlane.f32.xlu1 %v8234_v24 }
0x34a8   :  { %v8227_v34 = vpop.xlane.xlu0 %8226 }
0x34a9   :  { %14418 = vrcp.f32 %v8227_v34  ;;  %v8605_v34 = vrot.slane %v16487_v38, 2  ;;  %v8650_v38 = vrot.slane %v16500_v36, 2 }
0x34b3   :  { %v14419_v5 = vpop.eup %14418 }
0x34b4   :  { %v8241_v47 = vmul.f32 %v14419_v5, %v14411_v13 }
0x34b6   :  { %v8245_v26 = vpack.c.bf16 %v8241_v47, %v8241_v47 }
0x34b8   :  { %13724 = vmatmul.mubr.msk.bf16.vlgmr.msra.gmra.mrb[16].mxu0 %vm2138_vm5, %v8245_v26 }
0x34b9   :  { %13734 = vmatpush3.bf16.msra.mxu0 %v15186_v42  ;;  %13735 = vmatprep.mubr.msk.bf16.mxu0 %vm14572_vm1, %v17391_v15 }
0x34ba   :  { %13745 = vmatprep.subr.bf16.mxu0 %v17391_v15 }
0x351b   :  { %v8230_v41 = vpop.xlane.xlu1 %8229 }
0x351c   :  { %14420 = vrcp.f32 %v8230_v41  ;;  %v8233_v11 = vpop.xlane.xlu0 %8232 }
0x351d   :  { %14422 = vrcp.f32 %v8233_v11 }
0x3523   :  { %v8236_v6 = vpop.xlane.xlu1 %8235 }
0x3524   :  { %14424 = vrcp.f32 %v8236_v6 }
0x3526   :  { %v14421_v33 = vpop.eup %14420 }
0x3527   :  { %v14423_v51 = vpop.eup %14422  ;;  %v8242_v63 = vmul.f32 %v14421_v33, %v14413_v21 }
0x3528   :  { %v8243_v4 = vmul.f32 %v14423_v51, %v14415_v27 }
0x3529   :  { %v8246_v22 = vpack.c.bf16 %v8242_v63, %v8242_v63 }
0x352a   :  { %v8247_v17 = vpack.c.bf16 %v8243_v4, %v8243_v4 }
0x352b   :  { %13730 = vmatmul.mubr.msk.bf16.vlgmr.msra.gmra.mrb[24].mxu1 %vm2138_vm5, %v8246_v22 }
0x352c   :  { %13736 = vmatmul.mubr.msk.bf16.vlgmr.msra.gmra.mrb[20].mxu0 %vm2138_vm5, %v8247_v17  ;;  %13740 = vmatpush3.bf16.msra.mxu1 %v15199_v53 }
0x352d   :  { %13741 = vmatprep.mubr.msk.bf16.mxu1 %vm14572_vm1, %v17391_v15  ;;  %13746 = vmatpush3.bf16.msra.mxu0 %v15203_v62 }
0x352e   :  { %v14425_v42 = vpop.eup %14424  ;;  %13747 = vmatprep.mubr.msk.bf16.mxu0 %vm14572_vm1, %v17391_v15  ;;  %13757 = vmatprep.subr.bf16.mxu0 %v17391_v15 }
0x352f   :  { %v8244_v56 = vmul.f32 %v14425_v42, %v14417_v50  ;;  %13751 = vmatprep.subr.bf16.mxu1 %v17391_v15 }
0x3531   :  { %v8248_v2 = vpack.c.bf16 %v8244_v56, %v8244_v56 }
0x3533   :  { %13742 = vmatmul.mubr.msk.bf16.vlgmr.msra.gmra.mrb[28].mxu1 %vm2138_vm5, %v8248_v2 }
0x3534   :  { %13752 = vmatpush3.bf16.msra.mxu1 %v15218_v18  ;;  %13753 = vmatprep.mubr.msk.bf16.mxu1 %vm14572_vm1, %v17391_v15 }
0x3535   :  { %13763 = vmatprep.subr.bf16.mxu1 %v17391_v15 }
0x358b   :  { %v8286_v53 = vpop.f32.mrb[16].mxu0 }
0x358c   :  { %v8421_v13 = vpack.c.bf16 %v8286_v53, %v8286_v53  ;;  %v13725_v57 = vpop.f32.mrb[17].mxu0 }
0x358d   :  { %v8289_v40 = vpop.f32.mrb[18].mxu0 }
0x358e   :  { %v13726_v16 = vpop.f32.mrb[19].mxu0  ;;  %13748 = vmatmul.mubr.msk.bf16.vlgmr.msra.gmra.mrb[24].mxu0 %vm554_vm3, %v8421_v13 }
0x358f   :  { %13758 = vmatpush3.bf16.msra.mxu0 %v15229_v25  ;;  %13759 = vmatprep.mubr.msk.bf16.mxu0 %vm14572_vm1, %v17391_v15 }
0x3590   :  { %13769 = vmatprep.subr.bf16.mxu0 %v17391_v15 }
0x35fe   :  { %v8329_v19 = vpop.f32.mrb[24].mxu1 }
0x35ff   :  { %v8422_v28 = vpack.c.bf16 %v8329_v19, %v8329_v19  ;;  %v8372_v12 = vpop.f32.mrb[20].mxu0  ;;  %v13731_v20 = vpop.f32.mrb[25].mxu1 }
0x3600   :  { %v8423_v23 = vpack.c.bf16 %v8372_v12, %v8372_v12  ;;  %v13737_v0 = vpop.f32.mrb[21].mxu0  ;;  %v8332_v35 = vpop.f32.mrb[26].mxu1 }
0x3601   :  { %v8375_v21 = vpop.f32.mrb[22].mxu0  ;;  %v13732_v27 = vpop.f32.mrb[27].mxu1  ;;  %13754 = vmatmul.mubr.msk.bf16.vlgmr.msra.gmra.mrb[32].mxu1 %vm554_vm3, %v8422_v28 }
0x3602   :  { %v13738_v46 = vpop.f32.mrb[23].mxu0  ;;  %13760 = vmatmul.mubr.msk.bf16.vlgmr.msra.gmra.mrb[28].mxu0 %vm554_vm3, %v8423_v23  ;;  %13764 = vmatpush3.bf16.msra.mxu1 %v15246_v14 }
0x3603   :  { %13770 = vmatpush3.bf16.xpose.msra.mxu0 %v15256_v8  ;;  %13765 = vmatprep.mubr.msk.bf16.mxu1 %vm14572_vm1, %v17391_v15  ;;  %v8695_v8 = vrot.slane %v16498_v10, 2 }
0x3604   :  { %13771 = vmatprep.mubr.msk.bf16.mxu0 %vm14572_vm1, %v17391_v15  ;;  %13781 = vmatprep.subr.bf16.mxu0 %v17391_v15 }
0x3605   :  { %13775 = vmatprep.subr.bf16.mxu1 %v17391_v15 }
0x3606   :  { %v8415_v39 = vpop.f32.mrb[28].mxu1 }
0x3607   :  { %v8424_v50 = vpack.c.bf16 %v8415_v39, %v8415_v39  ;;  %v13743_v24 = vpop.f32.mrb[29].mxu1 }
0x3608   :  { %v8418_v5 = vpop.f32.mrb[30].mxu1 }
0x3609   :  { %v13744_v47 = vpop.f32.mrb[31].mxu1  ;;  %13766 = vmatmul.mubr.msk.bf16.vlgmr.msra.gmra.mrb[36].mxu1 %vm554_vm3, %v8424_v50 }
0x360a   :  { %13772 = vmatmul.mubr.msk.bf16.vlgmr.msra.gmra.mrb[32].mxu0 %vm554_vm3, %v8605_v34  ;;  %13777 = vmatprep.mubr.msk.bf16.mxu1 %vm14572_vm1, %v17391_v15 }
0x360b   :  { %13782 = vmatpush3.bf16.xpose.msra.mxu0 %v15280_v31  ;;  %13776 = vmatpush3.bf16.xpose.msra.mxu1 %v15272_v30  ;;  %v8740_v30 = vrot.slane %v16514_v1, 2 }
0x360c   :  { %13783 = vmatprep.mubr.msk.bf16.mxu0 %vm14572_vm1, %v17391_v15  ;;  %13793 = vmatprep.subr.bf16.mxu0 %v17391_v15 }
0x360d   :  { %13787 = vmatprep.subr.bf16.mxu1 %v17391_v15 }
0x3612   :  { %13778 = vmatmul.mubr.msk.bf16.vlgmr.msra.gmra.mrb[40].mxu1 %vm554_vm3, %v8650_v38  ;;  %13784 = vmatmul.mubr.msk.bf16.vlgmr.msra.gmra.mrb[36].mxu0 %vm554_vm3, %v8695_v8 }
0x3613   :  { %13794 = vmatpush3.bf16.msra.mxu0 %v15317_v61  ;;  %13788 = vmatpush3.bf16.xpose.msra.mxu1 %v15292_v37 }
0x3614   :  { %13789 = vmatprep.mubr.msk.bf16.mxu1 %vm14572_vm1, %v17391_v15  ;;  %13799 = vmatprep.subr.bf16.mxu1 %v17391_v15 }
0x3615   :  { %13795 = vmatprep.mubr.msk.bf16.mxu0 %vm14572_vm1, %v17391_v15  ;;  %13805 = vmatprep.subr.bf16.mxu0 %v17391_v15 }
0x361a   :  { %13790 = vmatmul.mubr.msk.bf16.vlgmr.msra.gmra.mrb[44].mxu1 %vm554_vm3, %v8740_v30 }
0x361b   :  { %13800 = vmatpush3.bf16.msra.mxu1 %v15352_v49  ;;  %13801 = vmatprep.mubr.msk.bf16.mxu1 %vm14572_vm1, %v17391_v15 }
0x361c   :  { %13811 = vmatprep.subr.bf16.mxu1 %v17391_v15 }
0x3661   :  { %v8462_v31 = vpop.f32.mrb[24].mxu0 }
0x3662   :  { %v13749_v37 = vpop.f32.mrb[25].mxu0  ;;  %v8597_v26 = vsel %vm7313_vm15, %v8462_v31, 0.0 }
0x3663   :  { %v8465_v61 = vpop.f32.mrb[26].mxu0 }
0x3664   :  { %v13750_v10 = vpop.f32.mrb[27].mxu0 }
0x36d4   :  { %v8505_v36 = vpop.f32.mrb[32].mxu1 }
0x36d5   :  { %v8598_v41 = vsel %vm7313_vm15, %v8505_v36, 0.0  ;;  %v8548_v11 = vpop.f32.mrb[28].mxu0  ;;  %v13755_v1 = vpop.f32.mrb[33].mxu1 }
0x36d6   :  { %v8599_v6 = vadd.f32 %v8598_v41, %v8597_v26  ;;  %v13761_v33 = vpop.f32.mrb[29].mxu0  ;;  %v8508_v51 = vpop.f32.mrb[34].mxu1  ;;  %v8600_v49 = vsel %vm7313_vm15, %v8548_v11, 0.0 }
0x36d7   :  { %v8551_v63 = vpop.f32.mrb[30].mxu0  ;;  %v13756_v4 = vpop.f32.mrb[35].mxu1 }
0x36d8   :  { %v8601_v22 = vadd.f32 %v8600_v49, %v8599_v6  ;;  %v13762_v17 = vpop.f32.mrb[31].mxu0 }
0x36dc   :  { %v8591_v42 = vpop.f32.mrb[36].mxu1 }
0x36dd   :  { %v8602_v56 = vsel %vm7313_vm15, %v8591_v42, 0.0  ;;  %v8643_v2 = vpop.f32.mrb[32].mxu0  ;;  %v13767_v53 = vpop.f32.mrb[37].mxu1 }
0x36de   :  { %v16598_v13 = vadd.f32 %v8602_v56, %v8601_v22  ;;  %v13773_v57 = vpop.f32.mrb[33].mxu0  ;;  %v8594_v40 = vpop.f32.mrb[38].mxu1  ;;  %v8784_v16 = vsel %vm8200_vm2, %v8643_v2, -inf }
0x36df   :  { %8785 = vmax.xlane.f32.xlu0 %v8784_v16  ;;  %v8646_v19 = vpop.f32.mrb[34].mxu0  ;;  %v13768_v28 = vpop.f32.mrb[39].mxu1 }
0x36e0   :  { %v13774_v12 = vpop.f32.mrb[35].mxu0 }
0x36e5   :  { %v8688_v20 = vpop.f32.mrb[40].mxu1  ;;  %v8733_v23 = vpop.f32.mrb[36].mxu0 }
0x36e6   :  { %v13779_v0 = vpop.f32.mrb[41].mxu1  ;;  %v13785_v35 = vpop.f32.mrb[37].mxu0  ;;  %v8787_v21 = vsel %vm8200_vm2, %v8688_v20, -inf  ;;  %v8790_v27 = vsel %vm8200_vm2, %v8733_v23, -inf }
0x36e7   :  { %8788 = vmax.xlane.f32.xlu1 %v8787_v21  ;;  %v8691_v46 = vpop.f32.mrb[42].mxu1  ;;  %8791 = vmax.xlane.f32.xlu0 %v8790_v27  ;;  %v8736_v39 = vpop.f32.mrb[38].mxu0 }
0x36e8   :  { %v13780_v50 = vpop.f32.mrb[43].mxu1  ;;  %v13786_v24 = vpop.f32.mrb[39].mxu0 }
0x36ed   :  { %v8778_v34 = vpop.f32.mrb[44].mxu1 }
0x36ee   :  { %v13791_v5 = vpop.f32.mrb[45].mxu1  ;;  %v8793_v47 = vsel %vm8200_vm2, %v8778_v34, -inf }
0x36ef   :  { %8794 = vmax.xlane.f32.xlu1 %v8793_v47  ;;  %v8781_v8 = vpop.f32.mrb[46].mxu1 }
0x36f0   :  { %v13792_v38 = vpop.f32.mrb[47].mxu1 }
0x376c   :  { %v8786_v30 = vpop.xlane.xlu0 %8785 }
0x376d   :  { %v8796_v31 = vsub.f32 %v8643_v2, %v8786_v30 }
0x376f   :  { %v8800_v37 = vmul.f32 1.442695, %v8796_v31 }
0x3771   :  { %14426 = vpow2.f32 %v8800_v37 }
0x3774   :  { %v8789_v61 = vpop.xlane.xlu1 %8788  ;;  %v8792_v10 = vpop.xlane.xlu0 %8791 }
0x3775   :  { %v8797_v36 = vsub.f32 %v8688_v20, %v8789_v61  ;;  %v8798_v26 = vsub.f32 %v8733_v23, %v8792_v10 }
0x3777   :  { %v8802_v41 = vmul.f32 1.442695, %v8797_v36  ;;  %v8804_v11 = vmul.f32 1.442695, %v8798_v26 }
0x3779   :  { %14428 = vpow2.f32 %v8802_v41 }
0x377a   :  { %14430 = vpow2.f32 %v8804_v11 }
0x377b   :  { %v14427_v1 = vpop.eup %14426 }
0x377c   :  { %v8795_v6 = vpop.xlane.xlu1 %8794  ;;  %v8808_v33 = vsel %vm8200_vm2, %v14427_v1, 0.0 }
0x377d   :  { %v8799_v51 = vsub.f32 %v8778_v34, %v8795_v6  ;;  %8809 = vadd.xlane.f32.xlu0 %v8808_v33 }
0x377f   :  { %v8806_v49 = vmul.f32 1.442695, %v8799_v51 }
0x3781   :  { %14432 = vpow2.f32 %v8806_v49 }
0x3783   :  { %v14429_v63 = vpop.eup %14428 }
0x3784   :  { %v14431_v4 = vpop.eup %14430  ;;  %v8811_v22 = vsel %vm8200_vm2, %v14429_v63, 0.0 }
0x3785   :  { %8812 = vadd.xlane.f32.xlu1 %v8811_v22  ;;  %v8814_v17 = vsel %vm8200_vm2, %v14431_v4, 0.0  ;;  %v14544_v22 = vld [vmem:[%s17361_s10 + $0x10] sm:$0xff]  }
0x3786   :  { %8815 = vadd.xlane.f32.xlu0 %v8814_v17  ;;  %v14545_v17 = vld [vmem:[%s17361_s10 + $0x18] sm:$0xff]  }
0x378b   :  { %v14433_v42 = vpop.eup %14432 }
0x378c   :  { %v8817_v56 = vsel %vm8200_vm2, %v14433_v42, 0.0 }
0x378d   :  { %8818 = vadd.xlane.f32.xlu1 %v8817_v56 }
0x380a   :  { %v8810_v2 = vpop.xlane.xlu0 %8809 }
0x380b   :  { %14434 = vrcp.f32 %v8810_v2 }
0x3812   :  { %v8813_v53 = vpop.xlane.xlu1 %8812 }
0x3813   :  { %14436 = vrcp.f32 %v8813_v53  ;;  %v8816_v57 = vpop.xlane.xlu0 %8815 }
0x3814   :  { %14438 = vrcp.f32 %v8816_v57 }
0x3815   :  { %v14435_v40 = vpop.eup %14434 }
0x3816   :  { %v8824_v16 = vmul.f32 %v14435_v40, %v14427_v1 }
0x3818   :  { %v8828_v19 = vpack.c.bf16 %v8824_v16, %v8824_v16 }
0x381a   :  { %v8819_v28 = vpop.xlane.xlu1 %8818  ;;  %13796 = vmatmul.mubr.msk.bf16.vlgmr.msra.gmra.mrb[40].mxu0 %vm2138_vm5, %v8828_v19 }
0x381b   :  { %14440 = vrcp.f32 %v8819_v28  ;;  %13806 = vmatpush3.bf16.msra.mxu0 %v15344_v44  ;;  %13807 = vmatprep.mubr.msk.bf16.mxu0 %vm14572_vm1, %v17391_v15 }
0x381c   :  { %13817 = vmatprep.subr.bf16.mxu0 %v17391_v15 }
0x381d   :  { %v14437_v12 = vpop.eup %14436 }
0x381e   :  { %v14439_v20 = vpop.eup %14438  ;;  %v8825_v23 = vmul.f32 %v14437_v12, %v14429_v63  ;;  %v14542_v63 = vld [vmem:[%s17361_s10] sm:$0xff]  }
0x381f   :  { %v8826_v0 = vmul.f32 %v14439_v20, %v14431_v4  ;;  %v14543_v4 = vld [vmem:[%s17361_s10 + $0x8] sm:$0xff]  }
0x3820   :  { %v8829_v35 = vpack.c.bf16 %v8825_v23, %v8825_v23 }
0x3821   :  { %v8830_v21 = vpack.c.bf16 %v8826_v0, %v8826_v0 }
0x3822   :  { %13802 = vmatmul.mubr.msk.bf16.vlgmr.msra.gmra.mrb[48].mxu1 %vm2138_vm5, %v8829_v35 }
0x3823   :  { %13808 = vmatmul.mubr.msk.bf16.vlgmr.msra.gmra.mrb[44].mxu0 %vm2138_vm5, %v8830_v21  ;;  %13812 = vmatpush3.bf16.msra.mxu1 %v15357_v54  ;;  %v12352_v54 = vld [vmem:[%s17363_s3 + $0x4] sm:$0x7] }
0x3824   :  { %13813 = vmatprep.mubr.msk.bf16.mxu1 %vm14572_vm1, %v17391_v15  ;;  %13818 = vmatpush3.bf16.msra.mxu0 %v15203_v62  ;;  %v9315_v62 = vld [vmem:[%s17363_s3] sm:$0x7]  ;;  %v9319_v39 = vrot.slane %v12352_v54, 5 }
0x3825   :  { %v14441_v44 = vpop.eup %14440  ;;  %13819 = vmatprep.mubr.msk.bf16.mxu0 %vm14572_vm1, %v17391_v15  ;;  %13823 = vmatprep.subr.bf16.mxu1 %v17391_v15 }
0x3826   :  { %v8827_v27 = vmul.f32 %v14441_v44, %v14433_v42  ;;  %13829 = vmatprep.subr.bf16.mxu0 %v17391_v15  ;;  %v16635_v50 = vsel %vm2194_vm7, %v9315_v62, %v9319_v39 }
0x3828   :  { %v8831_v46 = vpack.c.bf16 %v8827_v27, %v8827_v27 }
0x382a   :  { %13814 = vmatmul.mubr.msk.bf16.vlgmr.msra.gmra.mrb[52].mxu1 %vm2138_vm5, %v8831_v46  ;;  %vm9662_vm5 = vcmask 1040384  }
0x382b   :  { %13824 = vmatpush3.bf16.msra.mxu1 %v15218_v18  ;;  %13825 = vmatprep.mubr.msk.bf16.mxu1 %vm14572_vm1, %v17391_v15  ;;  %v9323_v18 = vsel %vm9322_vm10, %v16635_v50, 0.0 }
0x382c   :  { %13835 = vmatprep.subr.bf16.mxu1 %v17391_v15  ;;  %9324 = vadd.xlane.f32.xlu1 %v9323_v18 }
0x38b9   :  { %v9325_v42 = vpop.xlane.xlu1 %9324 }
0x38ba   :  { %v9326_v56 = vmul.f32 0.03125, %v9325_v42 }
0x38bc   :  { %v9327_v2 = vsub.f32 %v16635_v50, %v9326_v56  ;;  %v14548_v56 = vld [vmem:[%s17356_s11 + $0xc] ss:$0 sm:$0xff] }
0x38be   :  { %v9328_v53 = vmul.f32 %v9327_v2, %v9327_v2 }
0x38c0   :  { %v9329_v57 = vsel %vm9322_vm10, %v9328_v53, 0.0 }
0x38c1   :  { %9330 = vadd.xlane.f32.xlu1 %v9329_v57  ;;  %v14549_v57 = vld [vmem:[%s17356_s11 + $0x16] ss:$0 sm:$0xff] }
0x38ed   :  { %v8869_v24 = vpop.f32.mrb[40].mxu0 }
0x38ee   :  { %v9004_v34 = vpack.c.bf16 %v8869_v24, %v8869_v24  ;;  %v13797_v5 = vpop.f32.mrb[41].mxu0 }
0x38ef   :  { %v8872_v47 = vpop.f32.mrb[42].mxu0 }
0x38f0   :  { %v13798_v8 = vpop.f32.mrb[43].mxu0  ;;  %13820 = vmatmul.mubr.msk.bf16.vlgmr.msra.gmra.mrb[48].mxu0 %vm554_vm3, %v9004_v34 }
0x38f1   :  { %13830 = vmatpush3.bf16.msra.mxu0 %v15229_v25  ;;  %13831 = vmatprep.mubr.msk.bf16.mxu0 %vm14572_vm1, %v17391_v15  ;;  %v14540_v25 = vld [vmem:[%s17360_s9] sm:$0xff]  }
0x38f2   :  { %13841 = vmatprep.subr.bf16.mxu0 %v17391_v15 }
0x38f5   :  { %v8912_v38 = vpop.f32.mrb[48].mxu1 }
0x38f6   :  { %v9005_v30 = vpack.c.bf16 %v8912_v38, %v8912_v38  ;;  %v8955_v31 = vpop.f32.mrb[44].mxu0  ;;  %v13803_v37 = vpop.f32.mrb[49].mxu1 }
0x38f7   :  { %v9006_v61 = vpack.c.bf16 %v8955_v31, %v8955_v31  ;;  %v13809_v10 = vpop.f32.mrb[45].mxu0  ;;  %v8915_v36 = vpop.f32.mrb[50].mxu1 }
0x38f8   :  { %v8958_v26 = vpop.f32.mrb[46].mxu0  ;;  %v13804_v41 = vpop.f32.mrb[51].mxu1  ;;  %13826 = vmatmul.mubr.msk.bf16.vlgmr.msra.gmra.mrb[56].mxu1 %vm554_vm3, %v9005_v30 }
0x38f9   :  { %v13810_v11 = vpop.f32.mrb[47].mxu0  ;;  %13832 = vmatmul.mubr.msk.bf16.vlgmr.msra.gmra.mrb[52].mxu0 %vm554_vm3, %v9006_v61  ;;  %13836 = vmatpush3.bf16.msra.mxu1 %v15246_v14  ;;  %v14541_v14 = vld [vmem:[%s17360_s9 + $0x8] sm:$0xff]   ;;  %v14546_v61 = vld [vmem:[%s17356_s11 + $0x4] ss:$0 sm:$0xff] }
0x38fa   :  { %13837 = vmatprep.mubr.msk.bf16.mxu1 %vm14572_vm1, %v17391_v15  ;;  %13842 = vmatpush3.bf16.msra.mxu0 %v14540_v25 }
0x38fb   :  { %13843 = vmatprep.subr.bf16.mxu0 %v17391_v15  ;;  %13845 = vmatprep.mubr.msk.bf16.mxu0 %vm14572_vm1, %v17391_v15 }
0x38fc   :  { %13849 = vmatprep.subr.bf16.mxu1 %v17391_v15 }
0x38fd   :  { %v8998_v1 = vpop.f32.mrb[52].mxu1 }
0x38fe   :  { %v9007_v6 = vpack.c.bf16 %v8998_v1, %v8998_v1  ;;  %v13815_v33 = vpop.f32.mrb[53].mxu1  ;;  %13844 = vmatpush3.bf16.msra.mxu0 %v14541_v14 }
0x38ff   :  { %v9001_v51 = vpop.f32.mrb[54].mxu1  ;;  %13861 = vmatprep.subr.bf16.mxu0 %v17391_v15 }
0x3900   :  { %v13816_v49 = vpop.f32.mrb[55].mxu1  ;;  %13838 = vmatmul.mubr.msk.bf16.vlgmr.msra.gmra.mrb[60].mxu1 %vm554_vm3, %v9007_v6 }
0x3901   :  { %13850 = vmatpush3.bf16.msra.mxu1 %v14542_v63  ;;  %13857 = vmatprep.mubr.msk.bf16.mxu1 %vm14572_vm1, %v17391_v15 }
0x3902   :  { %13851 = vmatprep.subr.bf16.mxu1 %v17391_v15 }
0x3905   :  { %13852 = vmatpush3.bf16.msra.mxu1 %v14543_v4 }
0x3906   :  { %13853 = vmatprep.subr.bf16.mxu1 %v17391_v15 }
0x3909   :  { %13854 = vmatpush3.bf16.msra.mxu1 %v14544_v22 }
0x390a   :  { %13855 = vmatprep.subr.bf16.mxu1 %v17391_v15 }
0x390d   :  { %13856 = vmatpush3.bf16.msra.mxu1 %v14545_v17  ;;  %v14547_v17 = vld [vmem:[%s17356_s11 + $0xb] ss:$0 sm:$0xff] }
0x390e   :  { %13875 = vmatprep.subr.bf16.mxu1 %v17391_v15 }
0x39c3   :  { %v9045_v40 = vpop.f32.mrb[48].mxu0 }
0x39c4   :  { %v13821_v16 = vpop.f32.mrb[49].mxu0  ;;  %v9180_v20 = vsel %vm7313_vm15, %v9045_v40, 0.0 }
0x39c5   :  { %v9048_v19 = vpop.f32.mrb[50].mxu0 }
0x39c6   :  { %v13822_v28 = vpop.f32.mrb[51].mxu0  ;;  %v14551_v19 = vld [vmem:[%s17356_s11 + $0x17] ss:$0 sm:$0xff] }
0x39cb   :  { %v9088_v12 = vpop.f32.mrb[56].mxu1 }
0x39cc   :  { %v9181_v23 = vsel %vm7313_vm15, %v9088_v12, 0.0  ;;  %v9131_v0 = vpop.f32.mrb[52].mxu0  ;;  %v13827_v35 = vpop.f32.mrb[57].mxu1  ;;  %v14552_v12 = vld [vmem:[%s17354_s5 + $0x18] sm:$0xff]  }
0x39cd   :  { %v9182_v21 = vadd.f32 %v9181_v23, %v9180_v20  ;;  %v13833_v44 = vpop.f32.mrb[53].mxu0  ;;  %v9091_v27 = vpop.f32.mrb[58].mxu1  ;;  %v9183_v46 = vsel %vm7313_vm15, %v9131_v0, 0.0  ;;  %v14553_v0 = vld [vmem:[%s17356_s11 + $0x5] ss:$0 sm:$0xff] }
0x39ce   :  { %v9134_v62 = vpop.f32.mrb[54].mxu0  ;;  %v13828_v54 = vpop.f32.mrb[59].mxu1 }
0x39cf   :  { %v9184_v39 = vadd.f32 %v9183_v46, %v9182_v21  ;;  %v13834_v18 = vpop.f32.mrb[55].mxu0 }
0x39d3   :  { %v9174_v24 = vpop.f32.mrb[60].mxu1 }
0x39d4   :  { %v9185_v34 = vsel %vm7313_vm15, %v9174_v24, 0.0  ;;  %v13839_v5 = vpop.f32.mrb[61].mxu1 }
0x39d5   :  { %v9186_v47 = vadd.f32 %v9185_v34, %v9184_v39  ;;  %v9177_v8 = vpop.f32.mrb[62].mxu1  ;;  %v14554_v39 = vld [vmem:[%s17356_s11 + $0x10] ss:$0 sm:$0xff] }
0x39d6   :  { %v13840_v38 = vpop.f32.mrb[63].mxu1 }
0x39d7   :  { %v9188_v30 = vrot.slane %v9186_v47, 4 }
0x39d9   :  { %v9190_v31 = vsel %vm801_vm4, %v16598_v13, %v9188_v30  ;;  %v9331_v13 = vpop.xlane.xlu1 %9330  ;;  %vm9607_vm4 = vcmask 18432  }
0x39da   :  { %v9191_v37 = vadd.f32 %v9190_v31, %v16467_v55  ;;  %v9332_v55 = vmul.f32 0.03125, %v9331_v13 }
0x39dc   :  { %v16691_v10 = vadd.f32 %v14546_v61, %v9191_v37  ;;  %v9333_v6 = vadd.f32 1e-05, %v9332_v55 }
0x39de   :  { %v9193_v36 = vsel %vm143_vm0, %v16691_v10, 0.0  ;;  %14442 = vrsqrt.f32 %v9333_v6 }
0x39df   :  { %9194 = vadd.xlane.f32.xlu0 %v9193_v36 }
0x39e8   :  { %v14443_v49 = vpop.eup %14442 }
0x39e9   :  { %v9335_v22 = vmul.f32 %v14443_v49, %v9327_v2  ;;  %v14550_v2 = vld [vmem:[%s17354_s5 + $0x10] sm:$0xff]  }
0x39eb   :  { %v9336_v40 = vmul.f32 %v14549_v57, %v9335_v22 }
0x39ed   :  { %v9337_v28 = vadd.f32 %v14551_v19, %v9336_v40 }
0x39ef   :  { %v9338_v20 = vpack.c.bf16 %v9337_v28, %v9337_v28 }
0x3a6c   :  { %v9195_v26 = vpop.xlane.xlu0 %9194 }
0x3a6d   :  { %v9196_v41 = vmul.f32 0.03125, %v9195_v26 }
0x3a6f   :  { %v9197_v11 = vsub.f32 %v16691_v10, %v9196_v41 }
0x3a71   :  { %v9198_v25 = vmul.f32 %v9197_v11, %v9197_v11 }
0x3a73   :  { %v9199_v1 = vsel %vm143_vm0, %v9198_v25, 0.0 }
0x3a74   :  { %9200 = vadd.xlane.f32.xlu0 %v9199_v1 }
0x3b01   :  { %v9201_v33 = vpop.xlane.xlu0 %9200 }
0x3b02   :  { %v9202_v14 = vmul.f32 0.03125, %v9201_v33 }
0x3b04   :  { %v9203_v51 = vadd.f32 1e-05, %v9202_v14 }
0x3b06   :  { %14444 = vrsqrt.f32 %v9203_v51 }
0x3b10   :  { %v14445_v63 = vpop.eup %14444 }
0x3b11   :  { %v9205_v4 = vmul.f32 %v14445_v63, %v9197_v11 }
0x3b13   :  { %v9206_v42 = vmul.f32 %v14547_v17, %v9205_v4 }
0x3b15   :  { %v9207_v53 = vadd.f32 %v14548_v56, %v9206_v42 }
0x3b17   :  { %v9208_v16 = vpack.c.bf16 %v9207_v53, %v9207_v53 }
0x3b19   :  { %13846 = vmatmul.mubr.msk.bf16.vlgmr.msra.gmra.mrb[56].mxu0 %vm143_vm0, %v9208_v16 }
0x3b1a   :  { %13862 = vmatpush3.bf16.msra.mxu0 %v14550_v2  ;;  %13865 = vmatprep.mubr.msk.bf16.mxu0 %vm14572_vm1, %v17391_v15 }
0x3b1b   :  { %13863 = vmatprep.subr.bf16.mxu0 %v17391_v15 }
0x3b1e   :  { %13864 = vmatpush3.bf16.msra.mxu0 %v14552_v12 }
0x3b1f   :  { %13869 = vmatprep.subr.bf16.mxu0 %v17391_v15 }
0x3b21   :  { %13866 = vmatmul.mubr.msk.bf16.vlgmr.msra.gmra.mrb[60].mxu0 %vm143_vm0, %v9338_v20 }
0x3b22   :  { %13871 = vmatprep.mubr.msk.bf16.mxu0 %vm14572_vm1, %v17391_v15 }
0x3bec   :  { %v9246_v23 = vpop.f32.mrb[56].mxu0 }
0x3bed   :  { %v9247_v35 = vadd.f32 %v14553_v0, %v9246_v23  ;;  %v13847_v21 = vpop.f32.mrb[57].mxu0 }
0x3bee   :  { %v9249_v44 = vpop.f32.mrb[58].mxu0 }
0x3bef   :  { %v9252_v27 = vmax.f32 %v9247_v35, 0.0  ;;  %v13848_v46 = vpop.f32.mrb[59].mxu0 }
0x3bf1   :  { %v9253_v62 = vpack.c.bf16 %v9252_v27, %v9252_v27 }
0x3bf3   :  { %13858 = vmatmul.mubr.msk.bf16.vlgmr.msra.gmra.mrb[64].mxu1 %vm3383_vm9, %v9253_v62 }
0x3bf4   :  { %v9376_v54 = vpop.f32.mrb[60].mxu0  ;;  %13877 = vmatprep.mubr.msk.bf16.mxu1 %vm14572_vm1, %v17391_v15 }
0x3bf5   :  { %v9377_v18 = vadd.f32 %v14554_v39, %v9376_v54  ;;  %v13867_v24 = vpop.f32.mrb[61].mxu0 }
0x3bf6   :  { %v9379_v34 = vpop.f32.mrb[62].mxu0 }
0x3bf7   :  { %9401 = vrot.lane.b32.xlu1 %v9377_v18, %s14573_s14  ;;  %9398 = vrot.lane.b32.xlu0 %v9377_v18, %s14574_s15  ;;  %v13868_v5 = vpop.f32.mrb[63].mxu0  ;;  %v16735_v47 = vpack.c.bf16 %v9377_v18, %v9377_v18  ;;  %v9382_v8 = vmul.f32 0.35355338, %v9377_v18 }
0x3bf9   :  { %v16756_v11 = vpack.c.bf16 %v9382_v8, %v9382_v8 }
0x3bfb   :  { %9404 = vrot.lane.b32.xlu1 %v9377_v18, %s14575_s18 }
0x3bff   :  { %9412 = vrot.lane.b32.xlu1 %v16735_v47, %s14576_s21 }
0x3c03   :  { %9384 = vrot.lane.b32.xlu1 %v9382_v8, %s14574_s15 }
0x3c69   :  { %v9402_v38 = vpop.permute.xlu1 %9401  ;;  %v9399_v30 = vpop.permute.xlu0 %9398 }
0x3c6a   :  { %v16740_v31 = vpack.c.bf16 %v9399_v30, %v9399_v30  ;;  %v16744_v61 = vpack.c.bf16 %v9402_v38, %v9402_v38 }
0x3c6c   :  { %9461 = vrot.lane.b32.xlu0 %v16740_v31, %s14576_s21 }
0x3c6d   :  { %v9405_v37 = vpop.permute.xlu1 %9404 }
0x3c6e   :  { %v16746_v36 = vpack.c.bf16 %v9405_v37, %v9405_v37 }
0x3c70   :  { %9510 = vrot.lane.b32.xlu0 %v16744_v61, %s14576_s21  ;;  %9559 = vrot.lane.b32.xlu1 %v16746_v36, %s14576_s21 }
0x3c71   :  { %v9413_v26 = vpop.permute.xlu1 %9412 }
0x3c72   :  { %v9418_v41 = vsel %vm554_vm3, %v9413_v26, 0 }
0x3c73   :  { %13870 = vmatpush3.bf16.xpose.msra.mxu0 %v9418_v41 }
0x3c74   :  { %9387 = vrot.lane.b32.xlu0 %v9382_v8, %s14573_s14  ;;  %13881 = vmatprep.subr.bf16.mxu0 %v17391_v15 }
0x3c75   :  { %9390 = vrot.lane.b32.xlu1 %v9382_v8, %s14575_s18  ;;  %v9385_v14 = vpop.permute.xlu1 %9384 }
0x3c76   :  { %v16767_v4 = vpack.c.bf16 %v9385_v14, %v9385_v14 }
0x3c7a   :  { %13872 = vmatmul.mubr.msk.bf16.vlgmr.msra.gmra.mrb[64].mxu0 %vm554_vm3, %v16756_v11 }
0x3c7b   :  { %13883 = vmatprep.mubr.msk.bf16.mxu0 %vm14572_vm1, %v17391_v15 }
0x3cc6   :  { %v16762_v25 = vpop.f32.mrb[64].mxu1 }
0x3cc7   :  { %v13859_v1 = vpop.f32.mrb[65].mxu1 }
0x3cc8   :  { %v9294_v13 = vpop.f32.mrb[66].mxu1 }
0x3cc9   :  { %v13860_v55 = vpop.f32.mrb[67].mxu1 }
0x3cde   :  { %v9462_v6 = vpop.permute.xlu0 %9461 }
0x3cdf   :  { %v9467_v33 = vsel %vm554_vm3, %v9462_v6, 0 }
0x3ce0   :  { %13876 = vmatpush3.bf16.xpose.msra.mxu1 %v9467_v33 }
0x3ce1   :  { %13887 = vmatprep.subr.bf16.mxu1 %v17391_v15 }
0x3ce2   :  { %v9511_v51 = vpop.permute.xlu0 %9510  ;;  %v9560_v63 = vpop.permute.xlu1 %9559 }
0x3ce3   :  { %v9516_v49 = vsel %vm554_vm3, %v9511_v51, 0  ;;  %v9565_v17 = vsel %vm554_vm3, %v9560_v63, 0  ;;  %v10047_v63 = vshll.u32 %v16735_v47, 16 }
0x3ce4   :  { %13882 = vmatpush3.bf16.xpose.msra.mxu0 %v9516_v49  ;;  %v10044_v49 = vshrl.u32 %v16735_v47, 16 }
0x3ce5   :  { %13893 = vmatprep.subr.bf16.mxu0 %v17391_v15 }
0x3ce6   :  { %v9388_v22 = vpop.permute.xlu0 %9387 }
0x3ce7   :  { %13878 = vmatmul.mubr.msk.bf16.vlgmr.msra.gmra.mrb[68].mxu1 %vm554_vm3, %v16767_v4  ;;  %v16775_v42 = vpack.c.bf16 %v9388_v22, %v9388_v22  ;;  %v9391_v56 = vpop.permute.xlu1 %9390  ;;  %v10170_v22 = vshrl.u32 %v16744_v61, 16 }
0x3ce8   :  { %13888 = vmatpush3.bf16.xpose.msra.mxu1 %v9565_v17  ;;  %13889 = vmatprep.mubr.msk.bf16.mxu1 %vm14572_vm1, %v17391_v15  ;;  %v16782_v53 = vpack.c.bf16 %v9391_v56, %v9391_v56  ;;  %v10173_v17 = vshll.u32 %v16744_v61, 16  ;;  %v10046_v56 = vrot.slane %v10044_v49, 1 }
0x3ce9   :  { %13899 = vmatprep.subr.bf16.mxu1 %v17391_v15 }
0x3ceb   :  { %13884 = vmatmul.mubr.msk.bf16.vlgmr.msra.gmra.mrb[68].mxu0 %vm554_vm3, %v16775_v42 }
0x3cec   :  { %13895 = vmatprep.mubr.msk.bf16.mxu0 %vm14572_vm1, %v17391_v15 }
0x3cef   :  { %13890 = vmatmul.mubr.msk.bf16.vlgmr.msra.gmra.mrb[72].mxu1 %vm554_vm3, %v16782_v53 }
0x3cf0   :  { %13901 = vmatprep.mubr.msk.bf16.mxu1 %vm14572_vm1, %v17391_v15 }
0x3d4d   :  { %v9454_v57 = vpop.f32.mrb[64].mxu0 }
0x3d4e   :  { %v13873_v40 = vpop.f32.mrb[65].mxu0  ;;  %v9608_v16 = vsel %vm9607_vm4, %v9454_v57, -inf }
0x3d4f   :  { %9609 = vmax.xlane.f32.xlu0 %v9608_v16  ;;  %v9457_v2 = vpop.f32.mrb[66].mxu0  ;;  %v10172_v40 = vrot.slane %v10170_v22, 1  ;;  %v10175_v16 = vrot.slane %v10173_v17, 2 }
0x3d50   :  { %v13874_v19 = vpop.f32.mrb[67].mxu0 }
0x3dba   :  { %v9503_v28 = vpop.f32.mrb[68].mxu1 }
0x3dbb   :  { %v13879_v12 = vpop.f32.mrb[69].mxu1  ;;  %v9611_v20 = vsel %vm9607_vm4, %v9503_v28, -inf }
0x3dbc   :  { %9612 = vmax.xlane.f32.xlu1 %v9611_v20  ;;  %v9506_v23 = vpop.f32.mrb[70].mxu1 }
0x3dbd   :  { %v13880_v0 = vpop.f32.mrb[71].mxu1 }
0x3dbe   :  { %v9552_v35 = vpop.f32.mrb[68].mxu0  ;;  %v10110_v0 = vshll.u32 %v16740_v31, 16 }
0x3dbf   :  { %v13885_v21 = vpop.f32.mrb[69].mxu0  ;;  %v9614_v44 = vsel %vm9607_vm4, %v9552_v35, -inf }
0x3dc0   :  { %9615 = vmax.xlane.f32.xlu0 %v9614_v44  ;;  %v9555_v27 = vpop.f32.mrb[70].mxu0  ;;  %v10112_v21 = vrot.slane %v10110_v0, 2  ;;  %v10233_v44 = vshrl.u32 %v16746_v36, 16 }
0x3dc1   :  { %v13886_v46 = vpop.f32.mrb[71].mxu0  ;;  %v10236_v27 = vshll.u32 %v16746_v36, 16 }
0x3dc2   :  { %v9601_v62 = vpop.f32.mrb[72].mxu1  ;;  %v10235_v46 = vrot.slane %v10233_v44, 1 }
0x3dc3   :  { %v13891_v54 = vpop.f32.mrb[73].mxu1  ;;  %v9617_v39 = vsel %vm9607_vm4, %v9601_v62, -inf }
0x3dc4   :  { %v9604_v18 = vpop.f32.mrb[74].mxu1  ;;  %9618 = vmax.xlane.f32.xlu0 %v9617_v39 }
0x3dc5   :  { %v13892_v24 = vpop.f32.mrb[75].mxu1  ;;  %v17408_v18 = vmov 65535  }
0x3dc6   :  { %v9663_v24 = vsel %vm9662_vm5, 4294967295, %v17408_v18  ;;  %v10036_v18 = vshrl.u32 %v16756_v11, 16 }
0x3ddc   :  { %v9610_v34 = vpop.xlane.xlu0 %9609 }
0x3ddd   :  { %v9620_v5 = vsub.f32 %v9454_v57, %v9610_v34  ;;  %v10049_v57 = vrot.slane %v10047_v63, 2 }
0x3ddf   :  { %v9624_v8 = vmul.f32 1.442695, %v9620_v5  ;;  %v16814_v2 = vor.u32 %v10049_v57, %v10046_v56 }
0x3de1   :  { %14446 = vpow2.f32 %v9624_v8 }
0x3deb   :  { %v16792_v38 = vpop.eup %14446 }
0x3dec   :  { %v9632_v30 = vsel %vm9607_vm4, %v16792_v38, 0.0 }
0x3ded   :  { %9633 = vadd.xlane.f32.xlu0 %v9632_v30 }
0x3e49   :  { %v9613_v37 = vpop.xlane.xlu1 %9612 }
0x3e4a   :  { %v9621_v26 = vsub.f32 %v9503_v28, %v9613_v37  ;;  %v16818_v28 = vor.u32 %v10175_v16, %v10172_v40 }
0x3e4c   :  { %v9626_v41 = vmul.f32 1.442695, %v9621_v26 }
0x3e4d   :  { %v9616_v1 = vpop.xlane.xlu0 %9615 }
0x3e4e   :  { %14448 = vpow2.f32 %v9626_v41  ;;  %v9622_v13 = vsub.f32 %v9552_v35, %v9616_v1 }
0x3e50   :  { %v9628_v55 = vmul.f32 1.442695, %v9622_v13 }
0x3e51   :  { %v9619_v19 = vpop.xlane.xlu0 %9618 }
0x3e52   :  { %14450 = vpow2.f32 %v9628_v55  ;;  %v9623_v12 = vsub.f32 %v9601_v62, %v9619_v19  ;;  %v10238_v62 = vrot.slane %v10236_v27, 2 }
0x3e54   :  { %v16833_v39 = vor.u32 %v10238_v62, %v10235_v46 }
0x3e58   :  { %v16796_v6 = vpop.eup %14448 }
0x3e59   :  { %v9635_v33 = vsel %vm9607_vm4, %v16796_v6, 0.0 }
0x3e5a   :  { %9636 = vadd.xlane.f32.xlu1 %v9635_v33 }
0x3e5c   :  { %v16800_v14 = vpop.eup %14450 }
0x3e5d   :  { %v9638_v51 = vsel %vm9607_vm4, %v16800_v14, 0.0 }
0x3e5e   :  { %9639 = vadd.xlane.f32.xlu0 %v9638_v51 }
0x3e6b   :  { %9708 = vrot.lane.b32.xlu1 %v16740_v31, %s14577_s25 }
0x3e6f   :  { %9756 = vrot.lane.b32.xlu1 %v16744_v61, %s14577_s25  ;;  %v9630_v61 = vmul.f32 1.442695, %v9623_v12 }
0x3e71   :  { %14452 = vpow2.f32 %v9630_v61 }
0x3e74   :  { %9656 = vrot.lane.b32.xlu0 %v16735_v47, %s14577_s25  ;;  %v10107_v47 = vshrl.u32 %v16740_v31, 16 }
0x3e76   :  { %v10109_v35 = vrot.slane %v10107_v47, 1 }
0x3e78   :  { %10051 = vrot.lane.b32.xlu0 %v16814_v2, %s14576_s21  ;;  %v16829_v54 = vor.u32 %v10112_v21, %v10109_v35 }
0x3e7a   :  { %v9634_v31 = vpop.xlane.xlu0 %9633 }
0x3e7b   :  { %v14453_v20 = vpop.eup %14452  ;;  %14454 = vrcp.f32 %v9634_v31 }
0x3e7c   :  { %10177 = vrot.lane.b32.xlu0 %v16818_v28, %s14576_s21  ;;  %v9641_v23 = vsel %vm9607_vm4, %v14453_v20, 0.0 }
0x3e85   :  { %v14455_v30 = vpop.eup %14454 }
0x3e86   :  { %v9648_v26 = vmul.f32 %v14455_v30, %v16792_v38  ;;  %v10038_v30 = vrot.slane %v10036_v18, 1 }
0x3e88   :  { %v9652_v33 = vpack.c.bf16 %v9648_v26, %v9648_v26 }
0x3e93   :  { %9642 = vadd.xlane.f32.xlu1 %v9641_v23 }
0x3ea4   :  { %9804 = vrot.lane.b32.xlu1 %v16746_v36, %s14577_s25  ;;  %v16839_v36 = vsel %vm2193_vm6, %v9663_v24, 0  ;;  %v10039_v24 = vshll.u32 %v16756_v11, 16  ;;  %v10165_v11 = vshll.u32 %v16775_v42, 16  ;;  %vm10028_vm6 = vcmask 256000  }
0x3ea8   :  { %10114 = vrot.lane.b32.xlu1 %v16829_v54, %s14576_s21 }
0x3eac   :  { %10240 = vrot.lane.b32.xlu1 %v16833_v39, %s14576_s21 }
0x3ee7   :  { %v9637_v34 = vpop.xlane.xlu1 %9636 }
0x3ee8   :  { %14456 = vrcp.f32 %v9637_v34 }
0x3eeb   :  { %v9709_v5 = vpop.permute.xlu1 %9708  ;;  %v9640_v8 = vpop.xlane.xlu0 %9639 }
0x3eec   :  { %v9714_v37 = vand.u32 %v9709_v5, %v16839_v36  ;;  %14458 = vrcp.f32 %v9640_v8 }
0x3eee   :  { %13900 = vmatpush3.bf16.msra.mxu1 %v9714_v37  ;;  %v10041_v37 = vrot.slane %v10039_v24, 2 }
0x3eef   :  { %v9657_v41 = vpop.permute.xlu0 %9656  ;;  %13911 = vmatprep.subr.bf16.mxu1 %v17391_v15  ;;  %v9757_v13 = vpop.permute.xlu1 %9756 }
0x3ef0   :  { %v9666_v1 = vand.u32 %v16839_v36, %v9657_v41  ;;  %v9762_v49 = vand.u32 %v9757_v13, %v16839_v36  ;;  %v10042_v41 = vor.u32 %v10041_v37, %v10038_v30 }
0x3ef2   :  { %v14457_v55 = vpop.eup %14456  ;;  %13894 = vmatpush3.bf16.msra.mxu0 %v9666_v1  ;;  %v10162_v1 = vshrl.u32 %v16775_v42, 16 }
0x3ef3   :  { %v9649_v51 = vmul.f32 %v14457_v55, %v16796_v6  ;;  %13905 = vmatprep.subr.bf16.mxu0 %v17391_v15  ;;  %v10052_v46 = vpop.permute.xlu0 %10051 }
0x3ef4   :  { %v10057_v8 = vsel %vm554_vm3, %v10052_v46, 0  ;;  %v10164_v55 = vrot.slane %v10162_v1, 1 }
0x3ef5   :  { %v9653_v63 = vpack.c.bf16 %v9649_v51, %v9649_v51  ;;  %13896 = vmatmul.mubr.msk.bf16.vlgmr.msra.gmra.mrb[72].mxu0 %vm9658_vm11, %v9652_v33  ;;  %v10167_v33 = vrot.slane %v10165_v11, 2 }
0x3ef6   :  { %v14459_v38 = vpop.eup %14458  ;;  %13906 = vmatpush3.bf16.msra.mxu0 %v9762_v49  ;;  %13907 = vmatprep.mubr.msk.bf16.mxu0 %vm14572_vm1, %v17391_v15 }
0x3ef7   :  { %v9650_v22 = vmul.f32 %v14459_v38, %v16800_v14  ;;  %13902 = vmatmul.mubr.msk.bf16.vlgmr.msra.gmra.mrb[76].mxu1 %vm9658_vm11, %v9653_v63  ;;  %13917 = vmatprep.subr.bf16.mxu0 %v17391_v15  ;;  %v10178_v26 = vpop.permute.xlu0 %10177  ;;  %v10168_v51 = vor.u32 %v10167_v33, %v10164_v55  ;;  %v10099_v63 = vshrl.u32 %v16767_v4, 16  ;;  %v10102_v38 = vshll.u32 %v16767_v4, 16 }
0x3ef8   :  { %13913 = vmatprep.mubr.msk.bf16.mxu1 %vm14572_vm1, %v17391_v15  ;;  %v10183_v13 = vsel %vm554_vm3, %v10178_v26, 0  ;;  %v10225_v4 = vshrl.u32 %v16782_v53, 16 }
0x3ef9   :  { %v9654_v6 = vpack.c.bf16 %v9650_v22, %v9650_v22 }
0x3efd   :  { %13908 = vmatmul.mubr.msk.bf16.vlgmr.msra.gmra.mrb[76].mxu0 %vm9658_vm11, %v9654_v6 }
0x3efe   :  { %13918 = vmatpush3.bf16.msra.mxu0 %v15623_v45  ;;  %13919 = vmatprep.mubr.msk.bf16.mxu0 %vm14572_vm1, %v17391_v15 }
0x3eff   :  { %13929 = vmatprep.subr.bf16.mxu0 %v17391_v15 }
0x3f20   :  { %v9643_v17 = vpop.xlane.xlu1 %9642 }
0x3f21   :  { %14460 = vrcp.f32 %v9643_v17 }
0x3f24   :  { %v9805_v14 = vpop.permute.xlu1 %9804 }
0x3f25   :  { %v9810_v56 = vand.u32 %v9805_v14, %v16839_v36 }
0x3f27   :  { %13912 = vmatpush3.bf16.msra.mxu1 %v9810_v56 }
0x3f28   :  { %13923 = vmatprep.subr.bf16.mxu1 %v17391_v15  ;;  %v10115_v49 = vpop.permute.xlu1 %10114 }
0x3f29   :  { %v10120_v14 = vsel %vm554_vm3, %v10115_v49, 0 }
0x3f2b   :  { %v14461_v57 = vpop.eup %14460 }
0x3f2c   :  { %v9651_v40 = vmul.f32 %v14461_v57, %v14453_v20  ;;  %v10101_v57 = vrot.slane %v10099_v63, 1 }
0x3f2e   :  { %v9655_v16 = vpack.c.bf16 %v9651_v40, %v9651_v40  ;;  %v10104_v40 = vrot.slane %v10102_v38, 2 }
0x3f30   :  { %13914 = vmatmul.mubr.msk.bf16.vlgmr.msra.gmra.mrb[80].mxu1 %vm9658_vm11, %v9655_v16  ;;  %v10241_v16 = vpop.permute.xlu1 %10240 }
0x3f31   :  { %13924 = vmatpush3.bf16.msra.mxu1 %v15641_v58  ;;  %13925 = vmatprep.mubr.msk.bf16.mxu1 %vm14572_vm1, %v17391_v15 }
0x3f32   :  { %13935 = vmatprep.subr.bf16.mxu1 %v17391_v15 }
0x3fc8   :  { %v9702_v19 = vpop.f32.mrb[72].mxu0 }
0x3fc9   :  { %v9852_v12 = vpack.c.bf16 %v9702_v19, %v9702_v19  ;;  %v13897_v61 = vpop.f32.mrb[73].mxu0  ;;  %v10105_v19 = vor.u32 %v10104_v40, %v10101_v57 }
0x3fca   :  { %v9705_v23 = vpop.f32.mrb[74].mxu0  ;;  %v9750_v47 = vpop.f32.mrb[76].mxu1  ;;  %v10246_v61 = vsel %vm554_vm3, %v10241_v16, 0 }
0x3fcb   :  { %v9853_v0 = vpack.c.bf16 %v9750_v47, %v9750_v47  ;;  %v13898_v35 = vpop.f32.mrb[75].mxu0  ;;  %v13903_v21 = vpop.f32.mrb[77].mxu1  ;;  %13920 = vmatmul.mubr.msk.bf16.vlgmr.msra.gmra.mrb[80].mxu0 %vm554_vm3, %v9852_v12  ;;  %v10228_v12 = vshll.u32 %v16782_v53, 16  ;;  %v10227_v23 = vrot.slane %v10225_v4, 1 }
0x3fcc   :  { %13930 = vmatpush3.bf16.msra.mxu0 %v15662_v60  ;;  %v9753_v20 = vpop.f32.mrb[78].mxu1  ;;  %13931 = vmatprep.mubr.msk.bf16.mxu0 %vm14572_vm1, %v17391_v15 }
0x3fcd   :  { %v13904_v44 = vpop.f32.mrb[79].mxu1  ;;  %13926 = vmatmul.mubr.msk.bf16.vlgmr.msra.gmra.mrb[84].mxu1 %vm554_vm3, %v9853_v0  ;;  %13941 = vmatprep.subr.bf16.mxu0 %v17391_v15  ;;  %v10230_v47 = vrot.slane %v10228_v12, 2 }
0x3fce   :  { %13936 = vmatpush3.bf16.msra.mxu1 %v15675_v43  ;;  %13937 = vmatprep.mubr.msk.bf16.mxu1 %vm14572_vm1, %v17391_v15 }
0x3fcf   :  { %13947 = vmatprep.subr.bf16.mxu1 %v17391_v15  ;;  %v10231_v0 = vor.u32 %v10230_v47, %v10227_v23 }
0x3fd0   :  { %v9798_v27 = vpop.f32.mrb[76].mxu0 }
0x3fd1   :  { %v9854_v62 = vpack.c.bf16 %v9798_v27, %v9798_v27  ;;  %v13909_v31 = vpop.f32.mrb[77].mxu0 }
0x3fd2   :  { %v9801_v34 = vpop.f32.mrb[78].mxu0 }
0x3fd3   :  { %v13910_v5 = vpop.f32.mrb[79].mxu0  ;;  %13932 = vmatmul.mubr.msk.bf16.vlgmr.msra.gmra.mrb[84].mxu0 %vm554_vm3, %v9854_v62 }
0x3fd4   :  { %13943 = vmatprep.mubr.msk.bf16.mxu0 %vm14572_vm1, %v17391_v15 }
0x3fd5   :  { %13942 = vmatpush3.bf16.xpose.msra.mxu0 %v10057_v8 }
0x3fd6   :  { %13953 = vmatprep.subr.bf16.mxu0 %v17391_v15 }
0x3fdc   :  { %13944 = vmatmul.mubr.msk.bf16.vlgmr.msra.gmra.mrb[88].mxu0 %vm554_vm3, %v10042_v41 }
0x3fdd   :  { %13954 = vmatpush3.bf16.xpose.msra.mxu0 %v10183_v13  ;;  %13955 = vmatprep.mubr.msk.bf16.mxu0 %vm14572_vm1, %v17391_v15 }
0x3fde   :  { %13965 = vmatprep.subr.bf16.mxu0 %v17391_v15 }
0x3fe4   :  { %13956 = vmatmul.mubr.msk.bf16.vlgmr.msra.gmra.mrb[92].mxu0 %vm554_vm3, %v10168_v51 }
0x3fe5   :  { %13967 = vmatprep.mubr.msk.bf16.mxu0 %vm14572_vm1, %v17391_v15 }
0x4003   :  { %v9846_v42 = vpop.f32.mrb[80].mxu1 }
0x4004   :  { %v9855_v22 = vpack.c.bf16 %v9846_v42, %v9846_v42  ;;  %v13915_v6 = vpop.f32.mrb[81].mxu1 }
0x4005   :  { %v9849_v17 = vpop.f32.mrb[82].mxu1 }
0x4006   :  { %v13916_v56 = vpop.f32.mrb[83].mxu1  ;;  %13938 = vmatmul.mubr.msk.bf16.vlgmr.msra.gmra.mrb[88].mxu1 %vm554_vm3, %v9855_v22 }
0x4007   :  { %13948 = vmatpush3.bf16.xpose.msra.mxu1 %v10120_v14  ;;  %13949 = vmatprep.mubr.msk.bf16.mxu1 %vm14572_vm1, %v17391_v15 }
0x4008   :  { %13959 = vmatprep.subr.bf16.mxu1 %v17391_v15 }
0x400e   :  { %13950 = vmatmul.mubr.msk.bf16.vlgmr.msra.gmra.mrb[92].mxu1 %vm554_vm3, %v10105_v19 }
0x400f   :  { %13960 = vmatpush3.bf16.xpose.msra.mxu1 %v10246_v61  ;;  %13961 = vmatprep.mubr.msk.bf16.mxu1 %vm14572_vm1, %v17391_v15 }
0x4010   :  { %13971 = vmatprep.subr.bf16.mxu1 %v17391_v15 }
0x4016   :  { %13962 = vmatmul.mubr.msk.bf16.vlgmr.msra.gmra.mrb[96].mxu1 %vm554_vm3, %v10231_v0 }
0x4017   :  { %13973 = vmatprep.mubr.msk.bf16.mxu1 %vm14572_vm1, %v17391_v15 }
0x409e   :  { %v9893_v35 = vpop.f32.mrb[80].mxu0 }
0x409f   :  { %v13921_v53 = vpop.f32.mrb[81].mxu0  ;;  %v10029_v44 = vsel %vm10028_vm6, %v9893_v35, 0.0 }
0x40a0   :  { %v9896_v21 = vpop.f32.mrb[82].mxu0  ;;  %v9936_v20 = vpop.f32.mrb[84].mxu1 }
0x40a1   :  { %v10030_v27 = vsel %vm10028_vm6, %v9936_v20, 0.0  ;;  %v13922_v46 = vpop.f32.mrb[83].mxu0  ;;  %v13927_v62 = vpop.f32.mrb[85].mxu1 }
0x40a2   :  { %v10031_v31 = vadd.f32 %v10030_v27, %v10029_v44  ;;  %v9939_v18 = vpop.f32.mrb[86].mxu1 }
0x40a3   :  { %v13928_v24 = vpop.f32.mrb[87].mxu1 }
0x40a6   :  { %v9979_v34 = vpop.f32.mrb[84].mxu0 }
0x40a7   :  { %v10032_v5 = vsel %vm10028_vm6, %v9979_v34, 0.0  ;;  %v13933_v8 = vpop.f32.mrb[85].mxu0 }
0x40a8   :  { %v10033_v30 = vadd.f32 %v10032_v5, %v10031_v31  ;;  %v9982_v37 = vpop.f32.mrb[86].mxu0 }
0x40a9   :  { %v13934_v26 = vpop.f32.mrb[87].mxu0 }
0x40af   :  { %v10093_v41 = vpop.f32.mrb[88].mxu0 }
0x40b0   :  { %v13945_v1 = vpop.f32.mrb[89].mxu0  ;;  %v10288_v11 = vsel %vm9607_vm4, %v10093_v41, -inf }
0x40b1   :  { %10289 = vmax.xlane.f32.xlu0 %v10288_v11  ;;  %v10096_v13 = vpop.f32.mrb[90].mxu0 }
0x40b2   :  { %v13946_v55 = vpop.f32.mrb[91].mxu0 }
0x40b7   :  { %v10219_v33 = vpop.f32.mrb[92].mxu0 }
0x40b8   :  { %v13957_v51 = vpop.f32.mrb[93].mxu0  ;;  %v10294_v49 = vsel %vm9607_vm4, %v10219_v33, -inf }
0x40b9   :  { %10295 = vmax.xlane.f32.xlu0 %v10294_v49  ;;  %v10222_v42 = vpop.f32.mrb[94].mxu0 }
0x40ba   :  { %v13958_v63 = vpop.f32.mrb[95].mxu0 }
0x40d9   :  { %v10022_v38 = vpop.f32.mrb[88].mxu1 }
0x40da   :  { %v10034_v22 = vsel %vm10028_vm6, %v10022_v38, 0.0  ;;  %v13939_v6 = vpop.f32.mrb[89].mxu1 }
0x40db   :  { %v16918_v17 = vadd.f32 %v10034_v22, %v10033_v30  ;;  %v10025_v14 = vpop.f32.mrb[90].mxu1 }
0x40dc   :  { %v13940_v56 = vpop.f32.mrb[91].mxu1 }
0x40e1   :  { %v10156_v57 = vpop.f32.mrb[92].mxu1 }
0x40e2   :  { %v13951_v40 = vpop.f32.mrb[93].mxu1  ;;  %v10291_v16 = vsel %vm9607_vm4, %v10156_v57, -inf }
0x40e3   :  { %10292 = vmax.xlane.f32.xlu1 %v10291_v16  ;;  %v10159_v19 = vpop.f32.mrb[94].mxu1 }
0x40e4   :  { %v13952_v4 = vpop.f32.mrb[95].mxu1 }
0x40e9   :  { %v10282_v12 = vpop.f32.mrb[96].mxu1 }
0x40ea   :  { %v13963_v61 = vpop.f32.mrb[97].mxu1  ;;  %v10297_v23 = vsel %vm9607_vm4, %v10282_v12, -inf }
0x40eb   :  { %v10285_v47 = vpop.f32.mrb[98].mxu1  ;;  %10298 = vmax.xlane.f32.xlu0 %v10297_v23 }
0x40ec   :  { %v13964_v0 = vpop.f32.mrb[99].mxu1 }
0x413e   :  { %v10290_v35 = vpop.xlane.xlu0 %10289 }
0x413f   :  { %v10300_v53 = vsub.f32 %v10093_v41, %v10290_v35 }
0x4141   :  { %v10304_v21 = vmul.f32 1.442695, %v10300_v53 }
0x4143   :  { %14462 = vpow2.f32 %v10304_v21 }
0x4146   :  { %v10296_v20 = vpop.xlane.xlu0 %10295 }
0x4147   :  { %v10302_v44 = vsub.f32 %v10219_v33, %v10296_v20 }
0x4149   :  { %v10308_v27 = vmul.f32 1.442695, %v10302_v44 }
0x414b   :  { %14464 = vpow2.f32 %v10308_v27 }
0x414d   :  { %v14463_v46 = vpop.eup %14462 }
0x414e   :  { %v10312_v62 = vsel %vm9607_vm4, %v14463_v46, 0.0 }
0x414f   :  { %10313 = vadd.xlane.f32.xlu0 %v10312_v62 }
0x4155   :  { %v14465_v31 = vpop.eup %14464 }
0x4156   :  { %v10318_v18 = vsel %vm9607_vm4, %v14465_v31, 0.0 }
0x4157   :  { %10319 = vadd.xlane.f32.xlu0 %v10318_v18 }
0x416d   :  { %10336 = vrot.lane.b32.xlu0 %v16814_v2, %s14577_s25 }
0x4170   :  { %v10293_v24 = vpop.xlane.xlu1 %10292 }
0x4171   :  { %v10301_v34 = vsub.f32 %v10156_v57, %v10293_v24  ;;  %v14556_v24 = vld [vmem:[%s17357_s7 + $0x18] sm:$0xff]  }
0x4173   :  { %v10306_v5 = vmul.f32 1.442695, %v10301_v34 }
0x4175   :  { %14466 = vpow2.f32 %v10306_v5 }
0x4178   :  { %v10299_v37 = vpop.xlane.xlu0 %10298 }
0x4179   :  { %v10303_v26 = vsub.f32 %v10282_v12, %v10299_v37 }
0x417b   :  { %v10310_v41 = vmul.f32 1.442695, %v10303_v26 }
0x417d   :  { %14468 = vpow2.f32 %v10310_v41 }
0x417f   :  { %v14467_v8 = vpop.eup %14466 }
0x4180   :  { %v10315_v30 = vsel %vm9607_vm4, %v14467_v8, 0.0 }
0x4181   :  { %10316 = vadd.xlane.f32.xlu1 %v10315_v30 }
0x4187   :  { %v14469_v1 = vpop.eup %14468 }
0x4188   :  { %v10321_v2 = vsel %vm9607_vm4, %v14469_v1, 0.0 }
0x4192   :  { %10384 = vrot.lane.b32.xlu1 %v16829_v54, %s14577_s25 }
0x4196   :  { %10432 = vrot.lane.b32.xlu1 %v16818_v28, %s14577_s25 }
0x41ba   :  { %10322 = vadd.xlane.f32.xlu1 %v10321_v2 }
0x41cb   :  { %10480 = vrot.lane.b32.xlu1 %v16833_v39, %s14577_s25 }
0x41dc   :  { %v10314_v11 = vpop.xlane.xlu0 %10313 }
0x41dd   :  { %14470 = vrcp.f32 %v10314_v11 }
0x41e4   :  { %v10320_v13 = vpop.xlane.xlu0 %10319 }
0x41e5   :  { %14472 = vrcp.f32 %v10320_v13 }
0x41e7   :  { %v14471_v55 = vpop.eup %14470 }
0x41e8   :  { %v10328_v33 = vmul.f32 %v14471_v55, %v14463_v46  ;;  %v10337_v54 = vpop.permute.xlu0 %10336 }
0x41e9   :  { %v10342_v51 = vand.u32 %v10337_v54, %v16839_v36 }
0x41ea   :  { %v10332_v28 = vpack.c.bf16 %v10328_v33, %v10328_v33 }
0x41eb   :  { %13966 = vmatpush3.bf16.msra.mxu0 %v10342_v51 }
0x41ec   :  { %13977 = vmatprep.subr.bf16.mxu0 %v17391_v15 }
0x41ee   :  { %13968 = vmatmul.mubr.msk.bf16.vlgmr.msra.gmra.mrb[96].mxu0 %vm9658_vm11, %v10332_v28 }
0x41ef   :  { %13979 = vmatprep.mubr.msk.bf16.mxu0 %vm14572_vm1, %v17391_v15  ;;  %v14473_v42 = vpop.eup %14472 }
0x41f0   :  { %v10330_v38 = vmul.f32 %v14473_v42, %v14465_v31 }
0x41f2   :  { %v10334_v56 = vpack.c.bf16 %v10330_v38, %v10330_v38 }
0x420e   :  { %v10317_v49 = vpop.xlane.xlu1 %10316 }
0x420f   :  { %14474 = vrcp.f32 %v10317_v49 }
0x4212   :  { %v10385_v39 = vpop.permute.xlu1 %10384 }
0x4213   :  { %v10390_v63 = vand.u32 %v10385_v39, %v16839_v36 }
0x4215   :  { %13972 = vmatpush3.bf16.msra.mxu1 %v10390_v63 }
0x4216   :  { %v10433_v22 = vpop.permute.xlu1 %10432  ;;  %13983 = vmatprep.subr.bf16.mxu1 %v17391_v15 }
0x4217   :  { %v10438_v6 = vand.u32 %v10433_v22, %v16839_v36 }
0x4219   :  { %v14475_v14 = vpop.eup %14474  ;;  %13978 = vmatpush3.bf16.msra.mxu0 %v10438_v6 }
0x421a   :  { %v10329_v57 = vmul.f32 %v14475_v14, %v14467_v8  ;;  %13989 = vmatprep.subr.bf16.mxu0 %v17391_v15 }
0x421c   :  { %v10333_v40 = vpack.c.bf16 %v10329_v57, %v10329_v57  ;;  %13980 = vmatmul.mubr.msk.bf16.vlgmr.msra.gmra.mrb[100].mxu0 %vm9658_vm11, %v10334_v56 }
0x421d   :  { %13990 = vmatpush3.bf16.msra.mxu0 %v15623_v45  ;;  %13991 = vmatprep.mubr.msk.bf16.mxu0 %vm14572_vm1, %v17391_v15 }
0x421e   :  { %13974 = vmatmul.mubr.msk.bf16.vlgmr.msra.gmra.mrb[100].mxu1 %vm9658_vm11, %v10333_v40  ;;  %14001 = vmatprep.subr.bf16.mxu0 %v17391_v15 }
0x421f   :  { %13985 = vmatprep.mubr.msk.bf16.mxu1 %vm14572_vm1, %v17391_v15 }
0x4247   :  { %v10323_v16 = vpop.xlane.xlu1 %10322 }
0x4248   :  { %14476 = vrcp.f32 %v10323_v16 }
0x424b   :  { %v10481_v19 = vpop.permute.xlu1 %10480 }
0x424c   :  { %v10486_v4 = vand.u32 %v10481_v19, %v16839_v36 }
0x424e   :  { %13984 = vmatpush3.bf16.msra.mxu1 %v10486_v4  ;;  %v14557_v4 = vld [vmem:[%s17356_s11 + $0x11] ss:$0 sm:$0xff] }
0x424f   :  { %13995 = vmatprep.subr.bf16.mxu1 %v17391_v15 }
0x4252   :  { %v14477_v12 = vpop.eup %14476 }
0x4253   :  { %v10331_v45 = vmul.f32 %v14477_v12, %v14469_v1 }
0x4255   :  { %v10335_v61 = vpack.c.bf16 %v10331_v45, %v10331_v45 }
0x4257   :  { %13986 = vmatmul.mubr.msk.bf16.vlgmr.msra.gmra.mrb[104].mxu1 %vm9658_vm11, %v10335_v61 }
0x4258   :  { %13996 = vmatpush3.bf16.msra.mxu1 %v15641_v58  ;;  %13997 = vmatprep.mubr.msk.bf16.mxu1 %vm14572_vm1, %v17391_v15 }
0x4259   :  { %14007 = vmatprep.subr.bf16.mxu1 %v17391_v15 }
0x42c1   :  { %v10378_v23 = vpop.f32.mrb[96].mxu0 }
0x42c2   :  { %v10528_v47 = vpack.c.bf16 %v10378_v23, %v10378_v23  ;;  %v13969_v0 = vpop.f32.mrb[97].mxu0 }
0x42c3   :  { %v10381_v35 = vpop.f32.mrb[98].mxu0 }
0x42c4   :  { %v13970_v36 = vpop.f32.mrb[99].mxu0  ;;  %13992 = vmatmul.mubr.msk.bf16.vlgmr.msra.gmra.mrb[104].mxu0 %vm554_vm3, %v10528_v47 }
0x42c5   :  { %14002 = vmatpush3.bf16.msra.mxu0 %v15662_v60  ;;  %14003 = vmatprep.mubr.msk.bf16.mxu0 %vm14572_vm1, %v17391_v15  ;;  %v14555_v60 = vld [vmem:[%s17357_s7 + $0x10] sm:$0xff]  }
0x42c6   :  { %14013 = vmatprep.subr.bf16.mxu0 %v17391_v15 }
0x42ef   :  { %v10474_v58 = vpop.f32.mrb[100].mxu0 }
0x42f0   :  { %v10530_v53 = vpack.c.bf16 %v10474_v58, %v10474_v58  ;;  %v13981_v21 = vpop.f32.mrb[101].mxu0 }
0x42f1   :  { %v10426_v20 = vpop.f32.mrb[100].mxu1  ;;  %v10477_v44 = vpop.f32.mrb[102].mxu0  ;;  %v14558_v21 = vld [vmem:[%s17356_s11 + $0x18] ss:$0 sm:$0xff] }
0x42f2   :  { %v10529_v27 = vpack.c.bf16 %v10426_v20, %v10426_v20  ;;  %v13975_v46 = vpop.f32.mrb[101].mxu1  ;;  %v13982_v62 = vpop.f32.mrb[103].mxu0  ;;  %14004 = vmatmul.mubr.msk.bf16.vlgmr.msra.gmra.mrb[108].mxu0 %vm554_vm3, %v10530_v53  ;;  %v14559_v44 = vld [vmem:[%s17356_s11 + $0x19] ss:$0 sm:$0xff] }
0x42f3   :  { %v10429_v31 = vpop.f32.mrb[102].mxu1  ;;  %14014 = vmatpush3.bf16.msra.mxu0 %v14555_v60  ;;  %14017 = vmatprep.mubr.msk.bf16.mxu0 %vm14572_vm1, %v17391_v15 }
0x42f4   :  { %v13976_v18 = vpop.f32.mrb[103].mxu1  ;;  %13998 = vmatmul.mubr.msk.bf16.vlgmr.msra.gmra.mrb[108].mxu1 %vm554_vm3, %v10529_v27  ;;  %14015 = vmatprep.subr.bf16.mxu0 %v17391_v15  ;;  %v14560_v31 = vld [vmem:[%s17356_s11 + $0x12] ss:$0 sm:$0xff] }
0x42f5   :  { %14008 = vmatpush3.bf16.msra.mxu1 %v15675_v43  ;;  %14009 = vmatprep.mubr.msk.bf16.mxu1 %vm14572_vm1, %v17391_v15 }
0x42f6   :  { %14021 = vmatprep.subr.bf16.mxu1 %v17391_v15 }
0x42f7   :  { %14016 = vmatpush3.bf16.msra.mxu0 %v14556_v24 }
0x42f8   :  { %14027 = vmatprep.subr.bf16.mxu0 %v17391_v15 }
0x432a   :  { %v10522_v34 = vpop.f32.mrb[104].mxu1 }
0x432b   :  { %v10531_v5 = vpack.c.bf16 %v10522_v34, %v10522_v34  ;;  %v13987_v8 = vpop.f32.mrb[105].mxu1 }
0x432c   :  { %v10525_v30 = vpop.f32.mrb[106].mxu1 }
0x432d   :  { %v13988_v37 = vpop.f32.mrb[107].mxu1  ;;  %14010 = vmatmul.mubr.msk.bf16.vlgmr.msra.gmra.mrb[112].mxu1 %vm554_vm3, %v10531_v5 }
0x432e   :  { %14022 = vmatpush3.bf16.xpose.msra.mxu1 %v15819_v52  ;;  %14023 = vmatprep.mubr.msk.bf16.mxu1 %vm14572_vm1, %v17391_v15 }
0x432f   :  { %14033 = vmatprep.subr.bf16.mxu1 %v17391_v15 }
0x4397   :  { %v10569_v43 = vpop.f32.mrb[104].mxu0 }
0x4398   :  { %v13993_v26 = vpop.f32.mrb[105].mxu0  ;;  %v10704_v33 = vsel %vm10028_vm6, %v10569_v43, 0.0 }
0x4399   :  { %v10572_v41 = vpop.f32.mrb[106].mxu0 }
0x439a   :  { %v13994_v1 = vpop.f32.mrb[107].mxu0 }
0x43c5   :  { %v10655_v2 = vpop.f32.mrb[108].mxu0 }
0x43c6   :  { %v14005_v11 = vpop.f32.mrb[109].mxu0  ;;  %v10707_v39 = vsel %vm10028_vm6, %v10655_v2, 0.0 }
0x43c7   :  { %v10612_v13 = vpop.f32.mrb[108].mxu1  ;;  %v10658_v55 = vpop.f32.mrb[110].mxu0 }
0x43c8   :  { %v10705_v54 = vsel %vm10028_vm6, %v10612_v13, 0.0  ;;  %v13999_v51 = vpop.f32.mrb[109].mxu1  ;;  %v14006_v28 = vpop.f32.mrb[111].mxu0 }
0x43c9   :  { %v10706_v52 = vadd.f32 %v10705_v54, %v10704_v33  ;;  %v10615_v49 = vpop.f32.mrb[110].mxu1 }
0x43ca   :  { %v14000_v42 = vpop.f32.mrb[111].mxu1 }
0x43cb   :  { %v10708_v63 = vadd.f32 %v10707_v39, %v10706_v52 }
0x4400   :  { %v10698_v38 = vpop.f32.mrb[112].mxu1 }
0x4401   :  { %v10709_v22 = vsel %vm10028_vm6, %v10698_v38, 0.0  ;;  %v14011_v6 = vpop.f32.mrb[113].mxu1 }
0x4402   :  { %v10710_v14 = vadd.f32 %v10709_v22, %v10708_v63  ;;  %v10701_v56 = vpop.f32.mrb[114].mxu1 }
0x4403   :  { %v14012_v57 = vpop.f32.mrb[115].mxu1 }
0x4404   :  { %v10712_v40 = vrot.slane %v10710_v14, 5 }
0x4406   :  { %v10714_v16 = vsel %vm2194_vm7, %v16918_v17, %v10712_v40 }
0x4407   :  { %v10715_v19 = vadd.f32 %v10714_v16, %v16635_v50 }
0x4409   :  { %v16994_v12 = vadd.f32 %v14557_v4, %v10715_v19 }
0x440b   :  { %v10717_v45 = vsel %vm9322_vm10, %v16994_v12, 0.0 }
0x440c   :  { %10718 = vadd.xlane.f32.xlu0 %v10717_v45 }
0x4499   :  { %v10719_v61 = vpop.xlane.xlu0 %10718 }
0x449a   :  { %v10720_v23 = vmul.f32 0.03125, %v10719_v61 }
0x449c   :  { %v10721_v47 = vsub.f32 %v16994_v12, %v10720_v23 }
0x449e   :  { %v10722_v0 = vmul.f32 %v10721_v47, %v10721_v47 }
0x44a0   :  { %v10723_v35 = vsel %vm9322_vm10, %v10722_v0, 0.0 }
0x44a1   :  { %10724 = vadd.xlane.f32.xlu1 %v10723_v35 }
0x452e   :  { %v10725_v17 = vpop.xlane.xlu1 %10724 }
0x452f   :  { %v10726_v50 = vmul.f32 0.03125, %v10725_v17 }
0x4531   :  { %v10727_v36 = vadd.f32 1e-05, %v10726_v50 }
0x4533   :  { %14478 = vrsqrt.f32 %v10727_v36 }
0x453d   :  { %v14479_v58 = vpop.eup %14478 }
0x453e   :  { %v10729_v53 = vmul.f32 %v14479_v58, %v10721_v47 }
0x4540   :  { %v10730_v20 = vmul.f32 %v14558_v21, %v10729_v53 }
0x4542   :  { %v10731_v27 = vadd.f32 %v14559_v44, %v10730_v20 }
0x4544   :  { %v10732_v46 = vpack.c.bf16 %v10731_v27, %v10731_v27 }
0x4546   :  { %14018 = vmatmul.mubr.msk.bf16.vlgmr.msra.gmra.mrb[112].mxu0 %vm143_vm0, %v10732_v46 }
0x4547   :  { %14028 = vmatpush3.bf16.xpose.msra.mxu0 %v15836_v9  ;;  %14029 = vmatprep.mubr.msk.bf16.mxu0 %vm14572_vm1, %v17391_v15 }
0x4548   :  { %14039 = vmatprep.subr.bf16.mxu0 %v17391_v15 }
0x4619   :  { %v10770_v62 = vpop.f32.mrb[112].mxu0 }
0x461a   :  { %v10771_v60 = vadd.f32 %v14560_v31, %v10770_v62  ;;  %v14019_v18 = vpop.f32.mrb[113].mxu0 }
0x461b   :  { %v10773_v24 = vpop.f32.mrb[114].mxu0 }
0x461c   :  { %v10776_v34 = vmul.f32 0.35355338, %v10771_v60  ;;  %v14020_v5 = vpop.f32.mrb[115].mxu0  ;;  %v17410_v60 = vld [vmem:[#allocation7_spill] sm:$0xff] }
0x461e   :  { %v17014_v8 = vpack.c.bf16 %v10776_v34, %v10776_v34  ;;  %10781 = vrot.lane.b32.xlu1 %v10776_v34, %s14573_s14  ;;  %10778 = vrot.lane.b32.xlu0 %v10776_v34, %s14574_s15 }
0x4620   :  { %14024 = vmatmul.mubr.msk.bf16.vlgmr.msra.gmra.mrb[116].mxu1 %vm554_vm3, %v17014_v8 }
0x4621   :  { %14034 = vmatpush3.bf16.xpose.msra.mxu1 %v15858_v29  ;;  %14035 = vmatprep.mubr.msk.bf16.mxu1 %vm14572_vm1, %v17391_v15  ;;  %v17409_v29 = vld [vmem:[#allocation6_spill] sm:$0xff] }
0x4622   :  { %10784 = vrot.lane.b32.xlu0 %v10776_v34, %s14575_s18  ;;  %14045 = vmatprep.subr.bf16.mxu1 %v17391_v15 }
0x4690   :  { %v10782_v9 = vpop.permute.xlu1 %10781  ;;  %v10779_v30 = vpop.permute.xlu0 %10778 }
0x4691   :  { %v17025_v37 = vpack.c.bf16 %v10782_v9, %v10782_v9  ;;  %v17027_v43 = vpack.c.bf16 %v10779_v30, %v10779_v30 }
0x4693   :  { %14030 = vmatmul.mubr.msk.bf16.vlgmr.msra.gmra.mrb[116].mxu0 %vm554_vm3, %v17027_v43  ;;  %14036 = vmatmul.mubr.msk.bf16.vlgmr.msra.gmra.mrb[120].mxu1 %vm554_vm3, %v17025_v37 }
0x4694   :  { %14040 = vmatpush3.bf16.xpose.msra.mxu0 %v17409_v29  ;;  %14046 = vmatpush3.bf16.msra.mxu1 %v15932_v7  ;;  %v10785_v26 = vpop.permute.xlu0 %10784 }
0x4695   :  { %14041 = vmatprep.mubr.msk.bf16.mxu0 %vm14572_vm1, %v17391_v15  ;;  %14051 = vmatprep.subr.bf16.mxu0 %v17391_v15  ;;  %v17041_v41 = vpack.c.bf16 %v10785_v26, %v10785_v26 }
0x4696   :  { %14047 = vmatprep.mubr.msk.bf16.mxu1 %vm14572_vm1, %v17391_v15  ;;  %14057 = vmatprep.subr.bf16.mxu1 %v17391_v15 }
0x469b   :  { %14042 = vmatmul.mubr.msk.bf16.vlgmr.msra.gmra.mrb[120].mxu0 %vm554_vm3, %v17041_v41 }
0x469c   :  { %14052 = vmatpush3.bf16.msra.mxu0 %v15935_v59  ;;  %14053 = vmatprep.mubr.msk.bf16.mxu0 %vm14572_vm1, %v17391_v15 }
0x469d   :  { %14063 = vmatprep.subr.bf16.mxu0 %v17391_v15 }
0x46f3   :  { %v10828_v7 = vpop.f32.mrb[116].mxu1 }
0x46f4   :  { %v14025_v1 = vpop.f32.mrb[117].mxu1  ;;  %v10964_v2 = vsel %vm10963_vm12, %v10828_v7, -inf }
0x46f5   :  { %10965 = vmax.xlane.f32.xlu1 %v10964_v2  ;;  %v10831_v11 = vpop.f32.mrb[118].mxu1 }
0x46f6   :  { %v14026_v13 = vpop.f32.mrb[119].mxu1 }
0x4766   :  { %v10871_v55 = vpop.f32.mrb[116].mxu0  ;;  %v10914_v33 = vpop.f32.mrb[120].mxu1 }
0x4767   :  { %v14031_v54 = vpop.f32.mrb[117].mxu0  ;;  %v14037_v51 = vpop.f32.mrb[121].mxu1  ;;  %v10967_v28 = vsel %vm10963_vm12, %v10871_v55, -inf  ;;  %v10970_v42 = vsel %vm10963_vm12, %v10914_v33, -inf }
0x4768   :  { %v10917_v59 = vpop.f32.mrb[122].mxu1  ;;  %10968 = vmax.xlane.f32.xlu0 %v10967_v28  ;;  %v10874_v52 = vpop.f32.mrb[118].mxu0 }
0x4769   :  { %v14032_v49 = vpop.f32.mrb[119].mxu0  ;;  %v14038_v39 = vpop.f32.mrb[123].mxu1 }
0x476c   :  { %10971 = vmax.xlane.f32.xlu0 %v10970_v42 }
0x476e   :  { %v10957_v63 = vpop.f32.mrb[120].mxu0 }
0x476f   :  { %v14043_v38 = vpop.f32.mrb[121].mxu0  ;;  %v10973_v22 = vsel %vm10963_vm12, %v10957_v63, -inf }
0x4770   :  { %10974 = vmax.xlane.f32.xlu0 %v10973_v22  ;;  %v10960_v6 = vpop.f32.mrb[122].mxu0  ;;  %v11367_v22 = vshrl.u32 %v17014_v8, 16 }
0x4771   :  { %v14044_v14 = vpop.f32.mrb[123].mxu0  ;;  %v11370_v6 = vshll.u32 %v17014_v8, 16  ;;  %v11417_v8 = vshrl.u32 %v17027_v43, 16 }
0x4782   :  { %v10966_v56 = vpop.xlane.xlu1 %10965 }
0x4783   :  { %v10976_v57 = vsub.f32 %v10828_v7, %v10966_v56  ;;  %v17411_v7 = vld [vmem:[#allocation8_spill] sm:$0xff] }
0x4785   :  { %v10980_v40 = vmul.f32 1.442695, %v10976_v57 }
0x4787   :  { %14480 = vpow2.f32 %v10980_v40 }
0x4791   :  { %v14481_v16 = vpop.eup %14480 }
0x4792   :  { %v10988_v19 = vsel %vm10963_vm12, %v14481_v16, 0.0 }
0x4793   :  { %10989 = vadd.xlane.f32.xlu1 %v10988_v19 }
0x47f5   :  { %v10969_v4 = vpop.xlane.xlu0 %10968 }
0x47f6   :  { %v10977_v45 = vsub.f32 %v10871_v55, %v10969_v4  ;;  %v11369_v4 = vrot.slane %v11367_v22, 1 }
0x47f8   :  { %v10982_v61 = vmul.f32 1.442695, %v10977_v45  ;;  %v11372_v45 = vrot.slane %v11370_v6, 2 }
0x47f9   :  { %v10972_v23 = vpop.xlane.xlu0 %10971 }
0x47fa   :  { %14482 = vpow2.f32 %v10982_v61  ;;  %v10978_v47 = vsub.f32 %v10914_v33, %v10972_v23 }
0x47fc   :  { %v10984_v0 = vmul.f32 1.442695, %v10978_v47  ;;  %v11420_v47 = vshll.u32 %v17027_v43, 16  ;;  %v17415_v43 = vld [vmem:[#allocation11_spill] sm:$0xff] }
0x47fd   :  { %v10975_v35 = vpop.xlane.xlu0 %10974 }
0x47fe   :  { %14484 = vpow2.f32 %v10984_v0  ;;  %v10979_v17 = vsub.f32 %v10957_v63, %v10975_v35  ;;  %v17412_v63 = vld [vmem:[#allocation9_spill] sm:$0xff] }
0x4800   :  { %v10986_v50 = vmul.f32 1.442695, %v10979_v17  ;;  %v11373_v17 = vor.u32 %v11372_v45, %v11369_v4 }
0x4802   :  { %14486 = vpow2.f32 %v10986_v50  ;;  %v11467_v50 = vshrl.u32 %v17025_v37, 16 }
0x4804   :  { %v14483_v36 = vpop.eup %14482 }
0x4805   :  { %v10991_v58 = vsel %vm10963_vm12, %v14483_v36, 0.0 }
0x4806   :  { %10992 = vadd.xlane.f32.xlu0 %v10991_v58  ;;  %v17414_v58 = vld [vmem:[#allocation12_spill] sm:$0xff] }
0x4808   :  { %v14485_v53 = vpop.eup %14484 }
0x4809   :  { %v10994_v21 = vsel %vm10963_vm12, %v14485_v53, 0.0 }
0x480a   :  { %10995 = vadd.xlane.f32.xlu1 %v10994_v21  ;;  %v11422_v21 = vrot.slane %v11420_v47, 2 }
0x480c   :  { %v14487_v20 = vpop.eup %14486 }
0x480d   :  { %v10997_v44 = vsel %vm10963_vm12, %v14487_v20, 0.0 }
0x480e   :  { %10998 = vadd.xlane.f32.xlu0 %v10997_v44 }
0x4820   :  { %v10990_v27 = vpop.xlane.xlu1 %10989 }
0x4821   :  { %14488 = vrcp.f32 %v10990_v27 }
0x482b   :  { %v14489_v46 = vpop.eup %14488 }
0x482c   :  { %v11004_v62 = vmul.f32 %v14489_v46, %v14481_v16  ;;  %v17413_v16 = vld [vmem:[#allocation10_spill] sm:$0xff]  ;;  %v11520_v46 = vshll.u32 %v17041_v41, 16 }
0x482e   :  { %v11008_v31 = vpack.c.bf16 %v11004_v62, %v11004_v62 }
0x4830   :  { %14048 = vmatmul.mubr.msk.bf16.vlgmr.msra.gmra.mrb[124].mxu1 %vm554_vm3, %v11008_v31  ;;  %v17416_v31 = vld [vmem:[#allocation13_spill] sm:$0xff] }
0x4831   :  { %14058 = vmatpush3.bf16.msra.mxu1 %v17410_v60  ;;  %14059 = vmatprep.mubr.msk.bf16.mxu1 %vm14572_vm1, %v17391_v15 }
0x4832   :  { %14069 = vmatprep.subr.bf16.mxu1 %v17391_v15 }
0x4893   :  { %v10993_v18 = vpop.xlane.xlu0 %10992 }
0x4894   :  { %14490 = vrcp.f32 %v10993_v18  ;;  %v11522_v18 = vrot.slane %v11520_v46, 2 }
0x4897   :  { %v10996_v24 = vpop.xlane.xlu1 %10995 }
0x4898   :  { %14492 = vrcp.f32 %v10996_v24  ;;  %v17417_v24 = vld [vmem:[#allocation14_spill] sm:$0xff] }
0x489b   :  { %v10999_v34 = vpop.xlane.xlu0 %10998 }
0x489c   :  { %14494 = vrcp.f32 %v10999_v34  ;;  %v17418_v34 = vld [vmem:[#allocation16_spill] sm:$0xff] }
0x489e   :  { %v14491_v5 = vpop.eup %14490 }
0x489f   :  { %v11005_v9 = vmul.f32 %v14491_v5, %v14483_v36  ;;  %v11470_v36 = vshll.u32 %v17025_v37, 16  ;;  %v11517_v37 = vshrl.u32 %v17041_v41, 16 }
0x48a1   :  { %v11009_v30 = vpack.c.bf16 %v11005_v9, %v11005_v9  ;;  %v11472_v44 = vrot.slane %v11470_v36, 2  ;;  %v11519_v60 = vrot.slane %v11517_v37, 1 }
0x48a2   :  { %v14493_v29 = vpop.eup %14492 }
0x48a3   :  { %v11006_v26 = vmul.f32 %v14493_v29, %v14485_v53  ;;  %14054 = vmatmul.mubr.msk.bf16.vlgmr.msra.gmra.mrb[124].mxu0 %vm554_vm3, %v11009_v30  ;;  %v11419_v53 = vrot.slane %v11417_v8, 1  ;;  %v11523_v41 = vor.u32 %v11522_v18, %v11519_v60 }
0x48a4   :  { %14064 = vmatpush3.bf16.msra.mxu0 %v17411_v7  ;;  %14065 = vmatprep.mubr.msk.bf16.mxu0 %vm14572_vm1, %v17391_v15 }
0x48a5   :  { %v11010_v1 = vpack.c.bf16 %v11006_v26, %v11006_v26  ;;  %14075 = vmatprep.subr.bf16.mxu0 %v17391_v15  ;;  %v11423_v27 = vor.u32 %v11422_v21, %v11419_v53 }
0x48a6   :  { %v14495_v2 = vpop.eup %14494 }
0x48a7   :  { %v11007_v11 = vmul.f32 %v14495_v2, %v14487_v20  ;;  %14060 = vmatmul.mubr.msk.bf16.vlgmr.msra.gmra.mrb[128].mxu1 %vm554_vm3, %v11010_v1  ;;  %v11469_v20 = vrot.slane %v11467_v50, 1 }
0x48a8   :  { %14070 = vmatpush3.bf16.msra.mxu1 %v15953_v3  ;;  %14071 = vmatprep.mubr.msk.bf16.mxu1 %vm14572_vm1, %v17391_v15 }
0x48a9   :  { %v11011_v13 = vpack.c.bf16 %v11007_v11, %v11007_v11  ;;  %14081 = vmatprep.subr.bf16.mxu1 %v17391_v15  ;;  %v11473_v62 = vor.u32 %v11472_v44, %v11469_v20 }
0x48ab   :  { %14066 = vmatmul.mubr.msk.bf16.vlgmr.msra.gmra.mrb[128].mxu0 %vm554_vm3, %v11011_v13 }
0x48ac   :  { %14076 = vmatpush3.bf16.msra.mxu0 %v15975_v48  ;;  %14077 = vmatprep.mubr.msk.bf16.mxu0 %vm14572_vm1, %v17391_v15 }
0x48ad   :  { %14087 = vmatprep.subr.bf16.mxu0 %v17391_v15 }
0x4903   :  { %v11049_v55 = vpop.f32.mrb[124].mxu1 }
0x4904   :  { %v11184_v33 = vpack.c.bf16 %v11049_v55, %v11049_v55  ;;  %v14049_v54 = vpop.f32.mrb[125].mxu1 }
0x4905   :  { %v11052_v51 = vpop.f32.mrb[126].mxu1 }
0x4906   :  { %v14050_v28 = vpop.f32.mrb[127].mxu1  ;;  %14072 = vmatmul.mubr.msk.bf16.vlgmr.msra.gmra.mrb[132].mxu1 %vm554_vm3, %v11184_v33 }
0x4907   :  { %14082 = vmatpush3.bf16.msra.mxu1 %v15983_v32  ;;  %14083 = vmatprep.mubr.msk.bf16.mxu1 %vm14572_vm1, %v17391_v15 }
0x4908   :  { %14093 = vmatprep.subr.bf16.mxu1 %v17391_v15 }
0x4976   :  { %v11092_v59 = vpop.f32.mrb[124].mxu0 }
0x4977   :  { %v11185_v52 = vpack.c.bf16 %v11092_v59, %v11092_v59  ;;  %v14055_v49 = vpop.f32.mrb[125].mxu0 }
0x4978   :  { %v11095_v39 = vpop.f32.mrb[126].mxu0 }
0x4979   :  { %v14056_v42 = vpop.f32.mrb[127].mxu0  ;;  %14078 = vmatmul.mubr.msk.bf16.vlgmr.msra.gmra.mrb[132].mxu0 %vm554_vm3, %v11185_v52 }
0x497a   :  { %14088 = vmatpush3.bf16.msra.mxu0 %v17412_v63  ;;  %v11135_v38 = vpop.f32.mrb[128].mxu1  ;;  %14089 = vmatprep.mubr.msk.bf16.mxu0 %vm14572_vm1, %v17391_v15 }
0x497b   :  { %v11186_v14 = vpack.c.bf16 %v11135_v38, %v11135_v38  ;;  %v14061_v56 = vpop.f32.mrb[129].mxu1  ;;  %14099 = vmatprep.subr.bf16.mxu0 %v17391_v15 }
0x497c   :  { %v11138_v57 = vpop.f32.mrb[130].mxu1 }
0x497d   :  { %v14062_v40 = vpop.f32.mrb[131].mxu1  ;;  %14084 = vmatmul.mubr.msk.bf16.vlgmr.msra.gmra.mrb[136].mxu1 %vm554_vm3, %v11186_v14 }
0x497e   :  { %14094 = vmatpush3.bf16.xpose.msra.mxu1 %v17413_v16  ;;  %v11178_v19 = vpop.f32.mrb[128].mxu0  ;;  %14095 = vmatprep.mubr.msk.bf16.mxu1 %vm14572_vm1, %v17391_v15 }
0x497f   :  { %v11187_v61 = vpack.c.bf16 %v11178_v19, %v11178_v19  ;;  %v14067_v23 = vpop.f32.mrb[129].mxu0  ;;  %14105 = vmatprep.subr.bf16.mxu1 %v17391_v15 }
0x4980   :  { %v11181_v0 = vpop.f32.mrb[130].mxu0 }
0x4981   :  { %v14068_v35 = vpop.f32.mrb[131].mxu0  ;;  %14090 = vmatmul.mubr.msk.bf16.vlgmr.msra.gmra.mrb[136].mxu0 %vm554_vm3, %v11187_v61 }
0x4982   :  { %14101 = vmatprep.mubr.msk.bf16.mxu0 %vm14572_vm1, %v17391_v15 }
0x4983   :  { %14100 = vmatpush3.bf16.xpose.msra.mxu0 %v17414_v58 }
0x4984   :  { %14111 = vmatprep.subr.bf16.mxu0 %v17391_v15 }
0x4985   :  { %14096 = vmatmul.mubr.msk.bf16.vlgmr.msra.gmra.mrb[140].mxu1 %vm554_vm3, %v11373_v17 }
0x4986   :  { %14106 = vmatpush3.bf16.xpose.msra.mxu1 %v17415_v43  ;;  %14107 = vmatprep.mubr.msk.bf16.mxu1 %vm14572_vm1, %v17391_v15 }
0x4987   :  { %14117 = vmatprep.subr.bf16.mxu1 %v17391_v15 }
0x498a   :  { %14102 = vmatmul.mubr.msk.bf16.vlgmr.msra.gmra.mrb[140].mxu0 %vm554_vm3, %v11423_v27 }
0x498b   :  { %14112 = vmatpush3.bf16.xpose.msra.mxu0 %v17416_v31  ;;  %14113 = vmatprep.mubr.msk.bf16.mxu0 %vm14572_vm1, %v17391_v15 }
0x498c   :  { %14123 = vmatprep.subr.bf16.mxu0 %v17391_v15 }
0x498d   :  { %14108 = vmatmul.mubr.msk.bf16.vlgmr.msra.gmra.mrb[144].mxu1 %vm554_vm3, %v11473_v62 }
0x498e   :  { %14118 = vmatpush3.bf16.msra.mxu1 %v17417_v24  ;;  %14119 = vmatprep.mubr.msk.bf16.mxu1 %vm14572_vm1, %v17391_v15 }
0x498f   :  { %14129 = vmatprep.subr.bf16.mxu1 %v17391_v15 }
0x4992   :  { %14114 = vmatmul.mubr.msk.bf16.vlgmr.msra.gmra.mrb[144].mxu0 %vm554_vm3, %v11523_v41 }
0x4993   :  { %14124 = vmatpush3.bf16.msra.mxu0 %v17418_v34  ;;  %14125 = vmatprep.mubr.msk.bf16.mxu0 %vm14572_vm1, %v17391_v15 }
0x4994   :  { %14135 = vmatprep.subr.bf16.mxu0 %v17391_v15 }
0x49d9   :  { %v11225_v5 = vpop.f32.mrb[132].mxu1 }
0x49da   :  { %v14073_v9 = vpop.f32.mrb[133].mxu1  ;;  %v11360_v7 = vsel %vm10028_vm6, %v11225_v5, 0.0 }
0x49db   :  { %v11228_v30 = vpop.f32.mrb[134].mxu1 }
0x49dc   :  { %v14074_v29 = vpop.f32.mrb[135].mxu1 }
0x4a4c   :  { %v11268_v26 = vpop.f32.mrb[132].mxu0 }
0x4a4d   :  { %v11361_v1 = vsel %vm10028_vm6, %v11268_v26, 0.0  ;;  %v14079_v2 = vpop.f32.mrb[133].mxu0 }
0x4a4e   :  { %v11362_v11 = vadd.f32 %v11361_v1, %v11360_v7  ;;  %v11271_v13 = vpop.f32.mrb[134].mxu0 }
0x4a4f   :  { %v14080_v55 = vpop.f32.mrb[135].mxu0 }
0x4a50   :  { %v11311_v33 = vpop.f32.mrb[136].mxu1 }
0x4a51   :  { %v11363_v54 = vsel %vm10028_vm6, %v11311_v33, 0.0  ;;  %v14085_v51 = vpop.f32.mrb[137].mxu1 }
0x4a52   :  { %v11364_v28 = vadd.f32 %v11363_v54, %v11362_v11  ;;  %v11314_v59 = vpop.f32.mrb[138].mxu1 }
0x4a53   :  { %v14086_v52 = vpop.f32.mrb[139].mxu1 }
0x4a54   :  { %v11354_v49 = vpop.f32.mrb[136].mxu0  ;;  %v17419_v52 = vld [vmem:[#allocation15_spill] sm:$0xff] }
0x4a55   :  { %v11365_v39 = vsel %vm10028_vm6, %v11354_v49, 0.0  ;;  %v14091_v42 = vpop.f32.mrb[137].mxu0 }
0x4a56   :  { %v17129_v38 = vadd.f32 %v11365_v39, %v11364_v28  ;;  %v11357_v22 = vpop.f32.mrb[138].mxu0 }
0x4a57   :  { %v14092_v6 = vpop.f32.mrb[139].mxu0 }
0x4a58   :  { %v11411_v14 = vpop.f32.mrb[140].mxu1  ;;  %v17420_v6 = vld [vmem:[#allocation17_spill] sm:$0xff] }
0x4a59   :  { %v14097_v56 = vpop.f32.mrb[141].mxu1  ;;  %v11567_v57 = vsel %vm10963_vm12, %v11411_v14, -inf }
0x4a5a   :  { %11568 = vmax.xlane.f32.xlu1 %v11567_v57  ;;  %v11414_v40 = vpop.f32.mrb[142].mxu1 }
0x4a5b   :  { %v14098_v16 = vpop.f32.mrb[143].mxu1 }
0x4a5d   :  { %v11461_v19 = vpop.f32.mrb[140].mxu0 }
0x4a5e   :  { %v14103_v4 = vpop.f32.mrb[141].mxu0  ;;  %v11570_v45 = vsel %vm10963_vm12, %v11461_v19, -inf }
0x4a5f   :  { %11571 = vmax.xlane.f32.xlu0 %v11570_v45  ;;  %v11464_v61 = vpop.f32.mrb[142].mxu0 }
0x4a60   :  { %v14104_v23 = vpop.f32.mrb[143].mxu0  ;;  %v11511_v8 = vpop.f32.mrb[144].mxu1 }
0x4a61   :  { %v14109_v47 = vpop.f32.mrb[145].mxu1  ;;  %v11573_v0 = vsel %vm10963_vm12, %v11511_v8, -inf }
0x4a62   :  { %11574 = vmax.xlane.f32.xlu1 %v11573_v0  ;;  %v11514_v35 = vpop.f32.mrb[146].mxu1 }
0x4a63   :  { %v14110_v17 = vpop.f32.mrb[147].mxu1 }
0x4a65   :  { %v11561_v50 = vpop.f32.mrb[144].mxu0 }
0x4a66   :  { %v14115_v36 = vpop.f32.mrb[145].mxu0  ;;  %v11576_v58 = vsel %vm10963_vm12, %v11561_v50, -inf }
0x4a67   :  { %11577 = vmax.xlane.f32.xlu0 %v11576_v58  ;;  %v11564_v53 = vpop.f32.mrb[146].mxu0 }
0x4a68   :  { %v14116_v21 = vpop.f32.mrb[147].mxu0 }
0x4ae7   :  { %v11569_v43 = vpop.xlane.xlu1 %11568 }
0x4ae8   :  { %v11579_v20 = vsub.f32 %v11411_v14, %v11569_v43  ;;  %v14562_v43 = vld [vmem:[%s17360_s9 + $0x18] sm:$0xff]  }
0x4aea   :  { %v11583_v44 = vmul.f32 1.442695, %v11579_v20  ;;  %v14563_v20 = vld [vmem:[%s17361_s10 + $0x20] sm:$0xff]  }
0x4aec   :  { %14496 = vpow2.f32 %v11583_v44  ;;  %v11572_v27 = vpop.xlane.xlu0 %11571  ;;  %v14564_v44 = vld [vmem:[%s17361_s10 + $0x28] sm:$0xff]  }
0x4aed   :  { %v11580_v37 = vsub.f32 %v11461_v19, %v11572_v27  ;;  %v14565_v27 = vld [vmem:[%s17361_s10 + $0x30] sm:$0xff]  }
0x4aef   :  { %v11585_v46 = vmul.f32 1.442695, %v11580_v37  ;;  %v11575_v62 = vpop.xlane.xlu1 %11574  ;;  %v14566_v37 = vld [vmem:[%s17361_s10 + $0x38] sm:$0xff]  }
0x4af0   :  { %v11581_v31 = vsub.f32 %v11511_v8, %v11575_v62 }
0x4af1   :  { %14498 = vpow2.f32 %v11585_v46 }
0x4af2   :  { %v11587_v60 = vmul.f32 1.442695, %v11581_v31 }
0x4af4   :  { %14500 = vpow2.f32 %v11587_v60  ;;  %v11578_v18 = vpop.xlane.xlu0 %11577 }
0x4af5   :  { %v11582_v24 = vsub.f32 %v11561_v50, %v11578_v18  ;;  %v14561_v50 = vld [vmem:[%s17360_s9 + $0x10] sm:$0xff]  }
0x4af6   :  { %v14497_v41 = vpop.eup %14496 }
0x4af7   :  { %v11589_v34 = vmul.f32 1.442695, %v11582_v24  ;;  %v11591_v5 = vsel %vm10963_vm12, %v14497_v41, 0.0 }
0x4af8   :  { %11592 = vadd.xlane.f32.xlu1 %v11591_v5 }
0x4af9   :  { %14502 = vpow2.f32 %v11589_v34 }
0x4afb   :  { %v14499_v9 = vpop.eup %14498 }
0x4afc   :  { %v11594_v30 = vsel %vm10963_vm12, %v14499_v9, 0.0 }
0x4afd   :  { %11595 = vadd.xlane.f32.xlu0 %v11594_v30 }
0x4afe   :  { %v14501_v29 = vpop.eup %14500 }
0x4aff   :  { %v11597_v26 = vsel %vm10963_vm12, %v14501_v29, 0.0 }
0x4b00   :  { %11598 = vadd.xlane.f32.xlu1 %v11597_v26 }
0x4b03   :  { %v14503_v7 = vpop.eup %14502 }
0x4b04   :  { %v11600_v1 = vsel %vm10963_vm12, %v14503_v7, 0.0 }
0x4b05   :  { %11601 = vadd.xlane.f32.xlu0 %v11600_v1 }
0x4b85   :  { %v11593_v2 = vpop.xlane.xlu1 %11592 }
0x4b86   :  { %14504 = vrcp.f32 %v11593_v2 }
0x4b8a   :  { %v11596_v11 = vpop.xlane.xlu0 %11595 }
0x4b8b   :  { %14506 = vrcp.f32 %v11596_v11 }
0x4b8d   :  { %v11599_v13 = vpop.xlane.xlu1 %11598 }
0x4b8e   :  { %14508 = vrcp.f32 %v11599_v13 }
0x4b90   :  { %v14505_v55 = vpop.eup %14504 }
0x4b91   :  { %v11607_v33 = vmul.f32 %v14505_v55, %v14497_v41 }
0x4b92   :  { %v11602_v54 = vpop.xlane.xlu0 %11601 }
0x4b93   :  { %v11611_v51 = vpack.c.bf16 %v11607_v33, %v11607_v33  ;;  %14510 = vrcp.f32 %v11602_v54 }
0x4b95   :  { %v14507_v28 = vpop.eup %14506  ;;  %14120 = vmatmul.mubr.msk.bf16.vlgmr.msra.gmra.mrb[148].mxu1 %vm554_vm3, %v11611_v51 }
0x4b96   :  { %v11608_v59 = vmul.f32 %v14507_v28, %v14499_v9  ;;  %14130 = vmatpush3.bf16.msra.mxu1 %v17419_v52  ;;  %14131 = vmatprep.mubr.msk.bf16.mxu1 %vm14572_vm1, %v17391_v15 }
0x4b97   :  { %14141 = vmatprep.subr.bf16.mxu1 %v17391_v15 }
0x4b98   :  { %v14509_v49 = vpop.eup %14508  ;;  %v11612_v39 = vpack.c.bf16 %v11608_v59, %v11608_v59 }
0x4b99   :  { %v11609_v42 = vmul.f32 %v14509_v49, %v14501_v29  ;;  %v17421_v49 = vld [vmem:[#allocation2_spill] sm:$0xff] }
0x4b9a   :  { %14126 = vmatmul.mubr.msk.bf16.vlgmr.msra.gmra.mrb[148].mxu0 %vm554_vm3, %v11612_v39  ;;  %v17422_v39 = vld [vmem:[#allocation4_spill] sm:$0xff] }
0x4b9b   :  { %v11613_v22 = vpack.c.bf16 %v11609_v42, %v11609_v42  ;;  %14136 = vmatpush3.bf16.msra.mxu0 %v17420_v6  ;;  %14137 = vmatprep.mubr.msk.bf16.mxu0 %vm14572_vm1, %v17391_v15  ;;  %v3428_v42 = vadd.f32 %v17422_v39, %v17421_v49  ;;  %v12222_v6 = vld [vmem:[%s17356_s11 + $0x6] ss:$0 sm:$0xff] }
0x4b9c   :  { %14147 = vmatprep.subr.bf16.mxu0 %v17391_v15 }
0x4b9d   :  { %v14511_v14 = vpop.eup %14510  ;;  %14132 = vmatmul.mubr.msk.bf16.vlgmr.msra.gmra.mrb[152].mxu1 %vm554_vm3, %v11613_v22 }
0x4b9e   :  { %v11610_v56 = vmul.f32 %v14511_v14, %v14503_v7  ;;  %14142 = vmatpush3.bf16.msra.mxu1 %v15953_v3  ;;  %14143 = vmatprep.mubr.msk.bf16.mxu1 %vm14572_vm1, %v17391_v15  ;;  %v14567_v14 = vld [vmem:[%s17356_s11 + $0x13] ss:$0 sm:$0xff] }
0x4b9f   :  { %14153 = vmatprep.subr.bf16.mxu1 %v17391_v15 }
0x4ba0   :  { %v11614_v57 = vpack.c.bf16 %v11610_v56, %v11610_v56 }
0x4ba2   :  { %14138 = vmatmul.mubr.msk.bf16.vlgmr.msra.gmra.mrb[152].mxu0 %vm554_vm3, %v11614_v57  ;;  %v17423_v57 = vld [vmem:[#allocation19_spill] sm:$0xff] }
0x4ba3   :  { %14148 = vmatpush3.bf16.msra.mxu0 %v15975_v48  ;;  %14149 = vmatprep.mubr.msk.bf16.mxu0 %vm14572_vm1, %v17391_v15 }
0x4ba4   :  { %14159 = vmatprep.subr.bf16.mxu0 %v17391_v15 }
0x4c68   :  { %v11652_v40 = vpop.f32.mrb[148].mxu1 }
0x4c69   :  { %v11787_v16 = vpack.c.bf16 %v11652_v40, %v11652_v40  ;;  %v14121_v19 = vpop.f32.mrb[149].mxu1  ;;  %v17424_v40 = vld [vmem:[#allocation20_spill] sm:$0xff] }
0x4c6a   :  { %v11655_v4 = vpop.f32.mrb[150].mxu1  ;;  %v3434_v19 = vadd.f32 %v12222_v6, %v3428_v42  ;;  %v17283_v42 = vld [vmem:[%s17356_s11 + $0xd] ss:$0 sm:$0xff] }
0x4c6b   :  { %v14122_v3 = vpop.f32.mrb[151].mxu1  ;;  %14144 = vmatmul.mubr.msk.bf16.vlgmr.msra.gmra.mrb[156].mxu1 %vm554_vm3, %v11787_v16  ;;  %v6556_v16 = vadd.f32 %v17424_v40, %v17423_v57  ;;  %v17291_v57 = vld [vmem:[%s17356_s11 + $0xe] ss:$0 sm:$0xff] }
0x4c6c   :  { %14154 = vmatpush3.bf16.msra.mxu1 %v15983_v32  ;;  %14155 = vmatprep.mubr.msk.bf16.mxu1 %vm14572_vm1, %v17391_v15  ;;  %v9297_v3 = vadd.f32 %v16762_v25, %v16691_v10  ;;  %v17427_v25 = vld [vmem:[#allocation18_spill] sm:$0xff] }
0x4c6d   :  { %v11695_v45 = vpop.f32.mrb[148].mxu0  ;;  %14165 = vmatprep.subr.bf16.mxu1 %v17391_v15 }
0x4c6e   :  { %v11788_v48 = vpack.c.bf16 %v11695_v45, %v11695_v45  ;;  %v14127_v61 = vpop.f32.mrb[149].mxu0  ;;  %v3436_v45 = vsel %vm143_vm0, %v3434_v19, 0.0 }
0x4c6f   :  { %v11698_v23 = vpop.f32.mrb[150].mxu0 }
0x4c70   :  { %v14128_v8 = vpop.f32.mrb[151].mxu0  ;;  %14150 = vmatmul.mubr.msk.bf16.vlgmr.msra.gmra.mrb[156].mxu0 %vm554_vm3, %v11788_v48  ;;  %v11738_v47 = vpop.f32.mrb[152].mxu1  ;;  %v9298_v48 = vadd.f32 %v12222_v6, %v9297_v3 }
0x4c71   :  { %v11789_v0 = vpack.c.bf16 %v11738_v47, %v11738_v47  ;;  %v14133_v35 = vpop.f32.mrb[153].mxu1  ;;  %14160 = vmatpush3.bf16.msra.mxu0 %v17412_v63  ;;  %14161 = vmatprep.mubr.msk.bf16.mxu0 %vm14572_vm1, %v17391_v15 }
0x4c72   :  { %v11741_v32 = vpop.f32.mrb[154].mxu1  ;;  %14173 = vmatprep.subr.bf16.mxu0 %v17391_v15  ;;  %v9299_v23 = vsel %vm143_vm0, %v9298_v48, 0.0  ;;  %v17426_v35 = vld [vmem:[#allocation5_spill] sm:$0xff] }
0x4c73   :  { %v14134_v17 = vpop.f32.mrb[155].mxu1  ;;  %14156 = vmatmul.mubr.msk.bf16.vlgmr.msra.gmra.mrb[160].mxu1 %vm554_vm3, %v11789_v0  ;;  %v17425_v0 = vld [vmem:[#allocation3_spill] sm:$0xff] }
0x4c74   :  { %14166 = vmatpush3.bf16.msra.mxu1 %v14561_v50  ;;  %14169 = vmatprep.mubr.msk.bf16.mxu1 %vm14572_vm1, %v17391_v15  ;;  %v3429_v32 = vadd.f32 %v17426_v35, %v17425_v0 }
0x4c75   :  { %v11781_v36 = vpop.f32.mrb[152].mxu0  ;;  %14167 = vmatprep.subr.bf16.mxu1 %v17391_v15 }
0x4c76   :  { %v11790_v63 = vpack.c.bf16 %v11781_v36, %v11781_v36  ;;  %v14139_v58 = vpop.f32.mrb[153].mxu0 }
0x4c77   :  { %v11784_v53 = vpop.f32.mrb[154].mxu0 }
0x4c78   :  { %v14140_v21 = vpop.f32.mrb[155].mxu0  ;;  %14162 = vmatmul.mubr.msk.bf16.vlgmr.msra.gmra.mrb[160].mxu0 %vm554_vm3, %v11790_v63  ;;  %14168 = vmatpush3.bf16.msra.mxu1 %v14562_v43  ;;  %v17428_v63 = vld [vmem:[#allocation21_spill] sm:$0xff]  ;;  %v17235_v43 = vadd.f32 %v12222_v6, %v3429_v32  ;;  %v14570_v32 = vld [vmem:[%s17356_s11 + $0x14] ss:$0 sm:$0xff] }
0x4c79   :  { %14174 = vmatpush3.bf16.msra.mxu0 %v14563_v20  ;;  %14181 = vmatprep.mubr.msk.bf16.mxu0 %vm14572_vm1, %v17391_v15  ;;  %v6557_v58 = vadd.f32 %v17428_v63, %v17427_v25 }
0x4c7a   :  { %14175 = vmatprep.subr.bf16.mxu0 %v17391_v15 }
0x4c7d   :  { %14176 = vmatpush3.bf16.msra.mxu0 %v14564_v44 }
0x4c7e   :  { %14177 = vmatprep.subr.bf16.mxu0 %v17391_v15 }
0x4c81   :  { %14178 = vmatpush3.bf16.msra.mxu0 %v14565_v27 }
0x4c82   :  { %14179 = vmatprep.subr.bf16.mxu0 %v17391_v15  ;;  %v14568_v15 = vld [vmem:[%s17356_s11 + $0x1a] ss:$0 sm:$0xff] }
0x4c85   :  { %14180 = vmatpush3.bf16.msra.mxu0 %v14566_v37 }
0x4d3e   :  { %v11828_v46 = vpop.f32.mrb[156].mxu1 }
0x4d3f   :  { %v14145_v62 = vpop.f32.mrb[157].mxu1  ;;  %v11963_v24 = vsel %vm10028_vm6, %v11828_v46, 0.0 }
0x4d40   :  { %v11831_v31 = vpop.f32.mrb[158].mxu1  ;;  %v3439_v62 = vsel %vm143_vm0, %v17235_v43, 0.0 }
0x4d41   :  { %v14146_v60 = vpop.f32.mrb[159].mxu1 }
0x4d43   :  { %v11871_v18 = vpop.f32.mrb[156].mxu0 }
0x4d44   :  { %v11964_v41 = vsel %vm10028_vm6, %v11871_v18, 0.0  ;;  %v14151_v34 = vpop.f32.mrb[157].mxu0 }
0x4d45   :  { %v11965_v5 = vadd.f32 %v11964_v41, %v11963_v24  ;;  %v11874_v9 = vpop.f32.mrb[158].mxu0 }
0x4d46   :  { %v14152_v30 = vpop.f32.mrb[159].mxu0  ;;  %v11914_v29 = vpop.f32.mrb[160].mxu1 }
0x4d47   :  { %v11966_v26 = vsel %vm10028_vm6, %v11914_v29, 0.0  ;;  %v14157_v7 = vpop.f32.mrb[161].mxu1 }
0x4d48   :  { %v11967_v1 = vadd.f32 %v11966_v26, %v11965_v5  ;;  %v11917_v2 = vpop.f32.mrb[162].mxu1 }
0x4d49   :  { %v14158_v11 = vpop.f32.mrb[163].mxu1 }
0x4d4b   :  { %v11957_v13 = vpop.f32.mrb[160].mxu0 }
0x4d4c   :  { %v11968_v55 = vsel %vm10028_vm6, %v11957_v13, 0.0  ;;  %v14163_v33 = vpop.f32.mrb[161].mxu0 }
0x4d4d   :  { %v11969_v54 = vadd.f32 %v11968_v55, %v11967_v1  ;;  %v11960_v51 = vpop.f32.mrb[162].mxu0 }
0x4d4e   :  { %v14164_v28 = vpop.f32.mrb[163].mxu0 }
0x4d4f   :  { %v11971_v59 = vrot.slane %v11969_v54, 5 }
0x4d51   :  { %v11973_v52 = vsel %vm2194_vm7, %v17129_v38, %v11971_v59 }
0x4d52   :  { %v11974_v22 = vadd.f32 %v11973_v52, %v16994_v12  ;;  %v17221_v12 = vld [vmem:[%s17356_s11 + $0x15] ss:$0 sm:$0xff] }
0x4d53   :  { %v6562_v4 = vadd.f32 %v17221_v12, %v6556_v16  ;;  %v17238_v37 = vadd.f32 %v17221_v12, %v6557_v58 }
0x4d54   :  { %v17212_v56 = vadd.f32 %v14567_v14, %v11974_v22  ;;  %v14569_v22 = vld [vmem:[%s17356_s11 + $0x1b] ss:$0 sm:$0xff] }
0x4d55   :  { %v6564_v61 = vsel %vm143_vm0, %v6562_v4, 0.0  ;;  %v6567_v34 = vsel %vm3485_vm8, %v17238_v37, 0.0 }
0x4d56   :  { %v11976_v38 = vsel %vm9322_vm10, %v17212_v56, 0.0 }
0x4d57   :  { %11977 = vadd.xlane.f32.xlu1 %v11976_v38 }
0x4d5b   :  { %3437 = vadd.xlane.f32.xlu1 %v3436_v45  ;;  %v17304_v45 = vld [vmem:[%s17356_s11 + $0x1d] ss:$0 sm:$0xff] }
0x4d5f   :  { %6565 = vadd.xlane.f32.xlu1 %v6564_v61 }
0x4d63   :  { %9300 = vadd.xlane.f32.xlu1 %v9299_v23 }
0x4de4   :  { %v11978_v8 = vpop.xlane.xlu1 %11977 }
0x4de5   :  { %v11979_v47 = vmul.f32 0.03125, %v11978_v8 }
0x4de7   :  { %v11980_v17 = vsub.f32 %v17212_v56, %v11979_v47 }
0x4de8   :  { %v3438_v50 = vpop.xlane.xlu1 %3437 }
0x4de9   :  { %v3442_v36 = vmul.f32 0.03125, %v3438_v50  ;;  %v11981_v10 = vmul.f32 %v11980_v17, %v11980_v17 }
0x4deb   :  { %v3444_v53 = vsub.f32 %v3434_v19, %v3442_v36  ;;  %v11982_v21 = vsel %vm9322_vm10, %v11981_v10, 0.0  ;;  %v17297_v19 = vld [vmem:[%s17356_s11 + $0x1c] ss:$0 sm:$0xff] }
0x4dec   :  { %11983 = vadd.xlane.f32.xlu0 %v11982_v21  ;;  %v6566_v20 = vpop.xlane.xlu1 %6565 }
0x4ded   :  { %v6570_v44 = vmul.f32 0.03125, %v6566_v20  ;;  %v3446_v27 = vmul.f32 %v3444_v53, %v3444_v53 }
0x4def   :  { %v6572_v46 = vsub.f32 %v6562_v4, %v6570_v44  ;;  %v3448_v31 = vsel %vm143_vm0, %v3446_v27, 0.0 }
0x4df0   :  { %3440 = vadd.xlane.f32.xlu0 %v3439_v62  ;;  %3449 = vadd.xlane.f32.xlu1 %v3448_v31  ;;  %v9301_v60 = vpop.xlane.xlu1 %9300 }
0x4df1   :  { %v9302_v18 = vmul.f32 0.03125, %v9301_v60  ;;  %v6574_v24 = vmul.f32 %v6572_v46, %v6572_v46 }
0x4df3   :  { %v9303_v41 = vsub.f32 %v9298_v48, %v9302_v18  ;;  %v6576_v5 = vsel %vm143_vm0, %v6574_v24, 0.0 }
0x4df4   :  { %6568 = vadd.xlane.f32.xlu0 %v6567_v34  ;;  %6577 = vadd.xlane.f32.xlu1 %v6576_v5 }
0x4df5   :  { %v9304_v9 = vmul.f32 %v9303_v41, %v9303_v41 }
0x4df7   :  { %v9305_v30 = vsel %vm143_vm0, %v9304_v9, 0.0 }
0x4df8   :  { %9306 = vadd.xlane.f32.xlu1 %v9305_v30 }
0x4e79   :  { %v11984_v29 = vpop.xlane.xlu0 %11983 }
0x4e7a   :  { %v11985_v26 = vmul.f32 0.03125, %v11984_v29 }
0x4e7c   :  { %v11986_v7 = vadd.f32 1e-05, %v11985_v26 }
0x4e7d   :  { %v3450_v1 = vpop.xlane.xlu1 %3449  ;;  %v3441_v58 = vpop.xlane.xlu0 %3440 }
0x4e7e   :  { %14512 = vrsqrt.f32 %v11986_v7  ;;  %v3454_v2 = vmul.f32 0.03125, %v3450_v1 }
0x4e80   :  { %v3456_v11 = vadd.f32 1e-05, %v3454_v2 }
0x4e81   :  { %v6578_v13 = vpop.xlane.xlu1 %6577  ;;  %v6569_v21 = vpop.xlane.xlu0 %6568 }
0x4e82   :  { %14514 = vrsqrt.f32 %v3456_v11  ;;  %v6582_v55 = vmul.f32 0.03125, %v6578_v13  ;;  %v6571_v27 = vmul.f32 0.03125, %v6569_v21 }
0x4e84   :  { %v6584_v33 = vadd.f32 1e-05, %v6582_v55  ;;  %v6573_v24 = vsub.f32 %v17238_v37, %v6571_v27 }
0x4e85   :  { %v9307_v54 = vpop.xlane.xlu1 %9306 }
0x4e86   :  { %14516 = vrsqrt.f32 %v6584_v33  ;;  %v9308_v51 = vmul.f32 0.03125, %v9307_v54  ;;  %v6575_v9 = vmul.f32 %v6573_v24, %v6573_v24 }
0x4e88   :  { %v14513_v28 = vpop.eup %14512  ;;  %v9309_v59 = vadd.f32 1e-05, %v9308_v51 }
0x4e89   :  { %v11988_v52 = vmul.f32 %v14513_v28, %v11980_v17 }
0x4e8a   :  { %14518 = vrsqrt.f32 %v9309_v59 }
0x4e8b   :  { %v11989_v49 = vmul.f32 %v14568_v15, %v11988_v52 }
0x4e8c   :  { %v14515_v39 = vpop.eup %14514 }
0x4e8d   :  { %v11990_v6 = vadd.f32 %v14569_v22, %v11989_v49  ;;  %v3460_v14 = vmul.f32 %v14515_v39, %v3444_v53  ;;  %v3443_v53 = vmul.f32 0.03125, %v3441_v58 }
0x4e8f   :  { %v11991_v40 = vpack.c.bf16 %v11990_v6, %v11990_v6  ;;  %v3466_v16 = vmul.f32 %v17283_v42, %v3460_v14  ;;  %v3445_v44 = vsub.f32 %v17235_v43, %v3443_v53  ;;  %v6579_v43 = vsel %vm3485_vm8, %v6575_v9, 0.0 }
0x4e90   :  { %v14517_v38 = vpop.eup %14516 }
0x4e91   :  { %v3472_v4 = vadd.f32 %v17291_v57, %v3466_v16  ;;  %v6588_v3 = vmul.f32 %v14517_v38, %v6572_v46  ;;  %14170 = vmatmul.mubr.msk.bf16.vlgmr.msra.gmra.mrb[164].mxu1 %vm143_vm0, %v11991_v40  ;;  %v3447_v34 = vmul.f32 %v3445_v44, %v3445_v44 }
0x4e93   :  { %3474 = vst.msk [vmem:[%s17364_s12] sm:$0xff] %vm143_vm0, %v3472_v4  ;;  %v6594_v48 = vmul.f32 %v17297_v19, %v6588_v3  ;;  %v3451_v5 = vsel %vm143_vm0, %v3447_v34, 0.0 }
0x4e94   :  { %v14519_v61 = vpop.eup %14518 }
0x4e95   :  { %v6600_v23 = vadd.f32 %v17304_v45, %v6594_v48  ;;  %v9311_v8 = vmul.f32 %v14519_v61, %v9303_v41 }
0x4e97   :  { %6602 = vst.msk [vmem:[%s17364_s12 + $0x10] sm:$0xff] %vm143_vm0, %v6600_v23  ;;  %v9312_v47 = vmul.f32 %v17283_v42, %v9311_v8 }
0x4e99   :  { %v9313_v0 = vadd.f32 %v17291_v57, %v9312_v47 }
0x4e9b   :  { %9314 = vst.msk [vmem:[%s17364_s12 + $0x20] sm:$0xff] %vm143_vm0, %v9313_v0 }
0x4f64   :  { %v12029_v35 = vpop.f32.mrb[164].mxu1 }
0x4f65   :  { %v12030_v17 = vadd.f32 %v14570_v32, %v12029_v35  ;;  %v14171_v50 = vpop.f32.mrb[165].mxu1 }
0x4f66   :  { %v12032_v36 = vpop.f32.mrb[166].mxu1 }
0x4f67   :  { %v12035_v10 = vmax.f32 %v12030_v17, 0.0  ;;  %v14172_v25 = vpop.f32.mrb[167].mxu1 }
0x4f69   :  { %v12036_v63 = vpack.c.bf16 %v12035_v10, %v12035_v10 }
0x4f6b   :  { %14182 = vmatmul.mubr.msk.bf16.vlgmr.msra.gmra.mrb[164].mxu0 %vm3383_vm9, %v12036_v63 }
0x503e   :  { %v12074_v20 = vpop.f32.mrb[164].mxu0 }
0x503f   :  { %v12080_v46 = vadd.f32 %v12074_v20, %v17212_v56  ;;  %v14183_v62 = vpop.f32.mrb[165].mxu0 }
0x5040   :  { %v12077_v31 = vpop.f32.mrb[166].mxu0 }
0x5041   :  { %v12081_v60 = vadd.f32 %v17221_v12, %v12080_v46  ;;  %v14184_v18 = vpop.f32.mrb[167].mxu0 }
0x5043   :  { %v12082_v41 = vsel %vm9322_vm10, %v12081_v60, 0.0 }
0x5044   :  { %12083 = vadd.xlane.f32.xlu0 %v12082_v41 }
0x5048   :  { %3452 = vadd.xlane.f32.xlu0 %v3451_v5 }
0x504c   :  { %6580 = vadd.xlane.f32.xlu0 %v6579_v43 }
0x50d1   :  { %v12084_v30 = vpop.xlane.xlu0 %12083 }
0x50d2   :  { %v12085_v56 = vmul.f32 0.03125, %v12084_v30 }
0x50d4   :  { %v12086_v29 = vsub.f32 %v12081_v60, %v12085_v56 }
0x50d5   :  { %v3453_v26 = vpop.xlane.xlu0 %3452 }
0x50d6   :  { %v3455_v7 = vmul.f32 0.03125, %v3453_v26  ;;  %v12087_v12 = vmul.f32 %v12086_v29, %v12086_v29 }
0x50d8   :  { %v3457_v1 = vadd.f32 1e-05, %v3455_v7  ;;  %v12088_v37 = vsel %vm9322_vm10, %v12087_v12, 0.0 }
0x50d9   :  { %12089 = vadd.xlane.f32.xlu0 %v12088_v37  ;;  %v6581_v2 = vpop.xlane.xlu0 %6580 }
0x50da   :  { %14520 = vrsqrt.f32 %v3457_v1  ;;  %v6583_v11 = vmul.f32 0.03125, %v6581_v2 }
0x50dc   :  { %v6585_v13 = vadd.f32 1e-05, %v6583_v11 }
0x50de   :  { %14522 = vrsqrt.f32 %v6585_v13 }
0x50e4   :  { %v14521_v55 = vpop.eup %14520 }
0x50e5   :  { %v3461_v33 = vmul.f32 %v14521_v55, %v3445_v44 }
0x50e7   :  { %v3467_v54 = vmul.f32 %v17283_v42, %v3461_v33 }
0x50e8   :  { %v14523_v51 = vpop.eup %14522 }
0x50e9   :  { %v3473_v28 = vadd.f32 %v17291_v57, %v3467_v54  ;;  %v6589_v59 = vmul.f32 %v14523_v51, %v6573_v24 }
0x50eb   :  { %3475 = vst.msk [vmem:[%s17364_s12 + $0x8] sm:$0xff] %vm143_vm0, %v3473_v28  ;;  %v6595_v52 = vmul.f32 %v17297_v19, %v6589_v59 }
0x50ed   :  { %v6601_v15 = vadd.f32 %v17304_v45, %v6595_v52 }
0x50ef   :  { %6603 = vst.msk [vmem:[%s17364_s12 + $0x18] sm:$0x3] %vm3485_vm8, %v6601_v15 }
0x5166   :  { %v12090_v49 = vpop.xlane.xlu0 %12089 }
0x5167   :  { %v12091_v39 = vmul.f32 0.03125, %v12090_v49 }
0x5169   :  { %v12092_v42 = vadd.f32 1e-05, %v12091_v39 }
0x516b   :  { %14524 = vrsqrt.f32 %v12092_v42 }
0x5175   :  { %v14525_v22 = vpop.eup %14524 }
0x5176   :  { %v12094_v6 = vmul.f32 %v14525_v22, %v12086_v29 }
0x5178   :  { %v12095_v14 = vmul.f32 %v17297_v19, %v12094_v6 }
0x517a   :  { %v12096_v57 = vadd.f32 %v17304_v45, %v12095_v14 }
0x517c   :  { %12097 = vst.msk [vmem:[%s17364_s12 + $0x28] sm:$0x3f] %vm9322_vm10, %v12096_v57 }

</bundles_post_ra>
